<compile_context>
chip_gen: v7x
topology: tpu7x:2x2x1
jax: 0.10.0
libtpu: 0.0.40
codegen_flags: <defaults>
</compile_context>

<pallas_src>
import jax
import jax.numpy as jnp
import numpy as np
from jax.experimental import pallas as pl
from jax.experimental.pallas import tpu as pltpu

N_TYPES = 8          # stand-in for MarioLevel.n_types (input tile-type channels)
BASE_CHANNELS = 32
BN_EPS = 1e-5
LEAKY_SLOPE = 0.1


# --------------------------------------------------------------------------
# Fused Pallas kernel: whole SADiscriminator forward for one batch element
# --------------------------------------------------------------------------

def _sad_fused_kernel(
    x_ref,
    s1_ref, w1_ref, sc1_ref, sh1_ref,
    wq1_ref, bq1_ref, wk1_ref, bk1_ref, wv1_ref, bv1_ref, g1_ref,
    s2_ref, w2_ref, sc2_ref, sh2_ref,
    wq2_ref, bq2_ref, wk2_ref, bk2_ref, wv2_ref, bv2_ref, g2_ref,
    s3_ref, w3_ref, sc3_ref, sh3_ref,
    w4_ref, b4_ref,
    o_ref,
):
    def conv_bn_lrelu(x_bf16, s_ref, w_ref, sc_ref, sh_ref):
        # x_bf16: (Cin, N_in) bf16.  For each kernel tap t = di*kw + dj:
        #   x @ S[t]   gathers the strided, zero-padded input window -> (Cin, N_out)
        #   W[t] @ (.) accumulates that tap's contribution            -> (Cout, N_out)
        n_taps, _, n_out = s_ref.shape
        cout = w_ref.shape[1]
        acc = jnp.zeros((cout, n_out), jnp.float32)
        for t in range(n_taps):                      # static unroll (9 or 16 taps)
            xg = jnp.dot(x_bf16, s_ref[t], preferred_element_type=jnp.float32)
            acc = acc + jnp.dot(w_ref[t], xg.astype(jnp.bfloat16),
                                preferred_element_type=jnp.float32)
        y = acc * sc_ref[...] + sh_ref[...]          # fused eval-mode BatchNorm (f32)
        return jnp.where(y >= 0, y, LEAKY_SLOPE * y)  # LeakyReLU(0.1)

    def self_attn(x_f32, wqt_ref, bq_ref, wk_ref, bk_ref, wv_ref, bv_ref, g_ref):
        xb = x_f32.astype(jnp.bfloat16)              # (C, N)
        # q is produced directly as (N, Cq) so energy = q_t @ k is canonical (M,K)@(K,N)
        q_t = jax.lax.dot_general(xb, wqt_ref[...], (((0,), (0,)), ((), ())),
                                  preferred_element_type=jnp.float32) + bq_ref[...]
        k = jnp.dot(wk_ref[...], xb, preferred_element_type=jnp.float32) + bk_ref[...]
        v = jnp.dot(wv_ref[...], xb, preferred_element_type=jnp.float32) + bv_ref[...]
        energy = jnp.dot(q_t.astype(jnp.bfloat16), k.astype(jnp.bfloat16),
                         preferred_element_type=jnp.float32)           # (N, N)
        m = jnp.max(energy, axis=-1, keepdims=True)                    # f32 softmax
        e = jnp.exp(energy - m)
        att = e * pl.reciprocal(jnp.sum(e, axis=-1, keepdims=True), approx=True)
        # out[c, i] = sum_j v[c, j] * att[i, j]
        out = jax.lax.dot_general(v.astype(jnp.bfloat16), att.astype(jnp.bfloat16),
                                  (((1,), (1,)), ((), ())),
                                  preferred_element_type=jnp.float32)  # (C, N)
        return g_ref[...] * out + x_f32

    h = conv_bn_lrelu(x_ref[...], s1_ref, w1_ref, sc1_ref, sh1_ref)              # (32, 256)
    h = self_attn(h, wq1_ref, bq1_ref, wk1_ref, bk1_ref, wv1_ref, bv1_ref, g1_ref)
    h = conv_bn_lrelu(h.astype(jnp.bfloat16), s2_ref, w2_ref, sc2_ref, sh2_ref)  # (64, 64)
    h = self_attn(h, wq2_ref, bq2_ref, wk2_ref, bk2_ref, wv2_ref, bv2_ref, g2_ref)
    h = conv_bn_lrelu(h.astype(jnp.bfloat16), s3_ref, w3_ref, sc3_ref, sh3_ref)  # (128, 16)
    # final spectral-norm 4x4 valid conv (128 -> 1, spatial 4x4 -> 1x1), no BN / act
    r = jnp.sum(w4_ref[...] * h, axis=1, keepdims=True)                          # (128, 1)
    o_ref[...] = jnp.sum(r, axis=0, keepdims=True) + b4_ref[...]                 # (1, 1)


# --------------------------------------------------------------------------
# Wrapper glue: selection matrices, BN folding, operand packing, pallas_call
# --------------------------------------------------------------------------

def _selection_matrices(h, w, kh, kw, stride, pad):
    """S[t = di*kw+dj] is (h*w, ho*wo); S[t][hi*w+wi, io*wo+jo] = 1 iff unpadded input
    (hi, wi) feeds output (io, jo) at kernel offset (di, dj).  Out-of-bounds taps have
    no 1, which implements the zero padding."""
    ho = (h + 2 * pad - kh) // stride + 1
    wo = (w + 2 * pad - kw) // stride + 1
    s = np.zeros((kh * kw, h * w, ho * wo), np.float32)
    for di in range(kh):
        for dj in range(kw):
            t = di * kw + dj
            for io in range(ho):
                hi = stride * io + di - pad
                if hi < 0 or hi >= h:
                    continue
                for jo in range(wo):
                    wi = stride * jo + dj - pad
                    if 0 <= wi < w:
                        s[t, hi * w + wi, io * wo + jo] = 1.0
    return s


def _conv_operands(w, b, bn):
    """Per-tap (kh*kw, Cout, Cin) bf16 weights + folded BN scale/shift (Cout, 1) f32."""
    cout, cin, kh, kw = w.shape
    w_t = w.transpose(2, 3, 0, 1).reshape(kh * kw, cout, cin).astype(jnp.bfloat16)
    gamma, beta, mean, var = bn
    scale = gamma / jnp.sqrt(var + BN_EPS)
    shift = beta + (b - mean) * scale
    return (w_t, scale.reshape(cout, 1).astype(jnp.float32),
            shift.reshape(cout, 1).astype(jnp.float32))


def _attn_operands(attn_params):
    wq, bq, wk, bk, wv, bv, gamma = attn_params
    cq, c = wq.shape
    return (wq.T.astype(jnp.bfloat16),                       # (C, Cq): q comes out as (N, Cq)
            bq.reshape(1, cq).astype(jnp.float32),
            wk.astype(jnp.bfloat16),                         # (Cq, C)
            bk.reshape(cq, 1).astype(jnp.float32),
            wv.astype(jnp.bfloat16),                         # (C, C)
            bv.reshape(c, 1).astype(jnp.float32),
            jnp.asarray(gamma, jnp.float32).reshape(1, 1))


def _rep_spec(arr):
    """BlockSpec for an operand fully replicated across the (batch) grid."""
    zeros = (0,) * arr.ndim
    return pl.BlockSpec(arr.shape, lambda b, _z=zeros: _z)


def sa_discriminator_forward(x, p):
    B, C, H, W = x.shape
    assert C == N_TYPES and H == 16 and W == 16, "expects (B, n_types, 16, 16)"

    x_flat = x.reshape(B, C, H * W).astype(jnp.bfloat16)

    # Constant 0/1 conv-tap selection matrices (become XLA constants under jit).
    s1 = jnp.asarray(_selection_matrices(16, 16, 3, 3, 1, 1), jnp.bfloat16)   # (9, 256, 256)
    s2 = jnp.asarray(_selection_matrices(16, 16, 4, 4, 2, 1), jnp.bfloat16)   # (16, 256, 64)
    s3 = jnp.asarray(_selection_matrices(8, 8, 4, 4, 2, 1), jnp.bfloat16)     # (16, 64, 16)

    w1, sc1, sh1 = _conv_operands(p["w1"], p["b1"], p["bn1"])
    w2, sc2, sh2 = _conv_operands(p["w2"], p["b2"], p["bn2"])
    w3, sc3, sh3 = _conv_operands(p["w3"], p["b3"], p["bn3"])
    a1 = _attn_operands(p["attn1"])
    a2 = _attn_operands(p["attn2"])
    # final 4x4 valid conv (128 -> 1) folded into the kernel as (C, 16) elementwise weights
    w4 = p["w4"].reshape(BASE_CHANNELS * 4, 16).astype(jnp.float32)
    b4 = p["b4"].reshape(1, 1).astype(jnp.float32)

    operands = [x_flat,
                s1, w1, sc1, sh1, *a1,
                s2, w2, sc2, sh2, *a2,
                s3, w3, sc3, sh3,
                w4, b4]

    in_specs = [pl.BlockSpec((None, C, H * W), lambda b: (b, 0, 0))]
    in_specs += [_rep_spec(op) for op in operands[1:]]

    out = pl.pallas_call(
        _sad_fused_kernel,
        out_shape=jax.ShapeDtypeStruct((B, 1, 1), jnp.float32),
        grid=(B,),
        in_specs=in_specs,
        out_specs=pl.BlockSpec((None, 1, 1), lambda b: (b, 0, 0)),
        compiler_params=pltpu.CompilerParams(dimension_semantics=("parallel",)),
    )(*operands)

    return out.reshape(B, 1)                                   # Flatten -> (B, 1)


# --------------------------------------------------------------------------
# Parameter setup (deterministic, synthetic)
# --------------------------------------------------------------------------

def spectral_normalize(w, n_iter=30):
    """Divide conv weight by its largest singular value (power iteration)."""
    w_mat = w.reshape(w.shape[0], -1).astype(jnp.float32)
    u = jnp.ones((w_mat.shape[0],), jnp.float32)
    v = jnp.ones((w_mat.shape[1],), jnp.float32)
    for _ in range(n_iter):
        v = w_mat.T @ u
        v = v / (jnp.linalg.norm(v) + 1e-12)
        u = w_mat @ v
        u = u / (jnp.linalg.norm(u) + 1e-12)
    sigma = u @ (w_mat @ v)
    return w / sigma


def init_params(key):
    ks = iter(jax.random.split(key, 64))
    p = {}

    def conv(cout, cin, k):
        w = 0.1 * jax.random.normal(next(ks), (cout, cin, k, k), jnp.float32)
        b = 0.1 * jax.random.normal(next(ks), (cout,), jnp.float32)
        return spectral_normalize(w), b

    def bn(c):
        g = 1.0 + 0.1 * jax.random.normal(next(ks), (c,), jnp.float32)
        be = 0.1 * jax.random.normal(next(ks), (c,), jnp.float32)
        m = 0.1 * jax.random.normal(next(ks), (c,), jnp.float32)
        v = 1.0 + 0.1 * jnp.abs(jax.random.normal(next(ks), (c,), jnp.float32))
        return g, be, m, v

    def attn(c):
        cq = c // 8
        wq = 0.1 * jax.random.normal(next(ks), (cq, c), jnp.float32)
        bq = 0.1 * jax.random.normal(next(ks), (cq,), jnp.float32)
        wk = 0.1 * jax.random.normal(next(ks), (cq, c), jnp.float32)
        bk = 0.1 * jax.random.normal(next(ks), (cq,), jnp.float32)
        wv = 0.1 * jax.random.normal(next(ks), (c, c), jnp.float32)
        bv = 0.1 * jax.random.normal(next(ks), (c,), jnp.float32)
        # PyTorch __init__ sets gamma = 0 (attention path would be a no-op);
        # use 0.1 here so the attention compute is exercised.
        gamma = jnp.float32(0.1)
        return wq, bq, wk, bk, wv, bv, gamma

    bc = BASE_CHANNELS
    p["w1"], p["b1"] = conv(bc, N_TYPES, 3)
    p["bn1"] = bn(bc)
    p["attn1"] = attn(bc)
    p["w2"], p["b2"] = conv(bc * 2, bc, 4)
    p["bn2"] = bn(bc * 2)
    p["attn2"] = attn(bc * 2)
    p["w3"], p["b3"] = conv(bc * 4, bc * 2, 4)
    p["bn3"] = bn(bc * 4)
    p["w4"], p["b4"] = conv(1, bc * 4, 4)
    return p


if __name__ == "__main__":
    key = jax.random.PRNGKey(0)
    kx, kp = jax.random.split(key)

    # Input: (B, MarioLevel.n_types, 16, 16) so the final 4x4 valid conv yields 1x1.
    x = jax.random.normal(kx, (2, N_TYPES, 16, 16), jnp.float32)
    params = init_params(kp)

    fwd = jax.jit(sa_discriminator_forward)
    out = jax.block_until_ready(fwd(x, params))

    assert out.shape == (2, 1), out.shape
    assert jnp.all(jnp.isfinite(out)), "non-finite output"
    print("KERNEL_OK")
</pallas_src>

<mosaic_0001>
module attributes {stable_mosaic.version = 11 : i64} {
  func.func @_sad_fused_kernel(%arg0: i32, %arg1: memref<1x8x256xbf16, #tpu.memory_space<vmem>>, %arg2: memref<9x256x256xbf16, #tpu.memory_space<vmem>>, %arg3: memref<9x32x8xbf16, #tpu.memory_space<vmem>>, %arg4: memref<32x1xf32, #tpu.memory_space<vmem>>, %arg5: memref<32x1xf32, #tpu.memory_space<vmem>>, %arg6: memref<32x4xbf16, #tpu.memory_space<vmem>>, %arg7: memref<1x4xf32, #tpu.memory_space<vmem>>, %arg8: memref<4x32xbf16, #tpu.memory_space<vmem>>, %arg9: memref<4x1xf32, #tpu.memory_space<vmem>>, %arg10: memref<32x32xbf16, #tpu.memory_space<vmem>>, %arg11: memref<32x1xf32, #tpu.memory_space<vmem>>, %arg12: memref<1x1xf32, #tpu.memory_space<vmem>>, %arg13: memref<16x256x64xbf16, #tpu.memory_space<vmem>>, %arg14: memref<16x64x32xbf16, #tpu.memory_space<vmem>>, %arg15: memref<64x1xf32, #tpu.memory_space<vmem>>, %arg16: memref<64x1xf32, #tpu.memory_space<vmem>>, %arg17: memref<64x8xbf16, #tpu.memory_space<vmem>>, %arg18: memref<1x8xf32, #tpu.memory_space<vmem>>, %arg19: memref<8x64xbf16, #tpu.memory_space<vmem>>, %arg20: memref<8x1xf32, #tpu.memory_space<vmem>>, %arg21: memref<64x64xbf16, #tpu.memory_space<vmem>>, %arg22: memref<64x1xf32, #tpu.memory_space<vmem>>, %arg23: memref<1x1xf32, #tpu.memory_space<vmem>>, %arg24: memref<16x64x16xbf16, #tpu.memory_space<vmem>>, %arg25: memref<16x128x64xbf16, #tpu.memory_space<vmem>>, %arg26: memref<128x1xf32, #tpu.memory_space<vmem>>, %arg27: memref<128x1xf32, #tpu.memory_space<vmem>>, %arg28: memref<128x16xf32, #tpu.memory_space<vmem>>, %arg29: memref<1x1xf32, #tpu.memory_space<vmem>>, %arg30: memref<1x1x1xf32, #tpu.memory_space<vmem>>) attributes {dimension_semantics = [#tpu.dimension_semantics<parallel>], iteration_bounds = array<i64: 2>, scalar_prefetch = 0 : i64, scratch_operands = 0 : i64, tpu.core_type = #tpu.core_type<tc>, window_params = [{transform_indices = @transform_0, window_bounds = array<i64: 1, 8, 256>}, {pipeline_mode = #tpu.pipeline_mode<synchronous>, transform_indices = @transform_1, window_bounds = array<i64: 9, 256, 256>}, {pipeline_mode = #tpu.pipeline_mode<synchronous>, transform_indices = @transform_2, window_bounds = array<i64: 9, 32, 8>}, {pipeline_mode = #tpu.pipeline_mode<synchronous>, transform_indices = @transform_3, window_bounds = array<i64: 32, 1>}, {pipeline_mode = #tpu.pipeline_mode<synchronous>, transform_indices = @transform_4, window_bounds = array<i64: 32, 1>}, {pipeline_mode = #tpu.pipeline_mode<synchronous>, transform_indices = @transform_5, window_bounds = array<i64: 32, 4>}, {pipeline_mode = #tpu.pipeline_mode<synchronous>, transform_indices = @transform_6, window_bounds = array<i64: 1, 4>}, {pipeline_mode = #tpu.pipeline_mode<synchronous>, transform_indices = @transform_7, window_bounds = array<i64: 4, 32>}, {pipeline_mode = #tpu.pipeline_mode<synchronous>, transform_indices = @transform_8, window_bounds = array<i64: 4, 1>}, {pipeline_mode = #tpu.pipeline_mode<synchronous>, transform_indices = @transform_9, window_bounds = array<i64: 32, 32>}, {pipeline_mode = #tpu.pipeline_mode<synchronous>, transform_indices = @transform_10, window_bounds = array<i64: 32, 1>}, {pipeline_mode = #tpu.pipeline_mode<synchronous>, transform_indices = @transform_11, window_bounds = array<i64: 1, 1>}, {pipeline_mode = #tpu.pipeline_mode<synchronous>, transform_indices = @transform_12, window_bounds = array<i64: 16, 256, 64>}, {pipeline_mode = #tpu.pipeline_mode<synchronous>, transform_indices = @transform_13, window_bounds = array<i64: 16, 64, 32>}, {pipeline_mode = #tpu.pipeline_mode<synchronous>, transform_indices = @transform_14, window_bounds = array<i64: 64, 1>}, {pipeline_mode = #tpu.pipeline_mode<synchronous>, transform_indices = @transform_15, window_bounds = array<i64: 64, 1>}, {pipeline_mode = #tpu.pipeline_mode<synchronous>, transform_indices = @transform_16, window_bounds = array<i64: 64, 8>}, {pipeline_mode = #tpu.pipeline_mode<synchronous>, transform_indices = @transform_17, window_bounds = array<i64: 1, 8>}, {pipeline_mode = #tpu.pipeline_mode<synchronous>, transform_indices = @transform_18, window_bounds = array<i64: 8, 64>}, {pipeline_mode = #tpu.pipeline_mode<synchronous>, transform_indices = @transform_19, window_bounds = array<i64: 8, 1>}, {pipeline_mode = #tpu.pipeline_mode<synchronous>, transform_indices = @transform_20, window_bounds = array<i64: 64, 64>}, {pipeline_mode = #tpu.pipeline_mode<synchronous>, transform_indices = @transform_21, window_bounds = array<i64: 64, 1>}, {pipeline_mode = #tpu.pipeline_mode<synchronous>, transform_indices = @transform_22, window_bounds = array<i64: 1, 1>}, {pipeline_mode = #tpu.pipeline_mode<synchronous>, transform_indices = @transform_23, window_bounds = array<i64: 16, 64, 16>}, {pipeline_mode = #tpu.pipeline_mode<synchronous>, transform_indices = @transform_24, window_bounds = array<i64: 16, 128, 64>}, {pipeline_mode = #tpu.pipeline_mode<synchronous>, transform_indices = @transform_25, window_bounds = array<i64: 128, 1>}, {pipeline_mode = #tpu.pipeline_mode<synchronous>, transform_indices = @transform_26, window_bounds = array<i64: 128, 1>}, {pipeline_mode = #tpu.pipeline_mode<synchronous>, transform_indices = @transform_27, window_bounds = array<i64: 128, 16>}, {pipeline_mode = #tpu.pipeline_mode<synchronous>, transform_indices = @transform_28, window_bounds = array<i64: 1, 1>}, {transform_indices = @transform_29, window_bounds = array<i64: 1, 1, 1>}]} {
    %c0 = arith.constant 0 : index
    %c0_0 = arith.constant 0 : index
    %c0_1 = arith.constant 0 : index
    %0 = vector.load %arg1[%c0, %c0_0, %c0_1] : memref<1x8x256xbf16, #tpu.memory_space<vmem>>, vector<1x8x256xbf16>
    %1 = vector.shape_cast %0 : vector<1x8x256xbf16> to vector<8x256xbf16>
    %cst = arith.constant 0.000000e+00 : f32
    %2 = vector.broadcast %cst : f32 to vector<32x256xf32>
    %c0_2 = arith.constant 0 : index
    %c0_3 = arith.constant 0 : index
    %c0_4 = arith.constant 0 : index
    %3 = vector.load %arg2[%c0_2, %c0_3, %c0_4] : memref<9x256x256xbf16, #tpu.memory_space<vmem>>, vector<1x256x256xbf16>
    %4 = vector.shape_cast %3 : vector<1x256x256xbf16> to vector<256x256xbf16>
    %cst_5 = arith.constant dense<0.000000e+00> : vector<8x256xf32>
    %5 = tpu.matmul %1, %4, %cst_5 {dimension_numbers = #tpu.dot_dimension_numbers<[1], [0], [0], [1], [0, 0, 1, 1], [], []>} : vector<8x256xbf16>, vector<256x256xbf16>, vector<8x256xf32> -> vector<8x256xf32>
    %c0_6 = arith.constant 0 : index
    %c0_7 = arith.constant 0 : index
    %c0_8 = arith.constant 0 : index
    %6 = vector.load %arg3[%c0_6, %c0_7, %c0_8] : memref<9x32x8xbf16, #tpu.memory_space<vmem>>, vector<1x32x8xbf16>
    %7 = vector.shape_cast %6 : vector<1x32x8xbf16> to vector<32x8xbf16>
    %8 = arith.truncf %5 : vector<8x256xf32> to vector<8x256xbf16>
    %cst_9 = arith.constant dense<0.000000e+00> : vector<32x256xf32>
    %9 = tpu.matmul %7, %8, %cst_9 {dimension_numbers = #tpu.dot_dimension_numbers<[1], [0], [0], [1], [0, 0, 1, 1], [], []>} : vector<32x8xbf16>, vector<8x256xbf16>, vector<32x256xf32> -> vector<32x256xf32>
    %10 = arith.addf %2, %9 : vector<32x256xf32>
    %c1 = arith.constant 1 : index
    %c0_10 = arith.constant 0 : index
    %c0_11 = arith.constant 0 : index
    %11 = vector.load %arg2[%c1, %c0_10, %c0_11] : memref<9x256x256xbf16, #tpu.memory_space<vmem>>, vector<1x256x256xbf16>
    %12 = vector.shape_cast %11 : vector<1x256x256xbf16> to vector<256x256xbf16>
    %cst_12 = arith.constant dense<0.000000e+00> : vector<8x256xf32>
    %13 = tpu.matmul %1, %12, %cst_12 {dimension_numbers = #tpu.dot_dimension_numbers<[1], [0], [0], [1], [0, 0, 1, 1], [], []>} : vector<8x256xbf16>, vector<256x256xbf16>, vector<8x256xf32> -> vector<8x256xf32>
    %c1_13 = arith.constant 1 : index
    %c0_14 = arith.constant 0 : index
    %c0_15 = arith.constant 0 : index
    %14 = vector.load %arg3[%c1_13, %c0_14, %c0_15] : memref<9x32x8xbf16, #tpu.memory_space<vmem>>, vector<1x32x8xbf16>
    %15 = vector.shape_cast %14 : vector<1x32x8xbf16> to vector<32x8xbf16>
    %16 = arith.truncf %13 : vector<8x256xf32> to vector<8x256xbf16>
    %cst_16 = arith.constant dense<0.000000e+00> : vector<32x256xf32>
    %17 = tpu.matmul %15, %16, %cst_16 {dimension_numbers = #tpu.dot_dimension_numbers<[1], [0], [0], [1], [0, 0, 1, 1], [], []>} : vector<32x8xbf16>, vector<8x256xbf16>, vector<32x256xf32> -> vector<32x256xf32>
    %18 = arith.addf %10, %17 : vector<32x256xf32>
    %c2 = arith.constant 2 : index
    %c0_17 = arith.constant 0 : index
    %c0_18 = arith.constant 0 : index
    %19 = vector.load %arg2[%c2, %c0_17, %c0_18] : memref<9x256x256xbf16, #tpu.memory_space<vmem>>, vector<1x256x256xbf16>
    %20 = vector.shape_cast %19 : vector<1x256x256xbf16> to vector<256x256xbf16>
    %cst_19 = arith.constant dense<0.000000e+00> : vector<8x256xf32>
    %21 = tpu.matmul %1, %20, %cst_19 {dimension_numbers = #tpu.dot_dimension_numbers<[1], [0], [0], [1], [0, 0, 1, 1], [], []>} : vector<8x256xbf16>, vector<256x256xbf16>, vector<8x256xf32> -> vector<8x256xf32>
    %c2_20 = arith.constant 2 : index
    %c0_21 = arith.constant 0 : index
    %c0_22 = arith.constant 0 : index
    %22 = vector.load %arg3[%c2_20, %c0_21, %c0_22] : memref<9x32x8xbf16, #tpu.memory_space<vmem>>, vector<1x32x8xbf16>
    %23 = vector.shape_cast %22 : vector<1x32x8xbf16> to vector<32x8xbf16>
    %24 = arith.truncf %21 : vector<8x256xf32> to vector<8x256xbf16>
    %cst_23 = arith.constant dense<0.000000e+00> : vector<32x256xf32>
    %25 = tpu.matmul %23, %24, %cst_23 {dimension_numbers = #tpu.dot_dimension_numbers<[1], [0], [0], [1], [0, 0, 1, 1], [], []>} : vector<32x8xbf16>, vector<8x256xbf16>, vector<32x256xf32> -> vector<32x256xf32>
    %26 = arith.addf %18, %25 : vector<32x256xf32>
    %c3 = arith.constant 3 : index
    %c0_24 = arith.constant 0 : index
    %c0_25 = arith.constant 0 : index
    %27 = vector.load %arg2[%c3, %c0_24, %c0_25] : memref<9x256x256xbf16, #tpu.memory_space<vmem>>, vector<1x256x256xbf16>
    %28 = vector.shape_cast %27 : vector<1x256x256xbf16> to vector<256x256xbf16>
    %cst_26 = arith.constant dense<0.000000e+00> : vector<8x256xf32>
    %29 = tpu.matmul %1, %28, %cst_26 {dimension_numbers = #tpu.dot_dimension_numbers<[1], [0], [0], [1], [0, 0, 1, 1], [], []>} : vector<8x256xbf16>, vector<256x256xbf16>, vector<8x256xf32> -> vector<8x256xf32>
    %c3_27 = arith.constant 3 : index
    %c0_28 = arith.constant 0 : index
    %c0_29 = arith.constant 0 : index
    %30 = vector.load %arg3[%c3_27, %c0_28, %c0_29] : memref<9x32x8xbf16, #tpu.memory_space<vmem>>, vector<1x32x8xbf16>
    %31 = vector.shape_cast %30 : vector<1x32x8xbf16> to vector<32x8xbf16>
    %32 = arith.truncf %29 : vector<8x256xf32> to vector<8x256xbf16>
    %cst_30 = arith.constant dense<0.000000e+00> : vector<32x256xf32>
    %33 = tpu.matmul %31, %32, %cst_30 {dimension_numbers = #tpu.dot_dimension_numbers<[1], [0], [0], [1], [0, 0, 1, 1], [], []>} : vector<32x8xbf16>, vector<8x256xbf16>, vector<32x256xf32> -> vector<32x256xf32>
    %34 = arith.addf %26, %33 : vector<32x256xf32>
    %c4 = arith.constant 4 : index
    %c0_31 = arith.constant 0 : index
    %c0_32 = arith.constant 0 : index
    %35 = vector.load %arg2[%c4, %c0_31, %c0_32] : memref<9x256x256xbf16, #tpu.memory_space<vmem>>, vector<1x256x256xbf16>
    %36 = vector.shape_cast %35 : vector<1x256x256xbf16> to vector<256x256xbf16>
    %cst_33 = arith.constant dense<0.000000e+00> : vector<8x256xf32>
    %37 = tpu.matmul %1, %36, %cst_33 {dimension_numbers = #tpu.dot_dimension_numbers<[1], [0], [0], [1], [0, 0, 1, 1], [], []>} : vector<8x256xbf16>, vector<256x256xbf16>, vector<8x256xf32> -> vector<8x256xf32>
    %c4_34 = arith.constant 4 : index
    %c0_35 = arith.constant 0 : index
    %c0_36 = arith.constant 0 : index
    %38 = vector.load %arg3[%c4_34, %c0_35, %c0_36] : memref<9x32x8xbf16, #tpu.memory_space<vmem>>, vector<1x32x8xbf16>
    %39 = vector.shape_cast %38 : vector<1x32x8xbf16> to vector<32x8xbf16>
    %40 = arith.truncf %37 : vector<8x256xf32> to vector<8x256xbf16>
    %cst_37 = arith.constant dense<0.000000e+00> : vector<32x256xf32>
    %41 = tpu.matmul %39, %40, %cst_37 {dimension_numbers = #tpu.dot_dimension_numbers<[1], [0], [0], [1], [0, 0, 1, 1], [], []>} : vector<32x8xbf16>, vector<8x256xbf16>, vector<32x256xf32> -> vector<32x256xf32>
    %42 = arith.addf %34, %41 : vector<32x256xf32>
    %c5 = arith.constant 5 : index
    %c0_38 = arith.constant 0 : index
    %c0_39 = arith.constant 0 : index
    %43 = vector.load %arg2[%c5, %c0_38, %c0_39] : memref<9x256x256xbf16, #tpu.memory_space<vmem>>, vector<1x256x256xbf16>
    %44 = vector.shape_cast %43 : vector<1x256x256xbf16> to vector<256x256xbf16>
    %cst_40 = arith.constant dense<0.000000e+00> : vector<8x256xf32>
    %45 = tpu.matmul %1, %44, %cst_40 {dimension_numbers = #tpu.dot_dimension_numbers<[1], [0], [0], [1], [0, 0, 1, 1], [], []>} : vector<8x256xbf16>, vector<256x256xbf16>, vector<8x256xf32> -> vector<8x256xf32>
    %c5_41 = arith.constant 5 : index
    %c0_42 = arith.constant 0 : index
    %c0_43 = arith.constant 0 : index
    %46 = vector.load %arg3[%c5_41, %c0_42, %c0_43] : memref<9x32x8xbf16, #tpu.memory_space<vmem>>, vector<1x32x8xbf16>
    %47 = vector.shape_cast %46 : vector<1x32x8xbf16> to vector<32x8xbf16>
    %48 = arith.truncf %45 : vector<8x256xf32> to vector<8x256xbf16>
    %cst_44 = arith.constant dense<0.000000e+00> : vector<32x256xf32>
    %49 = tpu.matmul %47, %48, %cst_44 {dimension_numbers = #tpu.dot_dimension_numbers<[1], [0], [0], [1], [0, 0, 1, 1], [], []>} : vector<32x8xbf16>, vector<8x256xbf16>, vector<32x256xf32> -> vector<32x256xf32>
    %50 = arith.addf %42, %49 : vector<32x256xf32>
    %c6 = arith.constant 6 : index
    %c0_45 = arith.constant 0 : index
    %c0_46 = arith.constant 0 : index
    %51 = vector.load %arg2[%c6, %c0_45, %c0_46] : memref<9x256x256xbf16, #tpu.memory_space<vmem>>, vector<1x256x256xbf16>
    %52 = vector.shape_cast %51 : vector<1x256x256xbf16> to vector<256x256xbf16>
    %cst_47 = arith.constant dense<0.000000e+00> : vector<8x256xf32>
    %53 = tpu.matmul %1, %52, %cst_47 {dimension_numbers = #tpu.dot_dimension_numbers<[1], [0], [0], [1], [0, 0, 1, 1], [], []>} : vector<8x256xbf16>, vector<256x256xbf16>, vector<8x256xf32> -> vector<8x256xf32>
    %c6_48 = arith.constant 6 : index
    %c0_49 = arith.constant 0 : index
    %c0_50 = arith.constant 0 : index
    %54 = vector.load %arg3[%c6_48, %c0_49, %c0_50] : memref<9x32x8xbf16, #tpu.memory_space<vmem>>, vector<1x32x8xbf16>
    %55 = vector.shape_cast %54 : vector<1x32x8xbf16> to vector<32x8xbf16>
    %56 = arith.truncf %53 : vector<8x256xf32> to vector<8x256xbf16>
    %cst_51 = arith.constant dense<0.000000e+00> : vector<32x256xf32>
    %57 = tpu.matmul %55, %56, %cst_51 {dimension_numbers = #tpu.dot_dimension_numbers<[1], [0], [0], [1], [0, 0, 1, 1], [], []>} : vector<32x8xbf16>, vector<8x256xbf16>, vector<32x256xf32> -> vector<32x256xf32>
    %58 = arith.addf %50, %57 : vector<32x256xf32>
    %c7 = arith.constant 7 : index
    %c0_52 = arith.constant 0 : index
    %c0_53 = arith.constant 0 : index
    %59 = vector.load %arg2[%c7, %c0_52, %c0_53] : memref<9x256x256xbf16, #tpu.memory_space<vmem>>, vector<1x256x256xbf16>
    %60 = vector.shape_cast %59 : vector<1x256x256xbf16> to vector<256x256xbf16>
    %cst_54 = arith.constant dense<0.000000e+00> : vector<8x256xf32>
    %61 = tpu.matmul %1, %60, %cst_54 {dimension_numbers = #tpu.dot_dimension_numbers<[1], [0], [0], [1], [0, 0, 1, 1], [], []>} : vector<8x256xbf16>, vector<256x256xbf16>, vector<8x256xf32> -> vector<8x256xf32>
    %c7_55 = arith.constant 7 : index
    %c0_56 = arith.constant 0 : index
    %c0_57 = arith.constant 0 : index
    %62 = vector.load %arg3[%c7_55, %c0_56, %c0_57] : memref<9x32x8xbf16, #tpu.memory_space<vmem>>, vector<1x32x8xbf16>
    %63 = vector.shape_cast %62 : vector<1x32x8xbf16> to vector<32x8xbf16>
    %64 = arith.truncf %61 : vector<8x256xf32> to vector<8x256xbf16>
    %cst_58 = arith.constant dense<0.000000e+00> : vector<32x256xf32>
    %65 = tpu.matmul %63, %64, %cst_58 {dimension_numbers = #tpu.dot_dimension_numbers<[1], [0], [0], [1], [0, 0, 1, 1], [], []>} : vector<32x8xbf16>, vector<8x256xbf16>, vector<32x256xf32> -> vector<32x256xf32>
    %66 = arith.addf %58, %65 : vector<32x256xf32>
    %c8 = arith.constant 8 : index
    %c0_59 = arith.constant 0 : index
    %c0_60 = arith.constant 0 : index
    %67 = vector.load %arg2[%c8, %c0_59, %c0_60] : memref<9x256x256xbf16, #tpu.memory_space<vmem>>, vector<1x256x256xbf16>
    %68 = vector.shape_cast %67 : vector<1x256x256xbf16> to vector<256x256xbf16>
    %cst_61 = arith.constant dense<0.000000e+00> : vector<8x256xf32>
    %69 = tpu.matmul %1, %68, %cst_61 {dimension_numbers = #tpu.dot_dimension_numbers<[1], [0], [0], [1], [0, 0, 1, 1], [], []>} : vector<8x256xbf16>, vector<256x256xbf16>, vector<8x256xf32> -> vector<8x256xf32>
    %c8_62 = arith.constant 8 : index
    %c0_63 = arith.constant 0 : index
    %c0_64 = arith.constant 0 : index
    %70 = vector.load %arg3[%c8_62, %c0_63, %c0_64] : memref<9x32x8xbf16, #tpu.memory_space<vmem>>, vector<1x32x8xbf16>
    %71 = vector.shape_cast %70 : vector<1x32x8xbf16> to vector<32x8xbf16>
    %72 = arith.truncf %69 : vector<8x256xf32> to vector<8x256xbf16>
    %cst_65 = arith.constant dense<0.000000e+00> : vector<32x256xf32>
    %73 = tpu.matmul %71, %72, %cst_65 {dimension_numbers = #tpu.dot_dimension_numbers<[1], [0], [0], [1], [0, 0, 1, 1], [], []>} : vector<32x8xbf16>, vector<8x256xbf16>, vector<32x256xf32> -> vector<32x256xf32>
    %74 = arith.addf %66, %73 : vector<32x256xf32>
    %c0_66 = arith.constant 0 : index
    %c0_67 = arith.constant 0 : index
    %75 = vector.load %arg4[%c0_66, %c0_67] : memref<32x1xf32, #tpu.memory_space<vmem>>, vector<32x1xf32>
    %76 = vector.broadcast %75 : vector<32x1xf32> to vector<32x256xf32>
    %77 = arith.mulf %74, %76 : vector<32x256xf32>
    %c0_68 = arith.constant 0 : index
    %c0_69 = arith.constant 0 : index
    %78 = vector.load %arg5[%c0_68, %c0_69] : memref<32x1xf32, #tpu.memory_space<vmem>>, vector<32x1xf32>
    %79 = vector.broadcast %78 : vector<32x1xf32> to vector<32x256xf32>
    %80 = arith.addf %77, %79 : vector<32x256xf32>
    %cst_70 = arith.constant 0.000000e+00 : f32
    %81 = vector.broadcast %cst_70 : f32 to vector<32x256xf32>
    %82 = arith.cmpf oge, %80, %81 : vector<32x256xf32>
    %cst_71 = arith.constant 1.000000e-01 : f32
    %83 = vector.broadcast %cst_71 : f32 to vector<32x256xf32>
    %84 = arith.mulf %83, %80 : vector<32x256xf32>
    %85 = arith.select %82, %80, %84 : vector<32x256xi1>, vector<32x256xf32>
    %86 = arith.truncf %85 : vector<32x256xf32> to vector<32x256xbf16>
    %c0_72 = arith.constant 0 : index
    %c0_73 = arith.constant 0 : index
    %87 = vector.load %arg6[%c0_72, %c0_73] : memref<32x4xbf16, #tpu.memory_space<vmem>>, vector<32x4xbf16>
    %cst_74 = arith.constant dense<0.000000e+00> : vector<256x4xf32>
    %88 = tpu.matmul %86, %87, %cst_74 {dimension_numbers = #tpu.dot_dimension_numbers<[0], [0], [1], [1], [0, 1, 1, 1], [], []>} : vector<32x256xbf16>, vector<32x4xbf16>, vector<256x4xf32> -> vector<256x4xf32>
    %c0_75 = arith.constant 0 : index
    %c0_76 = arith.constant 0 : index
    %89 = vector.load %arg7[%c0_75, %c0_76] : memref<1x4xf32, #tpu.memory_space<vmem>>, vector<1x4xf32>
    %90 = vector.broadcast %89 : vector<1x4xf32> to vector<256x4xf32>
    %91 = arith.addf %88, %90 : vector<256x4xf32>
    %c0_77 = arith.constant 0 : index
    %c0_78 = arith.constant 0 : index
    %92 = vector.load %arg8[%c0_77, %c0_78] : memref<4x32xbf16, #tpu.memory_space<vmem>>, vector<4x32xbf16>
    %cst_79 = arith.constant dense<0.000000e+00> : vector<4x256xf32>
    %93 = tpu.matmul %92, %86, %cst_79 {dimension_numbers = #tpu.dot_dimension_numbers<[1], [0], [0], [1], [0, 0, 1, 1], [], []>} : vector<4x32xbf16>, vector<32x256xbf16>, vector<4x256xf32> -> vector<4x256xf32>
    %c0_80 = arith.constant 0 : index
    %c0_81 = arith.constant 0 : index
    %94 = vector.load %arg9[%c0_80, %c0_81] : memref<4x1xf32, #tpu.memory_space<vmem>>, vector<4x1xf32>
    %95 = vector.broadcast %94 : vector<4x1xf32> to vector<4x256xf32>
    %96 = arith.addf %93, %95 : vector<4x256xf32>
    %c0_82 = arith.constant 0 : index
    %c0_83 = arith.constant 0 : index
    %97 = vector.load %arg10[%c0_82, %c0_83] : memref<32x32xbf16, #tpu.memory_space<vmem>>, vector<32x32xbf16>
    %cst_84 = arith.constant dense<0.000000e+00> : vector<32x256xf32>
    %98 = tpu.matmul %97, %86, %cst_84 {dimension_numbers = #tpu.dot_dimension_numbers<[1], [0], [0], [1], [0, 0, 1, 1], [], []>} : vector<32x32xbf16>, vector<32x256xbf16>, vector<32x256xf32> -> vector<32x256xf32>
    %c0_85 = arith.constant 0 : index
    %c0_86 = arith.constant 0 : index
    %99 = vector.load %arg11[%c0_85, %c0_86] : memref<32x1xf32, #tpu.memory_space<vmem>>, vector<32x1xf32>
    %100 = vector.broadcast %99 : vector<32x1xf32> to vector<32x256xf32>
    %101 = arith.addf %98, %100 : vector<32x256xf32>
    %102 = arith.truncf %91 : vector<256x4xf32> to vector<256x4xbf16>
    %103 = arith.truncf %96 : vector<4x256xf32> to vector<4x256xbf16>
    %cst_87 = arith.constant dense<0.000000e+00> : vector<256x256xf32>
    %104 = tpu.matmul %102, %103, %cst_87 {dimension_numbers = #tpu.dot_dimension_numbers<[1], [0], [0], [1], [0, 0, 1, 1], [], []>} : vector<256x4xbf16>, vector<4x256xbf16>, vector<256x256xf32> -> vector<256x256xf32>
    %cst_88 = arith.constant dense<0xFF800000> : vector<256xf32>
    %105 = vector.multi_reduction <maximumf>, %104, %cst_88 [1] : vector<256x256xf32> to vector<256xf32>
    %106 = vector.shape_cast %105 : vector<256xf32> to vector<256x1xf32>
    %107 = vector.broadcast %106 : vector<256x1xf32> to vector<256x256xf32>
    %108 = arith.subf %104, %107 : vector<256x256xf32>
    %109 = math.exp %108 : vector<256x256xf32>
    %cst_89 = arith.constant dense<0.000000e+00> : vector<256xf32>
    %110 = vector.multi_reduction <add>, %109, %cst_89 [1] : vector<256x256xf32> to vector<256xf32>
    %111 = vector.shape_cast %110 : vector<256xf32> to vector<256x1xf32>
    %112 = tpu.reciprocal %111 {approx = true} : vector<256x1xf32> -> vector<256x1xf32>
    %113 = vector.broadcast %112 : vector<256x1xf32> to vector<256x256xf32>
    %114 = arith.mulf %109, %113 : vector<256x256xf32>
    %115 = arith.truncf %101 : vector<32x256xf32> to vector<32x256xbf16>
    %116 = arith.truncf %114 : vector<256x256xf32> to vector<256x256xbf16>
    %cst_90 = arith.constant dense<0.000000e+00> : vector<32x256xf32>
    %117 = tpu.matmul %115, %116, %cst_90 {dimension_numbers = #tpu.dot_dimension_numbers<[1], [1], [0], [0], [0, 0, 1, 0], [], []>} : vector<32x256xbf16>, vector<256x256xbf16>, vector<32x256xf32> -> vector<32x256xf32>
    %c0_91 = arith.constant 0 : index
    %c0_92 = arith.constant 0 : index
    %118 = vector.load %arg12[%c0_91, %c0_92] : memref<1x1xf32, #tpu.memory_space<vmem>>, vector<1x1xf32>
    %119 = vector.broadcast %118 : vector<1x1xf32> to vector<32x256xf32>
    %120 = arith.mulf %119, %117 : vector<32x256xf32>
    %121 = arith.addf %120, %85 : vector<32x256xf32>
    %122 = arith.truncf %121 : vector<32x256xf32> to vector<32x256xbf16>
    %cst_93 = arith.constant 0.000000e+00 : f32
    %123 = vector.broadcast %cst_93 : f32 to vector<64x64xf32>
    %c0_94 = arith.constant 0 : index
    %c0_95 = arith.constant 0 : index
    %c0_96 = arith.constant 0 : index
    %124 = vector.load %arg13[%c0_94, %c0_95, %c0_96] : memref<16x256x64xbf16, #tpu.memory_space<vmem>>, vector<1x256x64xbf16>
    %125 = vector.shape_cast %124 : vector<1x256x64xbf16> to vector<256x64xbf16>
    %cst_97 = arith.constant dense<0.000000e+00> : vector<32x64xf32>
    %126 = tpu.matmul %122, %125, %cst_97 {dimension_numbers = #tpu.dot_dimension_numbers<[1], [0], [0], [1], [0, 0, 1, 1], [], []>} : vector<32x256xbf16>, vector<256x64xbf16>, vector<32x64xf32> -> vector<32x64xf32>
    %c0_98 = arith.constant 0 : index
    %c0_99 = arith.constant 0 : index
    %c0_100 = arith.constant 0 : index
    %127 = vector.load %arg14[%c0_98, %c0_99, %c0_100] : memref<16x64x32xbf16, #tpu.memory_space<vmem>>, vector<1x64x32xbf16>
    %128 = vector.shape_cast %127 : vector<1x64x32xbf16> to vector<64x32xbf16>
    %129 = arith.truncf %126 : vector<32x64xf32> to vector<32x64xbf16>
    %cst_101 = arith.constant dense<0.000000e+00> : vector<64x64xf32>
    %130 = tpu.matmul %128, %129, %cst_101 {dimension_numbers = #tpu.dot_dimension_numbers<[1], [0], [0], [1], [0, 0, 1, 1], [], []>} : vector<64x32xbf16>, vector<32x64xbf16>, vector<64x64xf32> -> vector<64x64xf32>
    %131 = arith.addf %123, %130 : vector<64x64xf32>
    %c1_102 = arith.constant 1 : index
    %c0_103 = arith.constant 0 : index
    %c0_104 = arith.constant 0 : index
    %132 = vector.load %arg13[%c1_102, %c0_103, %c0_104] : memref<16x256x64xbf16, #tpu.memory_space<vmem>>, vector<1x256x64xbf16>
    %133 = vector.shape_cast %132 : vector<1x256x64xbf16> to vector<256x64xbf16>
    %cst_105 = arith.constant dense<0.000000e+00> : vector<32x64xf32>
    %134 = tpu.matmul %122, %133, %cst_105 {dimension_numbers = #tpu.dot_dimension_numbers<[1], [0], [0], [1], [0, 0, 1, 1], [], []>} : vector<32x256xbf16>, vector<256x64xbf16>, vector<32x64xf32> -> vector<32x64xf32>
    %c1_106 = arith.constant 1 : index
    %c0_107 = arith.constant 0 : index
    %c0_108 = arith.constant 0 : index
    %135 = vector.load %arg14[%c1_106, %c0_107, %c0_108] : memref<16x64x32xbf16, #tpu.memory_space<vmem>>, vector<1x64x32xbf16>
    %136 = vector.shape_cast %135 : vector<1x64x32xbf16> to vector<64x32xbf16>
    %137 = arith.truncf %134 : vector<32x64xf32> to vector<32x64xbf16>
    %cst_109 = arith.constant dense<0.000000e+00> : vector<64x64xf32>
    %138 = tpu.matmul %136, %137, %cst_109 {dimension_numbers = #tpu.dot_dimension_numbers<[1], [0], [0], [1], [0, 0, 1, 1], [], []>} : vector<64x32xbf16>, vector<32x64xbf16>, vector<64x64xf32> -> vector<64x64xf32>
    %139 = arith.addf %131, %138 : vector<64x64xf32>
    %c2_110 = arith.constant 2 : index
    %c0_111 = arith.constant 0 : index
    %c0_112 = arith.constant 0 : index
    %140 = vector.load %arg13[%c2_110, %c0_111, %c0_112] : memref<16x256x64xbf16, #tpu.memory_space<vmem>>, vector<1x256x64xbf16>
    %141 = vector.shape_cast %140 : vector<1x256x64xbf16> to vector<256x64xbf16>
    %cst_113 = arith.constant dense<0.000000e+00> : vector<32x64xf32>
    %142 = tpu.matmul %122, %141, %cst_113 {dimension_numbers = #tpu.dot_dimension_numbers<[1], [0], [0], [1], [0, 0, 1, 1], [], []>} : vector<32x256xbf16>, vector<256x64xbf16>, vector<32x64xf32> -> vector<32x64xf32>
    %c2_114 = arith.constant 2 : index
    %c0_115 = arith.constant 0 : index
    %c0_116 = arith.constant 0 : index
    %143 = vector.load %arg14[%c2_114, %c0_115, %c0_116] : memref<16x64x32xbf16, #tpu.memory_space<vmem>>, vector<1x64x32xbf16>
    %144 = vector.shape_cast %143 : vector<1x64x32xbf16> to vector<64x32xbf16>
    %145 = arith.truncf %142 : vector<32x64xf32> to vector<32x64xbf16>
    %cst_117 = arith.constant dense<0.000000e+00> : vector<64x64xf32>
    %146 = tpu.matmul %144, %145, %cst_117 {dimension_numbers = #tpu.dot_dimension_numbers<[1], [0], [0], [1], [0, 0, 1, 1], [], []>} : vector<64x32xbf16>, vector<32x64xbf16>, vector<64x64xf32> -> vector<64x64xf32>
    %147 = arith.addf %139, %146 : vector<64x64xf32>
    %c3_118 = arith.constant 3 : index
    %c0_119 = arith.constant 0 : index
    %c0_120 = arith.constant 0 : index
    %148 = vector.load %arg13[%c3_118, %c0_119, %c0_120] : memref<16x256x64xbf16, #tpu.memory_space<vmem>>, vector<1x256x64xbf16>
    %149 = vector.shape_cast %148 : vector<1x256x64xbf16> to vector<256x64xbf16>
    %cst_121 = arith.constant dense<0.000000e+00> : vector<32x64xf32>
    %150 = tpu.matmul %122, %149, %cst_121 {dimension_numbers = #tpu.dot_dimension_numbers<[1], [0], [0], [1], [0, 0, 1, 1], [], []>} : vector<32x256xbf16>, vector<256x64xbf16>, vector<32x64xf32> -> vector<32x64xf32>
    %c3_122 = arith.constant 3 : index
    %c0_123 = arith.constant 0 : index
    %c0_124 = arith.constant 0 : index
    %151 = vector.load %arg14[%c3_122, %c0_123, %c0_124] : memref<16x64x32xbf16, #tpu.memory_space<vmem>>, vector<1x64x32xbf16>
    %152 = vector.shape_cast %151 : vector<1x64x32xbf16> to vector<64x32xbf16>
    %153 = arith.truncf %150 : vector<32x64xf32> to vector<32x64xbf16>
    %cst_125 = arith.constant dense<0.000000e+00> : vector<64x64xf32>
    %154 = tpu.matmul %152, %153, %cst_125 {dimension_numbers = #tpu.dot_dimension_numbers<[1], [0], [0], [1], [0, 0, 1, 1], [], []>} : vector<64x32xbf16>, vector<32x64xbf16>, vector<64x64xf32> -> vector<64x64xf32>
    %155 = arith.addf %147, %154 : vector<64x64xf32>
    %c4_126 = arith.constant 4 : index
    %c0_127 = arith.constant 0 : index
    %c0_128 = arith.constant 0 : index
    %156 = vector.load %arg13[%c4_126, %c0_127, %c0_128] : memref<16x256x64xbf16, #tpu.memory_space<vmem>>, vector<1x256x64xbf16>
    %157 = vector.shape_cast %156 : vector<1x256x64xbf16> to vector<256x64xbf16>
    %cst_129 = arith.constant dense<0.000000e+00> : vector<32x64xf32>
    %158 = tpu.matmul %122, %157, %cst_129 {dimension_numbers = #tpu.dot_dimension_numbers<[1], [0], [0], [1], [0, 0, 1, 1], [], []>} : vector<32x256xbf16>, vector<256x64xbf16>, vector<32x64xf32> -> vector<32x64xf32>
    %c4_130 = arith.constant 4 : index
    %c0_131 = arith.constant 0 : index
    %c0_132 = arith.constant 0 : index
    %159 = vector.load %arg14[%c4_130, %c0_131, %c0_132] : memref<16x64x32xbf16, #tpu.memory_space<vmem>>, vector<1x64x32xbf16>
    %160 = vector.shape_cast %159 : vector<1x64x32xbf16> to vector<64x32xbf16>
    %161 = arith.truncf %158 : vector<32x64xf32> to vector<32x64xbf16>
    %cst_133 = arith.constant dense<0.000000e+00> : vector<64x64xf32>
    %162 = tpu.matmul %160, %161, %cst_133 {dimension_numbers = #tpu.dot_dimension_numbers<[1], [0], [0], [1], [0, 0, 1, 1], [], []>} : vector<64x32xbf16>, vector<32x64xbf16>, vector<64x64xf32> -> vector<64x64xf32>
    %163 = arith.addf %155, %162 : vector<64x64xf32>
    %c5_134 = arith.constant 5 : index
    %c0_135 = arith.constant 0 : index
    %c0_136 = arith.constant 0 : index
    %164 = vector.load %arg13[%c5_134, %c0_135, %c0_136] : memref<16x256x64xbf16, #tpu.memory_space<vmem>>, vector<1x256x64xbf16>
    %165 = vector.shape_cast %164 : vector<1x256x64xbf16> to vector<256x64xbf16>
    %cst_137 = arith.constant dense<0.000000e+00> : vector<32x64xf32>
    %166 = tpu.matmul %122, %165, %cst_137 {dimension_numbers = #tpu.dot_dimension_numbers<[1], [0], [0], [1], [0, 0, 1, 1], [], []>} : vector<32x256xbf16>, vector<256x64xbf16>, vector<32x64xf32> -> vector<32x64xf32>
    %c5_138 = arith.constant 5 : index
    %c0_139 = arith.constant 0 : index
    %c0_140 = arith.constant 0 : index
    %167 = vector.load %arg14[%c5_138, %c0_139, %c0_140] : memref<16x64x32xbf16, #tpu.memory_space<vmem>>, vector<1x64x32xbf16>
    %168 = vector.shape_cast %167 : vector<1x64x32xbf16> to vector<64x32xbf16>
    %169 = arith.truncf %166 : vector<32x64xf32> to vector<32x64xbf16>
    %cst_141 = arith.constant dense<0.000000e+00> : vector<64x64xf32>
    %170 = tpu.matmul %168, %169, %cst_141 {dimension_numbers = #tpu.dot_dimension_numbers<[1], [0], [0], [1], [0, 0, 1, 1], [], []>} : vector<64x32xbf16>, vector<32x64xbf16>, vector<64x64xf32> -> vector<64x64xf32>
    %171 = arith.addf %163, %170 : vector<64x64xf32>
    %c6_142 = arith.constant 6 : index
    %c0_143 = arith.constant 0 : index
    %c0_144 = arith.constant 0 : index
    %172 = vector.load %arg13[%c6_142, %c0_143, %c0_144] : memref<16x256x64xbf16, #tpu.memory_space<vmem>>, vector<1x256x64xbf16>
    %173 = vector.shape_cast %172 : vector<1x256x64xbf16> to vector<256x64xbf16>
    %cst_145 = arith.constant dense<0.000000e+00> : vector<32x64xf32>
    %174 = tpu.matmul %122, %173, %cst_145 {dimension_numbers = #tpu.dot_dimension_numbers<[1], [0], [0], [1], [0, 0, 1, 1], [], []>} : vector<32x256xbf16>, vector<256x64xbf16>, vector<32x64xf32> -> vector<32x64xf32>
    %c6_146 = arith.constant 6 : index
    %c0_147 = arith.constant 0 : index
    %c0_148 = arith.constant 0 : index
    %175 = vector.load %arg14[%c6_146, %c0_147, %c0_148] : memref<16x64x32xbf16, #tpu.memory_space<vmem>>, vector<1x64x32xbf16>
    %176 = vector.shape_cast %175 : vector<1x64x32xbf16> to vector<64x32xbf16>
    %177 = arith.truncf %174 : vector<32x64xf32> to vector<32x64xbf16>
    %cst_149 = arith.constant dense<0.000000e+00> : vector<64x64xf32>
    %178 = tpu.matmul %176, %177, %cst_149 {dimension_numbers = #tpu.dot_dimension_numbers<[1], [0], [0], [1], [0, 0, 1, 1], [], []>} : vector<64x32xbf16>, vector<32x64xbf16>, vector<64x64xf32> -> vector<64x64xf32>
    %179 = arith.addf %171, %178 : vector<64x64xf32>
    %c7_150 = arith.constant 7 : index
    %c0_151 = arith.constant 0 : index
    %c0_152 = arith.constant 0 : index
    %180 = vector.load %arg13[%c7_150, %c0_151, %c0_152] : memref<16x256x64xbf16, #tpu.memory_space<vmem>>, vector<1x256x64xbf16>
    %181 = vector.shape_cast %180 : vector<1x256x64xbf16> to vector<256x64xbf16>
    %cst_153 = arith.constant dense<0.000000e+00> : vector<32x64xf32>
    %182 = tpu.matmul %122, %181, %cst_153 {dimension_numbers = #tpu.dot_dimension_numbers<[1], [0], [0], [1], [0, 0, 1, 1], [], []>} : vector<32x256xbf16>, vector<256x64xbf16>, vector<32x64xf32> -> vector<32x64xf32>
    %c7_154 = arith.constant 7 : index
    %c0_155 = arith.constant 0 : index
    %c0_156 = arith.constant 0 : index
    %183 = vector.load %arg14[%c7_154, %c0_155, %c0_156] : memref<16x64x32xbf16, #tpu.memory_space<vmem>>, vector<1x64x32xbf16>
    %184 = vector.shape_cast %183 : vector<1x64x32xbf16> to vector<64x32xbf16>
    %185 = arith.truncf %182 : vector<32x64xf32> to vector<32x64xbf16>
    %cst_157 = arith.constant dense<0.000000e+00> : vector<64x64xf32>
    %186 = tpu.matmul %184, %185, %cst_157 {dimension_numbers = #tpu.dot_dimension_numbers<[1], [0], [0], [1], [0, 0, 1, 1], [], []>} : vector<64x32xbf16>, vector<32x64xbf16>, vector<64x64xf32> -> vector<64x64xf32>
    %187 = arith.addf %179, %186 : vector<64x64xf32>
    %c8_158 = arith.constant 8 : index
    %c0_159 = arith.constant 0 : index
    %c0_160 = arith.constant 0 : index
    %188 = vector.load %arg13[%c8_158, %c0_159, %c0_160] : memref<16x256x64xbf16, #tpu.memory_space<vmem>>, vector<1x256x64xbf16>
    %189 = vector.shape_cast %188 : vector<1x256x64xbf16> to vector<256x64xbf16>
    %cst_161 = arith.constant dense<0.000000e+00> : vector<32x64xf32>
    %190 = tpu.matmul %122, %189, %cst_161 {dimension_numbers = #tpu.dot_dimension_numbers<[1], [0], [0], [1], [0, 0, 1, 1], [], []>} : vector<32x256xbf16>, vector<256x64xbf16>, vector<32x64xf32> -> vector<32x64xf32>
    %c8_162 = arith.constant 8 : index
    %c0_163 = arith.constant 0 : index
    %c0_164 = arith.constant 0 : index
    %191 = vector.load %arg14[%c8_162, %c0_163, %c0_164] : memref<16x64x32xbf16, #tpu.memory_space<vmem>>, vector<1x64x32xbf16>
    %192 = vector.shape_cast %191 : vector<1x64x32xbf16> to vector<64x32xbf16>
    %193 = arith.truncf %190 : vector<32x64xf32> to vector<32x64xbf16>
    %cst_165 = arith.constant dense<0.000000e+00> : vector<64x64xf32>
    %194 = tpu.matmul %192, %193, %cst_165 {dimension_numbers = #tpu.dot_dimension_numbers<[1], [0], [0], [1], [0, 0, 1, 1], [], []>} : vector<64x32xbf16>, vector<32x64xbf16>, vector<64x64xf32> -> vector<64x64xf32>
    %195 = arith.addf %187, %194 : vector<64x64xf32>
    %c9 = arith.constant 9 : index
    %c0_166 = arith.constant 0 : index
    %c0_167 = arith.constant 0 : index
    %196 = vector.load %arg13[%c9, %c0_166, %c0_167] : memref<16x256x64xbf16, #tpu.memory_space<vmem>>, vector<1x256x64xbf16>
    %197 = vector.shape_cast %196 : vector<1x256x64xbf16> to vector<256x64xbf16>
    %cst_168 = arith.constant dense<0.000000e+00> : vector<32x64xf32>
    %198 = tpu.matmul %122, %197, %cst_168 {dimension_numbers = #tpu.dot_dimension_numbers<[1], [0], [0], [1], [0, 0, 1, 1], [], []>} : vector<32x256xbf16>, vector<256x64xbf16>, vector<32x64xf32> -> vector<32x64xf32>
    %c9_169 = arith.constant 9 : index
    %c0_170 = arith.constant 0 : index
    %c0_171 = arith.constant 0 : index
    %199 = vector.load %arg14[%c9_169, %c0_170, %c0_171] : memref<16x64x32xbf16, #tpu.memory_space<vmem>>, vector<1x64x32xbf16>
    %200 = vector.shape_cast %199 : vector<1x64x32xbf16> to vector<64x32xbf16>
    %201 = arith.truncf %198 : vector<32x64xf32> to vector<32x64xbf16>
    %cst_172 = arith.constant dense<0.000000e+00> : vector<64x64xf32>
    %202 = tpu.matmul %200, %201, %cst_172 {dimension_numbers = #tpu.dot_dimension_numbers<[1], [0], [0], [1], [0, 0, 1, 1], [], []>} : vector<64x32xbf16>, vector<32x64xbf16>, vector<64x64xf32> -> vector<64x64xf32>
    %203 = arith.addf %195, %202 : vector<64x64xf32>
    %c10 = arith.constant 10 : index
    %c0_173 = arith.constant 0 : index
    %c0_174 = arith.constant 0 : index
    %204 = vector.load %arg13[%c10, %c0_173, %c0_174] : memref<16x256x64xbf16, #tpu.memory_space<vmem>>, vector<1x256x64xbf16>
    %205 = vector.shape_cast %204 : vector<1x256x64xbf16> to vector<256x64xbf16>
    %cst_175 = arith.constant dense<0.000000e+00> : vector<32x64xf32>
    %206 = tpu.matmul %122, %205, %cst_175 {dimension_numbers = #tpu.dot_dimension_numbers<[1], [0], [0], [1], [0, 0, 1, 1], [], []>} : vector<32x256xbf16>, vector<256x64xbf16>, vector<32x64xf32> -> vector<32x64xf32>
    %c10_176 = arith.constant 10 : index
    %c0_177 = arith.constant 0 : index
    %c0_178 = arith.constant 0 : index
    %207 = vector.load %arg14[%c10_176, %c0_177, %c0_178] : memref<16x64x32xbf16, #tpu.memory_space<vmem>>, vector<1x64x32xbf16>
    %208 = vector.shape_cast %207 : vector<1x64x32xbf16> to vector<64x32xbf16>
    %209 = arith.truncf %206 : vector<32x64xf32> to vector<32x64xbf16>
    %cst_179 = arith.constant dense<0.000000e+00> : vector<64x64xf32>
    %210 = tpu.matmul %208, %209, %cst_179 {dimension_numbers = #tpu.dot_dimension_numbers<[1], [0], [0], [1], [0, 0, 1, 1], [], []>} : vector<64x32xbf16>, vector<32x64xbf16>, vector<64x64xf32> -> vector<64x64xf32>
    %211 = arith.addf %203, %210 : vector<64x64xf32>
    %c11 = arith.constant 11 : index
    %c0_180 = arith.constant 0 : index
    %c0_181 = arith.constant 0 : index
    %212 = vector.load %arg13[%c11, %c0_180, %c0_181] : memref<16x256x64xbf16, #tpu.memory_space<vmem>>, vector<1x256x64xbf16>
    %213 = vector.shape_cast %212 : vector<1x256x64xbf16> to vector<256x64xbf16>
    %cst_182 = arith.constant dense<0.000000e+00> : vector<32x64xf32>
    %214 = tpu.matmul %122, %213, %cst_182 {dimension_numbers = #tpu.dot_dimension_numbers<[1], [0], [0], [1], [0, 0, 1, 1], [], []>} : vector<32x256xbf16>, vector<256x64xbf16>, vector<32x64xf32> -> vector<32x64xf32>
    %c11_183 = arith.constant 11 : index
    %c0_184 = arith.constant 0 : index
    %c0_185 = arith.constant 0 : index
    %215 = vector.load %arg14[%c11_183, %c0_184, %c0_185] : memref<16x64x32xbf16, #tpu.memory_space<vmem>>, vector<1x64x32xbf16>
    %216 = vector.shape_cast %215 : vector<1x64x32xbf16> to vector<64x32xbf16>
    %217 = arith.truncf %214 : vector<32x64xf32> to vector<32x64xbf16>
    %cst_186 = arith.constant dense<0.000000e+00> : vector<64x64xf32>
    %218 = tpu.matmul %216, %217, %cst_186 {dimension_numbers = #tpu.dot_dimension_numbers<[1], [0], [0], [1], [0, 0, 1, 1], [], []>} : vector<64x32xbf16>, vector<32x64xbf16>, vector<64x64xf32> -> vector<64x64xf32>
    %219 = arith.addf %211, %218 : vector<64x64xf32>
    %c12 = arith.constant 12 : index
    %c0_187 = arith.constant 0 : index
    %c0_188 = arith.constant 0 : index
    %220 = vector.load %arg13[%c12, %c0_187, %c0_188] : memref<16x256x64xbf16, #tpu.memory_space<vmem>>, vector<1x256x64xbf16>
    %221 = vector.shape_cast %220 : vector<1x256x64xbf16> to vector<256x64xbf16>
    %cst_189 = arith.constant dense<0.000000e+00> : vector<32x64xf32>
    %222 = tpu.matmul %122, %221, %cst_189 {dimension_numbers = #tpu.dot_dimension_numbers<[1], [0], [0], [1], [0, 0, 1, 1], [], []>} : vector<32x256xbf16>, vector<256x64xbf16>, vector<32x64xf32> -> vector<32x64xf32>
    %c12_190 = arith.constant 12 : index
    %c0_191 = arith.constant 0 : index
    %c0_192 = arith.constant 0 : index
    %223 = vector.load %arg14[%c12_190, %c0_191, %c0_192] : memref<16x64x32xbf16, #tpu.memory_space<vmem>>, vector<1x64x32xbf16>
    %224 = vector.shape_cast %223 : vector<1x64x32xbf16> to vector<64x32xbf16>
    %225 = arith.truncf %222 : vector<32x64xf32> to vector<32x64xbf16>
    %cst_193 = arith.constant dense<0.000000e+00> : vector<64x64xf32>
    %226 = tpu.matmul %224, %225, %cst_193 {dimension_numbers = #tpu.dot_dimension_numbers<[1], [0], [0], [1], [0, 0, 1, 1], [], []>} : vector<64x32xbf16>, vector<32x64xbf16>, vector<64x64xf32> -> vector<64x64xf32>
    %227 = arith.addf %219, %226 : vector<64x64xf32>
    %c13 = arith.constant 13 : index
    %c0_194 = arith.constant 0 : index
    %c0_195 = arith.constant 0 : index
    %228 = vector.load %arg13[%c13, %c0_194, %c0_195] : memref<16x256x64xbf16, #tpu.memory_space<vmem>>, vector<1x256x64xbf16>
    %229 = vector.shape_cast %228 : vector<1x256x64xbf16> to vector<256x64xbf16>
    %cst_196 = arith.constant dense<0.000000e+00> : vector<32x64xf32>
    %230 = tpu.matmul %122, %229, %cst_196 {dimension_numbers = #tpu.dot_dimension_numbers<[1], [0], [0], [1], [0, 0, 1, 1], [], []>} : vector<32x256xbf16>, vector<256x64xbf16>, vector<32x64xf32> -> vector<32x64xf32>
    %c13_197 = arith.constant 13 : index
    %c0_198 = arith.constant 0 : index
    %c0_199 = arith.constant 0 : index
    %231 = vector.load %arg14[%c13_197, %c0_198, %c0_199] : memref<16x64x32xbf16, #tpu.memory_space<vmem>>, vector<1x64x32xbf16>
    %232 = vector.shape_cast %231 : vector<1x64x32xbf16> to vector<64x32xbf16>
    %233 = arith.truncf %230 : vector<32x64xf32> to vector<32x64xbf16>
    %cst_200 = arith.constant dense<0.000000e+00> : vector<64x64xf32>
    %234 = tpu.matmul %232, %233, %cst_200 {dimension_numbers = #tpu.dot_dimension_numbers<[1], [0], [0], [1], [0, 0, 1, 1], [], []>} : vector<64x32xbf16>, vector<32x64xbf16>, vector<64x64xf32> -> vector<64x64xf32>
    %235 = arith.addf %227, %234 : vector<64x64xf32>
    %c14 = arith.constant 14 : index
    %c0_201 = arith.constant 0 : index
    %c0_202 = arith.constant 0 : index
    %236 = vector.load %arg13[%c14, %c0_201, %c0_202] : memref<16x256x64xbf16, #tpu.memory_space<vmem>>, vector<1x256x64xbf16>
    %237 = vector.shape_cast %236 : vector<1x256x64xbf16> to vector<256x64xbf16>
    %cst_203 = arith.constant dense<0.000000e+00> : vector<32x64xf32>
    %238 = tpu.matmul %122, %237, %cst_203 {dimension_numbers = #tpu.dot_dimension_numbers<[1], [0], [0], [1], [0, 0, 1, 1], [], []>} : vector<32x256xbf16>, vector<256x64xbf16>, vector<32x64xf32> -> vector<32x64xf32>
    %c14_204 = arith.constant 14 : index
    %c0_205 = arith.constant 0 : index
    %c0_206 = arith.constant 0 : index
    %239 = vector.load %arg14[%c14_204, %c0_205, %c0_206] : memref<16x64x32xbf16, #tpu.memory_space<vmem>>, vector<1x64x32xbf16>
    %240 = vector.shape_cast %239 : vector<1x64x32xbf16> to vector<64x32xbf16>
    %241 = arith.truncf %238 : vector<32x64xf32> to vector<32x64xbf16>
    %cst_207 = arith.constant dense<0.000000e+00> : vector<64x64xf32>
    %242 = tpu.matmul %240, %241, %cst_207 {dimension_numbers = #tpu.dot_dimension_numbers<[1], [0], [0], [1], [0, 0, 1, 1], [], []>} : vector<64x32xbf16>, vector<32x64xbf16>, vector<64x64xf32> -> vector<64x64xf32>
    %243 = arith.addf %235, %242 : vector<64x64xf32>
    %c15 = arith.constant 15 : index
    %c0_208 = arith.constant 0 : index
    %c0_209 = arith.constant 0 : index
    %244 = vector.load %arg13[%c15, %c0_208, %c0_209] : memref<16x256x64xbf16, #tpu.memory_space<vmem>>, vector<1x256x64xbf16>
    %245 = vector.shape_cast %244 : vector<1x256x64xbf16> to vector<256x64xbf16>
    %cst_210 = arith.constant dense<0.000000e+00> : vector<32x64xf32>
    %246 = tpu.matmul %122, %245, %cst_210 {dimension_numbers = #tpu.dot_dimension_numbers<[1], [0], [0], [1], [0, 0, 1, 1], [], []>} : vector<32x256xbf16>, vector<256x64xbf16>, vector<32x64xf32> -> vector<32x64xf32>
    %c15_211 = arith.constant 15 : index
    %c0_212 = arith.constant 0 : index
    %c0_213 = arith.constant 0 : index
    %247 = vector.load %arg14[%c15_211, %c0_212, %c0_213] : memref<16x64x32xbf16, #tpu.memory_space<vmem>>, vector<1x64x32xbf16>
    %248 = vector.shape_cast %247 : vector<1x64x32xbf16> to vector<64x32xbf16>
    %249 = arith.truncf %246 : vector<32x64xf32> to vector<32x64xbf16>
    %cst_214 = arith.constant dense<0.000000e+00> : vector<64x64xf32>
    %250 = tpu.matmul %248, %249, %cst_214 {dimension_numbers = #tpu.dot_dimension_numbers<[1], [0], [0], [1], [0, 0, 1, 1], [], []>} : vector<64x32xbf16>, vector<32x64xbf16>, vector<64x64xf32> -> vector<64x64xf32>
    %251 = arith.addf %243, %250 : vector<64x64xf32>
    %c0_215 = arith.constant 0 : index
    %c0_216 = arith.constant 0 : index
    %252 = vector.load %arg15[%c0_215, %c0_216] : memref<64x1xf32, #tpu.memory_space<vmem>>, vector<64x1xf32>
    %253 = vector.broadcast %252 : vector<64x1xf32> to vector<64x64xf32>
    %254 = arith.mulf %251, %253 : vector<64x64xf32>
    %c0_217 = arith.constant 0 : index
    %c0_218 = arith.constant 0 : index
    %255 = vector.load %arg16[%c0_217, %c0_218] : memref<64x1xf32, #tpu.memory_space<vmem>>, vector<64x1xf32>
    %256 = vector.broadcast %255 : vector<64x1xf32> to vector<64x64xf32>
    %257 = arith.addf %254, %256 : vector<64x64xf32>
    %cst_219 = arith.constant 0.000000e+00 : f32
    %258 = vector.broadcast %cst_219 : f32 to vector<64x64xf32>
    %259 = arith.cmpf oge, %257, %258 : vector<64x64xf32>
    %cst_220 = arith.constant 1.000000e-01 : f32
    %260 = vector.broadcast %cst_220 : f32 to vector<64x64xf32>
    %261 = arith.mulf %260, %257 : vector<64x64xf32>
    %262 = arith.select %259, %257, %261 : vector<64x64xi1>, vector<64x64xf32>
    %263 = arith.truncf %262 : vector<64x64xf32> to vector<64x64xbf16>
    %c0_221 = arith.constant 0 : index
    %c0_222 = arith.constant 0 : index
    %264 = vector.load %arg17[%c0_221, %c0_222] : memref<64x8xbf16, #tpu.memory_space<vmem>>, vector<64x8xbf16>
    %cst_223 = arith.constant dense<0.000000e+00> : vector<64x8xf32>
    %265 = tpu.matmul %263, %264, %cst_223 {dimension_numbers = #tpu.dot_dimension_numbers<[0], [0], [1], [1], [0, 1, 1, 1], [], []>} : vector<64x64xbf16>, vector<64x8xbf16>, vector<64x8xf32> -> vector<64x8xf32>
    %c0_224 = arith.constant 0 : index
    %c0_225 = arith.constant 0 : index
    %266 = vector.load %arg18[%c0_224, %c0_225] : memref<1x8xf32, #tpu.memory_space<vmem>>, vector<1x8xf32>
    %267 = vector.broadcast %266 : vector<1x8xf32> to vector<64x8xf32>
    %268 = arith.addf %265, %267 : vector<64x8xf32>
    %c0_226 = arith.constant 0 : index
    %c0_227 = arith.constant 0 : index
    %269 = vector.load %arg19[%c0_226, %c0_227] : memref<8x64xbf16, #tpu.memory_space<vmem>>, vector<8x64xbf16>
    %cst_228 = arith.constant dense<0.000000e+00> : vector<8x64xf32>
    %270 = tpu.matmul %269, %263, %cst_228 {dimension_numbers = #tpu.dot_dimension_numbers<[1], [0], [0], [1], [0, 0, 1, 1], [], []>} : vector<8x64xbf16>, vector<64x64xbf16>, vector<8x64xf32> -> vector<8x64xf32>
    %c0_229 = arith.constant 0 : index
    %c0_230 = arith.constant 0 : index
    %271 = vector.load %arg20[%c0_229, %c0_230] : memref<8x1xf32, #tpu.memory_space<vmem>>, vector<8x1xf32>
    %272 = vector.broadcast %271 : vector<8x1xf32> to vector<8x64xf32>
    %273 = arith.addf %270, %272 : vector<8x64xf32>
    %c0_231 = arith.constant 0 : index
    %c0_232 = arith.constant 0 : index
    %274 = vector.load %arg21[%c0_231, %c0_232] : memref<64x64xbf16, #tpu.memory_space<vmem>>, vector<64x64xbf16>
    %cst_233 = arith.constant dense<0.000000e+00> : vector<64x64xf32>
    %275 = tpu.matmul %274, %263, %cst_233 {dimension_numbers = #tpu.dot_dimension_numbers<[1], [0], [0], [1], [0, 0, 1, 1], [], []>} : vector<64x64xbf16>, vector<64x64xbf16>, vector<64x64xf32> -> vector<64x64xf32>
    %c0_234 = arith.constant 0 : index
    %c0_235 = arith.constant 0 : index
    %276 = vector.load %arg22[%c0_234, %c0_235] : memref<64x1xf32, #tpu.memory_space<vmem>>, vector<64x1xf32>
    %277 = vector.broadcast %276 : vector<64x1xf32> to vector<64x64xf32>
    %278 = arith.addf %275, %277 : vector<64x64xf32>
    %279 = arith.truncf %268 : vector<64x8xf32> to vector<64x8xbf16>
    %280 = arith.truncf %273 : vector<8x64xf32> to vector<8x64xbf16>
    %cst_236 = arith.constant dense<0.000000e+00> : vector<64x64xf32>
    %281 = tpu.matmul %279, %280, %cst_236 {dimension_numbers = #tpu.dot_dimension_numbers<[1], [0], [0], [1], [0, 0, 1, 1], [], []>} : vector<64x8xbf16>, vector<8x64xbf16>, vector<64x64xf32> -> vector<64x64xf32>
    %cst_237 = arith.constant dense<0xFF800000> : vector<64xf32>
    %282 = vector.multi_reduction <maximumf>, %281, %cst_237 [1] : vector<64x64xf32> to vector<64xf32>
    %283 = vector.shape_cast %282 : vector<64xf32> to vector<64x1xf32>
    %284 = vector.broadcast %283 : vector<64x1xf32> to vector<64x64xf32>
    %285 = arith.subf %281, %284 : vector<64x64xf32>
    %286 = math.exp %285 : vector<64x64xf32>
    %cst_238 = arith.constant dense<0.000000e+00> : vector<64xf32>
    %287 = vector.multi_reduction <add>, %286, %cst_238 [1] : vector<64x64xf32> to vector<64xf32>
    %288 = vector.shape_cast %287 : vector<64xf32> to vector<64x1xf32>
    %289 = tpu.reciprocal %288 {approx = true} : vector<64x1xf32> -> vector<64x1xf32>
    %290 = vector.broadcast %289 : vector<64x1xf32> to vector<64x64xf32>
    %291 = arith.mulf %286, %290 : vector<64x64xf32>
    %292 = arith.truncf %278 : vector<64x64xf32> to vector<64x64xbf16>
    %293 = arith.truncf %291 : vector<64x64xf32> to vector<64x64xbf16>
    %cst_239 = arith.constant dense<0.000000e+00> : vector<64x64xf32>
    %294 = tpu.matmul %292, %293, %cst_239 {dimension_numbers = #tpu.dot_dimension_numbers<[1], [1], [0], [0], [0, 0, 1, 0], [], []>} : vector<64x64xbf16>, vector<64x64xbf16>, vector<64x64xf32> -> vector<64x64xf32>
    %c0_240 = arith.constant 0 : index
    %c0_241 = arith.constant 0 : index
    %295 = vector.load %arg23[%c0_240, %c0_241] : memref<1x1xf32, #tpu.memory_space<vmem>>, vector<1x1xf32>
    %296 = vector.broadcast %295 : vector<1x1xf32> to vector<64x64xf32>
    %297 = arith.mulf %296, %294 : vector<64x64xf32>
    %298 = arith.addf %297, %262 : vector<64x64xf32>
    %299 = arith.truncf %298 : vector<64x64xf32> to vector<64x64xbf16>
    %cst_242 = arith.constant 0.000000e+00 : f32
    %300 = vector.broadcast %cst_242 : f32 to vector<128x16xf32>
    %c0_243 = arith.constant 0 : index
    %c0_244 = arith.constant 0 : index
    %c0_245 = arith.constant 0 : index
    %301 = vector.load %arg24[%c0_243, %c0_244, %c0_245] : memref<16x64x16xbf16, #tpu.memory_space<vmem>>, vector<1x64x16xbf16>
    %302 = vector.shape_cast %301 : vector<1x64x16xbf16> to vector<64x16xbf16>
    %cst_246 = arith.constant dense<0.000000e+00> : vector<64x16xf32>
    %303 = tpu.matmul %299, %302, %cst_246 {dimension_numbers = #tpu.dot_dimension_numbers<[1], [0], [0], [1], [0, 0, 1, 1], [], []>} : vector<64x64xbf16>, vector<64x16xbf16>, vector<64x16xf32> -> vector<64x16xf32>
    %c0_247 = arith.constant 0 : index
    %c0_248 = arith.constant 0 : index
    %c0_249 = arith.constant 0 : index
    %304 = vector.load %arg25[%c0_247, %c0_248, %c0_249] : memref<16x128x64xbf16, #tpu.memory_space<vmem>>, vector<1x128x64xbf16>
    %305 = vector.shape_cast %304 : vector<1x128x64xbf16> to vector<128x64xbf16>
    %306 = arith.truncf %303 : vector<64x16xf32> to vector<64x16xbf16>
    %cst_250 = arith.constant dense<0.000000e+00> : vector<128x16xf32>
    %307 = tpu.matmul %305, %306, %cst_250 {dimension_numbers = #tpu.dot_dimension_numbers<[1], [0], [0], [1], [0, 0, 1, 1], [], []>} : vector<128x64xbf16>, vector<64x16xbf16>, vector<128x16xf32> -> vector<128x16xf32>
    %308 = arith.addf %300, %307 : vector<128x16xf32>
    %c1_251 = arith.constant 1 : index
    %c0_252 = arith.constant 0 : index
    %c0_253 = arith.constant 0 : index
    %309 = vector.load %arg24[%c1_251, %c0_252, %c0_253] : memref<16x64x16xbf16, #tpu.memory_space<vmem>>, vector<1x64x16xbf16>
    %310 = vector.shape_cast %309 : vector<1x64x16xbf16> to vector<64x16xbf16>
    %cst_254 = arith.constant dense<0.000000e+00> : vector<64x16xf32>
    %311 = tpu.matmul %299, %310, %cst_254 {dimension_numbers = #tpu.dot_dimension_numbers<[1], [0], [0], [1], [0, 0, 1, 1], [], []>} : vector<64x64xbf16>, vector<64x16xbf16>, vector<64x16xf32> -> vector<64x16xf32>
    %c1_255 = arith.constant 1 : index
    %c0_256 = arith.constant 0 : index
    %c0_257 = arith.constant 0 : index
    %312 = vector.load %arg25[%c1_255, %c0_256, %c0_257] : memref<16x128x64xbf16, #tpu.memory_space<vmem>>, vector<1x128x64xbf16>
    %313 = vector.shape_cast %312 : vector<1x128x64xbf16> to vector<128x64xbf16>
    %314 = arith.truncf %311 : vector<64x16xf32> to vector<64x16xbf16>
    %cst_258 = arith.constant dense<0.000000e+00> : vector<128x16xf32>
    %315 = tpu.matmul %313, %314, %cst_258 {dimension_numbers = #tpu.dot_dimension_numbers<[1], [0], [0], [1], [0, 0, 1, 1], [], []>} : vector<128x64xbf16>, vector<64x16xbf16>, vector<128x16xf32> -> vector<128x16xf32>
    %316 = arith.addf %308, %315 : vector<128x16xf32>
    %c2_259 = arith.constant 2 : index
    %c0_260 = arith.constant 0 : index
    %c0_261 = arith.constant 0 : index
    %317 = vector.load %arg24[%c2_259, %c0_260, %c0_261] : memref<16x64x16xbf16, #tpu.memory_space<vmem>>, vector<1x64x16xbf16>
    %318 = vector.shape_cast %317 : vector<1x64x16xbf16> to vector<64x16xbf16>
    %cst_262 = arith.constant dense<0.000000e+00> : vector<64x16xf32>
    %319 = tpu.matmul %299, %318, %cst_262 {dimension_numbers = #tpu.dot_dimension_numbers<[1], [0], [0], [1], [0, 0, 1, 1], [], []>} : vector<64x64xbf16>, vector<64x16xbf16>, vector<64x16xf32> -> vector<64x16xf32>
    %c2_263 = arith.constant 2 : index
    %c0_264 = arith.constant 0 : index
    %c0_265 = arith.constant 0 : index
    %320 = vector.load %arg25[%c2_263, %c0_264, %c0_265] : memref<16x128x64xbf16, #tpu.memory_space<vmem>>, vector<1x128x64xbf16>
    %321 = vector.shape_cast %320 : vector<1x128x64xbf16> to vector<128x64xbf16>
    %322 = arith.truncf %319 : vector<64x16xf32> to vector<64x16xbf16>
    %cst_266 = arith.constant dense<0.000000e+00> : vector<128x16xf32>
    %323 = tpu.matmul %321, %322, %cst_266 {dimension_numbers = #tpu.dot_dimension_numbers<[1], [0], [0], [1], [0, 0, 1, 1], [], []>} : vector<128x64xbf16>, vector<64x16xbf16>, vector<128x16xf32> -> vector<128x16xf32>
    %324 = arith.addf %316, %323 : vector<128x16xf32>
    %c3_267 = arith.constant 3 : index
    %c0_268 = arith.constant 0 : index
    %c0_269 = arith.constant 0 : index
    %325 = vector.load %arg24[%c3_267, %c0_268, %c0_269] : memref<16x64x16xbf16, #tpu.memory_space<vmem>>, vector<1x64x16xbf16>
    %326 = vector.shape_cast %325 : vector<1x64x16xbf16> to vector<64x16xbf16>
    %cst_270 = arith.constant dense<0.000000e+00> : vector<64x16xf32>
    %327 = tpu.matmul %299, %326, %cst_270 {dimension_numbers = #tpu.dot_dimension_numbers<[1], [0], [0], [1], [0, 0, 1, 1], [], []>} : vector<64x64xbf16>, vector<64x16xbf16>, vector<64x16xf32> -> vector<64x16xf32>
    %c3_271 = arith.constant 3 : index
    %c0_272 = arith.constant 0 : index
    %c0_273 = arith.constant 0 : index
    %328 = vector.load %arg25[%c3_271, %c0_272, %c0_273] : memref<16x128x64xbf16, #tpu.memory_space<vmem>>, vector<1x128x64xbf16>
    %329 = vector.shape_cast %328 : vector<1x128x64xbf16> to vector<128x64xbf16>
    %330 = arith.truncf %327 : vector<64x16xf32> to vector<64x16xbf16>
    %cst_274 = arith.constant dense<0.000000e+00> : vector<128x16xf32>
    %331 = tpu.matmul %329, %330, %cst_274 {dimension_numbers = #tpu.dot_dimension_numbers<[1], [0], [0], [1], [0, 0, 1, 1], [], []>} : vector<128x64xbf16>, vector<64x16xbf16>, vector<128x16xf32> -> vector<128x16xf32>
    %332 = arith.addf %324, %331 : vector<128x16xf32>
    %c4_275 = arith.constant 4 : index
    %c0_276 = arith.constant 0 : index
    %c0_277 = arith.constant 0 : index
    %333 = vector.load %arg24[%c4_275, %c0_276, %c0_277] : memref<16x64x16xbf16, #tpu.memory_space<vmem>>, vector<1x64x16xbf16>
    %334 = vector.shape_cast %333 : vector<1x64x16xbf16> to vector<64x16xbf16>
    %cst_278 = arith.constant dense<0.000000e+00> : vector<64x16xf32>
    %335 = tpu.matmul %299, %334, %cst_278 {dimension_numbers = #tpu.dot_dimension_numbers<[1], [0], [0], [1], [0, 0, 1, 1], [], []>} : vector<64x64xbf16>, vector<64x16xbf16>, vector<64x16xf32> -> vector<64x16xf32>
    %c4_279 = arith.constant 4 : index
    %c0_280 = arith.constant 0 : index
    %c0_281 = arith.constant 0 : index
    %336 = vector.load %arg25[%c4_279, %c0_280, %c0_281] : memref<16x128x64xbf16, #tpu.memory_space<vmem>>, vector<1x128x64xbf16>
    %337 = vector.shape_cast %336 : vector<1x128x64xbf16> to vector<128x64xbf16>
    %338 = arith.truncf %335 : vector<64x16xf32> to vector<64x16xbf16>
    %cst_282 = arith.constant dense<0.000000e+00> : vector<128x16xf32>
    %339 = tpu.matmul %337, %338, %cst_282 {dimension_numbers = #tpu.dot_dimension_numbers<[1], [0], [0], [1], [0, 0, 1, 1], [], []>} : vector<128x64xbf16>, vector<64x16xbf16>, vector<128x16xf32> -> vector<128x16xf32>
    %340 = arith.addf %332, %339 : vector<128x16xf32>
    %c5_283 = arith.constant 5 : index
    %c0_284 = arith.constant 0 : index
    %c0_285 = arith.constant 0 : index
    %341 = vector.load %arg24[%c5_283, %c0_284, %c0_285] : memref<16x64x16xbf16, #tpu.memory_space<vmem>>, vector<1x64x16xbf16>
    %342 = vector.shape_cast %341 : vector<1x64x16xbf16> to vector<64x16xbf16>
    %cst_286 = arith.constant dense<0.000000e+00> : vector<64x16xf32>
    %343 = tpu.matmul %299, %342, %cst_286 {dimension_numbers = #tpu.dot_dimension_numbers<[1], [0], [0], [1], [0, 0, 1, 1], [], []>} : vector<64x64xbf16>, vector<64x16xbf16>, vector<64x16xf32> -> vector<64x16xf32>
    %c5_287 = arith.constant 5 : index
    %c0_288 = arith.constant 0 : index
    %c0_289 = arith.constant 0 : index
    %344 = vector.load %arg25[%c5_287, %c0_288, %c0_289] : memref<16x128x64xbf16, #tpu.memory_space<vmem>>, vector<1x128x64xbf16>
    %345 = vector.shape_cast %344 : vector<1x128x64xbf16> to vector<128x64xbf16>
    %346 = arith.truncf %343 : vector<64x16xf32> to vector<64x16xbf16>
    %cst_290 = arith.constant dense<0.000000e+00> : vector<128x16xf32>
    %347 = tpu.matmul %345, %346, %cst_290 {dimension_numbers = #tpu.dot_dimension_numbers<[1], [0], [0], [1], [0, 0, 1, 1], [], []>} : vector<128x64xbf16>, vector<64x16xbf16>, vector<128x16xf32> -> vector<128x16xf32>
    %348 = arith.addf %340, %347 : vector<128x16xf32>
    %c6_291 = arith.constant 6 : index
    %c0_292 = arith.constant 0 : index
    %c0_293 = arith.constant 0 : index
    %349 = vector.load %arg24[%c6_291, %c0_292, %c0_293] : memref<16x64x16xbf16, #tpu.memory_space<vmem>>, vector<1x64x16xbf16>
    %350 = vector.shape_cast %349 : vector<1x64x16xbf16> to vector<64x16xbf16>
    %cst_294 = arith.constant dense<0.000000e+00> : vector<64x16xf32>
    %351 = tpu.matmul %299, %350, %cst_294 {dimension_numbers = #tpu.dot_dimension_numbers<[1], [0], [0], [1], [0, 0, 1, 1], [], []>} : vector<64x64xbf16>, vector<64x16xbf16>, vector<64x16xf32> -> vector<64x16xf32>
    %c6_295 = arith.constant 6 : index
    %c0_296 = arith.constant 0 : index
    %c0_297 = arith.constant 0 : index
    %352 = vector.load %arg25[%c6_295, %c0_296, %c0_297] : memref<16x128x64xbf16, #tpu.memory_space<vmem>>, vector<1x128x64xbf16>
    %353 = vector.shape_cast %352 : vector<1x128x64xbf16> to vector<128x64xbf16>
    %354 = arith.truncf %351 : vector<64x16xf32> to vector<64x16xbf16>
    %cst_298 = arith.constant dense<0.000000e+00> : vector<128x16xf32>
    %355 = tpu.matmul %353, %354, %cst_298 {dimension_numbers = #tpu.dot_dimension_numbers<[1], [0], [0], [1], [0, 0, 1, 1], [], []>} : vector<128x64xbf16>, vector<64x16xbf16>, vector<128x16xf32> -> vector<128x16xf32>
    %356 = arith.addf %348, %355 : vector<128x16xf32>
    %c7_299 = arith.constant 7 : index
    %c0_300 = arith.constant 0 : index
    %c0_301 = arith.constant 0 : index
    %357 = vector.load %arg24[%c7_299, %c0_300, %c0_301] : memref<16x64x16xbf16, #tpu.memory_space<vmem>>, vector<1x64x16xbf16>
    %358 = vector.shape_cast %357 : vector<1x64x16xbf16> to vector<64x16xbf16>
    %cst_302 = arith.constant dense<0.000000e+00> : vector<64x16xf32>
    %359 = tpu.matmul %299, %358, %cst_302 {dimension_numbers = #tpu.dot_dimension_numbers<[1], [0], [0], [1], [0, 0, 1, 1], [], []>} : vector<64x64xbf16>, vector<64x16xbf16>, vector<64x16xf32> -> vector<64x16xf32>
    %c7_303 = arith.constant 7 : index
    %c0_304 = arith.constant 0 : index
    %c0_305 = arith.constant 0 : index
    %360 = vector.load %arg25[%c7_303, %c0_304, %c0_305] : memref<16x128x64xbf16, #tpu.memory_space<vmem>>, vector<1x128x64xbf16>
    %361 = vector.shape_cast %360 : vector<1x128x64xbf16> to vector<128x64xbf16>
    %362 = arith.truncf %359 : vector<64x16xf32> to vector<64x16xbf16>
    %cst_306 = arith.constant dense<0.000000e+00> : vector<128x16xf32>
    %363 = tpu.matmul %361, %362, %cst_306 {dimension_numbers = #tpu.dot_dimension_numbers<[1], [0], [0], [1], [0, 0, 1, 1], [], []>} : vector<128x64xbf16>, vector<64x16xbf16>, vector<128x16xf32> -> vector<128x16xf32>
    %364 = arith.addf %356, %363 : vector<128x16xf32>
    %c8_307 = arith.constant 8 : index
    %c0_308 = arith.constant 0 : index
    %c0_309 = arith.constant 0 : index
    %365 = vector.load %arg24[%c8_307, %c0_308, %c0_309] : memref<16x64x16xbf16, #tpu.memory_space<vmem>>, vector<1x64x16xbf16>
    %366 = vector.shape_cast %365 : vector<1x64x16xbf16> to vector<64x16xbf16>
    %cst_310 = arith.constant dense<0.000000e+00> : vector<64x16xf32>
    %367 = tpu.matmul %299, %366, %cst_310 {dimension_numbers = #tpu.dot_dimension_numbers<[1], [0], [0], [1], [0, 0, 1, 1], [], []>} : vector<64x64xbf16>, vector<64x16xbf16>, vector<64x16xf32> -> vector<64x16xf32>
    %c8_311 = arith.constant 8 : index
    %c0_312 = arith.constant 0 : index
    %c0_313 = arith.constant 0 : index
    %368 = vector.load %arg25[%c8_311, %c0_312, %c0_313] : memref<16x128x64xbf16, #tpu.memory_space<vmem>>, vector<1x128x64xbf16>
    %369 = vector.shape_cast %368 : vector<1x128x64xbf16> to vector<128x64xbf16>
    %370 = arith.truncf %367 : vector<64x16xf32> to vector<64x16xbf16>
    %cst_314 = arith.constant dense<0.000000e+00> : vector<128x16xf32>
    %371 = tpu.matmul %369, %370, %cst_314 {dimension_numbers = #tpu.dot_dimension_numbers<[1], [0], [0], [1], [0, 0, 1, 1], [], []>} : vector<128x64xbf16>, vector<64x16xbf16>, vector<128x16xf32> -> vector<128x16xf32>
    %372 = arith.addf %364, %371 : vector<128x16xf32>
    %c9_315 = arith.constant 9 : index
    %c0_316 = arith.constant 0 : index
    %c0_317 = arith.constant 0 : index
    %373 = vector.load %arg24[%c9_315, %c0_316, %c0_317] : memref<16x64x16xbf16, #tpu.memory_space<vmem>>, vector<1x64x16xbf16>
    %374 = vector.shape_cast %373 : vector<1x64x16xbf16> to vector<64x16xbf16>
    %cst_318 = arith.constant dense<0.000000e+00> : vector<64x16xf32>
    %375 = tpu.matmul %299, %374, %cst_318 {dimension_numbers = #tpu.dot_dimension_numbers<[1], [0], [0], [1], [0, 0, 1, 1], [], []>} : vector<64x64xbf16>, vector<64x16xbf16>, vector<64x16xf32> -> vector<64x16xf32>
    %c9_319 = arith.constant 9 : index
    %c0_320 = arith.constant 0 : index
    %c0_321 = arith.constant 0 : index
    %376 = vector.load %arg25[%c9_319, %c0_320, %c0_321] : memref<16x128x64xbf16, #tpu.memory_space<vmem>>, vector<1x128x64xbf16>
    %377 = vector.shape_cast %376 : vector<1x128x64xbf16> to vector<128x64xbf16>
    %378 = arith.truncf %375 : vector<64x16xf32> to vector<64x16xbf16>
    %cst_322 = arith.constant dense<0.000000e+00> : vector<128x16xf32>
    %379 = tpu.matmul %377, %378, %cst_322 {dimension_numbers = #tpu.dot_dimension_numbers<[1], [0], [0], [1], [0, 0, 1, 1], [], []>} : vector<128x64xbf16>, vector<64x16xbf16>, vector<128x16xf32> -> vector<128x16xf32>
    %380 = arith.addf %372, %379 : vector<128x16xf32>
    %c10_323 = arith.constant 10 : index
    %c0_324 = arith.constant 0 : index
    %c0_325 = arith.constant 0 : index
    %381 = vector.load %arg24[%c10_323, %c0_324, %c0_325] : memref<16x64x16xbf16, #tpu.memory_space<vmem>>, vector<1x64x16xbf16>
    %382 = vector.shape_cast %381 : vector<1x64x16xbf16> to vector<64x16xbf16>
    %cst_326 = arith.constant dense<0.000000e+00> : vector<64x16xf32>
    %383 = tpu.matmul %299, %382, %cst_326 {dimension_numbers = #tpu.dot_dimension_numbers<[1], [0], [0], [1], [0, 0, 1, 1], [], []>} : vector<64x64xbf16>, vector<64x16xbf16>, vector<64x16xf32> -> vector<64x16xf32>
    %c10_327 = arith.constant 10 : index
    %c0_328 = arith.constant 0 : index
    %c0_329 = arith.constant 0 : index
    %384 = vector.load %arg25[%c10_327, %c0_328, %c0_329] : memref<16x128x64xbf16, #tpu.memory_space<vmem>>, vector<1x128x64xbf16>
    %385 = vector.shape_cast %384 : vector<1x128x64xbf16> to vector<128x64xbf16>
    %386 = arith.truncf %383 : vector<64x16xf32> to vector<64x16xbf16>
    %cst_330 = arith.constant dense<0.000000e+00> : vector<128x16xf32>
    %387 = tpu.matmul %385, %386, %cst_330 {dimension_numbers = #tpu.dot_dimension_numbers<[1], [0], [0], [1], [0, 0, 1, 1], [], []>} : vector<128x64xbf16>, vector<64x16xbf16>, vector<128x16xf32> -> vector<128x16xf32>
    %388 = arith.addf %380, %387 : vector<128x16xf32>
    %c11_331 = arith.constant 11 : index
    %c0_332 = arith.constant 0 : index
    %c0_333 = arith.constant 0 : index
    %389 = vector.load %arg24[%c11_331, %c0_332, %c0_333] : memref<16x64x16xbf16, #tpu.memory_space<vmem>>, vector<1x64x16xbf16>
    %390 = vector.shape_cast %389 : vector<1x64x16xbf16> to vector<64x16xbf16>
    %cst_334 = arith.constant dense<0.000000e+00> : vector<64x16xf32>
    %391 = tpu.matmul %299, %390, %cst_334 {dimension_numbers = #tpu.dot_dimension_numbers<[1], [0], [0], [1], [0, 0, 1, 1], [], []>} : vector<64x64xbf16>, vector<64x16xbf16>, vector<64x16xf32> -> vector<64x16xf32>
    %c11_335 = arith.constant 11 : index
    %c0_336 = arith.constant 0 : index
    %c0_337 = arith.constant 0 : index
    %392 = vector.load %arg25[%c11_335, %c0_336, %c0_337] : memref<16x128x64xbf16, #tpu.memory_space<vmem>>, vector<1x128x64xbf16>
    %393 = vector.shape_cast %392 : vector<1x128x64xbf16> to vector<128x64xbf16>
    %394 = arith.truncf %391 : vector<64x16xf32> to vector<64x16xbf16>
    %cst_338 = arith.constant dense<0.000000e+00> : vector<128x16xf32>
    %395 = tpu.matmul %393, %394, %cst_338 {dimension_numbers = #tpu.dot_dimension_numbers<[1], [0], [0], [1], [0, 0, 1, 1], [], []>} : vector<128x64xbf16>, vector<64x16xbf16>, vector<128x16xf32> -> vector<128x16xf32>
    %396 = arith.addf %388, %395 : vector<128x16xf32>
    %c12_339 = arith.constant 12 : index
    %c0_340 = arith.constant 0 : index
    %c0_341 = arith.constant 0 : index
    %397 = vector.load %arg24[%c12_339, %c0_340, %c0_341] : memref<16x64x16xbf16, #tpu.memory_space<vmem>>, vector<1x64x16xbf16>
    %398 = vector.shape_cast %397 : vector<1x64x16xbf16> to vector<64x16xbf16>
    %cst_342 = arith.constant dense<0.000000e+00> : vector<64x16xf32>
    %399 = tpu.matmul %299, %398, %cst_342 {dimension_numbers = #tpu.dot_dimension_numbers<[1], [0], [0], [1], [0, 0, 1, 1], [], []>} : vector<64x64xbf16>, vector<64x16xbf16>, vector<64x16xf32> -> vector<64x16xf32>
    %c12_343 = arith.constant 12 : index
    %c0_344 = arith.constant 0 : index
    %c0_345 = arith.constant 0 : index
    %400 = vector.load %arg25[%c12_343, %c0_344, %c0_345] : memref<16x128x64xbf16, #tpu.memory_space<vmem>>, vector<1x128x64xbf16>
    %401 = vector.shape_cast %400 : vector<1x128x64xbf16> to vector<128x64xbf16>
    %402 = arith.truncf %399 : vector<64x16xf32> to vector<64x16xbf16>
    %cst_346 = arith.constant dense<0.000000e+00> : vector<128x16xf32>
    %403 = tpu.matmul %401, %402, %cst_346 {dimension_numbers = #tpu.dot_dimension_numbers<[1], [0], [0], [1], [0, 0, 1, 1], [], []>} : vector<128x64xbf16>, vector<64x16xbf16>, vector<128x16xf32> -> vector<128x16xf32>
    %404 = arith.addf %396, %403 : vector<128x16xf32>
    %c13_347 = arith.constant 13 : index
    %c0_348 = arith.constant 0 : index
    %c0_349 = arith.constant 0 : index
    %405 = vector.load %arg24[%c13_347, %c0_348, %c0_349] : memref<16x64x16xbf16, #tpu.memory_space<vmem>>, vector<1x64x16xbf16>
    %406 = vector.shape_cast %405 : vector<1x64x16xbf16> to vector<64x16xbf16>
    %cst_350 = arith.constant dense<0.000000e+00> : vector<64x16xf32>
    %407 = tpu.matmul %299, %406, %cst_350 {dimension_numbers = #tpu.dot_dimension_numbers<[1], [0], [0], [1], [0, 0, 1, 1], [], []>} : vector<64x64xbf16>, vector<64x16xbf16>, vector<64x16xf32> -> vector<64x16xf32>
    %c13_351 = arith.constant 13 : index
    %c0_352 = arith.constant 0 : index
    %c0_353 = arith.constant 0 : index
    %408 = vector.load %arg25[%c13_351, %c0_352, %c0_353] : memref<16x128x64xbf16, #tpu.memory_space<vmem>>, vector<1x128x64xbf16>
    %409 = vector.shape_cast %408 : vector<1x128x64xbf16> to vector<128x64xbf16>
    %410 = arith.truncf %407 : vector<64x16xf32> to vector<64x16xbf16>
    %cst_354 = arith.constant dense<0.000000e+00> : vector<128x16xf32>
    %411 = tpu.matmul %409, %410, %cst_354 {dimension_numbers = #tpu.dot_dimension_numbers<[1], [0], [0], [1], [0, 0, 1, 1], [], []>} : vector<128x64xbf16>, vector<64x16xbf16>, vector<128x16xf32> -> vector<128x16xf32>
    %412 = arith.addf %404, %411 : vector<128x16xf32>
    %c14_355 = arith.constant 14 : index
    %c0_356 = arith.constant 0 : index
    %c0_357 = arith.constant 0 : index
    %413 = vector.load %arg24[%c14_355, %c0_356, %c0_357] : memref<16x64x16xbf16, #tpu.memory_space<vmem>>, vector<1x64x16xbf16>
    %414 = vector.shape_cast %413 : vector<1x64x16xbf16> to vector<64x16xbf16>
    %cst_358 = arith.constant dense<0.000000e+00> : vector<64x16xf32>
    %415 = tpu.matmul %299, %414, %cst_358 {dimension_numbers = #tpu.dot_dimension_numbers<[1], [0], [0], [1], [0, 0, 1, 1], [], []>} : vector<64x64xbf16>, vector<64x16xbf16>, vector<64x16xf32> -> vector<64x16xf32>
    %c14_359 = arith.constant 14 : index
    %c0_360 = arith.constant 0 : index
    %c0_361 = arith.constant 0 : index
    %416 = vector.load %arg25[%c14_359, %c0_360, %c0_361] : memref<16x128x64xbf16, #tpu.memory_space<vmem>>, vector<1x128x64xbf16>
    %417 = vector.shape_cast %416 : vector<1x128x64xbf16> to vector<128x64xbf16>
    %418 = arith.truncf %415 : vector<64x16xf32> to vector<64x16xbf16>
    %cst_362 = arith.constant dense<0.000000e+00> : vector<128x16xf32>
    %419 = tpu.matmul %417, %418, %cst_362 {dimension_numbers = #tpu.dot_dimension_numbers<[1], [0], [0], [1], [0, 0, 1, 1], [], []>} : vector<128x64xbf16>, vector<64x16xbf16>, vector<128x16xf32> -> vector<128x16xf32>
    %420 = arith.addf %412, %419 : vector<128x16xf32>
    %c15_363 = arith.constant 15 : index
    %c0_364 = arith.constant 0 : index
    %c0_365 = arith.constant 0 : index
    %421 = vector.load %arg24[%c15_363, %c0_364, %c0_365] : memref<16x64x16xbf16, #tpu.memory_space<vmem>>, vector<1x64x16xbf16>
    %422 = vector.shape_cast %421 : vector<1x64x16xbf16> to vector<64x16xbf16>
    %cst_366 = arith.constant dense<0.000000e+00> : vector<64x16xf32>
    %423 = tpu.matmul %299, %422, %cst_366 {dimension_numbers = #tpu.dot_dimension_numbers<[1], [0], [0], [1], [0, 0, 1, 1], [], []>} : vector<64x64xbf16>, vector<64x16xbf16>, vector<64x16xf32> -> vector<64x16xf32>
    %c15_367 = arith.constant 15 : index
    %c0_368 = arith.constant 0 : index
    %c0_369 = arith.constant 0 : index
    %424 = vector.load %arg25[%c15_367, %c0_368, %c0_369] : memref<16x128x64xbf16, #tpu.memory_space<vmem>>, vector<1x128x64xbf16>
    %425 = vector.shape_cast %424 : vector<1x128x64xbf16> to vector<128x64xbf16>
    %426 = arith.truncf %423 : vector<64x16xf32> to vector<64x16xbf16>
    %cst_370 = arith.constant dense<0.000000e+00> : vector<128x16xf32>
    %427 = tpu.matmul %425, %426, %cst_370 {dimension_numbers = #tpu.dot_dimension_numbers<[1], [0], [0], [1], [0, 0, 1, 1], [], []>} : vector<128x64xbf16>, vector<64x16xbf16>, vector<128x16xf32> -> vector<128x16xf32>
    %428 = arith.addf %420, %427 : vector<128x16xf32>
    %c0_371 = arith.constant 0 : index
    %c0_372 = arith.constant 0 : index
    %429 = vector.load %arg26[%c0_371, %c0_372] : memref<128x1xf32, #tpu.memory_space<vmem>>, vector<128x1xf32>
    %430 = vector.broadcast %429 : vector<128x1xf32> to vector<128x16xf32>
    %431 = arith.mulf %428, %430 : vector<128x16xf32>
    %c0_373 = arith.constant 0 : index
    %c0_374 = arith.constant 0 : index
    %432 = vector.load %arg27[%c0_373, %c0_374] : memref<128x1xf32, #tpu.memory_space<vmem>>, vector<128x1xf32>
    %433 = vector.broadcast %432 : vector<128x1xf32> to vector<128x16xf32>
    %434 = arith.addf %431, %433 : vector<128x16xf32>
    %cst_375 = arith.constant 0.000000e+00 : f32
    %435 = vector.broadcast %cst_375 : f32 to vector<128x16xf32>
    %436 = arith.cmpf oge, %434, %435 : vector<128x16xf32>
    %cst_376 = arith.constant 1.000000e-01 : f32
    %437 = vector.broadcast %cst_376 : f32 to vector<128x16xf32>
    %438 = arith.mulf %437, %434 : vector<128x16xf32>
    %439 = arith.select %436, %434, %438 : vector<128x16xi1>, vector<128x16xf32>
    %c0_377 = arith.constant 0 : index
    %c0_378 = arith.constant 0 : index
    %440 = vector.load %arg28[%c0_377, %c0_378] : memref<128x16xf32, #tpu.memory_space<vmem>>, vector<128x16xf32>
    %441 = arith.mulf %440, %439 : vector<128x16xf32>
    %cst_379 = arith.constant dense<0.000000e+00> : vector<128xf32>
    %442 = vector.multi_reduction <add>, %441, %cst_379 [1] : vector<128x16xf32> to vector<128xf32>
    %443 = vector.shape_cast %442 : vector<128xf32> to vector<128x1xf32>
    %cst_380 = arith.constant dense<0.000000e+00> : vector<1xf32>
    %444 = vector.multi_reduction <add>, %443, %cst_380 [0] : vector<128x1xf32> to vector<1xf32>
    %445 = vector.shape_cast %444 : vector<1xf32> to vector<1x1xf32>
    %c0_381 = arith.constant 0 : index
    %c0_382 = arith.constant 0 : index
    %446 = vector.load %arg29[%c0_381, %c0_382] : memref<1x1xf32, #tpu.memory_space<vmem>>, vector<1x1xf32>
    %447 = arith.addf %445, %446 : vector<1x1xf32>
    %c0_383 = arith.constant 0 : index
    %c0_384 = arith.constant 0 : index
    %c0_385 = arith.constant 0 : index
    %448 = vector.load %arg30[%c0_383, %c0_384, %c0_385] : memref<1x1x1xf32, #tpu.memory_space<vmem>>, vector<1x1x1xf32>
    %449 = vector.shape_cast %448 : vector<1x1x1xf32> to vector<1x1xf32>
    %450 = vector.shape_cast %447 : vector<1x1xf32> to vector<1x1x1xf32>
    tpu.vector_store %arg30[%c0_383, %c0_384, %c0_385], %450 {strides = array<i32>} : memref<1x1x1xf32, #tpu.memory_space<vmem>>, vector<1x1x1xf32>,
    return
  }
  func.func @transform_0(%arg0: i32) -> (i32, i32, i32) {
    %c0_i32 = arith.constant 0 : i32
    %c0_i32_0 = arith.constant 0 : i32
    %c0_i32_1 = arith.constant 0 : i32
    return %arg0, %c0_i32, %c0_i32_0 : i32, i32, i32
  }
  func.func @transform_1(%arg0: i32) -> (i32, i32, i32) {
    %c0_i32 = arith.constant 0 : i32
    %c0_i32_0 = arith.constant 0 : i32
    %c0_i32_1 = arith.constant 0 : i32
    %c0_i32_2 = arith.constant 0 : i32
    return %c0_i32, %c0_i32_0, %c0_i32_1 : i32, i32, i32
  }
  func.func @transform_2(%arg0: i32) -> (i32, i32, i32) {
    %c0_i32 = arith.constant 0 : i32
    %c0_i32_0 = arith.constant 0 : i32
    %c0_i32_1 = arith.constant 0 : i32
    %c0_i32_2 = arith.constant 0 : i32
    return %c0_i32, %c0_i32_0, %c0_i32_1 : i32, i32, i32
  }
  func.func @transform_3(%arg0: i32) -> (i32, i32) {
    %c0_i32 = arith.constant 0 : i32
    %c0_i32_0 = arith.constant 0 : i32
    %c0_i32_1 = arith.constant 0 : i32
    return %c0_i32, %c0_i32_0 : i32, i32
  }
  func.func @transform_4(%arg0: i32) -> (i32, i32) {
    %c0_i32 = arith.constant 0 : i32
    %c0_i32_0 = arith.constant 0 : i32
    %c0_i32_1 = arith.constant 0 : i32
    return %c0_i32, %c0_i32_0 : i32, i32
  }
  func.func @transform_5(%arg0: i32) -> (i32, i32) {
    %c0_i32 = arith.constant 0 : i32
    %c0_i32_0 = arith.constant 0 : i32
    %c0_i32_1 = arith.constant 0 : i32
    return %c0_i32, %c0_i32_0 : i32, i32
  }
  func.func @transform_6(%arg0: i32) -> (i32, i32) {
    %c0_i32 = arith.constant 0 : i32
    %c0_i32_0 = arith.constant 0 : i32
    %c0_i32_1 = arith.constant 0 : i32
    return %c0_i32, %c0_i32_0 : i32, i32
  }
  func.func @transform_7(%arg0: i32) -> (i32, i32) {
    %c0_i32 = arith.constant 0 : i32
    %c0_i32_0 = arith.constant 0 : i32
    %c0_i32_1 = arith.constant 0 : i32
    return %c0_i32, %c0_i32_0 : i32, i32
  }
  func.func @transform_8(%arg0: i32) -> (i32, i32) {
    %c0_i32 = arith.constant 0 : i32
    %c0_i32_0 = arith.constant 0 : i32
    %c0_i32_1 = arith.constant 0 : i32
    return %c0_i32, %c0_i32_0 : i32, i32
  }
  func.func @transform_9(%arg0: i32) -> (i32, i32) {
    %c0_i32 = arith.constant 0 : i32
    %c0_i32_0 = arith.constant 0 : i32
    %c0_i32_1 = arith.constant 0 : i32
    return %c0_i32, %c0_i32_0 : i32, i32
  }
  func.func @transform_10(%arg0: i32) -> (i32, i32) {
    %c0_i32 = arith.constant 0 : i32
    %c0_i32_0 = arith.constant 0 : i32
    %c0_i32_1 = arith.constant 0 : i32
    return %c0_i32, %c0_i32_0 : i32, i32
  }
  func.func @transform_11(%arg0: i32) -> (i32, i32) {
    %c0_i32 = arith.constant 0 : i32
    %c0_i32_0 = arith.constant 0 : i32
    %c0_i32_1 = arith.constant 0 : i32
    return %c0_i32, %c0_i32_0 : i32, i32
  }
  func.func @transform_12(%arg0: i32) -> (i32, i32, i32) {
    %c0_i32 = arith.constant 0 : i32
    %c0_i32_0 = arith.constant 0 : i32
    %c0_i32_1 = arith.constant 0 : i32
    %c0_i32_2 = arith.constant 0 : i32
    return %c0_i32, %c0_i32_0, %c0_i32_1 : i32, i32, i32
  }
  func.func @transform_13(%arg0: i32) -> (i32, i32, i32) {
    %c0_i32 = arith.constant 0 : i32
    %c0_i32_0 = arith.constant 0 : i32
    %c0_i32_1 = arith.constant 0 : i32
    %c0_i32_2 = arith.constant 0 : i32
    return %c0_i32, %c0_i32_0, %c0_i32_1 : i32, i32, i32
  }
  func.func @transform_14(%arg0: i32) -> (i32, i32) {
    %c0_i32 = arith.constant 0 : i32
    %c0_i32_0 = arith.constant 0 : i32
    %c0_i32_1 = arith.constant 0 : i32
    return %c0_i32, %c0_i32_0 : i32, i32
  }
  func.func @transform_15(%arg0: i32) -> (i32, i32) {
    %c0_i32 = arith.constant 0 : i32
    %c0_i32_0 = arith.constant 0 : i32
    %c0_i32_1 = arith.constant 0 : i32
    return %c0_i32, %c0_i32_0 : i32, i32
  }
  func.func @transform_16(%arg0: i32) -> (i32, i32) {
    %c0_i32 = arith.constant 0 : i32
    %c0_i32_0 = arith.constant 0 : i32
    %c0_i32_1 = arith.constant 0 : i32
    return %c0_i32, %c0_i32_0 : i32, i32
  }
  func.func @transform_17(%arg0: i32) -> (i32, i32) {
    %c0_i32 = arith.constant 0 : i32
    %c0_i32_0 = arith.constant 0 : i32
    %c0_i32_1 = arith.constant 0 : i32
    return %c0_i32, %c0_i32_0 : i32, i32
  }
  func.func @transform_18(%arg0: i32) -> (i32, i32) {
    %c0_i32 = arith.constant 0 : i32
    %c0_i32_0 = arith.constant 0 : i32
    %c0_i32_1 = arith.constant 0 : i32
    return %c0_i32, %c0_i32_0 : i32, i32
  }
  func.func @transform_19(%arg0: i32) -> (i32, i32) {
    %c0_i32 = arith.constant 0 : i32
    %c0_i32_0 = arith.constant 0 : i32
    %c0_i32_1 = arith.constant 0 : i32
    return %c0_i32, %c0_i32_0 : i32, i32
  }
  func.func @transform_20(%arg0: i32) -> (i32, i32) {
    %c0_i32 = arith.constant 0 : i32
    %c0_i32_0 = arith.constant 0 : i32
    %c0_i32_1 = arith.constant 0 : i32
    return %c0_i32, %c0_i32_0 : i32, i32
  }
  func.func @transform_21(%arg0: i32) -> (i32, i32) {
    %c0_i32 = arith.constant 0 : i32
    %c0_i32_0 = arith.constant 0 : i32
    %c0_i32_1 = arith.constant 0 : i32
    return %c0_i32, %c0_i32_0 : i32, i32
  }
  func.func @transform_22(%arg0: i32) -> (i32, i32) {
    %c0_i32 = arith.constant 0 : i32
    %c0_i32_0 = arith.constant 0 : i32
    %c0_i32_1 = arith.constant 0 : i32
    return %c0_i32, %c0_i32_0 : i32, i32
  }
  func.func @transform_23(%arg0: i32) -> (i32, i32, i32) {
    %c0_i32 = arith.constant 0 : i32
    %c0_i32_0 = arith.constant 0 : i32
    %c0_i32_1 = arith.constant 0 : i32
    %c0_i32_2 = arith.constant 0 : i32
    return %c0_i32, %c0_i32_0, %c0_i32_1 : i32, i32, i32
  }
  func.func @transform_24(%arg0: i32) -> (i32, i32, i32) {
    %c0_i32 = arith.constant 0 : i32
    %c0_i32_0 = arith.constant 0 : i32
    %c0_i32_1 = arith.constant 0 : i32
    %c0_i32_2 = arith.constant 0 : i32
    return %c0_i32, %c0_i32_0, %c0_i32_1 : i32, i32, i32
  }
  func.func @transform_25(%arg0: i32) -> (i32, i32) {
    %c0_i32 = arith.constant 0 : i32
    %c0_i32_0 = arith.constant 0 : i32
    %c0_i32_1 = arith.constant 0 : i32
    return %c0_i32, %c0_i32_0 : i32, i32
  }
  func.func @transform_26(%arg0: i32) -> (i32, i32) {
    %c0_i32 = arith.constant 0 : i32
    %c0_i32_0 = arith.constant 0 : i32
    %c0_i32_1 = arith.constant 0 : i32
    return %c0_i32, %c0_i32_0 : i32, i32
  }
  func.func @transform_27(%arg0: i32) -> (i32, i32) {
    %c0_i32 = arith.constant 0 : i32
    %c0_i32_0 = arith.constant 0 : i32
    %c0_i32_1 = arith.constant 0 : i32
    return %c0_i32, %c0_i32_0 : i32, i32
  }
  func.func @transform_28(%arg0: i32) -> (i32, i32) {
    %c0_i32 = arith.constant 0 : i32
    %c0_i32_0 = arith.constant 0 : i32
    %c0_i32_1 = arith.constant 0 : i32
    return %c0_i32, %c0_i32_0 : i32, i32
  }
  func.func @transform_29(%arg0: i32) -> (i32, i32, i32) {
    %c0_i32 = arith.constant 0 : i32
    %c0_i32_0 = arith.constant 0 : i32
    %c0_i32_1 = arith.constant 0 : i32
    return %arg0, %c0_i32, %c0_i32_0 : i32, i32, i32
  }
}

</mosaic_0001>

<bundles_post_ra>
// kernel: sa_discriminator_forward.1
= control target key start
LH: loop header
LB: loop body
LE: loop exit
PB: predicated region body
PF: predicated region fallthrough
CT: control target
= control target key end

     0   :  { %s21778_s6 = smov 1   ;;  %s21779_s10 = smov 2   ;;  %s24557_s0 = inlined_call_operand.smem [shape: u32[30], index: -1, kind: input, shape index: {}] }
   0x1   :  { %s21818_s5 = sld [smem:[%s24557_s0]]   ;;  %s21780_s14 = smov 3  }
   0x2   :  { %s21823_s9 = sld [smem:[%s24557_s0 + %s21778_s6]]   ;;  %s21781_s18 = smov 4  }
   0x3   :  { %s21828_s13 = sld [smem:[%s24557_s0 + %s21779_s10]]   ;;  %s21782_s22 = smov 5  }
   0x4   :  { %s21833_s17 = sld [smem:[%s24557_s0 + %s21780_s14]]   ;;  %s21783_s26 = smov 6  }
   0x5   :  { %s21838_s21 = sld [smem:[%s24557_s0 + %s21781_s18]]   ;;  %s21784_s30 = smov 7  }
   0x6   :  { %s21843_s25 = sld [smem:[%s24557_s0 + %s21782_s22]]   ;;  %s21785_s4 = smov 8  }
   0x7   :  { %s21848_s29 = sld [smem:[%s24557_s0 + %s21783_s26]]   ;;  %s21786_s10 = smov 9  }
   0x8   :  { %s21853_s3 = sld [smem:[%s24557_s0 + %s21784_s30]]   ;;  %s21787_s15 = smov 10  }
   0x9   :  { %s21858_s8 = sld [smem:[%s24557_s0 + %s21785_s4]]   ;;  %s21788_s20 = smov 11  }
   0xa   :  { %s21863_s14 = sld [smem:[%s24557_s0 + %s21786_s10]]   ;;  %s21789_s26 = smov 12  }
   0xb   :  { %s21868_s19 = sld [smem:[%s24557_s0 + %s21787_s15]]   ;;  %s21790_s1 = smov 13  }
   0xc   :  { %s15796_s24 = sld [smem:[%s24557_s0 + %s21788_s20]]   ;;  %s21791_s7 = smov 14  }
   0xd   :  { %s21876_s30 = sld [smem:[%s24557_s0 + %s21789_s26]]   ;;  %s21792_s15 = smov 15  }
   0xe   :  { %s21881_s6 = sld [smem:[%s24557_s0 + %s21790_s1]]   ;;  %s21793_s22 = smov 16  }
   0xf   :  { %s21886_s12 = sld [smem:[%s24557_s0 + %s21791_s7]]   ;;  %s21794_s28 = smov 17  }
  0x10   :  { %s21891_s20 = sld [smem:[%s24557_s0 + %s21792_s15]]   ;;  %s21795_s7 = smov 18  }
  0x11   :  { %s21896_s27 = sld [smem:[%s24557_s0 + %s21793_s22]]   ;;  %s21796_s15 = smov 19  }
  0x12   :  { %s21901_s4 = sld [smem:[%s24557_s0 + %s21794_s28]]   ;;  %v64_v0 = vstv %s15796_s24  ;;  %s21797_s23 = smov 20  }
  0x13   :  { %24603 = sst [smem:[#allocation5_spill]] %s21876_s30  ;;  %65 = vst [vmem:[#allocation2] sm:$0x1] %v64_v0  ;;  %s21798_s24 = smov 21  }
  0x14   :  { %24604 = sst [smem:[#allocation6_spill]] %s21881_s6  ;;  %s21800_s6 = smov 24  }
  0x15   :  { %s21906_s16 = sld [smem:[%s24557_s0 + %s21795_s7]]   ;;  %s21799_s7 = smov 23  }
  0x16   :  { %s21911_s22 = sld [smem:[%s24557_s0 + %s21796_s15]]   ;;  %s21806_s1 = smov 28  }
  0x17   :  { %24605 = sst [smem:[#allocation7_spill]] %s21896_s27  ;;  %s21801_s27 = smov 25  }
  0x18   :  { %24606 = sst [smem:[#allocation8_spill]] %s21901_s4  ;;  %s21803_s4 = smov 27  }
  0x19   :  { %s21916_s28 = sld [smem:[%s24557_s0 + %s21797_s23]]  }
  0x1a   :  { %s21921_s10 = sld [smem:[%s24557_s0 + %s21798_s24]]   ;;  %s21802_s24 = smov 26  }
  0x1b   :  { %24607 = sst [smem:[#allocation9_spill]] %s21906_s16 }
  0x1c   :  { %s21926_s16 = sld [smem:[%s24557_s0 + %s21799_s7]]  }
  0x1d   :  { %s21931_s30 = sld [smem:[%s24557_s0 + %s21800_s6]]   ;;  %s21804_s6 = smov 29  }
  0x1f   :  { %24608 = sst [smem:[#allocation10_spill]] %s21916_s28 }
  0x20   :  { %24609 = sst [smem:[#allocation11_spill]] %s21921_s10 }
  0x21   :  { %s21936_s28 = sld [smem:[%s24557_s0 + %s21801_s27]]   ;;  %s21805_s27 = smov 22  }
  0x22   :  { %24610 = sst [smem:[#allocation12_spill]] %s21926_s16 }
  0x23   :  { %24611 = sst [smem:[#allocation13_spill]] %s21931_s30 }
  0x24   :  { %s21941_s10 = sld [smem:[%s24557_s0 + %s21802_s24]]  }
  0x25   :  { %s21946_s16 = sld [smem:[%s24557_s0 + %s21803_s4]]   ;;  %s21959_s4 = smov 0  }
  0x26   :  { %s21951_s30 = sld [smem:[%s24557_s0 + %s21804_s6]]  }
  0x27   :  { %24612 = sst [smem:[#allocation14_spill]] %s21936_s28 }
  0x28   :  { %s15807_s28 = sld [smem:[%s24557_s0 + %s21805_s27]]  }
  0x2a   :  { %24613 = sst [smem:[#allocation15_spill]] %s21941_s10 }
  0x2b   :  { %s15813_s10 = sld [smem:[%s24557_s0 + %s21806_s1]]  }
  0x2e   :  { %v66_v1 = vstv %s15807_s28 }
  0x2f   :  { %67 = vst [vmem:[#allocation3] sm:$0x1] %v66_v1 }
  0x31   :  { %v68_v2 = vstv %s15813_s10 }
  0x32   :  { %69 = vst [vmem:[#allocation4] sm:$0x1] %v68_v2 }
  0x33 LB: > { %s15815_s7 = sadd.s32 4294967295, %s21776_s4   ;;  %p15819_p0 = scmp.ge.s32.totalorder %s21776_s4, 1  ;;  %s21776_s4 = sphi %s21959_s4, %s75_s4  }
  0x34   : > { %p823_p1 = scmp.lt.s32.totalorder %s21776_s4, 3 }
  0x36   : > { %p824_p2 = pnand %p15819_p0, %p823_p1 }
  0x38   : > { %827 = sbr.rel (%p824_p2) target bundleno = 6921 (0x1b09), region = 136 }
  0x3f   : > { %v20570_v3 = vld [vmem:[%s21823_s9 + $0x4] ss:$8 sps:$4 sm:$0xff]   ;;  %v20572_v4 = vld [vmem:[%s21823_s9] ss:$8 sps:$4 sm:$0xff]   ;;  %v20573_v5 = vld [vmem:[%s21823_s9 + $0x14] ss:$8 sps:$4 sm:$0xff]  }
  0x40   : > { %1106 = vmatprep.subr.bf16.mxu1 %v20570_v3  ;;  %v20575_v6 = vld [vmem:[%s21823_s9 + $0x10] ss:$8 sps:$4 sm:$0xff]   ;;  %v20576_v7 = vld [vmem:[%s21823_s9 + $0x24] ss:$8 sps:$4 sm:$0xff]   ;;  %v20578_v8 = vld [vmem:[%s21823_s9 + $0x20] ss:$8 sps:$4 sm:$0xff]  }
  0x41   : > { %1107 = vmatpush1.bf16.msra.mxu1 %v20572_v4  ;;  %p897_p3 = scmp.lt.s32.totalorder %s15815_s7, 1  ;;  %v20579_v9 = vld [vmem:[%s21823_s9 + $0x34] ss:$8 sps:$4 sm:$0xff]   ;;  %v20581_v10 = vld [vmem:[%s21823_s9 + $0x30] ss:$8 sps:$4 sm:$0xff]   ;;  %vm1411_vm0 = vcmask 1043456  }
  0x42   : > { %1108 = vmatprep.subr.bf16.mxu1 %v20573_v5  ;;  %v20582_v11 = vld [vmem:[%s21823_s9 + $0x44] ss:$8 sps:$4 sm:$0xff]   ;;  %v20584_v12 = vld [vmem:[%s21823_s9 + $0x40] ss:$8 sps:$4 sm:$0xff]   ;;  %v20585_v13 = vld [vmem:[%s21823_s9 + $0x54] ss:$8 sps:$4 sm:$0xff]  }
  0x43   : > { %s24704_s7 = smov (!%p897_p3, %s15815_s7), 1  ;;  %v20587_v14 = vld [vmem:[%s21823_s9 + $0x50] ss:$8 sps:$4 sm:$0xff]   ;;  %v20588_v15 = vld [vmem:[%s21823_s9 + $0x64] ss:$8 sps:$4 sm:$0xff]   ;;  %vm1404_vm1 = vcmask 64512  }
  0x44   : > { %s18244_s0 = sshll.u32 %s24704_s7, 3  ;;  %v20590_v18 = vld [vmem:[%s21823_s9 + $0x60] ss:$8 sps:$4 sm:$0xff]   ;;  %v20591_v19 = vld [vmem:[%s21823_s9 + $0x74] ss:$8 sps:$4 sm:$0xff]   ;;  %vm3961_vm10 = vcmask 261120  }
  0x45   : > { %1109 = vmatpush1.bf16.msra.mxu1 %v20575_v6  ;;  %s901_s28 = scalar_lea.vmem %s21818_s5, %s18244_s0  ;;  %v20593_v20 = vld [vmem:[%s21823_s9 + $0x70] ss:$8 sps:$4 sm:$0xff]   ;;  %v20594_v21 = vld [vmem:[%s21823_s9 + $0x84] ss:$8 sps:$4 sm:$0xff]   ;;  %v20596_v22 = vld [vmem:[%s21823_s9 + $0x80] ss:$8 sps:$4 sm:$0xff]   ;;  %s904_s0 = scalar_lea.vmem %s21951_s30, %s24704_s7 }
  0x46   : > { %1110 = vmatprep.subr.bf16.mxu1 %v20576_v7  ;;  %v906_v16 = vld [vmem:[%s901_s28] sm:$0xff]  ;;  %v20597_v23 = vld [vmem:[%s21823_s9 + $0x94] ss:$8 sps:$4 sm:$0xff]   ;;  %v20599_v24 = vld [vmem:[%s21823_s9 + $0x90] ss:$8 sps:$4 sm:$0xff]   ;;  %vm4386_vm11 = vcmask 1041408  }
  0x47   : > { %v21984_v17 = vcombine.high %v906_v16, %v906_v16  ;;  %v20600_v25 = vld [vmem:[%s21823_s9 + $0xa4] ss:$8 sps:$4 sm:$0xff]   ;;  %v20602_v26 = vld [vmem:[%s21823_s9 + $0xa0] ss:$8 sps:$4 sm:$0xff]   ;;  %v20603_v27 = vld [vmem:[%s21823_s9 + $0xb4] ss:$8 sps:$4 sm:$0xff]   ;;  %v22007_v38 = vcombine.low %v906_v16, %v906_v16 }
  0x48   : > { %v20605_v28 = vld [vmem:[%s21823_s9 + $0xb0] ss:$8 sps:$4 sm:$0xff]   ;;  %v20606_v29 = vld [vmem:[%s21823_s9 + $0xc4] ss:$8 sps:$4 sm:$0xff]   ;;  %v20608_v30 = vld [vmem:[%s21823_s9 + $0xc0] ss:$8 sps:$4 sm:$0xff]  }
  0x49   : > { %1111 = vmatpush1.bf16.msra.mxu1 %v20578_v8  ;;  %1138 = vmatprep.mubr.bf16.mxu1 %v21984_v17  ;;  %v20609_v31 = vld [vmem:[%s21823_s9 + $0xd4] ss:$8 sps:$4 sm:$0xff]   ;;  %v20611_v32 = vld [vmem:[%s21823_s9 + $0xd0] ss:$8 sps:$4 sm:$0xff]   ;;  %v20612_v33 = vld [vmem:[%s21823_s9 + $0xe4] ss:$8 sps:$4 sm:$0xff]  }
  0x4a   : > { %1112 = vmatprep.subr.bf16.mxu1 %v20579_v9  ;;  %v20614_v34 = vld [vmem:[%s21823_s9 + $0xe0] ss:$8 sps:$4 sm:$0xff]   ;;  %v20615_v35 = vld [vmem:[%s21823_s9 + $0xf4] ss:$8 sps:$4 sm:$0xff]   ;;  %v20617_v36 = vld [vmem:[%s21823_s9 + $0xf0] ss:$8 sps:$4 sm:$0xff]  }
  0x4b   : > { %v20622_v37 = vld [vmem:[%s21823_s9 + $0x104] ss:$8 sps:$4 sm:$0xff]   ;;  %v20620_v39 = vld [vmem:[%s21823_s9 + $0x100] ss:$8 sps:$4 sm:$0xff]   ;;  %v20625_v40 = vld [vmem:[%s21823_s9 + $0x114] ss:$8 sps:$4 sm:$0xff]  }
  0x4c   : > { %v20623_v41 = vld [vmem:[%s21823_s9 + $0x110] ss:$8 sps:$4 sm:$0xff]   ;;  %v20628_v42 = vld [vmem:[%s21823_s9 + $0x124] ss:$8 sps:$4 sm:$0xff]   ;;  %v20626_v43 = vld [vmem:[%s21823_s9 + $0x120] ss:$8 sps:$4 sm:$0xff]  }
  0x4d   : > { %1113 = vmatpush1.bf16.msra.mxu1 %v20581_v10  ;;  %v20631_v44 = vld [vmem:[%s21823_s9 + $0x134] ss:$8 sps:$4 sm:$0xff]   ;;  %v20629_v45 = vld [vmem:[%s21823_s9 + $0x130] ss:$8 sps:$4 sm:$0xff]   ;;  %v20634_v46 = vld [vmem:[%s21823_s9 + $0x144] ss:$8 sps:$4 sm:$0xff]  }
  0x4e   : > { %1114 = vmatprep.subr.bf16.mxu1 %v20582_v11  ;;  %v20632_v47 = vld [vmem:[%s21823_s9 + $0x140] ss:$8 sps:$4 sm:$0xff]   ;;  %v20637_v48 = vld [vmem:[%s21823_s9 + $0x154] ss:$8 sps:$4 sm:$0xff]   ;;  %v20635_v49 = vld [vmem:[%s21823_s9 + $0x150] ss:$8 sps:$4 sm:$0xff]  }
  0x4f   : > { %v20640_v50 = vld [vmem:[%s21823_s9 + $0x164] ss:$8 sps:$4 sm:$0xff]   ;;  %v20638_v51 = vld [vmem:[%s21823_s9 + $0x160] ss:$8 sps:$4 sm:$0xff]   ;;  %v20643_v52 = vld [vmem:[%s21823_s9 + $0x174] ss:$8 sps:$4 sm:$0xff]  }
  0x50   : > { %v20641_v53 = vld [vmem:[%s21823_s9 + $0x170] ss:$8 sps:$4 sm:$0xff]   ;;  %v20646_v54 = vld [vmem:[%s21823_s9 + $0x184] ss:$8 sps:$4 sm:$0xff]   ;;  %v20644_v55 = vld [vmem:[%s21823_s9 + $0x180] ss:$8 sps:$4 sm:$0xff]  }
  0x51   : > { %1115 = vmatpush1.bf16.msra.mxu1 %v20584_v12  ;;  %v20649_v56 = vld [vmem:[%s21823_s9 + $0x194] ss:$8 sps:$4 sm:$0xff]   ;;  %v20647_v57 = vld [vmem:[%s21823_s9 + $0x190] ss:$8 sps:$4 sm:$0xff]   ;;  %v20652_v58 = vld [vmem:[%s21823_s9 + $0x1a4] ss:$8 sps:$4 sm:$0xff]  }
  0x52   : > { %1116 = vmatprep.subr.bf16.mxu1 %v20585_v13  ;;  %v20650_v59 = vld [vmem:[%s21823_s9 + $0x1a0] ss:$8 sps:$4 sm:$0xff]   ;;  %v20655_v60 = vld [vmem:[%s21823_s9 + $0x1b4] ss:$8 sps:$4 sm:$0xff]   ;;  %v20653_v61 = vld [vmem:[%s21823_s9 + $0x1b0] ss:$8 sps:$4 sm:$0xff]  }
  0x53   : > { %v20658_v62 = vld [vmem:[%s21823_s9 + $0x1c4] ss:$8 sps:$4 sm:$0xff]   ;;  %v20656_v63 = vld [vmem:[%s21823_s9 + $0x1c0] ss:$8 sps:$4 sm:$0xff]   ;;  %v20661_v0 = vld [vmem:[%s21823_s9 + $0x1d4] ss:$8 sps:$4 sm:$0xff]  }
  0x54   : > { %v20659_v1 = vld [vmem:[%s21823_s9 + $0x1d0] ss:$8 sps:$4 sm:$0xff]   ;;  %v20664_v2 = vld [vmem:[%s21823_s9 + $0x1e4] ss:$8 sps:$4 sm:$0xff]   ;;  %v20662_v3 = vld [vmem:[%s21823_s9 + $0x1e0] ss:$8 sps:$4 sm:$0xff]  }
  0x55   : > { %1117 = vmatpush1.bf16.msra.mxu1 %v20587_v14  ;;  %v20667_v4 = vld [vmem:[%s21823_s9 + $0x1f4] ss:$8 sps:$4 sm:$0xff]   ;;  %v20665_v5 = vld [vmem:[%s21823_s9 + $0x1f0] ss:$8 sps:$4 sm:$0xff]   ;;  %v20670_v6 = vld [vmem:[%s21823_s9 + $0x204] ss:$8 sps:$4 sm:$0xff]  }
  0x56   : > { %1118 = vmatprep.subr.bf16.mxu1 %v20588_v15  ;;  %v20668_v7 = vld [vmem:[%s21823_s9 + $0x200] ss:$8 sps:$4 sm:$0xff]   ;;  %v20673_v8 = vld [vmem:[%s21823_s9 + $0x214] ss:$8 sps:$4 sm:$0xff]   ;;  %v20671_v9 = vld [vmem:[%s21823_s9 + $0x210] ss:$8 sps:$4 sm:$0xff]  }
  0x57   : > { %v20676_v10 = vld [vmem:[%s21823_s9 + $0x224] ss:$8 sps:$4 sm:$0xff]   ;;  %v20674_v11 = vld [vmem:[%s21823_s9 + $0x220] ss:$8 sps:$4 sm:$0xff]   ;;  %v20679_v12 = vld [vmem:[%s21823_s9 + $0x234] ss:$8 sps:$4 sm:$0xff]  }
  0x58   : > { %v20677_v13 = vld [vmem:[%s21823_s9 + $0x230] ss:$8 sps:$4 sm:$0xff]   ;;  %v20682_v14 = vld [vmem:[%s21823_s9 + $0x244] ss:$8 sps:$4 sm:$0xff]   ;;  %v20680_v15 = vld [vmem:[%s21823_s9 + $0x240] ss:$8 sps:$4 sm:$0xff]  }
  0x59   : > { %1119 = vmatpush1.bf16.msra.mxu1 %v20590_v18  ;;  %v20685_v16 = vld [vmem:[%s21823_s9 + $0x254] ss:$8 sps:$4 sm:$0xff]   ;;  %v20683_v18 = vld [vmem:[%s21823_s9 + $0x250] ss:$8 sps:$4 sm:$0xff]   ;;  %vm4337_vm12 = vcmask 31744   ;;  %s24682_s10 = sld [smem:[#allocation5_spill]] }
  0x5a   : > { %1120 = vmatprep.subr.bf16.mxu1 %v20591_v19  ;;  %v20688_v19 = vld [vmem:[%s21823_s9 + $0x264] ss:$8 sps:$4 sm:$0xff]   ;;  %s24693_s11 = sld [smem:[#allocation6_spill]]  ;;  %s24694_s6 = sld [smem:[#allocation7_spill]] }
  0x5b   : > { %s24695_s15 = sld [smem:[#allocation9_spill]]  ;;  %s24696_s18 = sld [smem:[#allocation8_spill]] }
  0x5c   : > { %s24697_s27 = sld [smem:[#allocation10_spill]]  ;;  %s24698_s23 = sld [smem:[#allocation11_spill]] }
  0x5d   : > { %1121 = vmatpush1.bf16.msra.mxu1 %v20593_v20  ;;  %v20686_v20 = vld [vmem:[%s21823_s9 + $0x260] ss:$8 sps:$4 sm:$0xff]   ;;  %s24699_s26 = sld [smem:[#allocation14_spill]]  ;;  %s24700_s1 = sld [smem:[#allocation15_spill]] }
  0x5e   : > { %1122 = vmatprep.subr.bf16.mxu1 %v20594_v21  ;;  %v20691_v21 = vld [vmem:[%s21823_s9 + $0x274] ss:$8 sps:$4 sm:$0xff]   ;;  %s24701_s24 = sld [smem:[#allocation12_spill]]  ;;  %s24702_s2 = sld [smem:[#allocation13_spill]] }
  0x61   : > { %1123 = vmatpush1.bf16.msra.mxu1 %v20596_v22  ;;  %v20689_v22 = vld [vmem:[%s21823_s9 + $0x270] ss:$8 sps:$4 sm:$0xff]  }
  0x62   : > { %1124 = vmatprep.subr.bf16.mxu1 %v20597_v23  ;;  %v20694_v23 = vld [vmem:[%s21823_s9 + $0x284] ss:$8 sps:$4 sm:$0xff]  }
  0x65   : > { %1125 = vmatpush1.bf16.msra.mxu1 %v20599_v24  ;;  %v20692_v24 = vld [vmem:[%s21823_s9 + $0x280] ss:$8 sps:$4 sm:$0xff]  }
  0x66   : > { %1126 = vmatprep.subr.bf16.mxu1 %v20600_v25  ;;  %v20697_v25 = vld [vmem:[%s21823_s9 + $0x294] ss:$8 sps:$4 sm:$0xff]  }
  0x69   : > { %1127 = vmatpush1.bf16.msra.mxu1 %v20602_v26  ;;  %v20695_v26 = vld [vmem:[%s21823_s9 + $0x290] ss:$8 sps:$4 sm:$0xff]  }
  0x6a   : > { %1128 = vmatprep.subr.bf16.mxu1 %v20603_v27  ;;  %v20700_v27 = vld [vmem:[%s21823_s9 + $0x2a4] ss:$8 sps:$4 sm:$0xff]  }
  0x6d   : > { %1129 = vmatpush1.bf16.msra.mxu1 %v20605_v28  ;;  %v20698_v28 = vld [vmem:[%s21823_s9 + $0x2a0] ss:$8 sps:$4 sm:$0xff]  }
  0x6e   : > { %1130 = vmatprep.subr.bf16.mxu1 %v20606_v29  ;;  %v20703_v29 = vld [vmem:[%s21823_s9 + $0x2b4] ss:$8 sps:$4 sm:$0xff]  }
  0x71   : > { %1131 = vmatpush1.bf16.msra.mxu1 %v20608_v30  ;;  %v20701_v30 = vld [vmem:[%s21823_s9 + $0x2b0] ss:$8 sps:$4 sm:$0xff]  }
  0x72   : > { %1132 = vmatprep.subr.bf16.mxu1 %v20609_v31  ;;  %v20706_v31 = vld [vmem:[%s21823_s9 + $0x2c4] ss:$8 sps:$4 sm:$0xff]  }
  0x75   : > { %1133 = vmatpush1.bf16.msra.mxu1 %v20611_v32  ;;  %v20704_v32 = vld [vmem:[%s21823_s9 + $0x2c0] ss:$8 sps:$4 sm:$0xff]  }
  0x76   : > { %1134 = vmatprep.subr.bf16.mxu1 %v20612_v33  ;;  %v20709_v33 = vld [vmem:[%s21823_s9 + $0x2d4] ss:$8 sps:$4 sm:$0xff]  }
  0x79   : > { %1135 = vmatpush1.bf16.msra.mxu1 %v20614_v34  ;;  %v20707_v34 = vld [vmem:[%s21823_s9 + $0x2d0] ss:$8 sps:$4 sm:$0xff]  }
  0x7a   : > { %1136 = vmatprep.subr.bf16.mxu1 %v20615_v35  ;;  %v20712_v35 = vld [vmem:[%s21823_s9 + $0x2e4] ss:$8 sps:$4 sm:$0xff]  }
  0x7d   : > { %1137 = vmatpush1.bf16.msra.mxu1 %v20617_v36  ;;  %v20710_v36 = vld [vmem:[%s21823_s9 + $0x2e0] ss:$8 sps:$4 sm:$0xff]  }
  0x7e   : > { %1346 = vmatprep.subr.bf16.mxu1 %v20622_v37  ;;  %v20715_v37 = vld [vmem:[%s21823_s9 + $0x2f4] ss:$8 sps:$4 sm:$0xff]  }
  0x80   : > { %1139 = vmatmul.mubr.bf16.vlgmr.msra.gmra.mrb[0].mxu1 %v22007_v38 }
  0x81   : > { %1347 = vmatpush1.bf16.msra.mxu1 %v20620_v39  ;;  %1378 = vmatprep.mubr.bf16.mxu1 %v21984_v17  ;;  %v20713_v39 = vld [vmem:[%s21823_s9 + $0x2f0] ss:$8 sps:$4 sm:$0xff]  }
  0x82   : > { %1348 = vmatprep.subr.bf16.mxu1 %v20625_v40  ;;  %v24567_v40 = vmov 0  }
  0x83   : > { %1450 = vmatprep.mubr.bf16.mxu0 %v24567_v40  ;;  %20569 = vset.pattern.permute.xlu1 %v24567_v40 }
  0x84   : > { %20568 = vset.pattern.permute.xlu0 %v24567_v40 }
  0x85   : > { %1349 = vmatpush1.bf16.msra.mxu1 %v20623_v41 }
  0x86   : > { %1350 = vmatprep.subr.bf16.mxu1 %v20628_v42 }
  0x89   : > { %1351 = vmatpush1.bf16.msra.mxu1 %v20626_v43 }
  0x8a   : > { %1352 = vmatprep.subr.bf16.mxu1 %v20631_v44 }
  0x8d   : > { %1353 = vmatpush1.bf16.msra.mxu1 %v20629_v45  ;;  %v20733_v45 = vld [vmem:[%s21823_s9 + $0x400] ss:$8 sps:$4 sm:$0xff]  }
  0x8e   : > { %1354 = vmatprep.subr.bf16.mxu1 %v20634_v46  ;;  %v20735_v46 = vld [vmem:[%s21823_s9 + $0x404] ss:$8 sps:$4 sm:$0xff]  }
  0x91   : > { %1355 = vmatpush1.bf16.msra.mxu1 %v20632_v47  ;;  %v20739_v47 = vld [vmem:[%s21823_s9 + $0x410] ss:$8 sps:$4 sm:$0xff]  }
  0x92   : > { %1356 = vmatprep.subr.bf16.mxu1 %v20637_v48  ;;  %v20741_v48 = vld [vmem:[%s21823_s9 + $0x414] ss:$8 sps:$4 sm:$0xff]  }
  0x95   : > { %1357 = vmatpush1.bf16.msra.mxu1 %v20635_v49  ;;  %v20745_v49 = vld [vmem:[%s21823_s9 + $0x420] ss:$8 sps:$4 sm:$0xff]  }
  0x96   : > { %1358 = vmatprep.subr.bf16.mxu1 %v20640_v50  ;;  %v20747_v50 = vld [vmem:[%s21823_s9 + $0x424] ss:$8 sps:$4 sm:$0xff]  }
  0x99   : > { %1359 = vmatpush1.bf16.msra.mxu1 %v20638_v51  ;;  %v20751_v51 = vld [vmem:[%s21823_s9 + $0x430] ss:$8 sps:$4 sm:$0xff]  }
  0x9a   : > { %1360 = vmatprep.subr.bf16.mxu1 %v20643_v52  ;;  %v20753_v52 = vld [vmem:[%s21823_s9 + $0x434] ss:$8 sps:$4 sm:$0xff]  }
  0x9d   : > { %1361 = vmatpush1.bf16.msra.mxu1 %v20641_v53  ;;  %v20757_v53 = vld [vmem:[%s21823_s9 + $0x440] ss:$8 sps:$4 sm:$0xff]  }
  0x9e   : > { %1362 = vmatprep.subr.bf16.mxu1 %v20646_v54  ;;  %v20759_v54 = vld [vmem:[%s21823_s9 + $0x444] ss:$8 sps:$4 sm:$0xff]  }
  0xa1   : > { %1363 = vmatpush1.bf16.msra.mxu1 %v20644_v55  ;;  %v20763_v55 = vld [vmem:[%s21823_s9 + $0x450] ss:$8 sps:$4 sm:$0xff]  }
  0xa2   : > { %1364 = vmatprep.subr.bf16.mxu1 %v20649_v56  ;;  %v20765_v56 = vld [vmem:[%s21823_s9 + $0x454] ss:$8 sps:$4 sm:$0xff]  }
  0xa5   : > { %1365 = vmatpush1.bf16.msra.mxu1 %v20647_v57  ;;  %v20769_v57 = vld [vmem:[%s21823_s9 + $0x460] ss:$8 sps:$4 sm:$0xff]  }
  0xa6   : > { %1366 = vmatprep.subr.bf16.mxu1 %v20652_v58  ;;  %v20771_v58 = vld [vmem:[%s21823_s9 + $0x464] ss:$8 sps:$4 sm:$0xff]  }
  0xa9   : > { %1367 = vmatpush1.bf16.msra.mxu1 %v20650_v59  ;;  %v20775_v59 = vld [vmem:[%s21823_s9 + $0x470] ss:$8 sps:$4 sm:$0xff]  }
  0xaa   : > { %1368 = vmatprep.subr.bf16.mxu1 %v20655_v60  ;;  %v20777_v60 = vld [vmem:[%s21823_s9 + $0x474] ss:$8 sps:$4 sm:$0xff]  }
  0xad   : > { %1369 = vmatpush1.bf16.msra.mxu1 %v20653_v61  ;;  %v20781_v61 = vld [vmem:[%s21823_s9 + $0x480] ss:$8 sps:$4 sm:$0xff]  }
  0xae   : > { %1370 = vmatprep.subr.bf16.mxu1 %v20658_v62  ;;  %v20783_v62 = vld [vmem:[%s21823_s9 + $0x484] ss:$8 sps:$4 sm:$0xff]  }
  0xb1   : > { %1371 = vmatpush1.bf16.msra.mxu1 %v20656_v63  ;;  %v20787_v63 = vld [vmem:[%s21823_s9 + $0x490] ss:$8 sps:$4 sm:$0xff]  }
  0xb2   : > { %1372 = vmatprep.subr.bf16.mxu1 %v20661_v0  ;;  %v20789_v0 = vld [vmem:[%s21823_s9 + $0x494] ss:$8 sps:$4 sm:$0xff]  }
  0xb5   : > { %1373 = vmatpush1.bf16.msra.mxu1 %v20659_v1  ;;  %v20793_v1 = vld [vmem:[%s21823_s9 + $0x4a0] ss:$8 sps:$4 sm:$0xff]  }
  0xb6   : > { %1374 = vmatprep.subr.bf16.mxu1 %v20664_v2  ;;  %v20795_v2 = vld [vmem:[%s21823_s9 + $0x4a4] ss:$8 sps:$4 sm:$0xff]  }
  0xb9   : > { %1375 = vmatpush1.bf16.msra.mxu1 %v20662_v3  ;;  %v20800_v3 = vld [vmem:[%s21823_s9 + $0x4b0] ss:$8 sps:$4 sm:$0xff]  }
  0xba   : > { %1376 = vmatprep.subr.bf16.mxu1 %v20667_v4  ;;  %v20802_v4 = vld [vmem:[%s21823_s9 + $0x4b4] ss:$8 sps:$4 sm:$0xff]  }
  0xbd   : > { %1377 = vmatpush1.bf16.msra.mxu1 %v20665_v5 }
  0xbe   : > { %1739 = vmatprep.subr.bf16.mxu1 %v20670_v6 }
  0xc0   : > { %1379 = vmatmul.mubr.bf16.vlgmr.msra.gmra.mrb[4].mxu1 %v22007_v38 }
  0xc1   : > { %1740 = vmatpush1.bf16.msra.mxu1 %v20668_v7  ;;  %1771 = vmatprep.mubr.bf16.mxu1 %v21984_v17 }
  0xc2   : > { %1741 = vmatprep.subr.bf16.mxu1 %v20673_v8 }
  0xc5   : > { %1742 = vmatpush1.bf16.msra.mxu1 %v20671_v9 }
  0xc6   : > { %1743 = vmatprep.subr.bf16.mxu1 %v20676_v10  ;;  %v20716_v10 = vld [vmem:[%s21828_s13 + $0x10] sm:$0xff]  }
  0xc9   : > { %1744 = vmatpush1.bf16.msra.mxu1 %v20674_v11  ;;  %v20806_v11 = vld [vmem:[%s21823_s9 + $0x4c0] ss:$8 sps:$4 sm:$0xff]  }
  0xca   : > { %1745 = vmatprep.subr.bf16.mxu1 %v20679_v12  ;;  %v20808_v12 = vld [vmem:[%s21823_s9 + $0x4c4] ss:$8 sps:$4 sm:$0xff]  }
  0xcd   : > { %1746 = vmatpush1.bf16.msra.mxu1 %v20677_v13 }
  0xce   : > { %1747 = vmatprep.subr.bf16.mxu1 %v20682_v14 }
  0xd1   : > { %1748 = vmatpush1.bf16.msra.mxu1 %v20680_v15 }
  0xd2   : > { %1749 = vmatprep.subr.bf16.mxu1 %v20685_v16 }
  0xd5   : > { %1750 = vmatpush1.bf16.msra.mxu1 %v20683_v18  ;;  %v20811_v18 = vld [vmem:[%s21823_s9 + $0x4d4] ss:$8 sps:$4 sm:$0xff]  }
  0xd6   : > { %1751 = vmatprep.subr.bf16.mxu1 %v20688_v19  ;;  %v20809_v19 = vld [vmem:[%s21823_s9 + $0x4d0] ss:$8 sps:$4 sm:$0xff]  }
  0xd9   : > { %1752 = vmatpush1.bf16.msra.mxu1 %v20686_v20 }
  0xda   : > { %1753 = vmatprep.subr.bf16.mxu1 %v20691_v21  ;;  %v20814_v21 = vld [vmem:[%s21823_s9 + $0x4e4] ss:$8 sps:$4 sm:$0xff]  }
  0xdd   : > { %1754 = vmatpush1.bf16.msra.mxu1 %v20689_v22  ;;  %v20812_v22 = vld [vmem:[%s21823_s9 + $0x4e0] ss:$8 sps:$4 sm:$0xff]  }
  0xde   : > { %1755 = vmatprep.subr.bf16.mxu1 %v20694_v23  ;;  %v20717_v23 = vld [vmem:[%s21828_s13 + $0x18] sm:$0xff]  }
  0xe1   : > { %1756 = vmatpush1.bf16.msra.mxu1 %v20692_v24  ;;  %v20817_v24 = vld [vmem:[%s21823_s9 + $0x4f4] ss:$8 sps:$4 sm:$0xff]  }
  0xe2   : > { %1757 = vmatprep.subr.bf16.mxu1 %v20697_v25  ;;  %v20815_v25 = vld [vmem:[%s21823_s9 + $0x4f0] ss:$8 sps:$4 sm:$0xff]  }
  0xe5   : > { %1758 = vmatpush1.bf16.msra.mxu1 %v20695_v26  ;;  %v20820_v26 = vld [vmem:[%s21823_s9 + $0x604] ss:$8 sps:$4 sm:$0xff]  }
  0xe6   : > { %1759 = vmatprep.subr.bf16.mxu1 %v20700_v27  ;;  %v20818_v27 = vld [vmem:[%s21823_s9 + $0x600] ss:$8 sps:$4 sm:$0xff]  }
  0xe9   : > { %1760 = vmatpush1.bf16.msra.mxu1 %v20698_v28  ;;  %v20823_v28 = vld [vmem:[%s21823_s9 + $0x614] ss:$8 sps:$4 sm:$0xff]  }
  0xea   : > { %1761 = vmatprep.subr.bf16.mxu1 %v20703_v29  ;;  %v20718_v29 = vld [vmem:[%s21828_s13] sm:$0xff]  }
  0xed   : > { %1762 = vmatpush1.bf16.msra.mxu1 %v20701_v30  ;;  %v20821_v30 = vld [vmem:[%s21823_s9 + $0x610] ss:$8 sps:$4 sm:$0xff]  }
  0xee   : > { %1763 = vmatprep.subr.bf16.mxu1 %v20706_v31  ;;  %v20826_v31 = vld [vmem:[%s21823_s9 + $0x624] ss:$8 sps:$4 sm:$0xff]  }
  0xf1   : > { %1764 = vmatpush1.bf16.msra.mxu1 %v20704_v32  ;;  %v20824_v32 = vld [vmem:[%s21823_s9 + $0x620] ss:$8 sps:$4 sm:$0xff]  }
  0xf2   : > { %1765 = vmatprep.subr.bf16.mxu1 %v20709_v33  ;;  %v20829_v33 = vld [vmem:[%s21823_s9 + $0x634] ss:$8 sps:$4 sm:$0xff]  }
  0xf5   : > { %1766 = vmatpush1.bf16.msra.mxu1 %v20707_v34  ;;  %v20719_v34 = vld [vmem:[%s21828_s13 + $0x8] sm:$0xff]  }
  0xf6   : > { %1767 = vmatprep.subr.bf16.mxu1 %v20712_v35  ;;  %v20827_v35 = vld [vmem:[%s21823_s9 + $0x630] ss:$8 sps:$4 sm:$0xff]  }
  0xf9   : > { %1768 = vmatpush1.bf16.msra.mxu1 %v20710_v36 }
  0xfa   : > { %1769 = vmatprep.subr.bf16.mxu1 %v20715_v37  ;;  %v20722_v37 = vld [vmem:[%s21823_s9 + $0x304] ss:$8 sps:$4 sm:$0xff]  }
  0xfd   : > { %1770 = vmatpush1.bf16.msra.mxu1 %v20713_v39 }
  0xfe   : > { %2387 = vmatprep.subr.bf16.mxu1 %v20735_v46 }
 0x100   : > { %1772 = vmatmul.mubr.bf16.vlgmr.msra.gmra.mrb[8].mxu1 %v22007_v38 }
 0x101   : > { %2419 = vmatprep.mubr.bf16.mxu1 %v21984_v17  ;;  %2388 = vmatpush1.bf16.msra.mxu1 %v20733_v45 }
 0x102   : > { %2389 = vmatprep.subr.bf16.mxu1 %v20741_v48  ;;  %v20726_v48 = vld [vmem:[%s21823_s9 + $0x314] ss:$8 sps:$4 sm:$0xff]  }
 0x105   : > { %2390 = vmatpush1.bf16.msra.mxu1 %v20739_v47  ;;  %v20720_v47 = vld [vmem:[%s21823_s9 + $0x300] ss:$8 sps:$4 sm:$0xff]  }
 0x106   : > { %2391 = vmatprep.subr.bf16.mxu1 %v20747_v50  ;;  %v20729_v50 = vld [vmem:[%s21823_s9 + $0x324] ss:$8 sps:$4 sm:$0xff]  }
 0x109   : > { %2392 = vmatpush1.bf16.msra.mxu1 %v20745_v49  ;;  %v20724_v49 = vld [vmem:[%s21823_s9 + $0x310] ss:$8 sps:$4 sm:$0xff]  }
 0x10a   : > { %2393 = vmatprep.subr.bf16.mxu1 %v20753_v52  ;;  %v20727_v52 = vld [vmem:[%s21823_s9 + $0x320] ss:$8 sps:$4 sm:$0xff]  }
 0x10d   : > { %2394 = vmatpush1.bf16.msra.mxu1 %v20751_v51  ;;  %v20796_v51 = vld [vmem:[%s21828_s13 + $0x28] sm:$0xff]  }
 0x10e   : > { %2395 = vmatprep.subr.bf16.mxu1 %v20759_v54  ;;  %v20730_v54 = vld [vmem:[%s21823_s9 + $0x330] ss:$8 sps:$4 sm:$0xff]  }
 0x111   : > { %2396 = vmatpush1.bf16.msra.mxu1 %v20757_v53  ;;  %v20732_v53 = vld [vmem:[%s21823_s9 + $0x334] ss:$8 sps:$4 sm:$0xff]  }
 0x112   : > { %2397 = vmatprep.subr.bf16.mxu1 %v20765_v56  ;;  %v20736_v56 = vld [vmem:[%s21823_s9 + $0x340] ss:$8 sps:$4 sm:$0xff]  }
 0x115   : > { %2398 = vmatpush1.bf16.msra.mxu1 %v20763_v55  ;;  %v20738_v55 = vld [vmem:[%s21823_s9 + $0x344] ss:$8 sps:$4 sm:$0xff]  }
 0x116   : > { %2399 = vmatprep.subr.bf16.mxu1 %v20771_v58  ;;  %v20742_v58 = vld [vmem:[%s21823_s9 + $0x350] ss:$8 sps:$4 sm:$0xff]  }
 0x119   : > { %2400 = vmatpush1.bf16.msra.mxu1 %v20769_v57  ;;  %v20744_v57 = vld [vmem:[%s21823_s9 + $0x354] ss:$8 sps:$4 sm:$0xff]  }
 0x11a   : > { %2401 = vmatprep.subr.bf16.mxu1 %v20777_v60  ;;  %v20748_v60 = vld [vmem:[%s21823_s9 + $0x360] ss:$8 sps:$4 sm:$0xff]  }
 0x11d   : > { %2402 = vmatpush1.bf16.msra.mxu1 %v20775_v59  ;;  %v20750_v59 = vld [vmem:[%s21823_s9 + $0x364] ss:$8 sps:$4 sm:$0xff]  }
 0x11e   : > { %2403 = vmatprep.subr.bf16.mxu1 %v20783_v62  ;;  %v20754_v62 = vld [vmem:[%s21823_s9 + $0x370] ss:$8 sps:$4 sm:$0xff]  }
 0x121   : > { %2404 = vmatpush1.bf16.msra.mxu1 %v20781_v61  ;;  %v20756_v61 = vld [vmem:[%s21823_s9 + $0x374] ss:$8 sps:$4 sm:$0xff]  }
 0x122   : > { %2405 = vmatprep.subr.bf16.mxu1 %v20789_v0  ;;  %v20760_v0 = vld [vmem:[%s21823_s9 + $0x380] ss:$8 sps:$4 sm:$0xff]  }
 0x125   : > { %2406 = vmatpush1.bf16.msra.mxu1 %v20787_v63  ;;  %v20762_v63 = vld [vmem:[%s21823_s9 + $0x384] ss:$8 sps:$4 sm:$0xff]  }
 0x126   : > { %2407 = vmatprep.subr.bf16.mxu1 %v20795_v2  ;;  %v20766_v2 = vld [vmem:[%s21823_s9 + $0x390] ss:$8 sps:$4 sm:$0xff]  }
 0x129   : > { %2408 = vmatpush1.bf16.msra.mxu1 %v20793_v1  ;;  %v20768_v1 = vld [vmem:[%s21823_s9 + $0x394] ss:$8 sps:$4 sm:$0xff]  }
 0x12a   : > { %2409 = vmatprep.subr.bf16.mxu1 %v20802_v4  ;;  %v20772_v4 = vld [vmem:[%s21823_s9 + $0x3a0] ss:$8 sps:$4 sm:$0xff]  }
 0x12d   : > { %2410 = vmatpush1.bf16.msra.mxu1 %v20800_v3  ;;  %v20774_v3 = vld [vmem:[%s21823_s9 + $0x3a4] ss:$8 sps:$4 sm:$0xff]  }
 0x12e   : > { %2411 = vmatprep.subr.bf16.mxu1 %v20808_v12  ;;  %v20797_v12 = vld [vmem:[%s21823_s9 + $0x3e0] ss:$8 sps:$4 sm:$0xff]  }
 0x131   : > { %2412 = vmatpush1.bf16.msra.mxu1 %v20806_v11  ;;  %v20799_v11 = vld [vmem:[%s21823_s9 + $0x3e4] ss:$8 sps:$4 sm:$0xff]  }
 0x132   : > { %2413 = vmatprep.subr.bf16.mxu1 %v20811_v18  ;;  %v20833_v18 = vld [vmem:[%s21823_s9 + $0x650] ss:$8 sps:$4 sm:$0xff]  }
 0x135   : > { %2414 = vmatpush1.bf16.msra.mxu1 %v20809_v19  ;;  %v20835_v19 = vld [vmem:[%s21823_s9 + $0x654] ss:$8 sps:$4 sm:$0xff]  }
 0x136   : > { %2415 = vmatprep.subr.bf16.mxu1 %v20814_v21  ;;  %v20839_v21 = vld [vmem:[%s21823_s9 + $0x664] ss:$8 sps:$4 sm:$0xff]  }
 0x139   : > { %2416 = vmatpush1.bf16.msra.mxu1 %v20812_v22  ;;  %v20842_v22 = vld [vmem:[%s21823_s9 + $0x674] ss:$8 sps:$4 sm:$0xff]  }
 0x13a   : > { %2417 = vmatprep.subr.bf16.mxu1 %v20817_v24 }
 0x13d   : > { %2418 = vmatpush1.bf16.msra.mxu1 %v20815_v25 }
 0x13e   : > { %3035 = vmatprep.subr.bf16.mxu1 %v20820_v26 }
 0x140   : > { %2420 = vmatmul.mubr.bf16.vlgmr.msra.gmra.mrb[12].mxu1 %v22007_v38 }
 0x141   : > { %3036 = vmatpush1.bf16.msra.mxu1 %v20818_v27  ;;  %3067 = vmatprep.mubr.bf16.mxu1 %v21984_v17 }
 0x142   : > { %3037 = vmatprep.subr.bf16.mxu1 %v20823_v28  ;;  %v20844_v28 = vld [vmem:[%s21823_s9 + $0x680] ss:$8 sps:$4 sm:$0xff]  }
 0x145   : > { %3038 = vmatpush1.bf16.msra.mxu1 %v20821_v30  ;;  %v20852_v30 = vld [vmem:[%s21823_s9 + $0x694] ss:$8 sps:$4 sm:$0xff]  }
 0x146   : > { %3039 = vmatprep.subr.bf16.mxu1 %v20826_v31  ;;  %v20850_v31 = vld [vmem:[%s21823_s9 + $0x690] ss:$8 sps:$4 sm:$0xff]  }
 0x149   : > { %3040 = vmatpush1.bf16.msra.mxu1 %v20824_v32  ;;  %v20857_v32 = vld [vmem:[%s21823_s9 + $0x6a0] ss:$8 sps:$4 sm:$0xff]  }
 0x14a   : > { %3041 = vmatprep.subr.bf16.mxu1 %v20829_v33  ;;  %v20859_v33 = vld [vmem:[%s21823_s9 + $0x6a4] ss:$8 sps:$4 sm:$0xff]  }
 0x14d   : > { %3042 = vmatpush1.bf16.msra.mxu1 %v20827_v35  ;;  %v20865_v35 = vld [vmem:[%s21823_s9 + $0x6b4] ss:$8 sps:$4 sm:$0xff]  }
 0x153   : > { %v22081_v41 = vpop.f32.mrb[0].mxu1 }
 0x154   : > { %v22083_v42 = vpop.f32.mrb[1].mxu1  ;;  %v1151_v15 = vpack.c.bf16 %v22081_v41, %v22081_v41 }
 0x155   : > { %v1144_v43 = vpop.f32.mrb[2].mxu1  ;;  %v1152_v16 = vpack.c.bf16 %v22083_v42, %v22083_v42 }
 0x156   : > { %v1145_v44 = vpop.f32.mrb[3].mxu1  ;;  %v1488_v20 = vsel %vm1411_vm0, %v1151_v15, 0  ;;  %v20832_v15 = vld [vmem:[%s21823_s9 + $0x644] ss:$8 sps:$4 sm:$0xff]  }
 0x157   : > { %v20723_v44 = vld [vmem:[%s21828_s13 + $0x20] sm:$0xff]   ;;  %3043 = vmatprep.subr.bf16.mxu1 %v20832_v15 }
 0x193   : > { %v1380_v5 = vpop.f32.mrb[4].mxu1 }
 0x194   : > { %v1382_v6 = vpop.f32.mrb[5].mxu1  ;;  %v1392_v7 = vpack.c.bf16 %v1380_v5, %v1380_v5  ;;  %v20780_v5 = vld [vmem:[%s21823_s9 + $0x3b4] ss:$8 sps:$4 sm:$0xff]  }
 0x195   : > { %v1384_v8 = vpop.f32.mrb[6].mxu1  ;;  %v1393_v9 = vpack.c.bf16 %v1382_v6, %v1382_v6  ;;  %v20778_v6 = vld [vmem:[%s21823_s9 + $0x3b0] ss:$8 sps:$4 sm:$0xff]  }
 0x196   : > { %v1385_v13 = vpop.f32.mrb[7].mxu1  ;;  %v1413_v14 = vsel %vm1411_vm0, %v1392_v7, 0  ;;  %v20786_v7 = vld [vmem:[%s21823_s9 + $0x3c4] ss:$8 sps:$4 sm:$0xff]   ;;  %v20784_v8 = vld [vmem:[%s21823_s9 + $0x3c0] ss:$8 sps:$4 sm:$0xff]  }
 0x197   : > { %15926 = vmatprep.subr.msk.bf16.mxu0 %vm1411_vm0, %v1393_v9  ;;  %v20792_v9 = vld [vmem:[%s21823_s9 + $0x3d4] ss:$8 sps:$4 sm:$0xff]  }
 0x198   : > { %1419 = vmatpush1.bf16.msra.mxu0 %v1413_v14  ;;  %v20805_v13 = vld [vmem:[%s21823_s9 + $0x3f4] ss:$8 sps:$4 sm:$0xff]   ;;  %v20803_v14 = vld [vmem:[%s21823_s9 + $0x3f0] ss:$8 sps:$4 sm:$0xff]  }
 0x199   : > { %15931 = vmatprep.subr.msk.bf16.mxu0 %vm1411_vm0, %v1152_v16  ;;  %v20830_v16 = vld [vmem:[%s21823_s9 + $0x640] ss:$8 sps:$4 sm:$0xff]  }
 0x19a   : > { %3044 = vmatpush1.bf16.msra.mxu1 %v20830_v16 }
 0x19b   : > { %15927 = vmatmul.mubr.msk.bf16.vlgmr.msra.gmra.mrb[0].mxu0 %vm1404_vm1, %v20716_v10  ;;  %v20790_v10 = vld [vmem:[%s21823_s9 + $0x3d0] ss:$8 sps:$4 sm:$0xff]   ;;  %3045 = vmatprep.subr.bf16.mxu1 %v20835_v19 }
 0x19c   : > { %1494 = vmatpush1.bf16.msra.mxu0 %v1488_v20  ;;  %1460 = vmatprep.mubr.bf16.mxu0 %v24567_v40  ;;  %v20837_v20 = vld [vmem:[%s21823_s9 + $0x660] ss:$8 sps:$4 sm:$0xff]  }
 0x19e   : > { %3046 = vmatpush1.bf16.msra.mxu1 %v20833_v18 }
 0x19f   : > { %3047 = vmatprep.subr.bf16.mxu1 %v20839_v21 }
 0x1a2   : > { %3048 = vmatpush1.bf16.msra.mxu1 %v20837_v20 }
 0x1a3   : > { %15928 = vmatmul.mubr.msk.bf16.gmra.mrb[4].mxu0 %vm1404_vm1, %v20717_v23  ;;  %v20840_v23 = vld [vmem:[%s21823_s9 + $0x670] ss:$8 sps:$4 sm:$0xff]   ;;  %3049 = vmatprep.subr.bf16.mxu1 %v20842_v22 }
 0x1a4   : > { %1525 = vmatprep.mubr.bf16.mxu0 %v24567_v40 }
 0x1a6   : > { %3050 = vmatpush1.bf16.msra.mxu1 %v20840_v23 }
 0x1ab   : > { %15932 = vmatmul.mubr.msk.bf16.vlgmr.msra.gmra.mrb[0].mxu0 %vm1404_vm1, %v20718_v29  ;;  %v20846_v29 = vld [vmem:[%s21823_s9 + $0x684] ss:$8 sps:$4 sm:$0xff]  }
 0x1ac   : > { %1535 = vmatprep.mubr.bf16.mxu0 %v24567_v40  ;;  %3051 = vmatprep.subr.bf16.mxu1 %v20846_v29  ;;  %v20847_v29 = vld [vmem:[%s21823_s9 + $0x500] ss:$8 sps:$4 sm:$0xff]  }
 0x1ad   : > { %3052 = vmatpush1.bf16.msra.mxu1 %v20844_v28  ;;  %v20849_v28 = vld [vmem:[%s21823_s9 + $0x504] ss:$8 sps:$4 sm:$0xff]  }
 0x1ae   : > { %3053 = vmatprep.subr.bf16.mxu1 %v20852_v30  ;;  %v20856_v30 = vld [vmem:[%s21823_s9 + $0x514] ss:$8 sps:$4 sm:$0xff]  }
 0x1b1   : > { %3054 = vmatpush1.bf16.msra.mxu1 %v20850_v31  ;;  %v20854_v31 = vld [vmem:[%s21823_s9 + $0x510] ss:$8 sps:$4 sm:$0xff]  }
 0x1b2   : > { %3055 = vmatprep.subr.bf16.mxu1 %v20859_v33  ;;  %v20932_v33 = vld [vmem:[%s21828_s13 + $0x48] sm:$0xff]  }
 0x1b3   : > { %15933 = vmatmul.mubr.msk.bf16.gmra.mrb[4].mxu0 %vm1404_vm1, %v20719_v34  ;;  %v20863_v34 = vld [vmem:[%s21823_s9 + $0x6b0] ss:$8 sps:$4 sm:$0xff]  }
 0x1b4   : > { %1841 = vmatprep.mubr.bf16.mxu0 %v24567_v40 }
 0x1b5   : > { %3056 = vmatpush1.bf16.msra.mxu1 %v20857_v32  ;;  %v20862_v32 = vld [vmem:[%s21823_s9 + $0x524] ss:$8 sps:$4 sm:$0xff]  }
 0x1b6   : > { %3057 = vmatprep.subr.bf16.mxu1 %v20865_v35  ;;  %v20868_v35 = vld [vmem:[%s21823_s9 + $0x534] ss:$8 sps:$4 sm:$0xff]  }
 0x1b9   : > { %3058 = vmatpush1.bf16.msra.mxu1 %v20863_v34  ;;  %v20860_v34 = vld [vmem:[%s21823_s9 + $0x520] ss:$8 sps:$4 sm:$0xff]  }
 0x1d3   : > { %v1773_v36 = vpop.f32.mrb[8].mxu1 }
 0x1d4   : > { %v1785_v39 = vpack.c.bf16 %v1773_v36, %v1773_v36  ;;  %v1775_v41 = vpop.f32.mrb[9].mxu1  ;;  %v20869_v36 = vld [vmem:[%s21823_s9 + $0x6c0] ss:$8 sps:$4 sm:$0xff]  }
 0x1d5   : > { %v1786_v42 = vpack.c.bf16 %v1775_v41, %v1775_v41  ;;  %v1777_v43 = vpop.f32.mrb[10].mxu1  ;;  %v20877_v41 = vld [vmem:[%s21823_s9 + $0x6d4] ss:$8 sps:$4 sm:$0xff]  }
 0x1d6   : > { %v1778_v45 = vpop.f32.mrb[11].mxu1  ;;  %v1804_v46 = vsel %vm1411_vm0, %v1785_v39, 0  ;;  %v20875_v39 = vld [vmem:[%s21823_s9 + $0x6d0] ss:$8 sps:$4 sm:$0xff]   ;;  %v20883_v43 = vld [vmem:[%s21823_s9 + $0x6e4] ss:$8 sps:$4 sm:$0xff]  }
 0x1d7   : > { %16004 = vmatprep.subr.msk.bf16.mxu0 %vm1411_vm0, %v1786_v42  ;;  %v20881_v42 = vld [vmem:[%s21823_s9 + $0x6e0] ss:$8 sps:$4 sm:$0xff]   ;;  %v20889_v45 = vld [vmem:[%s21823_s9 + $0x6f4] ss:$8 sps:$4 sm:$0xff]  }
 0x1d8   : > { %1810 = vmatpush1.bf16.msra.mxu0 %v1804_v46  ;;  %v20893_v46 = vld [vmem:[%s21823_s9 + $0x700] ss:$8 sps:$4 sm:$0xff]  }
 0x1d9   : > { %2063 = vmatprep.subr.bf16.mxu0 %v20722_v37  ;;  %v20871_v37 = vld [vmem:[%s21823_s9 + $0x6c4] ss:$8 sps:$4 sm:$0xff]  }
 0x1da   : > { %3059 = vmatprep.subr.bf16.mxu1 %v20871_v37  ;;  %v20874_v37 = vld [vmem:[%s21823_s9 + $0x544] ss:$8 sps:$4 sm:$0xff]  }
 0x1db   : > { %16005 = vmatmul.mubr.msk.bf16.vlgmr.msra.gmra.mrb[0].mxu0 %vm1404_vm1, %v20723_v44  ;;  %3060 = vmatpush1.bf16.msra.mxu1 %v20869_v36  ;;  %v20887_v44 = vld [vmem:[%s21823_s9 + $0x6f0] ss:$8 sps:$4 sm:$0xff]  }
 0x1dc   : > { %2064 = vmatpush1.bf16.msra.mxu0 %v20720_v47  ;;  %1851 = vmatprep.mubr.bf16.mxu0 %v24567_v40  ;;  %v20895_v47 = vld [vmem:[%s21823_s9 + $0x704] ss:$8 sps:$4 sm:$0xff]   ;;  %v20866_v36 = vld [vmem:[%s21823_s9 + $0x530] ss:$8 sps:$4 sm:$0xff]  }
 0x1dd   : > { %2065 = vmatprep.subr.bf16.mxu0 %v20726_v48  ;;  %3061 = vmatprep.subr.bf16.mxu1 %v20877_v41  ;;  %v20899_v48 = vld [vmem:[%s21823_s9 + $0x710] ss:$8 sps:$4 sm:$0xff]   ;;  %v20880_v41 = vld [vmem:[%s21823_s9 + $0x554] ss:$8 sps:$4 sm:$0xff]  }
 0x1df   : > { %3062 = vmatpush1.bf16.msra.mxu1 %v20875_v39  ;;  %v20872_v39 = vld [vmem:[%s21823_s9 + $0x540] ss:$8 sps:$4 sm:$0xff]  }
 0x1e0   : > { %2066 = vmatpush1.bf16.msra.mxu0 %v20724_v49  ;;  %3063 = vmatprep.subr.bf16.mxu1 %v20883_v43  ;;  %v20901_v49 = vld [vmem:[%s21823_s9 + $0x714] ss:$8 sps:$4 sm:$0xff]   ;;  %v20886_v43 = vld [vmem:[%s21823_s9 + $0x564] ss:$8 sps:$4 sm:$0xff]  }
 0x1e1   : > { %2067 = vmatprep.subr.bf16.mxu0 %v20729_v50  ;;  %v20905_v50 = vld [vmem:[%s21823_s9 + $0x720] ss:$8 sps:$4 sm:$0xff]  }
 0x1e3   : > { %16006 = vmatmul.mubr.msk.bf16.gmra.mrb[4].mxu0 %vm1404_vm1, %v20796_v51  ;;  %3064 = vmatpush1.bf16.msra.mxu1 %v20881_v42  ;;  %v20907_v51 = vld [vmem:[%s21823_s9 + $0x724] ss:$8 sps:$4 sm:$0xff]   ;;  %v20878_v42 = vld [vmem:[%s21823_s9 + $0x550] ss:$8 sps:$4 sm:$0xff]  }
 0x1e4   : > { %2068 = vmatpush1.bf16.msra.mxu0 %v20727_v52  ;;  %2095 = vmatprep.mubr.bf16.mxu0 %v21984_v17  ;;  %v20911_v52 = vld [vmem:[%s21823_s9 + $0x730] ss:$8 sps:$4 sm:$0xff]  }
 0x1e5   : > { %2069 = vmatprep.subr.bf16.mxu0 %v20732_v53  ;;  %3065 = vmatprep.subr.bf16.mxu1 %v20889_v45  ;;  %v20913_v53 = vld [vmem:[%s21823_s9 + $0x734] ss:$8 sps:$4 sm:$0xff]  }
 0x1e6   : > { %v20892_v45 = vld [vmem:[%s21823_s9 + $0x574] ss:$8 sps:$4 sm:$0xff]  }
 0x1e7   : > { %3066 = vmatpush1.bf16.msra.mxu1 %v20887_v44  ;;  %v20884_v44 = vld [vmem:[%s21823_s9 + $0x560] ss:$8 sps:$4 sm:$0xff]  }
 0x1e8   : > { %2070 = vmatpush1.bf16.msra.mxu0 %v20730_v54  ;;  %3359 = vmatprep.subr.bf16.mxu1 %v20895_v47  ;;  %v20917_v54 = vld [vmem:[%s21823_s9 + $0x740] ss:$8 sps:$4 sm:$0xff]   ;;  %v20898_v47 = vld [vmem:[%s21823_s9 + $0x584] ss:$8 sps:$4 sm:$0xff]  }
 0x1e9   : > { %2071 = vmatprep.subr.bf16.mxu0 %v20738_v55  ;;  %v20919_v55 = vld [vmem:[%s21823_s9 + $0x744] ss:$8 sps:$4 sm:$0xff]  }
 0x1ea   : > { %3068 = vmatmul.mubr.bf16.vlgmr.msra.gmra.mrb[16].mxu1 %v22007_v38 }
 0x1eb   : > { %3360 = vmatpush1.bf16.msra.mxu1 %v20893_v46  ;;  %3391 = vmatprep.mubr.bf16.mxu1 %v21984_v17  ;;  %v20890_v46 = vld [vmem:[%s21823_s9 + $0x570] ss:$8 sps:$4 sm:$0xff]  }
 0x1ec   : > { %2072 = vmatpush1.bf16.msra.mxu0 %v20736_v56  ;;  %3361 = vmatprep.subr.bf16.mxu1 %v20901_v49  ;;  %v20923_v56 = vld [vmem:[%s21823_s9 + $0x750] ss:$8 sps:$4 sm:$0xff]   ;;  %v20904_v49 = vld [vmem:[%s21823_s9 + $0x594] ss:$8 sps:$4 sm:$0xff]  }
 0x1ed   : > { %2073 = vmatprep.subr.bf16.mxu0 %v20744_v57  ;;  %v20925_v57 = vld [vmem:[%s21823_s9 + $0x754] ss:$8 sps:$4 sm:$0xff]  }
 0x1ef   : > { %3362 = vmatpush1.bf16.msra.mxu1 %v20899_v48  ;;  %v20896_v48 = vld [vmem:[%s21823_s9 + $0x580] ss:$8 sps:$4 sm:$0xff]  }
 0x1f0   : > { %2074 = vmatpush1.bf16.msra.mxu0 %v20742_v58  ;;  %3363 = vmatprep.subr.bf16.mxu1 %v20907_v51  ;;  %v20929_v58 = vld [vmem:[%s21823_s9 + $0x760] ss:$8 sps:$4 sm:$0xff]   ;;  %v20910_v51 = vld [vmem:[%s21823_s9 + $0x5a4] ss:$8 sps:$4 sm:$0xff]  }
 0x1f1   : > { %2075 = vmatprep.subr.bf16.mxu0 %v20750_v59  ;;  %v20931_v59 = vld [vmem:[%s21823_s9 + $0x764] ss:$8 sps:$4 sm:$0xff]  }
 0x1f3   : > { %3364 = vmatpush1.bf16.msra.mxu1 %v20905_v50  ;;  %v20902_v50 = vld [vmem:[%s21823_s9 + $0x590] ss:$8 sps:$4 sm:$0xff]  }
 0x1f4   : > { %2076 = vmatpush1.bf16.msra.mxu0 %v20748_v60  ;;  %3365 = vmatprep.subr.bf16.mxu1 %v20913_v53  ;;  %v20936_v60 = vld [vmem:[%s21823_s9 + $0x770] ss:$8 sps:$4 sm:$0xff]   ;;  %v20916_v53 = vld [vmem:[%s21823_s9 + $0x5b4] ss:$8 sps:$4 sm:$0xff]  }
 0x1f5   : > { %2077 = vmatprep.subr.bf16.mxu0 %v20756_v61  ;;  %v20938_v61 = vld [vmem:[%s21823_s9 + $0x774] ss:$8 sps:$4 sm:$0xff]  }
 0x1f7   : > { %3366 = vmatpush1.bf16.msra.mxu1 %v20911_v52  ;;  %v20908_v52 = vld [vmem:[%s21823_s9 + $0x5a0] ss:$8 sps:$4 sm:$0xff]  }
 0x1f8   : > { %2078 = vmatpush1.bf16.msra.mxu0 %v20754_v62  ;;  %3367 = vmatprep.subr.bf16.mxu1 %v20919_v55  ;;  %v20942_v62 = vld [vmem:[%s21823_s9 + $0x780] ss:$8 sps:$4 sm:$0xff]   ;;  %v20922_v55 = vld [vmem:[%s21823_s9 + $0x5c4] ss:$8 sps:$4 sm:$0xff]  }
 0x1f9   : > { %2079 = vmatprep.subr.bf16.mxu0 %v20762_v63  ;;  %v20944_v63 = vld [vmem:[%s21823_s9 + $0x784] ss:$8 sps:$4 sm:$0xff]  }
 0x1fb   : > { %3368 = vmatpush1.bf16.msra.mxu1 %v20917_v54  ;;  %v20914_v54 = vld [vmem:[%s21823_s9 + $0x5b0] ss:$8 sps:$4 sm:$0xff]  }
 0x1fc   : > { %2080 = vmatpush1.bf16.msra.mxu0 %v20760_v0  ;;  %3369 = vmatprep.subr.bf16.mxu1 %v20925_v57  ;;  %v20947_v0 = vld [vmem:[%s21823_s9 + $0x794] ss:$8 sps:$4 sm:$0xff]  }
 0x1fd   : > { %2081 = vmatprep.subr.bf16.mxu0 %v20768_v1  ;;  %v20945_v1 = vld [vmem:[%s21823_s9 + $0x790] ss:$8 sps:$4 sm:$0xff]   ;;  %v20928_v57 = vld [vmem:[%s21823_s9 + $0x5d4] ss:$8 sps:$4 sm:$0xff]  }
 0x1ff   : > { %3370 = vmatpush1.bf16.msra.mxu1 %v20923_v56  ;;  %v20920_v56 = vld [vmem:[%s21823_s9 + $0x5c0] ss:$8 sps:$4 sm:$0xff]  }
 0x200   : > { %2082 = vmatpush1.bf16.msra.mxu0 %v20766_v2  ;;  %3371 = vmatprep.subr.bf16.mxu1 %v20931_v59  ;;  %v20950_v2 = vld [vmem:[%s21823_s9 + $0x7a4] ss:$8 sps:$4 sm:$0xff]  }
 0x201   : > { %2083 = vmatprep.subr.bf16.mxu0 %v20774_v3  ;;  %v20948_v3 = vld [vmem:[%s21823_s9 + $0x7a0] ss:$8 sps:$4 sm:$0xff]   ;;  %v20935_v59 = vld [vmem:[%s21823_s9 + $0x5e4] ss:$8 sps:$4 sm:$0xff]  }
 0x203   : > { %3372 = vmatpush1.bf16.msra.mxu1 %v20929_v58  ;;  %v20926_v58 = vld [vmem:[%s21823_s9 + $0x5d0] ss:$8 sps:$4 sm:$0xff]  }
 0x204   : > { %2084 = vmatpush1.bf16.msra.mxu0 %v20772_v4  ;;  %3373 = vmatprep.subr.bf16.mxu1 %v20938_v61  ;;  %v20953_v4 = vld [vmem:[%s21823_s9 + $0x7b4] ss:$8 sps:$4 sm:$0xff]  }
 0x205   : > { %2085 = vmatprep.subr.bf16.mxu0 %v20780_v5  ;;  %v20951_v5 = vld [vmem:[%s21823_s9 + $0x7b0] ss:$8 sps:$4 sm:$0xff]   ;;  %v20941_v61 = vld [vmem:[%s21823_s9 + $0x5f4] ss:$8 sps:$4 sm:$0xff]  }
 0x207   : > { %3374 = vmatpush1.bf16.msra.mxu1 %v20936_v60  ;;  %v20933_v60 = vld [vmem:[%s21823_s9 + $0x5e0] ss:$8 sps:$4 sm:$0xff]  }
 0x208   : > { %2086 = vmatpush1.bf16.msra.mxu0 %v20778_v6  ;;  %3375 = vmatprep.subr.bf16.mxu1 %v20944_v63  ;;  %v20956_v6 = vld [vmem:[%s21823_s9 + $0x7c4] ss:$8 sps:$4 sm:$0xff]  }
 0x209   : > { %2087 = vmatprep.subr.bf16.mxu0 %v20786_v7  ;;  %v20954_v7 = vld [vmem:[%s21823_s9 + $0x7c0] ss:$8 sps:$4 sm:$0xff]  }
 0x20b   : > { %3376 = vmatpush1.bf16.msra.mxu1 %v20942_v62  ;;  %v20939_v62 = vld [vmem:[%s21823_s9 + $0x5f0] ss:$8 sps:$4 sm:$0xff]  }
 0x20c   : > { %2088 = vmatpush1.bf16.msra.mxu0 %v20784_v8  ;;  %3377 = vmatprep.subr.bf16.mxu1 %v20947_v0  ;;  %v20959_v8 = vld [vmem:[%s21823_s9 + $0x7d4] ss:$8 sps:$4 sm:$0xff]  }
 0x20d   : > { %2089 = vmatprep.subr.bf16.mxu0 %v20792_v9  ;;  %v20957_v9 = vld [vmem:[%s21823_s9 + $0x7d0] ss:$8 sps:$4 sm:$0xff]  }
 0x20f   : > { %3378 = vmatpush1.bf16.msra.mxu1 %v20945_v1 }
 0x210   : > { %2090 = vmatpush1.bf16.msra.mxu0 %v20790_v10  ;;  %3379 = vmatprep.subr.bf16.mxu1 %v20950_v2  ;;  %v20962_v10 = vld [vmem:[%s21823_s9 + $0x7e4] ss:$8 sps:$4 sm:$0xff]  }
 0x211   : > { %2091 = vmatprep.subr.bf16.mxu0 %v20799_v11  ;;  %v20960_v11 = vld [vmem:[%s21823_s9 + $0x7e0] ss:$8 sps:$4 sm:$0xff]  }
 0x213   : > { %v22197_v24 = vpop.f32.mrb[12].mxu1  ;;  %3380 = vmatpush1.bf16.msra.mxu1 %v20948_v3 }
 0x214   : > { %2092 = vmatpush1.bf16.msra.mxu0 %v20797_v12  ;;  %v22199_v25 = vpop.f32.mrb[13].mxu1  ;;  %3381 = vmatprep.subr.bf16.mxu1 %v20953_v4  ;;  %v20965_v12 = vld [vmem:[%s21823_s9 + $0x7f4] ss:$8 sps:$4 sm:$0xff]   ;;  %v2433_v20 = vpack.c.bf16 %v22197_v24, %v22197_v24 }
 0x215   : > { %2093 = vmatprep.subr.bf16.mxu0 %v20805_v13  ;;  %v2425_v26 = vpop.f32.mrb[14].mxu1  ;;  %v20963_v13 = vld [vmem:[%s21823_s9 + $0x7f0] ss:$8 sps:$4 sm:$0xff]   ;;  %v2434_v21 = vpack.c.bf16 %v22199_v25, %v22199_v25  ;;  %v20853_v25 = vld [vmem:[%s21828_s13 + $0x40] sm:$0xff]  }
 0x216   : > { %v2426_v27 = vpop.f32.mrb[15].mxu1  ;;  %v20836_v26 = vld [vmem:[%s21828_s13 + $0x30] sm:$0xff]   ;;  %v20843_v24 = vld [vmem:[%s21828_s13 + $0x38] sm:$0xff]  }
 0x217   : > { %3382 = vmatpush1.bf16.msra.mxu1 %v20951_v5  ;;  %v2452_v27 = vsel %vm1411_vm0, %v2433_v20, 0  ;;  %v20967_v20 = vld [vmem:[%s21828_s13 + $0x58] sm:$0xff]  }
 0x218   : > { %2094 = vmatpush1.bf16.msra.mxu0 %v20803_v14  ;;  %3383 = vmatprep.subr.bf16.mxu1 %v20956_v6 }
 0x21b   : > { %2096 = vmatmul.mubr.bf16.vlgmr.msra.gmra.mrb[8].mxu0 %v22007_v38  ;;  %3384 = vmatpush1.bf16.msra.mxu1 %v20954_v7 }
 0x21c   : > { %2165 = vmatprep.mubr.bf16.mxu0 %v24567_v40  ;;  %3385 = vmatprep.subr.bf16.mxu1 %v20959_v8 }
 0x21f   : > { %3386 = vmatpush1.bf16.msra.mxu1 %v20957_v9 }
 0x220   : > { %3387 = vmatprep.subr.bf16.mxu1 %v20962_v10 }
 0x223   : > { %3388 = vmatpush1.bf16.msra.mxu1 %v20960_v11 }
 0x224   : > { %3389 = vmatprep.subr.bf16.mxu1 %v20965_v12 }
 0x227   : > { %3390 = vmatpush1.bf16.msra.mxu1 %v20963_v13 }
 0x22a   : > { %3392 = vmatmul.mubr.bf16.vlgmr.msra.gmra.mrb[20].mxu1 %v22007_v38 }
 0x2bd   : > { %v3069_v63 = vpop.f32.mrb[16].mxu1 }
 0x2be   : > { %v3071_v0 = vpop.f32.mrb[17].mxu1 }
 0x2bf   : > { %v3073_v1 = vpop.f32.mrb[18].mxu1 }
 0x2c0   : > { %v3074_v2 = vpop.f32.mrb[19].mxu1  ;;  %v3846_v1 = vld [vmem:[%s21838_s21] sm:$0xff] }
 0x2c1   : > { %v3849_v2 = vld [vmem:[%s21838_s21 + $0x18] sm:$0xff] }
 0x2ee   : > { %v2097_v14 = vpop.f32.mrb[8].mxu0 }
 0x2ef   : > { %v2109_v15 = vpack.c.bf16 %v2097_v14, %v2097_v14  ;;  %v2099_v16 = vpop.f32.mrb[9].mxu0  ;;  %v3081_v14 = vpack.c.bf16 %v3069_v63, %v3069_v63  ;;  %v3815_v63 = vld [vmem:[%s21833_s17 + $0x8] sm:$0xff] }
 0x2f0   : > { %v2110_v18 = vpack.c.bf16 %v2099_v16, %v2099_v16  ;;  %v2101_v19 = vpop.f32.mrb[10].mxu0  ;;  %v20966_v16 = vld [vmem:[%s21828_s13 + $0x50] sm:$0xff]  }
 0x2f1   : > { %v2128_v22 = vsel %vm1411_vm0, %v2109_v15, 0  ;;  %v2102_v23 = vpop.f32.mrb[11].mxu0  ;;  %v3082_v15 = vpack.c.bf16 %v3071_v0, %v3071_v0  ;;  %v3100_v19 = vsel %vm1411_vm0, %v3081_v14, 0  ;;  %v3847_v0 = vld [vmem:[%s21838_s21 + $0x8] sm:$0xff] }
 0x2f2   : > { %16077 = vmatprep.subr.msk.bf16.mxu0 %vm1411_vm0, %v2110_v18 }
 0x2f3   : > { %2134 = vmatpush1.bf16.msra.mxu0 %v2128_v22  ;;  %v20968_v22 = vld [vmem:[%s21828_s13 + $0x60] sm:$0xff]  }
 0x2f4   : > { %16150 = vmatprep.subr.msk.bf16.mxu0 %vm1411_vm0, %v2434_v21 }
 0x2f6   : > { %16078 = vmatmul.mubr.msk.bf16.vlgmr.msra.gmra.mrb[0].mxu0 %vm1404_vm1, %v20836_v26  ;;  %v20972_v26 = vld [vmem:[%s21823_s9 + $0x804] ss:$8 sps:$4 sm:$0xff]  }
 0x2f7   : > { %2175 = vmatprep.mubr.bf16.mxu0 %v24567_v40  ;;  %2458 = vmatpush1.bf16.msra.mxu0 %v2452_v27  ;;  %v20969_v27 = vld [vmem:[%s21828_s13 + $0x68] sm:$0xff]  }
 0x2f8   : > { %2711 = vmatprep.subr.bf16.mxu0 %v20849_v28  ;;  %v20973_v28 = vld [vmem:[%s21828_s13 + $0x70] sm:$0xff]  }
 0x2fd   : > { %v3393_v3 = vpop.f32.mrb[20].mxu1 }
 0x2fe   : > { %16079 = vmatmul.mubr.msk.bf16.gmra.mrb[4].mxu0 %vm1404_vm1, %v20843_v24  ;;  %v3395_v4 = vpop.f32.mrb[21].mxu1  ;;  %v3405_v21 = vpack.c.bf16 %v3393_v3, %v3393_v3  ;;  %v20970_v24 = vld [vmem:[%s21823_s9 + $0x800] ss:$8 sps:$4 sm:$0xff]   ;;  %v3848_v3 = vld [vmem:[%s21838_s21 + $0x10] sm:$0xff] }
 0x2ff   : > { %2489 = vmatprep.mubr.bf16.mxu0 %v24567_v40  ;;  %v3397_v5 = vpop.f32.mrb[22].mxu1  ;;  %v3406_v18 = vpack.c.bf16 %v3395_v4, %v3395_v4 }
 0x300   : > { %v3398_v6 = vpop.f32.mrb[23].mxu1  ;;  %v3424_v23 = vsel %vm1411_vm0, %v3405_v21, 0 }
 0x306   : > { %16151 = vmatmul.mubr.msk.bf16.vlgmr.msra.gmra.mrb[0].mxu0 %vm1404_vm1, %v20853_v25  ;;  %v20976_v25 = vld [vmem:[%s21823_s9 + $0x814] ss:$8 sps:$4 sm:$0xff]  }
 0x307   : > { %2712 = vmatpush1.bf16.msra.mxu0 %v20847_v29  ;;  %2499 = vmatprep.mubr.bf16.mxu0 %v24567_v40  ;;  %v20974_v29 = vld [vmem:[%s21823_s9 + $0x810] ss:$8 sps:$4 sm:$0xff]  }
 0x308   : > { %2713 = vmatprep.subr.bf16.mxu0 %v20856_v30  ;;  %v20979_v30 = vld [vmem:[%s21823_s9 + $0x824] ss:$8 sps:$4 sm:$0xff]  }
 0x30b   : > { %2714 = vmatpush1.bf16.msra.mxu0 %v20854_v31  ;;  %v21013_v31 = vld [vmem:[%s21828_s13 + $0x78] sm:$0xff]  }
 0x30c   : > { %2715 = vmatprep.subr.bf16.mxu0 %v20862_v32  ;;  %v20977_v32 = vld [vmem:[%s21823_s9 + $0x820] ss:$8 sps:$4 sm:$0xff]  }
 0x30e   : > { %16152 = vmatmul.mubr.msk.bf16.gmra.mrb[4].mxu0 %vm1404_vm1, %v20932_v33  ;;  %v20982_v33 = vld [vmem:[%s21823_s9 + $0x834] ss:$8 sps:$4 sm:$0xff]  }
 0x30f   : > { %2716 = vmatpush1.bf16.msra.mxu0 %v20860_v34  ;;  %2743 = vmatprep.mubr.bf16.mxu0 %v21984_v17  ;;  %v20980_v34 = vld [vmem:[%s21823_s9 + $0x830] ss:$8 sps:$4 sm:$0xff]  }
 0x310   : > { %2717 = vmatprep.subr.bf16.mxu0 %v20868_v35  ;;  %v20985_v35 = vld [vmem:[%s21823_s9 + $0x844] ss:$8 sps:$4 sm:$0xff]  }
 0x313   : > { %2718 = vmatpush1.bf16.msra.mxu0 %v20866_v36  ;;  %v20983_v36 = vld [vmem:[%s21823_s9 + $0x840] ss:$8 sps:$4 sm:$0xff]  }
 0x314   : > { %2719 = vmatprep.subr.bf16.mxu0 %v20874_v37  ;;  %v20988_v37 = vld [vmem:[%s21823_s9 + $0x854] ss:$8 sps:$4 sm:$0xff]  }
 0x317   : > { %2720 = vmatpush1.bf16.msra.mxu0 %v20872_v39  ;;  %v20986_v39 = vld [vmem:[%s21823_s9 + $0x850] ss:$8 sps:$4 sm:$0xff]  }
 0x318   : > { %2721 = vmatprep.subr.bf16.mxu0 %v20880_v41  ;;  %v20991_v41 = vld [vmem:[%s21823_s9 + $0x864] ss:$8 sps:$4 sm:$0xff]  }
 0x31b   : > { %2722 = vmatpush1.bf16.msra.mxu0 %v20878_v42  ;;  %v20989_v42 = vld [vmem:[%s21823_s9 + $0x860] ss:$8 sps:$4 sm:$0xff]  }
 0x31c   : > { %2723 = vmatprep.subr.bf16.mxu0 %v20886_v43  ;;  %v20992_v43 = vld [vmem:[%s21823_s9 + $0x870] ss:$8 sps:$4 sm:$0xff]  }
 0x31f   : > { %2724 = vmatpush1.bf16.msra.mxu0 %v20884_v44  ;;  %v20997_v44 = vld [vmem:[%s21823_s9 + $0x884] ss:$8 sps:$4 sm:$0xff]  }
 0x320   : > { %2725 = vmatprep.subr.bf16.mxu0 %v20892_v45  ;;  %v20995_v45 = vld [vmem:[%s21823_s9 + $0x880] ss:$8 sps:$4 sm:$0xff]  }
 0x323   : > { %2726 = vmatpush1.bf16.msra.mxu0 %v20890_v46  ;;  %v21000_v46 = vld [vmem:[%s21823_s9 + $0x894] ss:$8 sps:$4 sm:$0xff]  }
 0x324   : > { %2727 = vmatprep.subr.bf16.mxu0 %v20898_v47  ;;  %v20998_v47 = vld [vmem:[%s21823_s9 + $0x890] ss:$8 sps:$4 sm:$0xff]  }
 0x327   : > { %2728 = vmatpush1.bf16.msra.mxu0 %v20896_v48  ;;  %v21003_v48 = vld [vmem:[%s21823_s9 + $0x8a4] ss:$8 sps:$4 sm:$0xff]  }
 0x328   : > { %2729 = vmatprep.subr.bf16.mxu0 %v20904_v49  ;;  %v21001_v49 = vld [vmem:[%s21823_s9 + $0x8a0] ss:$8 sps:$4 sm:$0xff]  }
 0x32b   : > { %2730 = vmatpush1.bf16.msra.mxu0 %v20902_v50  ;;  %v21006_v50 = vld [vmem:[%s21823_s9 + $0x8b4] ss:$8 sps:$4 sm:$0xff]  }
 0x32c   : > { %2731 = vmatprep.subr.bf16.mxu0 %v20910_v51  ;;  %v21004_v51 = vld [vmem:[%s21823_s9 + $0x8b0] ss:$8 sps:$4 sm:$0xff]  }
 0x32f   : > { %2732 = vmatpush1.bf16.msra.mxu0 %v20908_v52  ;;  %v21009_v52 = vld [vmem:[%s21823_s9 + $0x8c4] ss:$8 sps:$4 sm:$0xff]  }
 0x330   : > { %2733 = vmatprep.subr.bf16.mxu0 %v20916_v53  ;;  %v21007_v53 = vld [vmem:[%s21823_s9 + $0x8c0] ss:$8 sps:$4 sm:$0xff]  }
 0x333   : > { %2734 = vmatpush1.bf16.msra.mxu0 %v20914_v54  ;;  %v21012_v54 = vld [vmem:[%s21823_s9 + $0x8d4] ss:$8 sps:$4 sm:$0xff]  }
 0x334   : > { %2735 = vmatprep.subr.bf16.mxu0 %v20922_v55  ;;  %v21010_v55 = vld [vmem:[%s21823_s9 + $0x8d0] ss:$8 sps:$4 sm:$0xff]  }
 0x337   : > { %2736 = vmatpush1.bf16.msra.mxu0 %v20920_v56  ;;  %v21016_v56 = vld [vmem:[%s21823_s9 + $0x8e4] ss:$8 sps:$4 sm:$0xff]  }
 0x338   : > { %2737 = vmatprep.subr.bf16.mxu0 %v20928_v57  ;;  %v21014_v57 = vld [vmem:[%s21823_s9 + $0x8e0] ss:$8 sps:$4 sm:$0xff]  }
 0x33b   : > { %2738 = vmatpush1.bf16.msra.mxu0 %v20926_v58  ;;  %v21019_v58 = vld [vmem:[%s21823_s9 + $0x8f4] ss:$8 sps:$4 sm:$0xff]  }
 0x33c   : > { %2739 = vmatprep.subr.bf16.mxu0 %v20935_v59  ;;  %v21017_v59 = vld [vmem:[%s21823_s9 + $0x8f0] ss:$8 sps:$4 sm:$0xff]  }
 0x33f   : > { %2740 = vmatpush1.bf16.msra.mxu0 %v20933_v60  ;;  %v3816_v60 = vld [vmem:[%s21833_s17 + $0x10] sm:$0xff] }
 0x340   : > { %2741 = vmatprep.subr.bf16.mxu0 %v20941_v61  ;;  %v3814_v61 = vld [vmem:[%s21833_s17] sm:$0xff]  ;;  %3830 = vperm.xlu1 %20569, %v3816_v60  }
 0x341   : > { %3820 = vperm.xlu0 %20568, %v3814_v61  }
 0x343   : > { %2742 = vmatpush1.bf16.msra.mxu0 %v20939_v62  ;;  %v3817_v62 = vld [vmem:[%s21833_s17 + $0x18] sm:$0xff] }
 0x344   : > { %3835 = vperm.xlu1 %20569, %v3817_v62  }
 0x345   : > { %3825 = vperm.xlu0 %20568, %v3815_v63  }
 0x346   : > { %2744 = vmatmul.mubr.bf16.vlgmr.msra.gmra.mrb[12].mxu0 %v22007_v38 }
 0x347   : > { %2813 = vmatprep.mubr.bf16.mxu0 %v24567_v40 }
 0x348   : > { %3857 = vperm.xlu1 %20569, %v3847_v0  }
 0x349   : > { %3852 = vperm.xlu0 %20568, %v3846_v1  }
 0x34c   : > { %3867 = vperm.xlu1 %20569, %v3849_v2  }
 0x34d   : > { %3862 = vperm.xlu0 %20568, %v3848_v3  }
 0x3c0   : > { %v3821_v14 = vpop.permute.xlu0 %3820 }
 0x419   : > { %v2745_v7 = vpop.f32.mrb[12].mxu0 }
 0x41a   : > { %v2757_v8 = vpack.c.bf16 %v2745_v7, %v2745_v7  ;;  %v2747_v9 = vpop.f32.mrb[13].mxu0 }
 0x41b   : > { %v2758_v10 = vpack.c.bf16 %v2747_v9, %v2747_v9  ;;  %v2749_v11 = vpop.f32.mrb[14].mxu0 }
 0x41c   : > { %v2776_v12 = vsel %vm1411_vm0, %v2757_v8, 0  ;;  %v2750_v13 = vpop.f32.mrb[15].mxu0  ;;  %v21021_v11 = vld [vmem:[%s21828_s13 + $0x88] sm:$0xff]  }
 0x41d   : > { %16223 = vmatprep.subr.msk.bf16.mxu0 %vm1411_vm0, %v2758_v10  ;;  %v21020_v10 = vld [vmem:[%s21828_s13 + $0x80] sm:$0xff]   ;;  %v21023_v13 = vld [vmem:[%s21843_s25 + $0x8] sm:$0xff]  }
 0x41e   : > { %2782 = vmatpush1.bf16.msra.mxu0 %v2776_v12  ;;  %v21022_v12 = vld [vmem:[%s21843_s25] sm:$0xff]  }
 0x41f   : > { %16296 = vmatprep.subr.msk.bf16.mxu0 %vm1411_vm0, %v3082_v15  ;;  %19161 = vmatprep.subr.bf16.mxu1 %v21022_v12  ;;  %v3831_v15 = vpop.permute.xlu1 %3830 }
 0x420   : > { %19162 = vmatpush3.bf16.msra.mxu1 %v21022_v12 }
 0x421   : > { %16224 = vmatmul.mubr.msk.bf16.vlgmr.msra.gmra.mrb[0].mxu0 %vm1404_vm1, %v20966_v16  ;;  %19163 = vmatprep.subr.bf16.mxu1 %v21023_v13  ;;  %v3826_v16 = vpop.permute.xlu0 %3825 }
 0x422   : > { %3106 = vmatpush1.bf16.msra.mxu0 %v3100_v19  ;;  %2823 = vmatprep.mubr.bf16.mxu0 %v24567_v40 }
 0x423   : > { %16369 = vmatprep.subr.msk.bf16.mxu0 %vm1411_vm0, %v3406_v18  ;;  %v3836_v18 = vpop.permute.xlu1 %3835 }
 0x424   : > { %19164 = vmatpush3.bf16.msra.mxu1 %v21023_v13 }
 0x429   : > { %16225 = vmatmul.mubr.msk.bf16.gmra.mrb[4].mxu0 %vm1404_vm1, %v20967_v20 }
 0x42a   : > { %3137 = vmatprep.mubr.bf16.mxu0 %v24567_v40 }
 0x431   : > { %16297 = vmatmul.mubr.msk.bf16.vlgmr.msra.gmra.mrb[0].mxu0 %vm1404_vm1, %v20968_v22  ;;  %v3853_v22 = vpop.permute.xlu0 %3852 }
 0x432   : > { %3147 = vmatprep.mubr.bf16.mxu0 %v24567_v40  ;;  %3430 = vmatpush1.bf16.msra.mxu0 %v3424_v23 }
 0x433   : > { %3683 = vmatprep.subr.bf16.mxu0 %v20972_v26 }
 0x439   : > { %16298 = vmatmul.mubr.msk.bf16.gmra.mrb[4].mxu0 %vm1404_vm1, %v20969_v27 }
 0x43a   : > { %3461 = vmatprep.mubr.bf16.mxu0 %v24567_v40 }
 0x441   : > { %16370 = vmatmul.mubr.msk.bf16.vlgmr.msra.gmra.mrb[0].mxu0 %vm1404_vm1, %v20973_v28 }
 0x442   : > { %3684 = vmatpush1.bf16.msra.mxu0 %v20970_v24  ;;  %3471 = vmatprep.mubr.bf16.mxu0 %v24567_v40 }
 0x443   : > { %3685 = vmatprep.subr.bf16.mxu0 %v20976_v25  ;;  %v3858_v25 = vpop.permute.xlu1 %3857 }
 0x446   : > { %3686 = vmatpush1.bf16.msra.mxu0 %v20974_v29 }
 0x447   : > { %3687 = vmatprep.subr.bf16.mxu0 %v20979_v30 }
 0x449   : > { %16371 = vmatmul.mubr.msk.bf16.gmra.mrb[4].mxu0 %vm1404_vm1, %v21013_v31 }
 0x44a   : > { %3688 = vmatpush1.bf16.msra.mxu0 %v20977_v32  ;;  %3715 = vmatprep.mubr.bf16.mxu0 %v21984_v17  ;;  %v20994_v17 = vld [vmem:[%s21823_s9 + $0x874] ss:$8 sps:$4 sm:$0xff]  }
 0x44b   : > { %3689 = vmatprep.subr.bf16.mxu0 %v20982_v33 }
 0x44e   : > { %3690 = vmatpush1.bf16.msra.mxu0 %v20980_v34 }
 0x44f   : > { %3691 = vmatprep.subr.bf16.mxu0 %v20985_v35 }
 0x452   : > { %3692 = vmatpush1.bf16.msra.mxu0 %v20983_v36 }
 0x453   : > { %3693 = vmatprep.subr.bf16.mxu0 %v20988_v37 }
 0x456   : > { %3694 = vmatpush1.bf16.msra.mxu0 %v20986_v39 }
 0x457   : > { %3695 = vmatprep.subr.bf16.mxu0 %v20991_v41 }
 0x45a   : > { %3696 = vmatpush1.bf16.msra.mxu0 %v20989_v42 }
 0x45b   : > { %3697 = vmatprep.subr.bf16.mxu0 %v20994_v17 }
 0x45e   : > { %3698 = vmatpush1.bf16.msra.mxu0 %v20992_v43  ;;  %v3863_v43 = vpop.permute.xlu0 %3862 }
 0x45f   : > { %3699 = vmatprep.subr.bf16.mxu0 %v20997_v44 }
 0x462   : > { %3700 = vmatpush1.bf16.msra.mxu0 %v20995_v45 }
 0x463   : > { %3701 = vmatprep.subr.bf16.mxu0 %v21000_v46 }
 0x466   : > { %3702 = vmatpush1.bf16.msra.mxu0 %v20998_v47 }
 0x467   : > { %3703 = vmatprep.subr.bf16.mxu0 %v21003_v48 }
 0x46a   : > { %3704 = vmatpush1.bf16.msra.mxu0 %v21001_v49 }
 0x46b   : > { %3705 = vmatprep.subr.bf16.mxu0 %v21006_v50 }
 0x46e   : > { %3706 = vmatpush1.bf16.msra.mxu0 %v21004_v51 }
 0x46f   : > { %3707 = vmatprep.subr.bf16.mxu0 %v21009_v52 }
 0x472   : > { %3708 = vmatpush1.bf16.msra.mxu0 %v21007_v53  ;;  %v3868_v53 = vpop.permute.xlu1 %3867 }
 0x473   : > { %3709 = vmatprep.subr.bf16.mxu0 %v21012_v54 }
 0x476   : > { %3710 = vmatpush1.bf16.msra.mxu0 %v21010_v55 }
 0x477   : > { %3711 = vmatprep.subr.bf16.mxu0 %v21016_v56 }
 0x47a   : > { %3712 = vmatpush1.bf16.msra.mxu0 %v21014_v57 }
 0x47b   : > { %3713 = vmatprep.subr.bf16.mxu0 %v21019_v58 }
 0x47e   : > { %3714 = vmatpush1.bf16.msra.mxu0 %v21017_v59 }
 0x481   : > { %3716 = vmatmul.mubr.bf16.vlgmr.msra.gmra.mrb[16].mxu0 %v22007_v38 }
 0x482   : > { %3785 = vmatprep.mubr.bf16.mxu0 %v24567_v40 }
 0x554   : > { %v3717_v38 = vpop.f32.mrb[16].mxu0 }
 0x555   : > { %v3729_v4 = vpack.c.bf16 %v3717_v38, %v3717_v38  ;;  %v3719_v5 = vpop.f32.mrb[17].mxu0  ;;  %v4171_v38 = vld [vmem:[%s21853_s3] sm:$0x3] }
 0x556   : > { %v3730_v6 = vpack.c.bf16 %v3719_v5, %v3719_v5  ;;  %v3721_v7 = vpop.f32.mrb[18].mxu0 }
 0x557   : > { %v3748_v8 = vsel %vm1411_vm0, %v3729_v4, 0  ;;  %v3722_v9 = vpop.f32.mrb[19].mxu0  ;;  %v4172_v4 = vld [vmem:[%s21858_s8] sm:$0xf] }
 0x558   : > { %16442 = vmatprep.subr.msk.bf16.mxu0 %vm1411_vm0, %v3730_v6 }
 0x559   : > { %3754 = vmatpush1.bf16.msra.mxu0 %v3748_v8 }
 0x55c   : > { %16443 = vmatmul.mubr.msk.bf16.vlgmr.msra.gmra.mrb[0].mxu0 %vm1404_vm1, %v21020_v10 }
 0x55d   : > { %3795 = vmatprep.mubr.bf16.mxu0 %v24567_v40 }
 0x564   : > { %16444 = vmatmul.mubr.msk.bf16.gmra.mrb[4].mxu0 %vm1404_vm1, %v21021_v11 }
 0x565   : > { %4213 = vmatprep.mubr.bf16.mxu0 %v24567_v40 }
 0x62f   : > { %v3787_v19 = vpop.f32.mrb[0].mxu0 }
 0x630   : > { %v3838_v20 = vmul.f32 %v3821_v14, %v3787_v19  ;;  %v3789_v21 = vpop.f32.mrb[1].mxu0 }
 0x631   : > { %v3839_v23 = vmul.f32 %v3821_v14, %v3789_v21  ;;  %v3791_v26 = vpop.f32.mrb[2].mxu0 }
 0x632   : > { %v3870_v27 = vadd.f32 %v3853_v22, %v3838_v20  ;;  %v3840_v28 = vmul.f32 %v3826_v16, %v3791_v26  ;;  %v3793_v24 = vpop.f32.mrb[3].mxu0 }
 0x633   : > { %v3871_v29 = vadd.f32 %v3853_v22, %v3839_v23  ;;  %v3841_v30 = vmul.f32 %v3826_v16, %v3793_v24 }
 0x634   : > { %v3886_v31 = vmul.f32 0.1, %v3870_v27  ;;  %v3872_v32 = vadd.f32 %v3858_v25, %v3840_v28  ;;  %vm3878_vm2 = vcmp.ge.f32.partialorder %v3870_v27, 0.0 }
 0x635   : > { %v3887_v33 = vmul.f32 0.1, %v3871_v29  ;;  %v3873_v34 = vadd.f32 %v3858_v25, %v3841_v30  ;;  %vm3879_vm3 = vcmp.ge.f32.partialorder %v3871_v29, 0.0 }
 0x636   : > { %vm3880_vm4 = vcmp.ge.f32.partialorder %v3872_v32, 0.0  ;;  %v3888_v35 = vmul.f32 0.1, %v3872_v32  ;;  %v22382_v42 = vsel %vm3878_vm2, %v3870_v27, %v3886_v31 }
 0x637   : > { %vm3881_vm5 = vcmp.ge.f32.partialorder %v3873_v34, 0.0  ;;  %v3889_v36 = vmul.f32 0.1, %v3873_v34  ;;  %v3797_v37 = vpop.f32.mrb[4].mxu0  ;;  %24614 = vst [vmem:[#allocation16_spill] sm:$0xff] %v22382_v42  ;;  %v22388_v47 = vsel %vm3879_vm3, %v3871_v29, %v3887_v33 }
 0x638   : > { %v3842_v39 = vmul.f32 %v3831_v15, %v3797_v37  ;;  %v3799_v41 = vpop.f32.mrb[5].mxu0  ;;  %v22384_v17 = vsel %vm3880_vm4, %v3872_v32, %v3888_v35  ;;  %24616 = vst [vmem:[#allocation18_spill] sm:$0xff] %v22388_v47  ;;  %v22428_v33 = vld [vmem:[%s21848_s29] ss:$0 sm:$0xff] }
 0x639   : > { %24615 = vst [vmem:[#allocation17_spill] sm:$0xff] %v22384_v17  ;;  %v3843_v44 = vmul.f32 %v3831_v15, %v3799_v41  ;;  %v3801_v45 = vpop.f32.mrb[6].mxu0  ;;  %v3902_v46 = vpack.c.bf16 %v22384_v17, %v22382_v42  ;;  %v22390_v48 = vsel %vm3881_vm5, %v3873_v34, %v3889_v36 }
 0x63a   : > { %24617 = vst [vmem:[#allocation19_spill] sm:$0xff] %v22390_v48  ;;  %v3874_v49 = vadd.f32 %v3863_v43, %v3842_v39  ;;  %v3844_v50 = vmul.f32 %v3836_v18, %v3801_v45  ;;  %v3803_v51 = vpop.f32.mrb[7].mxu0  ;;  %v3903_v52 = vpack.c.bf16 %v22390_v48, %v22388_v47  ;;  %v21024_v47 = vld [vmem:[%s21863_s14] sm:$0xff]  }
 0x63b   : > { %v3875_v54 = vadd.f32 %v3863_v43, %v3843_v44  ;;  %v3845_v55 = vmul.f32 %v3836_v18, %v3803_v51  ;;  %3917 = vxpose.xlu0.c.b16.start [1/2] (short) %v3902_v46, 128 }
 0x63c   : > { %v3890_v56 = vmul.f32 0.1, %v3874_v49  ;;  %v3876_v57 = vadd.f32 %v3868_v53, %v3844_v50  ;;  %3933 = vxpose.xlu1.c.b16.start [1/2] (short) %v3903_v52, 128  ;;  %4181 = vmatprep.subr.bf16.mxu0 %v3903_v52  ;;  %vm3882_vm6 = vcmp.ge.f32.partialorder %v3874_v49, 0.0 }
 0x63d   : > { %v3891_v58 = vmul.f32 0.1, %v3875_v54  ;;  %v3877_v59 = vadd.f32 %v3868_v53, %v3845_v55  ;;  %4182 = vmatpush1.bf16.msra.mxu0 %v3902_v46  ;;  %vm3883_vm7 = vcmp.ge.f32.partialorder %v3875_v54, 0.0 }
 0x63e   : > { %vm3884_vm8 = vcmp.ge.f32.partialorder %v3876_v57, 0.0  ;;  %v3892_v60 = vmul.f32 0.1, %v3876_v57  ;;  %v22394_v62 = vsel %vm3882_vm6, %v3874_v49, %v3890_v56 }
 0x63f   : > { %vm3885_vm9 = vcmp.ge.f32.partialorder %v3877_v59, 0.0  ;;  %v3893_v61 = vmul.f32 0.1, %v3877_v59  ;;  %24618 = vst [vmem:[#allocation20_spill] sm:$0xff] %v22394_v62  ;;  %v22398_v0 = vsel %vm3883_vm7, %v3875_v54, %v3891_v58  ;;  %vm10066_vm7 = vcmask 523264  }
 0x640   : > { %v22396_v63 = vsel %vm3884_vm8, %v3876_v57, %v3892_v60  ;;  %24620 = vst [vmem:[#allocation22_spill] sm:$0xff] %v22398_v0  ;;  %vm21809_vm8 = vmmov 0  }
 0x641   : > { %24619 = vst [vmem:[#allocation21_spill] sm:$0xff] %v22396_v63  ;;  %v22400_v1 = vsel %vm3885_vm9, %v3877_v59, %v3893_v61  ;;  %v3904_v2 = vpack.c.bf16 %v22396_v63, %v22394_v62 }
 0x642   : > { %24621 = vst [vmem:[#allocation23_spill] sm:$0xff] %v22400_v1  ;;  %v3905_v3 = vpack.c.bf16 %v22400_v1, %v22398_v0  ;;  %v21025_v0 = vld [vmem:[%s21863_s14 + $0x8] sm:$0xff]  }
 0x643   : > { %3918 = vxpose.xlu0.c.b16.end [2/2] (short) %v3904_v2, 128 }
 0x644   : > { %3934 = vxpose.xlu1.c.b16.end [2/2] (short) %v3905_v3, 128  ;;  %4183 = vmatprep.subr.bf16.mxu0 %v3905_v3 }
 0x645   : > { %4184 = vmatpush1.bf16.msra.mxu0 %v3904_v2 }
 0x646   : > { %4266 = vmatprep.subr.bf16.mxu0 %v3903_v52 }
 0x648   : > { %16464 = vmatmul.mubr.msk.bf16.vlgmr.msra.gmra.mrb[20].mxu0 %vm3961_vm10, %v4171_v38 }
 0x649   : > { %4267 = vmatpush1.bf16.msra.mxu0 %v3902_v46  ;;  %4298 = vmatprep.mubr.bf16.mxu0 %v24567_v40 }
 0x64a   : > { %4268 = vmatprep.subr.bf16.mxu0 %v3905_v3 }
 0x64d   : > { %4269 = vmatpush1.bf16.msra.mxu0 %v3904_v2 }
 0x650   : > { %16467 = vmatmul.mubr.msk.bf16.vlgmr.msra.gmra.mrb[24].mxu0 %vm3961_vm10, %v21024_v47 }
 0x664   : > { %4175 = vperm.xlu0 %20568, %v4172_v4  }
 0x6a5   : > { %v3925_v5 = vpop.trf.xlu0 }
 0x6a6   : > { %19165 = vmatprep.mubr.msk.bf16.mxu1 %vm3961_vm10, %v3925_v5  ;;  %v3941_v11 = vpop.trf.xlu1 }
 0x6a9   : > { %v3926_v6 = vpop.trf.xlu0 }
 0x6aa   : > { %19166 = vmatmul.mubr.msk.bf16.vlgmr.msra.gmra.mrb[24].mxu1 %vm3961_vm10, %v3926_v6  ;;  %v3942_v14 = vpop.trf.xlu1 }
 0x6ad   : > { %v3927_v7 = vpop.trf.xlu0 }
 0x6ae   : > { %19169 = vmatprep.mubr.msk.bf16.mxu1 %vm3961_vm10, %v3927_v7  ;;  %v3943_v15 = vpop.trf.xlu1 }
 0x6b1   : > { %v3928_v8 = vpop.trf.xlu0 }
 0x6b2   : > { %19170 = vmatmul.mubr.msk.bf16.gmra.mrb[28].mxu1 %vm3961_vm10, %v3928_v8  ;;  %v3944_v16 = vpop.trf.xlu1 }
 0x6b5   : > { %v3929_v9 = vpop.trf.xlu0 }
 0x6b6   : > { %19173 = vmatprep.mubr.msk.bf16.mxu1 %vm3961_vm10, %v3929_v9  ;;  %v3945_v18 = vpop.trf.xlu1 }
 0x6b9   : > { %v3930_v10 = vpop.trf.xlu0 }
 0x6ba   : > { %19174 = vmatmul.mubr.msk.bf16.gmra.mrb[32].mxu1 %vm3961_vm10, %v3930_v10  ;;  %v3946_v19 = vpop.trf.xlu1 }
 0x6bd   : > { %v3931_v12 = vpop.trf.xlu0 }
 0x6be   : > { %19177 = vmatprep.mubr.msk.bf16.mxu1 %vm3961_vm10, %v3931_v12  ;;  %v3947_v20 = vpop.trf.xlu1 }
 0x6c1   : > { %v3932_v13 = vpop.trf.xlu0 }
 0x6c2   : > { %19178 = vmatmul.mubr.msk.bf16.gmra.mrb[36].mxu1 %vm3961_vm10, %v3932_v13  ;;  %v3948_v21 = vpop.trf.xlu1 }
 0x6c3   : > { %19181 = vmatprep.mubr.msk.bf16.mxu1 %vm3961_vm10, %v3941_v11 }
 0x6ca   : > { %19182 = vmatmul.mubr.msk.bf16.gmra.mrb[40].mxu1 %vm3961_vm10, %v3942_v14 }
 0x6cb   : > { %19185 = vmatprep.mubr.msk.bf16.mxu1 %vm3961_vm10, %v3943_v15 }
 0x6d2   : > { %19186 = vmatmul.mubr.msk.bf16.gmra.mrb[44].mxu1 %vm3961_vm10, %v3944_v16 }
 0x6d3   : > { %19189 = vmatprep.mubr.msk.bf16.mxu1 %vm3961_vm10, %v3945_v18 }
 0x6da   : > { %19190 = vmatmul.mubr.msk.bf16.gmra.mrb[48].mxu1 %vm3961_vm10, %v3946_v19 }
 0x6db   : > { %19193 = vmatprep.mubr.msk.bf16.mxu1 %vm3961_vm10, %v3947_v20 }
 0x6e2   : > { %19194 = vmatmul.mubr.msk.bf16.gmra.mrb[52].mxu1 %vm3961_vm10, %v3948_v21 }
 0x6e3   : > { %4425 = vmatprep.mubr.bf16.mxu1 %v24567_v40  ;;  %v4176_v22 = vpop.permute.xlu0 %4175 }
 0x71b   : > { %v4215_v23 = vpop.f32.mrb[20].mxu0 }
 0x71c   : > { %v4216_v26 = vadd.f32 %v4215_v23, %v4176_v22  ;;  %v4217_v27 = vpop.f32.mrb[21].mxu0 }
 0x71d   : > { %v4218_v28 = vadd.f32 %v4217_v27, %v4176_v22  ;;  %v4219_v24 = vpop.f32.mrb[22].mxu0 }
 0x71e   : > { %v4335_v25 = vpack.c.bf16 %v4216_v26, %v4216_v26  ;;  %v4220_v29 = vpop.f32.mrb[23].mxu0 }
 0x71f   : > { %v4336_v30 = vpack.c.bf16 %v4218_v28, %v4218_v28 }
 0x720   : > { %v4388_v31 = vsel %vm4386_vm11, %v4335_v25, 0 }
 0x721   : > { %16469 = vmatprep.subr.msk.bf16.mxu1 %vm4386_vm11, %v4336_v30 }
 0x722   : > { %4394 = vmatpush1.bf16.msra.mxu1 %v4388_v31 }
 0x77d   : > { %v19167_v32 = vpop.f32.mrb[24].mxu1 }
 0x77e   : > { %v4044_v34 = vpop.f32.mrb[25].mxu1  ;;  %v4053_v36 = vadd.f32 %v19167_v32, %v22428_v33 }
 0x77f   : > { %v19168_v35 = vpop.f32.mrb[26].mxu1  ;;  %v4045_v41 = vadd.f32 %v22428_v33, %v4044_v34 }
 0x780   : > { %v4056_v37 = vadd.f32 %v19168_v35, %v22428_v33  ;;  %v4047_v39 = vpop.f32.mrb[27].mxu1 }
 0x781   : > { %v4048_v43 = vadd.f32 %v22428_v33, %v4047_v39 }
 0x782   : > { %v4320_v44 = vpack.c.bf16 %v4056_v37, %v4053_v36 }
 0x783   : > { %v4319_v45 = vpack.c.bf16 %v4048_v43, %v4045_v41 }
 0x785   : > { %16470 = vmatmul.mubr.msk.bf16.vlgmr.msra.gmra.mrb[56].mxu1 %vm4337_vm12, %v4319_v45  ;;  %v19171_v46 = vpop.f32.mrb[28].mxu1 }
 0x786   : > { %4435 = vmatprep.mubr.bf16.mxu1 %v24567_v40  ;;  %v4069_v49 = vadd.f32 %v19171_v46, %v22428_v33  ;;  %v4060_v50 = vpop.f32.mrb[29].mxu1 }
 0x787   : > { %v4061_v51 = vadd.f32 %v22428_v33, %v4060_v50  ;;  %v19172_v52 = vpop.f32.mrb[30].mxu1 }
 0x788   : > { %v4072_v53 = vadd.f32 %v19172_v52, %v22428_v33  ;;  %v4063_v54 = vpop.f32.mrb[31].mxu1 }
 0x789   : > { %v4064_v55 = vadd.f32 %v22428_v33, %v4063_v54 }
 0x78a   : > { %v4322_v56 = vpack.c.bf16 %v4072_v53, %v4069_v49 }
 0x78b   : > { %v4321_v57 = vpack.c.bf16 %v4064_v55, %v4061_v51 }
 0x78d   : > { %16471 = vmatmul.mubr.msk.bf16.gmra.mrb[60].mxu1 %vm4337_vm12, %v4320_v44  ;;  %v19175_v58 = vpop.f32.mrb[32].mxu1 }
 0x78e   : > { %4445 = vmatprep.mubr.bf16.mxu1 %v24567_v40  ;;  %v4085_v59 = vadd.f32 %v19175_v58, %v22428_v33  ;;  %v4076_v60 = vpop.f32.mrb[33].mxu1 }
 0x78f   : > { %v4077_v61 = vadd.f32 %v22428_v33, %v4076_v60  ;;  %v19176_v2 = vpop.f32.mrb[34].mxu1 }
 0x790   : > { %v4088_v3 = vadd.f32 %v19176_v2, %v22428_v33  ;;  %v4079_v38 = vpop.f32.mrb[35].mxu1 }
 0x791   : > { %v4080_v4 = vadd.f32 %v22428_v33, %v4079_v38 }
 0x792   : > { %v4324_v5 = vpack.c.bf16 %v4088_v3, %v4085_v59 }
 0x793   : > { %v4323_v6 = vpack.c.bf16 %v4080_v4, %v4077_v61 }
 0x795   : > { %16472 = vmatmul.mubr.msk.bf16.gmra.mrb[64].mxu1 %vm4337_vm12, %v4321_v57  ;;  %v19179_v7 = vpop.f32.mrb[36].mxu1 }
 0x796   : > { %4455 = vmatprep.mubr.bf16.mxu1 %v24567_v40  ;;  %v4101_v8 = vadd.f32 %v19179_v7, %v22428_v33  ;;  %v4092_v9 = vpop.f32.mrb[37].mxu1 }
 0x797   : > { %v4093_v10 = vadd.f32 %v22428_v33, %v4092_v9  ;;  %v19180_v11 = vpop.f32.mrb[38].mxu1 }
 0x798   : > { %v4104_v12 = vadd.f32 %v19180_v11, %v22428_v33  ;;  %v4095_v13 = vpop.f32.mrb[39].mxu1 }
 0x799   : > { %v4096_v14 = vadd.f32 %v22428_v33, %v4095_v13 }
 0x79a   : > { %v4326_v15 = vpack.c.bf16 %v4104_v12, %v4101_v8 }
 0x79b   : > { %v4325_v16 = vpack.c.bf16 %v4096_v14, %v4093_v10 }
 0x79d   : > { %16473 = vmatmul.mubr.msk.bf16.gmra.mrb[68].mxu1 %vm4337_vm12, %v4322_v56  ;;  %v19183_v18 = vpop.f32.mrb[40].mxu1 }
 0x79e   : > { %4465 = vmatprep.mubr.bf16.mxu1 %v24567_v40  ;;  %v4117_v19 = vadd.f32 %v19183_v18, %v22428_v33  ;;  %v4108_v20 = vpop.f32.mrb[41].mxu1 }
 0x79f   : > { %v4109_v21 = vadd.f32 %v22428_v33, %v4108_v20  ;;  %v19184_v22 = vpop.f32.mrb[42].mxu1 }
 0x7a0   : > { %v4120_v23 = vadd.f32 %v19184_v22, %v22428_v33  ;;  %v4111_v26 = vpop.f32.mrb[43].mxu1 }
 0x7a1   : > { %v4112_v27 = vadd.f32 %v22428_v33, %v4111_v26 }
 0x7a2   : > { %v4328_v28 = vpack.c.bf16 %v4120_v23, %v4117_v19 }
 0x7a3   : > { %v4327_v24 = vpack.c.bf16 %v4112_v27, %v4109_v21 }
 0x7a5   : > { %16474 = vmatmul.mubr.msk.bf16.gmra.mrb[72].mxu1 %vm4337_vm12, %v4323_v6  ;;  %v19187_v25 = vpop.f32.mrb[44].mxu1 }
 0x7a6   : > { %4475 = vmatprep.mubr.bf16.mxu1 %v24567_v40  ;;  %v4133_v29 = vadd.f32 %v19187_v25, %v22428_v33  ;;  %v4124_v30 = vpop.f32.mrb[45].mxu1 }
 0x7a7   : > { %v4125_v31 = vadd.f32 %v22428_v33, %v4124_v30  ;;  %v19188_v32 = vpop.f32.mrb[46].mxu1 }
 0x7a8   : > { %v4136_v34 = vadd.f32 %v19188_v32, %v22428_v33  ;;  %v4127_v35 = vpop.f32.mrb[47].mxu1 }
 0x7a9   : > { %v4128_v36 = vadd.f32 %v22428_v33, %v4127_v35 }
 0x7aa   : > { %v4330_v37 = vpack.c.bf16 %v4136_v34, %v4133_v29 }
 0x7ab   : > { %v4329_v39 = vpack.c.bf16 %v4128_v36, %v4125_v31 }
 0x7ad   : > { %16475 = vmatmul.mubr.msk.bf16.gmra.mrb[76].mxu1 %vm4337_vm12, %v4324_v5  ;;  %v19191_v41 = vpop.f32.mrb[48].mxu1 }
 0x7ae   : > { %4485 = vmatprep.mubr.bf16.mxu1 %v24567_v40  ;;  %v4149_v43 = vadd.f32 %v19191_v41, %v22428_v33  ;;  %v4140_v44 = vpop.f32.mrb[49].mxu1 }
 0x7af   : > { %v4141_v45 = vadd.f32 %v22428_v33, %v4140_v44  ;;  %v19192_v46 = vpop.f32.mrb[50].mxu1 }
 0x7b0   : > { %v4152_v49 = vadd.f32 %v19192_v46, %v22428_v33  ;;  %v4143_v50 = vpop.f32.mrb[51].mxu1 }
 0x7b1   : > { %v4144_v51 = vadd.f32 %v22428_v33, %v4143_v50 }
 0x7b2   : > { %v4332_v52 = vpack.c.bf16 %v4152_v49, %v4149_v43 }
 0x7b3   : > { %v4331_v53 = vpack.c.bf16 %v4144_v51, %v4141_v45 }
 0x7b5   : > { %16476 = vmatmul.mubr.msk.bf16.gmra.mrb[80].mxu1 %vm4337_vm12, %v4325_v16  ;;  %v19195_v54 = vpop.f32.mrb[52].mxu1 }
 0x7b6   : > { %4495 = vmatprep.mubr.bf16.mxu1 %v24567_v40  ;;  %v4165_v55 = vadd.f32 %v19195_v54, %v22428_v33  ;;  %v4156_v56 = vpop.f32.mrb[53].mxu1 }
 0x7b7   : > { %v4157_v57 = vadd.f32 %v22428_v33, %v4156_v56  ;;  %v19196_v58 = vpop.f32.mrb[54].mxu1 }
 0x7b8   : > { %v4168_v59 = vadd.f32 %v19196_v58, %v22428_v33  ;;  %v4159_v60 = vpop.f32.mrb[55].mxu1 }
 0x7b9   : > { %v4160_v61 = vadd.f32 %v22428_v33, %v4159_v60 }
 0x7ba   : > { %v4334_v2 = vpack.c.bf16 %v4168_v59, %v4165_v55 }
 0x7bb   : > { %v4333_v3 = vpack.c.bf16 %v4160_v61, %v4157_v57 }
 0x7bd   : > { %16477 = vmatmul.mubr.msk.bf16.gmra.mrb[84].mxu1 %vm4337_vm12, %v4326_v15 }
 0x7be   : > { %4505 = vmatprep.mubr.bf16.mxu1 %v24567_v40 }
 0x7c5   : > { %16478 = vmatmul.mubr.msk.bf16.gmra.mrb[88].mxu1 %vm4337_vm12, %v4327_v24 }
 0x7c6   : > { %4515 = vmatprep.mubr.bf16.mxu1 %v24567_v40 }
 0x7cd   : > { %16479 = vmatmul.mubr.msk.bf16.gmra.mrb[92].mxu1 %vm4337_vm12, %v4328_v28 }
 0x7ce   : > { %4525 = vmatprep.mubr.bf16.mxu1 %v24567_v40 }
 0x7d5   : > { %16480 = vmatmul.mubr.msk.bf16.gmra.mrb[96].mxu1 %vm4337_vm12, %v4329_v39 }
 0x7d6   : > { %4535 = vmatprep.mubr.bf16.mxu1 %v24567_v40 }
 0x7dd   : > { %16481 = vmatmul.mubr.msk.bf16.gmra.mrb[100].mxu1 %vm4337_vm12, %v4330_v37 }
 0x7de   : > { %4545 = vmatprep.mubr.bf16.mxu1 %v24567_v40 }
 0x7e5   : > { %16482 = vmatmul.mubr.msk.bf16.gmra.mrb[104].mxu1 %vm4337_vm12, %v4331_v53 }
 0x7e6   : > { %4555 = vmatprep.mubr.bf16.mxu1 %v24567_v40 }
 0x7ed   : > { %16483 = vmatmul.mubr.msk.bf16.gmra.mrb[108].mxu1 %vm4337_vm12, %v4332_v52 }
 0x7ee   : > { %4565 = vmatprep.mubr.bf16.mxu1 %v24567_v40 }
 0x7f5   : > { %16484 = vmatmul.mubr.msk.bf16.gmra.mrb[112].mxu1 %vm4337_vm12, %v4333_v3 }
 0x7f6   : > { %4575 = vmatprep.mubr.bf16.mxu1 %v24567_v40 }
 0x7fd   : > { %16485 = vmatmul.mubr.msk.bf16.gmra.mrb[116].mxu1 %vm4337_vm12, %v4334_v2 }
 0x858   : > { %v22493_v33 = vpop.f32.mrb[56].mxu1 }
 0x859   : > { %v22495_v38 = vpop.f32.mrb[57].mxu1 }
 0x85a   : > { %v22497_v4 = vpop.f32.mrb[58].mxu1  ;;  %v4586_v5 = vmax.f32 %v22493_v33, %v22495_v38 }
 0x85b   : > { %v22501_v6 = vpop.f32.mrb[59].mxu1 }
 0x85c   : > { %4587 = vmax.xlane.f32.xlu1 %v4586_v5  ;;  %v4589_v7 = vmax.f32 %v22497_v4, %v22501_v6 }
 0x85e   : > { %4590 = vmax.xlane.f32.xlu0 %v4589_v7 }
 0x860   : > { %v22505_v8 = vpop.f32.mrb[60].mxu1 }
 0x861   : > { %v22507_v9 = vpop.f32.mrb[61].mxu1 }
 0x862   : > { %v22509_v10 = vpop.f32.mrb[62].mxu1  ;;  %v4592_v11 = vmax.f32 %v22505_v8, %v22507_v9 }
 0x863   : > { %v22513_v12 = vpop.f32.mrb[63].mxu1 }
 0x864   : > { %4593 = vmax.xlane.f32.xlu1 %v4592_v11  ;;  %v4595_v13 = vmax.f32 %v22509_v10, %v22513_v12 }
 0x868   : > { %4596 = vmax.xlane.f32.xlu1 %v4595_v13  ;;  %v22517_v14 = vpop.f32.mrb[64].mxu1 }
 0x869   : > { %v22519_v15 = vpop.f32.mrb[65].mxu1 }
 0x86a   : > { %v4598_v16 = vmax.f32 %v22517_v14, %v22519_v15  ;;  %v22523_v18 = vpop.f32.mrb[66].mxu1 }
 0x86b   : > { %v22525_v19 = vpop.f32.mrb[67].mxu1 }
 0x86c   : > { %4599 = vmax.xlane.f32.xlu1 %v4598_v16  ;;  %v4601_v20 = vmax.f32 %v22523_v18, %v22525_v19 }
 0x870   : > { %4602 = vmax.xlane.f32.xlu1 %v4601_v20  ;;  %v22529_v21 = vpop.f32.mrb[68].mxu1 }
 0x871   : > { %v22531_v22 = vpop.f32.mrb[69].mxu1 }
 0x872   : > { %v4604_v23 = vmax.f32 %v22529_v21, %v22531_v22  ;;  %v22535_v26 = vpop.f32.mrb[70].mxu1 }
 0x873   : > { %v22537_v27 = vpop.f32.mrb[71].mxu1 }
 0x874   : > { %4605 = vmax.xlane.f32.xlu1 %v4604_v23  ;;  %v4607_v28 = vmax.f32 %v22535_v26, %v22537_v27 }
 0x878   : > { %4608 = vmax.xlane.f32.xlu1 %v4607_v28  ;;  %v22541_v24 = vpop.f32.mrb[72].mxu1 }
 0x879   : > { %v22543_v25 = vpop.f32.mrb[73].mxu1 }
 0x87a   : > { %v22545_v29 = vpop.f32.mrb[74].mxu1  ;;  %v4610_v30 = vmax.f32 %v22541_v24, %v22543_v25 }
 0x87b   : > { %v22549_v31 = vpop.f32.mrb[75].mxu1 }
 0x87c   : > { %4611 = vmax.xlane.f32.xlu0 %v4610_v30  ;;  %v4613_v32 = vmax.f32 %v22545_v29, %v22549_v31 }
 0x87e   : > { %4614 = vmax.xlane.f32.xlu1 %v4613_v32 }
 0x880   : > { %v22553_v34 = vpop.f32.mrb[76].mxu1 }
 0x881   : > { %v22555_v35 = vpop.f32.mrb[77].mxu1 }
 0x882   : > { %v22557_v36 = vpop.f32.mrb[78].mxu1  ;;  %v4616_v37 = vmax.f32 %v22553_v34, %v22555_v35 }
 0x883   : > { %v22561_v39 = vpop.f32.mrb[79].mxu1 }
 0x884   : > { %4617 = vmax.xlane.f32.xlu0 %v4616_v37  ;;  %v4619_v41 = vmax.f32 %v22557_v36, %v22561_v39 }
 0x886   : > { %4620 = vmax.xlane.f32.xlu1 %v4619_v41 }
 0x888   : > { %v22565_v43 = vpop.f32.mrb[80].mxu1 }
 0x889   : > { %v22567_v44 = vpop.f32.mrb[81].mxu1 }
 0x88a   : > { %v22569_v45 = vpop.f32.mrb[82].mxu1  ;;  %v4622_v46 = vmax.f32 %v22565_v43, %v22567_v44 }
 0x88b   : > { %v22573_v49 = vpop.f32.mrb[83].mxu1 }
 0x88c   : > { %4623 = vmax.xlane.f32.xlu0 %v4622_v46  ;;  %v4625_v50 = vmax.f32 %v22569_v45, %v22573_v49 }
 0x88e   : > { %4626 = vmax.xlane.f32.xlu1 %v4625_v50 }
 0x890   : > { %v22577_v51 = vpop.f32.mrb[84].mxu1 }
 0x891   : > { %v22579_v52 = vpop.f32.mrb[85].mxu1 }
 0x892   : > { %v22581_v53 = vpop.f32.mrb[86].mxu1  ;;  %v4628_v54 = vmax.f32 %v22577_v51, %v22579_v52 }
 0x893   : > { %v22585_v55 = vpop.f32.mrb[87].mxu1 }
 0x894   : > { %4629 = vmax.xlane.f32.xlu0 %v4628_v54  ;;  %v4631_v56 = vmax.f32 %v22581_v53, %v22585_v55 }
 0x896   : > { %4632 = vmax.xlane.f32.xlu1 %v4631_v56 }
 0x898   : > { %v22589_v57 = vpop.f32.mrb[88].mxu1 }
 0x899   : > { %v22591_v58 = vpop.f32.mrb[89].mxu1 }
 0x89a   : > { %v22593_v59 = vpop.f32.mrb[90].mxu1  ;;  %v4634_v60 = vmax.f32 %v22589_v57, %v22591_v58 }
 0x89b   : > { %v22597_v61 = vpop.f32.mrb[91].mxu1 }
 0x89c   : > { %4635 = vmax.xlane.f32.xlu0 %v4634_v60  ;;  %v4637_v2 = vmax.f32 %v22593_v59, %v22597_v61 }
 0x89e   : > { %4638 = vmax.xlane.f32.xlu1 %v4637_v2 }
 0x8a0   : > { %v22601_v3 = vpop.f32.mrb[92].mxu1 }
 0x8a1   : > { %v22603_v5 = vpop.f32.mrb[93].mxu1 }
 0x8a2   : > { %24622 = vst [vmem:[#allocation24_spill] sm:$0xff] %v22603_v5  ;;  %v22605_v7 = vpop.f32.mrb[94].mxu1  ;;  %v4640_v11 = vmax.f32 %v22601_v3, %v22603_v5 }
 0x8a3   : > { %24623 = vst [vmem:[#allocation25_spill] sm:$0xff] %v22605_v7  ;;  %v22609_v13 = vpop.f32.mrb[95].mxu1 }
 0x8a4   : > { %24624 = vst [vmem:[#allocation26_spill] sm:$0xff] %v22609_v13  ;;  %4641 = vmax.xlane.f32.xlu0 %v4640_v11  ;;  %v4643_v16 = vmax.f32 %v22605_v7, %v22609_v13 }
 0x8a6   : > { %4644 = vmax.xlane.f32.xlu1 %v4643_v16 }
 0x8a8   : > { %v22613_v20 = vpop.f32.mrb[96].mxu1 }
 0x8a9   : > { %24625 = vst [vmem:[#allocation27_spill] sm:$0xff] %v22613_v20  ;;  %v22615_v23 = vpop.f32.mrb[97].mxu1 }
 0x8aa   : > { %24626 = vst [vmem:[#allocation28_spill] sm:$0xff] %v22615_v23  ;;  %v22617_v28 = vpop.f32.mrb[98].mxu1  ;;  %v4646_v30 = vmax.f32 %v22613_v20, %v22615_v23 }
 0x8ab   : > { %24627 = vst [vmem:[#allocation29_spill] sm:$0xff] %v22617_v28  ;;  %v22621_v32 = vpop.f32.mrb[99].mxu1 }
 0x8ac   : > { %24628 = vst [vmem:[#allocation30_spill] sm:$0xff] %v22621_v32  ;;  %4647 = vmax.xlane.f32.xlu0 %v4646_v30  ;;  %v4649_v37 = vmax.f32 %v22617_v28, %v22621_v32 }
 0x8ae   : > { %4650 = vmax.xlane.f32.xlu1 %v4649_v37 }
 0x8b0   : > { %v22625_v41 = vpop.f32.mrb[100].mxu1 }
 0x8b1   : > { %24629 = vst [vmem:[#allocation31_spill] sm:$0xff] %v22625_v41  ;;  %v22627_v46 = vpop.f32.mrb[101].mxu1 }
 0x8b2   : > { %24630 = vst [vmem:[#allocation32_spill] sm:$0xff] %v22627_v46  ;;  %v22629_v50 = vpop.f32.mrb[102].mxu1  ;;  %v4652_v54 = vmax.f32 %v22625_v41, %v22627_v46  ;;  %v24635_v46 = vmov 0  }
 0x8b3   : > { %24631 = vst [vmem:[#allocation33_spill] sm:$0xff] %v22629_v50  ;;  %v22633_v56 = vpop.f32.mrb[103].mxu1  ;;  %4308 = vmatprep.mubr.bf16.mxu0 %v24635_v46 }
 0x8b4   : > { %24632 = vst [vmem:[#allocation34_spill] sm:$0xff] %v22633_v56  ;;  %4653 = vmax.xlane.f32.xlu0 %v4652_v54  ;;  %v4655_v60 = vmax.f32 %v22629_v50, %v22633_v56  ;;  %16468 = vmatmul.mubr.msk.bf16.gmra.mrb[28].mxu0 %vm3961_vm10, %v21025_v0 }
 0x8b6   : > { %4656 = vmax.xlane.f32.xlu1 %v4655_v60 }
 0x8b8   : > { %v22637_v2 = vpop.f32.mrb[104].mxu1 }
 0x8b9   : > { %v22639_v11 = vpop.f32.mrb[105].mxu1 }
 0x8ba   : > { %v22641_v16 = vpop.f32.mrb[106].mxu1 }
 0x8bb   : > { %24633 = vst [vmem:[#allocation35_spill] sm:$0xff] %v22641_v16  ;;  %v22645_v37 = vpop.f32.mrb[107].mxu1 }
 0x8bc   : > { %24634 = vst [vmem:[#allocation36_spill] sm:$0xff] %v22645_v37  ;;  %v4661_v40 = vmax.f32 %v22641_v16, %v22645_v37 }
 0x8be   : > { %4662 = vmax.xlane.f32.xlu1 %v4661_v40 }
 0x8c0   : > { %v22649_v54 = vpop.f32.mrb[108].mxu1 }
 0x8c1   : > { %v22651_v1 = vpop.f32.mrb[109].mxu1 }
 0x8c2   : > { %v22653_v60 = vpop.f32.mrb[110].mxu1 }
 0x8c3   : > { %v22657_v63 = vpop.f32.mrb[111].mxu1 }
 0x8c8   : > { %v22661_v62 = vpop.f32.mrb[112].mxu1 }
 0x8c9   : > { %v22663_v48 = vpop.f32.mrb[113].mxu1 }
 0x8ca   : > { %v22665_v40 = vpop.f32.mrb[114].mxu1 }
 0x8cb   : > { %v22669_v17 = vpop.f32.mrb[115].mxu1 }
 0x8d0   : > { %v22673_v42 = vpop.f32.mrb[116].mxu1 }
 0x8d1   : > { %v22675_v37 = vpop.f32.mrb[117].mxu1 }
 0x8d2   : > { %v22677_v30 = vpop.f32.mrb[118].mxu1 }
 0x8d3   : > { %v22681_v56 = vpop.f32.mrb[119].mxu1 }
 0x8e9   : > { %v4588_v41 = vpop.xlane.xlu1 %4587 }
 0x8ea   : > { %v4682_v32 = vsub.f32 %v22493_v33, %v4588_v41  ;;  %v4683_v28 = vsub.f32 %v22495_v38, %v4588_v41 }
 0x8eb   : > { %v4591_v23 = vpop.xlane.xlu0 %4590 }
 0x8ec   : > { %v4746_v16 = vmul.f32 1.442695, %v4682_v32  ;;  %v4748_v20 = vmul.f32 1.442695, %v4683_v28  ;;  %v4684_v13 = vsub.f32 %v22497_v4, %v4591_v23  ;;  %v4685_v50 = vsub.f32 %v22501_v6, %v4591_v23 }
 0x8ee   : > { %21546 = vpow2.f32 %v4746_v16  ;;  %v4750_v7 = vmul.f32 1.442695, %v4684_v13  ;;  %v4752_v47 = vmul.f32 1.442695, %v4685_v50 }
 0x8ef   : > { %21548 = vpow2.f32 %v4748_v20 }
 0x8f0   : > { %21550 = vpow2.f32 %v4750_v7 }
 0x8f1   : > { %21552 = vpow2.f32 %v4752_v47  ;;  %v4594_v46 = vpop.xlane.xlu1 %4593 }
 0x8f2   : > { %v4686_v0 = vsub.f32 %v22505_v8, %v4594_v46  ;;  %v4687_v33 = vsub.f32 %v22507_v9, %v4594_v46 }
 0x8f4   : > { %v4754_v5 = vmul.f32 1.442695, %v4686_v0  ;;  %v4756_v38 = vmul.f32 1.442695, %v4687_v33 }
 0x8f5   : > { %v4597_v41 = vpop.xlane.xlu1 %4596 }
 0x8f6   : > { %21554 = vpow2.f32 %v4754_v5  ;;  %v4688_v28 = vsub.f32 %v22509_v10, %v4597_v41  ;;  %v4689_v4 = vsub.f32 %v22513_v12, %v4597_v41 }
 0x8f7   : > { %21556 = vpow2.f32 %v4756_v38  ;;  %v24636_v38 = vmax.f32 %v22637_v2, %v22639_v11 }
 0x8f8   : > { %v22698_v6 = vpop.eup %21546  ;;  %v4758_v13 = vmul.f32 1.442695, %v4688_v28  ;;  %v4760_v20 = vmul.f32 1.442695, %v4689_v4 }
 0x8f9   : > { %v22700_v7 = vpop.eup %21548  ;;  %v4600_v23 = vpop.xlane.xlu1 %4599 }
 0x8fa   : > { %v22702_v32 = vpop.eup %21550  ;;  %21558 = vpow2.f32 %v4758_v13  ;;  %v4690_v8 = vsub.f32 %v22517_v14, %v4600_v23  ;;  %v4691_v9 = vsub.f32 %v22519_v15, %v4600_v23  ;;  %v4874_v10 = vadd.f32 %v22700_v7, %v22698_v6 }
 0x8fb   : > { %v22708_v5 = vpop.eup %21552  ;;  %21560 = vpow2.f32 %v4760_v20 }
 0x8fc   : > { %v4762_v12 = vmul.f32 1.442695, %v4690_v8  ;;  %v4764_v50 = vmul.f32 1.442695, %v4691_v9  ;;  %4875 = vadd.xlane.f32.xlu0 %v4874_v10  ;;  %v4877_v16 = vadd.f32 %v22708_v5, %v22702_v32 }
 0x8fd   : > { %v4603_v47 = vpop.xlane.xlu1 %4602 }
 0x8fe   : > { %21562 = vpow2.f32 %v4762_v12  ;;  %v4692_v46 = vsub.f32 %v22523_v18, %v4603_v47  ;;  %v4693_v14 = vsub.f32 %v22525_v19, %v4603_v47  ;;  %4878 = vadd.xlane.f32.xlu1 %v4877_v16  ;;  %v24637_v19 = vmax.f32 %v22653_v60, %v22657_v63 }
 0x8ff   : > { %21564 = vpow2.f32 %v4764_v50 }
 0x900   : > { %v22714_v15 = vpop.eup %21554  ;;  %v4766_v0 = vmul.f32 1.442695, %v4692_v46  ;;  %v4768_v33 = vmul.f32 1.442695, %v4693_v14  ;;  %4659 = vmax.xlane.f32.xlu0 %v24636_v38  ;;  %v24638_v46 = vmax.f32 %v22649_v54, %v22651_v1 }
 0x901   : > { %v22719_v41 = vpop.eup %21556  ;;  %v4606_v28 = vpop.xlane.xlu1 %4605 }
 0x902   : > { %21566 = vpow2.f32 %v4766_v0  ;;  %v4694_v4 = vsub.f32 %v22529_v21, %v4606_v28  ;;  %v4695_v18 = vsub.f32 %v22531_v22, %v4606_v28  ;;  %4668 = vmax.xlane.f32.xlu1 %v24637_v19  ;;  %v4880_v13 = vadd.f32 %v22719_v41, %v22714_v15 }
 0x903   : > { %21568 = vpow2.f32 %v4768_v33 }
 0x904   : > { %v22728_v20 = vpop.eup %21558  ;;  %v4770_v23 = vmul.f32 1.442695, %v4694_v4  ;;  %v4772_v8 = vmul.f32 1.442695, %v4695_v18  ;;  %4881 = vadd.xlane.f32.xlu0 %v4880_v13 }
 0x905   : > { %v22730_v9 = vpop.eup %21560  ;;  %v4609_v10 = vpop.xlane.xlu1 %4608 }
 0x906   : > { %21570 = vpow2.f32 %v4770_v23  ;;  %v4696_v21 = vsub.f32 %v22535_v26, %v4609_v10  ;;  %v4697_v22 = vsub.f32 %v22537_v27, %v4609_v10  ;;  %v4883_v12 = vadd.f32 %v22730_v9, %v22728_v20 }
 0x907   : > { %21572 = vpow2.f32 %v4772_v8  ;;  %v24639_v23 = vmax.f32 %v22665_v40, %v22669_v17 }
 0x908   : > { %v22736_v50 = vpop.eup %21562  ;;  %v4774_v16 = vmul.f32 1.442695, %v4696_v21  ;;  %v4776_v47 = vmul.f32 1.442695, %v4697_v22  ;;  %4665 = vmax.xlane.f32.xlu0 %v24638_v46  ;;  %4884 = vadd.xlane.f32.xlu1 %v4883_v12 }
 0x909   : > { %v22741_v14 = vpop.eup %21564  ;;  %v4612_v0 = vpop.xlane.xlu0 %4611 }
 0x90a   : > { %21574 = vpow2.f32 %v4774_v16  ;;  %v4698_v26 = vsub.f32 %v22541_v24, %v4612_v0  ;;  %v4699_v27 = vsub.f32 %v22543_v25, %v4612_v0  ;;  %v4886_v33 = vadd.f32 %v22741_v14, %v22736_v50 }
 0x90b   : > { %21576 = vpow2.f32 %v4776_v47  ;;  %v4615_v38 = vpop.xlane.xlu1 %4614 }
 0x90c   : > { %v22747_v28 = vpop.eup %21566  ;;  %v4778_v4 = vmul.f32 1.442695, %v4698_v26  ;;  %v4780_v18 = vmul.f32 1.442695, %v4699_v27  ;;  %v4700_v19 = vsub.f32 %v22545_v29, %v4615_v38  ;;  %v4701_v13 = vsub.f32 %v22549_v31, %v4615_v38  ;;  %4887 = vadd.xlane.f32.xlu0 %v4886_v33  ;;  %4674 = vmax.xlane.f32.xlu1 %v24639_v23 }
 0x90d   : > { %v22754_v24 = vpop.eup %21568  ;;  %v24640_v29 = vmax.f32 %v22661_v62, %v22663_v48 }
 0x90e   : > { %21578 = vpow2.f32 %v4778_v4  ;;  %v4782_v25 = vmul.f32 1.442695, %v4700_v19  ;;  %v4784_v8 = vmul.f32 1.442695, %v4701_v13  ;;  %v4889_v10 = vadd.f32 %v22754_v24, %v22747_v28 }
 0x90f   : > { %21580 = vpow2.f32 %v4780_v18  ;;  %v24641_v4 = vmax.f32 %v22677_v30, %v22681_v56 }
 0x910   : > { %v22758_v21 = vpop.eup %21570  ;;  %21582 = vpow2.f32 %v4782_v25  ;;  %4671 = vmax.xlane.f32.xlu0 %v24640_v29  ;;  %4890 = vadd.xlane.f32.xlu1 %v4889_v10 }
 0x911   : > { %v22763_v31 = vpop.eup %21572  ;;  %21584 = vpow2.f32 %v4784_v8  ;;  %v4618_v22 = vpop.xlane.xlu0 %4617 }
 0x912   : > { %v4702_v12 = vsub.f32 %v22553_v34, %v4618_v22  ;;  %v4703_v16 = vsub.f32 %v22555_v35, %v4618_v22  ;;  %v4892_v47 = vadd.f32 %v22763_v31, %v22758_v21 }
 0x913   : > { %v4621_v46 = vpop.xlane.xlu1 %4620 }
 0x914   : > { %v22769_v0 = vpop.eup %21574  ;;  %v4786_v26 = vmul.f32 1.442695, %v4702_v12  ;;  %v4788_v27 = vmul.f32 1.442695, %v4703_v16  ;;  %v4704_v33 = vsub.f32 %v22557_v36, %v4621_v46  ;;  %v4705_v38 = vsub.f32 %v22561_v39, %v4621_v46  ;;  %4893 = vadd.xlane.f32.xlu0 %v4892_v47  ;;  %4680 = vmax.xlane.f32.xlu1 %v24641_v4 }
 0x915   : > { %v22776_v34 = vpop.eup %21576  ;;  %v24642_v36 = vmax.f32 %v22673_v42, %v22675_v37 }
 0x916   : > { %21586 = vpow2.f32 %v4786_v26  ;;  %v4790_v35 = vmul.f32 1.442695, %v4704_v33  ;;  %v4792_v18 = vmul.f32 1.442695, %v4705_v38  ;;  %v4895_v19 = vadd.f32 %v22776_v34, %v22769_v0 }
 0x917   : > { %21588 = vpow2.f32 %v4788_v27 }
 0x918   : > { %v22780_v13 = vpop.eup %21578  ;;  %21590 = vpow2.f32 %v4790_v35  ;;  %4677 = vmax.xlane.f32.xlu0 %v24642_v36  ;;  %4896 = vadd.xlane.f32.xlu1 %v4895_v19 }
 0x919   : > { %v22785_v39 = vpop.eup %21580  ;;  %21592 = vpow2.f32 %v4792_v18  ;;  %v4624_v23 = vpop.xlane.xlu0 %4623 }
 0x91a   : > { %v22787_v25 = vpop.eup %21582  ;;  %v4706_v8 = vsub.f32 %v22565_v43, %v4624_v23  ;;  %v4707_v10 = vsub.f32 %v22567_v44, %v4624_v23  ;;  %v4898_v29 = vadd.f32 %v22785_v39, %v22780_v13 }
 0x91b   : > { %v22793_v22 = vpop.eup %21584  ;;  %v4627_v12 = vpop.xlane.xlu1 %4626 }
 0x91c   : > { %v4794_v16 = vmul.f32 1.442695, %v4706_v8  ;;  %v4796_v47 = vmul.f32 1.442695, %v4707_v10  ;;  %v4708_v46 = vsub.f32 %v22569_v45, %v4627_v12  ;;  %v4709_v26 = vsub.f32 %v22573_v49, %v4627_v12  ;;  %4899 = vadd.xlane.f32.xlu0 %v4898_v29 }
 0x91d   : > { %v4901_v27 = vadd.f32 %v22793_v22, %v22787_v25 }
 0x91e   : > { %21594 = vpow2.f32 %v4794_v16  ;;  %v4798_v43 = vmul.f32 1.442695, %v4708_v46  ;;  %v4800_v33 = vmul.f32 1.442695, %v4709_v26 }
 0x91f   : > { %21596 = vpow2.f32 %v4796_v47  ;;  %4902 = vadd.xlane.f32.xlu1 %v4901_v27 }
 0x920   : > { %v22799_v44 = vpop.eup %21586  ;;  %21598 = vpow2.f32 %v4798_v43 }
 0x921   : > { %v22801_v38 = vpop.eup %21588  ;;  %21600 = vpow2.f32 %v4800_v33  ;;  %v4630_v4 = vpop.xlane.xlu0 %4629 }
 0x922   : > { %v22803_v35 = vpop.eup %21590  ;;  %v4710_v45 = vsub.f32 %v22577_v51, %v4630_v4  ;;  %v4711_v49 = vsub.f32 %v22579_v52, %v4630_v4  ;;  %v4904_v18 = vadd.f32 %v22801_v38, %v22799_v44 }
 0x923   : > { %v22809_v19 = vpop.eup %21592  ;;  %v4633_v36 = vpop.xlane.xlu1 %4632 }
 0x924   : > { %v4802_v23 = vmul.f32 1.442695, %v4710_v45  ;;  %v4804_v8 = vmul.f32 1.442695, %v4711_v49  ;;  %v4712_v10 = vsub.f32 %v22581_v53, %v4633_v36  ;;  %v4713_v29 = vsub.f32 %v22585_v55, %v4633_v36  ;;  %4905 = vadd.xlane.f32.xlu0 %v4904_v18 }
 0x925   : > { %v4907_v12 = vadd.f32 %v22809_v19, %v22803_v35 }
 0x926   : > { %21602 = vpow2.f32 %v4802_v23  ;;  %v4806_v51 = vmul.f32 1.442695, %v4712_v10  ;;  %v4808_v16 = vmul.f32 1.442695, %v4713_v29 }
 0x927   : > { %21604 = vpow2.f32 %v4804_v8  ;;  %4908 = vadd.xlane.f32.xlu1 %v4907_v12 }
 0x928   : > { %v22815_v52 = vpop.eup %21594  ;;  %21606 = vpow2.f32 %v4806_v51 }
 0x929   : > { %v22817_v47 = vpop.eup %21596  ;;  %21608 = vpow2.f32 %v4808_v16  ;;  %v4636_v46 = vpop.xlane.xlu0 %4635 }
 0x92a   : > { %v22819_v26 = vpop.eup %21598  ;;  %v4714_v53 = vsub.f32 %v22589_v57, %v4636_v46  ;;  %v4715_v55 = vsub.f32 %v22591_v58, %v4636_v46  ;;  %v4910_v27 = vadd.f32 %v22817_v47, %v22815_v52 }
 0x92b   : > { %v22825_v43 = vpop.eup %21600  ;;  %v4639_v33 = vpop.xlane.xlu1 %4638 }
 0x92c   : > { %v4810_v4 = vmul.f32 1.442695, %v4714_v53  ;;  %v4812_v45 = vmul.f32 1.442695, %v4715_v55  ;;  %v4716_v49 = vsub.f32 %v22593_v59, %v4639_v33  ;;  %v4717_v18 = vsub.f32 %v22597_v61, %v4639_v33  ;;  %4911 = vadd.xlane.f32.xlu0 %v4910_v27  ;;  %v24644_v61 = vld [vmem:[#allocation24_spill] sm:$0xff]  ;;  %v24645_v27 = vld [vmem:[#allocation25_spill] sm:$0xff] }
 0x92d   : > { %v4913_v36 = vadd.f32 %v22825_v43, %v22819_v26 }
 0x92e   : > { %21610 = vpow2.f32 %v4810_v4  ;;  %v4814_v57 = vmul.f32 1.442695, %v4716_v49  ;;  %v4816_v23 = vmul.f32 1.442695, %v4717_v18  ;;  %v24646_v4 = vld [vmem:[#allocation26_spill] sm:$0xff] }
 0x92f   : > { %21612 = vpow2.f32 %v4812_v45  ;;  %4914 = vadd.xlane.f32.xlu1 %v4913_v36 }
 0x930   : > { %v22831_v58 = vpop.eup %21602  ;;  %21614 = vpow2.f32 %v4814_v57 }
 0x931   : > { %24643 = vst [vmem:[#allocation37_spill] sm:$0xff] %v22831_v58  ;;  %v22833_v8 = vpop.eup %21604  ;;  %21616 = vpow2.f32 %v4816_v23  ;;  %v4642_v10 = vpop.xlane.xlu0 %4641 }
 0x932   : > { %v22835_v29 = vpop.eup %21606  ;;  %v4718_v59 = vsub.f32 %v22601_v3, %v4642_v10  ;;  %v4719_v12 = vsub.f32 %v24644_v61, %v4642_v10  ;;  %v4916_v51 = vadd.f32 %v22833_v8, %v22831_v58 }
 0x933   : > { %v22841_v16 = vpop.eup %21608  ;;  %v4645_v46 = vpop.xlane.xlu1 %4644 }
 0x934   : > { %v4818_v53 = vmul.f32 1.442695, %v4718_v59  ;;  %v4820_v55 = vmul.f32 1.442695, %v4719_v12  ;;  %v4720_v33 = vsub.f32 %v24645_v27, %v4645_v46  ;;  %v4721_v45 = vsub.f32 %v24646_v4, %v4645_v46  ;;  %4917 = vadd.xlane.f32.xlu0 %v4916_v51  ;;  %v24650_v59 = vld [vmem:[#allocation27_spill] sm:$0xff]  ;;  %v24651_v12 = vld [vmem:[#allocation28_spill] sm:$0xff] }
 0x935   : > { %v4919_v49 = vadd.f32 %v22841_v16, %v22835_v29  ;;  %v24653_v4 = vld [vmem:[#allocation29_spill] sm:$0xff] }
 0x936   : > { %21618 = vpow2.f32 %v4818_v53  ;;  %v4822_v3 = vmul.f32 1.442695, %v4720_v33  ;;  %v4824_v18 = vmul.f32 1.442695, %v4721_v45 }
 0x937   : > { %21620 = vpow2.f32 %v4820_v55  ;;  %4920 = vadd.xlane.f32.xlu1 %v4919_v49  ;;  %v24654_v49 = vld [vmem:[#allocation30_spill] sm:$0xff] }
 0x938   : > { %v22847_v36 = vpop.eup %21610  ;;  %21622 = vpow2.f32 %v4822_v3 }
 0x939   : > { %24647 = vst [vmem:[#allocation24_spill] sm:$0xff] %v22847_v36  ;;  %v22849_v57 = vpop.eup %21612  ;;  %21624 = vpow2.f32 %v4824_v18  ;;  %v4648_v23 = vpop.xlane.xlu0 %4647 }
 0x93a   : > { %24648 = vst [vmem:[#allocation25_spill] sm:$0xff] %v22849_v57  ;;  %v22851_v10 = vpop.eup %21614  ;;  %v4722_v61 = vsub.f32 %v24650_v59, %v4648_v23  ;;  %v4723_v51 = vsub.f32 %v24651_v12, %v4648_v23  ;;  %v4922_v46 = vadd.f32 %v22849_v57, %v22847_v36  ;;  %v24657_v36 = vld [vmem:[#allocation33_spill] sm:$0xff] }
 0x93b   : > { %24649 = vst [vmem:[#allocation26_spill] sm:$0xff] %v22851_v10  ;;  %v22857_v53 = vpop.eup %21616  ;;  %v4651_v55 = vpop.xlane.xlu1 %4650 }
 0x93c   : > { %24652 = vst [vmem:[#allocation27_spill] sm:$0xff] %v22857_v53  ;;  %v4826_v27 = vmul.f32 1.442695, %v4722_v61  ;;  %v4828_v33 = vmul.f32 1.442695, %v4723_v51  ;;  %v4724_v45 = vsub.f32 %v24653_v4, %v4651_v55  ;;  %v4725_v3 = vsub.f32 %v24654_v49, %v4651_v55  ;;  %4923 = vadd.xlane.f32.xlu0 %v4922_v46  ;;  %v24655_v4 = vld [vmem:[#allocation31_spill] sm:$0xff] }
 0x93d   : > { %v4925_v18 = vadd.f32 %v22857_v53, %v22851_v10  ;;  %v24656_v46 = vld [vmem:[#allocation32_spill] sm:$0xff]  ;;  %v24658_v10 = vld [vmem:[#allocation34_spill] sm:$0xff] }
 0x93e   : > { %21626 = vpow2.f32 %v4826_v27  ;;  %v4830_v59 = vmul.f32 1.442695, %v4724_v45  ;;  %v4832_v58 = vmul.f32 1.442695, %v4725_v3 }
 0x93f   : > { %21628 = vpow2.f32 %v4828_v33  ;;  %4926 = vadd.xlane.f32.xlu1 %v4925_v18 }
 0x940   : > { %v22863_v23 = vpop.eup %21618  ;;  %21630 = vpow2.f32 %v4830_v59 }
 0x941   : > { %v22865_v12 = vpop.eup %21620  ;;  %21632 = vpow2.f32 %v4832_v58  ;;  %v4654_v61 = vpop.xlane.xlu0 %4653 }
 0x942   : > { %v22867_v51 = vpop.eup %21622  ;;  %v4726_v55 = vsub.f32 %v24655_v4, %v4654_v61  ;;  %v4727_v49 = vsub.f32 %v24656_v46, %v4654_v61  ;;  %v4928_v27 = vadd.f32 %v22865_v12, %v22863_v23 }
 0x943   : > { %v22873_v45 = vpop.eup %21624  ;;  %v4657_v33 = vpop.xlane.xlu1 %4656 }
 0x944   : > { %v4834_v3 = vmul.f32 1.442695, %v4726_v55  ;;  %v4836_v18 = vmul.f32 1.442695, %v4727_v49  ;;  %v4728_v59 = vsub.f32 %v24657_v36, %v4657_v33  ;;  %v4729_v53 = vsub.f32 %v24658_v10, %v4657_v33  ;;  %4929 = vadd.xlane.f32.xlu0 %v4928_v27  ;;  %v24662_v27 = vld [vmem:[#allocation35_spill] sm:$0xff] }
 0x945   : > { %v4931_v58 = vadd.f32 %v22873_v45, %v22867_v51 }
 0x946   : > { %21634 = vpow2.f32 %v4834_v3  ;;  %v4838_v4 = vmul.f32 1.442695, %v4728_v59  ;;  %v4840_v57 = vmul.f32 1.442695, %v4729_v53  ;;  %v24663_v3 = vld [vmem:[#allocation36_spill] sm:$0xff] }
 0x947   : > { %21636 = vpow2.f32 %v4836_v18  ;;  %4932 = vadd.xlane.f32.xlu1 %v4931_v58 }
 0x948   : > { %v22879_v61 = vpop.eup %21626  ;;  %21638 = vpow2.f32 %v4838_v4 }
 0x949   : > { %24659 = vst [vmem:[#allocation28_spill] sm:$0xff] %v22879_v61  ;;  %v22881_v46 = vpop.eup %21628  ;;  %21640 = vpow2.f32 %v4840_v57 }
 0x94a   : > { %24660 = vst [vmem:[#allocation29_spill] sm:$0xff] %v22881_v46  ;;  %v22883_v55 = vpop.eup %21630  ;;  %v4934_v36 = vadd.f32 %v22881_v46, %v22879_v61 }
 0x94b   : > { %24661 = vst [vmem:[#allocation30_spill] sm:$0xff] %v22883_v55  ;;  %v22887_v10 = vpop.eup %21632  ;;  %v4663_v49 = vpop.xlane.xlu1 %4662 }
 0x94c   : > { %v4732_v33 = vsub.f32 %v24662_v27, %v4663_v49  ;;  %v4733_v53 = vsub.f32 %v24663_v3, %v4663_v49  ;;  %4935 = vadd.xlane.f32.xlu0 %v4934_v36  ;;  %v4937_v18 = vadd.f32 %v22887_v10, %v22883_v55 }
 0x94e   : > { %v4846_v59 = vmul.f32 1.442695, %v4732_v33  ;;  %v4848_v58 = vmul.f32 1.442695, %v4733_v53  ;;  %4938 = vadd.xlane.f32.xlu1 %v4937_v18 }
 0x950   : > { %v22893_v57 = vpop.eup %21634  ;;  %21642 = vpow2.f32 %v4846_v59 }
 0x951   : > { %24664 = vst [vmem:[#allocation31_spill] sm:$0xff] %v22893_v57  ;;  %v22895_v4 = vpop.eup %21636  ;;  %21644 = vpow2.f32 %v4848_v58 }
 0x952   : > { %24665 = vst [vmem:[#allocation32_spill] sm:$0xff] %v22895_v4  ;;  %v22897_v61 = vpop.eup %21638  ;;  %v4940_v27 = vadd.f32 %v22895_v4, %v22893_v57 }
 0x953   : > { %24666 = vst [vmem:[#allocation33_spill] sm:$0xff] %v22897_v61  ;;  %v22901_v46 = vpop.eup %21640 }
 0x954   : > { %24667 = vst [vmem:[#allocation34_spill] sm:$0xff] %v22901_v46  ;;  %4941 = vadd.xlane.f32.xlu0 %v4940_v27  ;;  %v4943_v36 = vadd.f32 %v22901_v46, %v22897_v61 }
 0x956   : > { %4944 = vadd.xlane.f32.xlu1 %v4943_v36 }
 0x95a   : > { %v22905_v49 = vpop.eup %21642 }
 0x95b   : > { %24668 = vst [vmem:[#allocation35_spill] sm:$0xff] %v22905_v49  ;;  %v22907_v33 = vpop.eup %21644 }
 0x95c   : > { %24669 = vst [vmem:[#allocation36_spill] sm:$0xff] %v22907_v33  ;;  %v4949_v3 = vadd.f32 %v22907_v33, %v22905_v49 }
 0x95e   : > { %4950 = vadd.xlane.f32.xlu1 %v4949_v3 }
 0x989   : > { %v4876_v53 = vpop.xlane.xlu0 %4875 }
 0x98a   : > { %21646 = vrcp.f32 %v4876_v53 }
 0x98b   : > { %v4879_v18 = vpop.xlane.xlu1 %4878 }
 0x98c   : > { %21648 = vrcp.f32 %v4879_v18 }
 0x98d   : > { %v4660_v59 = vpop.xlane.xlu0 %4659 }
 0x98e   : > { %v4730_v58 = vsub.f32 %v22637_v2, %v4660_v59  ;;  %v4731_v27 = vsub.f32 %v22639_v11, %v4660_v59 }
 0x98f   : > { %v4669_v57 = vpop.xlane.xlu1 %4668 }
 0x990   : > { %v4842_v61 = vmul.f32 1.442695, %v4730_v58  ;;  %v4844_v36 = vmul.f32 1.442695, %v4731_v27  ;;  %v4736_v46 = vsub.f32 %v22653_v60, %v4669_v57  ;;  %v4737_v4 = vsub.f32 %v22657_v63, %v4669_v57 }
 0x991   : > { %v4882_v55 = vpop.xlane.xlu0 %4881 }
 0x992   : > { %21650 = vpow2.f32 %v4842_v61  ;;  %v4854_v49 = vmul.f32 1.442695, %v4736_v46  ;;  %v4856_v3 = vmul.f32 1.442695, %v4737_v4 }
 0x993   : > { %21652 = vpow2.f32 %v4844_v36 }
 0x994   : > { %v21647_v53 = vpop.eup %21646  ;;  %21654 = vpow2.f32 %v4854_v49 }
 0x995   : > { %21656 = vpow2.f32 %v4856_v3  ;;  %v4666_v18 = vpop.xlane.xlu0 %4665  ;;  %v4885_v33 = vpop.xlane.xlu1 %4884  ;;  %v5003_v60 = vmul.f32 %v21647_v53, %v22700_v7  ;;  %v5002_v61 = vmul.f32 %v21647_v53, %v22698_v6 }
 0x996   : > { %v21649_v2 = vpop.eup %21648  ;;  %21658 = vrcp.f32 %v4882_v55  ;;  %v4734_v11 = vsub.f32 %v22649_v54, %v4666_v18  ;;  %v4735_v59 = vsub.f32 %v22651_v1, %v4666_v18 }
 0x997   : > { %21660 = vrcp.f32 %v4885_v33  ;;  %v5005_v63 = vmul.f32 %v21649_v2, %v22708_v5  ;;  %v5004_v46 = vmul.f32 %v21649_v2, %v22702_v32 }
 0x998   : > { %v4850_v57 = vmul.f32 1.442695, %v4734_v11  ;;  %v4852_v4 = vmul.f32 1.442695, %v4735_v59 }
 0x999   : > { %v4888_v49 = vpop.xlane.xlu0 %4887  ;;  %v4675_v58 = vpop.xlane.xlu1 %4674  ;;  %v5071_v27 = vpack.c.bf16 %v5005_v63, %v5003_v60  ;;  %v5070_v36 = vpack.c.bf16 %v5004_v46, %v5002_v61 }
 0x99a   : > { %21662 = vpow2.f32 %v4850_v57  ;;  %v4740_v54 = vsub.f32 %v22665_v40, %v4675_v58  ;;  %v4741_v1 = vsub.f32 %v22669_v17, %v4675_v58 }
 0x99b   : > { %21664 = vpow2.f32 %v4852_v4  ;;  %5102 = vmatprep.subr.bf16.mxu1 %v5071_v27 }
 0x99c   : > { %v22923_v7 = vpop.eup %21650  ;;  %v4862_v5 = vmul.f32 1.442695, %v4740_v54  ;;  %v4864_v55 = vmul.f32 1.442695, %v4741_v1  ;;  %5103 = vmatpush1.bf16.xpose.msra.mxu1 %v5070_v36  ;;  %21666 = vrcp.f32 %v4888_v49 }
 0x99d   : > { %v22925_v6 = vpop.eup %21652  ;;  %v4672_v32 = vpop.xlane.xlu0 %4671 }
 0x99e   : > { %v4891_v33 = vpop.xlane.xlu1 %4890  ;;  %v22927_v3 = vpop.eup %21654  ;;  %21668 = vpow2.f32 %v4862_v5  ;;  %v4738_v53 = vsub.f32 %v22661_v62, %v4672_v32  ;;  %v4739_v40 = vsub.f32 %v22663_v48, %v4672_v32  ;;  %v4946_v17 = vadd.f32 %v22925_v6, %v22923_v7 }
 0x99f   : > { %v22933_v18 = vpop.eup %21656  ;;  %21670 = vpow2.f32 %v4864_v55 }
 0x9a0   : > { %v21659_v2 = vpop.eup %21658  ;;  %v4858_v11 = vmul.f32 1.442695, %v4738_v53  ;;  %v4860_v59 = vmul.f32 1.442695, %v4739_v40  ;;  %21672 = vrcp.f32 %v4891_v33  ;;  %4947 = vadd.xlane.f32.xlu0 %v4946_v17  ;;  %v4955_v60 = vadd.f32 %v22933_v18, %v22927_v3 }
 0x9a1   : > { %v21661_v63 = vpop.eup %21660  ;;  %v4894_v61 = vpop.xlane.xlu0 %4893  ;;  %v5007_v48 = vmul.f32 %v21659_v2, %v22719_v41  ;;  %v5006_v57 = vmul.f32 %v21659_v2, %v22714_v15 }
 0x9a2   : > { %v22937_v46 = vpop.xlane.xlu1 %4680  ;;  %21674 = vpow2.f32 %v4858_v11  ;;  %4956 = vadd.xlane.f32.xlu1 %v4955_v60  ;;  %v5009_v62 = vmul.f32 %v21661_v63, %v22730_v9  ;;  %v5008_v4 = vmul.f32 %v21661_v63, %v22728_v20 }
 0x9a3   : > { %21676 = vpow2.f32 %v4860_v59 }
 0x9a4   : > { %v22943_v49 = vpop.eup %21662  ;;  %v5073_v58 = vpack.c.bf16 %v5009_v62, %v5007_v48  ;;  %21678 = vrcp.f32 %v4894_v61  ;;  %v5072_v1 = vpack.c.bf16 %v5008_v4, %v5006_v57 }
 0x9a5   : > { %v22945_v27 = vpop.eup %21664  ;;  %v4678_v36 = vpop.xlane.xlu0 %4677 }
 0x9a6   : > { %v4897_v54 = vpop.xlane.xlu1 %4896  ;;  %5104 = vmatprep.subr.bf16.mxu1 %v5073_v58  ;;  %v4742_v5 = vsub.f32 %v22673_v42, %v4678_v36  ;;  %v4743_v41 = vsub.f32 %v22675_v37, %v4678_v36  ;;  %v4952_v9 = vadd.f32 %v22945_v27, %v22943_v49  ;;  %v21667_v15 = vpop.eup %21666 }
 0x9a7   : > { %5105 = vmatpush1.bf16.xpose.msra.mxu1 %v5072_v1  ;;  %21680 = vrcp.f32 %v4897_v54  ;;  %v5011_v37 = vmul.f32 %v21667_v15, %v22741_v14  ;;  %v5010_v2 = vmul.f32 %v21667_v15, %v22736_v50 }
 0x9a8   : > { %v22951_v20 = vpop.eup %21668  ;;  %v4866_v55 = vmul.f32 1.442695, %v4742_v5  ;;  %v4868_v32 = vmul.f32 1.442695, %v4743_v41  ;;  %4953 = vadd.xlane.f32.xlu0 %v4952_v9 }
 0x9a9   : > { %v22953_v33 = vpop.eup %21670  ;;  %v4900_v53 = vpop.xlane.xlu0 %4899 }
 0x9aa   : > { %v21673_v40 = vpop.eup %21672  ;;  %21682 = vpow2.f32 %v4866_v55  ;;  %v4961_v42 = vadd.f32 %v22953_v33, %v22951_v20 }
 0x9ab   : > { %21684 = vpow2.f32 %v4868_v32  ;;  %v5013_v17 = vmul.f32 %v21673_v40, %v22754_v24  ;;  %v5012_v11 = vmul.f32 %v21673_v40, %v22747_v28  ;;  %v4227_v32 = vld [vmem:[%s21868_s19 + $0x8] sm:$0xff]  ;;  %v22981_v40 = vpop.f32.mrb[24].mxu0 }
 0x9ac   : > { %v22961_v59 = vpop.eup %21674  ;;  %21686 = vrcp.f32 %v4900_v53  ;;  %4962 = vadd.xlane.f32.xlu1 %v4961_v42  ;;  %v4903_v60 = vpop.xlane.xlu1 %4902 }
 0x9ad   : > { %v22963_v63 = vpop.eup %21676  ;;  %21688 = vrcp.f32 %v4903_v60  ;;  %v5075_v61 = vpack.c.bf16 %v5013_v17, %v5011_v37  ;;  %v5074_v48 = vpack.c.bf16 %v5012_v11, %v5010_v2  ;;  %v22983_v42 = vpop.f32.mrb[25].mxu0 }
 0x9ae   : > { %v4958_v14 = vadd.f32 %v22963_v63, %v22961_v59  ;;  %v21679_v62 = vpop.eup %21678  ;;  %v22986_v2 = vpop.f32.mrb[26].mxu0 }
 0x9af   : > { %5106 = vmatprep.subr.bf16.mxu1 %v5075_v61  ;;  %v5015_v28 = vmul.f32 %v21679_v62, %v22763_v31  ;;  %v5014_v4 = vmul.f32 %v21679_v62, %v22758_v21 }
 0x9b0   : > { %5107 = vmatpush1.bf16.xpose.msra.mxu1 %v5074_v48  ;;  %4959 = vadd.xlane.f32.xlu0 %v4958_v14 }
 0x9b1   : > { %v4906_v50 = vpop.xlane.xlu0 %4905  ;;  %v21681_v24 = vpop.eup %21680 }
 0x9b2   : > { %21690 = vrcp.f32 %v4906_v50  ;;  %v5017_v57 = vmul.f32 %v21681_v24, %v22776_v34  ;;  %v5016_v58 = vmul.f32 %v21681_v24, %v22769_v0 }
 0x9b4   : > { %v22971_v36 = vpop.eup %21682  ;;  %v4909_v54 = vpop.xlane.xlu1 %4908  ;;  %v5077_v5 = vpack.c.bf16 %v5017_v57, %v5015_v28  ;;  %v5076_v41 = vpack.c.bf16 %v5016_v58, %v5014_v4 }
 0x9b5   : > { %v22973_v1 = vpop.eup %21684  ;;  %21692 = vrcp.f32 %v4909_v54 }
 0x9b6   : > { %v21687_v9 = vpop.eup %21686  ;;  %v4964_v31 = vadd.f32 %v22973_v1, %v22971_v36  ;;  %5108 = vmatprep.subr.bf16.mxu1 %v5077_v5  ;;  %v4226_v5 = vld [vmem:[%s21868_s19] sm:$0xff] }
 0x9b7   : > { %v21689_v15 = vpop.eup %21688  ;;  %v5019_v21 = vmul.f32 %v21687_v9, %v22785_v39  ;;  %v5018_v17 = vmul.f32 %v21687_v9, %v22780_v13  ;;  %v22988_v39 = vpop.f32.mrb[27].mxu0 }
 0x9b8   : > { %5109 = vmatpush1.bf16.xpose.msra.mxu1 %v5076_v41  ;;  %4965 = vadd.xlane.f32.xlu0 %v4964_v31  ;;  %v5021_v0 = vmul.f32 %v21689_v15, %v22793_v22  ;;  %v5020_v53 = vmul.f32 %v21689_v15, %v22787_v25 }
 0x9b9   : > { %v4912_v34 = vpop.xlane.xlu0 %4911 }
 0x9ba   : > { %v5079_v55 = vpack.c.bf16 %v5021_v0, %v5019_v21  ;;  %21694 = vrcp.f32 %v4912_v34  ;;  %v5078_v22 = vpack.c.bf16 %v5020_v53, %v5018_v17  ;;  %v4229_v21 = vld [vmem:[%s21868_s19 + $0x18] sm:$0xff]  ;;  %v9871_v53 = vld [vmem:[%s21886_s12] sm:$0xff] }
 0x9bc   : > { %5110 = vmatprep.subr.bf16.mxu1 %v5079_v55  ;;  %v4915_v37 = vpop.xlane.xlu1 %4914  ;;  %v21691_v11 = vpop.eup %21690 }
 0x9bd   : > { %21696 = vrcp.f32 %v4915_v37  ;;  %4237 = vperm.xlu1 %20569, %v4227_v32   ;;  %v5023_v25 = vmul.f32 %v21691_v11, %v22801_v38  ;;  %v5022_v50 = vmul.f32 %v21691_v11, %v22799_v44 }
 0x9bf   : > { %v21693_v60 = vpop.eup %21692 }
 0x9c0   : > { %5111 = vmatpush1.bf16.xpose.msra.mxu1 %v5078_v22  ;;  %v5025_v61 = vmul.f32 %v21693_v60, %v22809_v19  ;;  %v5024_v62 = vmul.f32 %v21693_v60, %v22803_v35  ;;  %v4744_v19 = vsub.f32 %v22677_v30, %v22937_v46  ;;  %v4745_v35 = vsub.f32 %v22681_v56, %v22937_v46  ;;  %v23006_v46 = vpop.f32.mrb[28].mxu0 }
 0x9c1   : > { %v4918_v48 = vpop.xlane.xlu0 %4917  ;;  %v23008_v34 = vpop.f32.mrb[29].mxu0 }
 0x9c2   : > { %v5081_v14 = vpack.c.bf16 %v5025_v61, %v5023_v25  ;;  %21698 = vrcp.f32 %v4918_v48  ;;  %v5080_v28 = vpack.c.bf16 %v5024_v62, %v5022_v50  ;;  %v4870_v31 = vmul.f32 1.442695, %v4744_v19  ;;  %v23011_v32 = vpop.f32.mrb[30].mxu0  ;;  %v9873_v25 = vld [vmem:[%s21886_s12 + $0x10] sm:$0xff]  ;;  %v24672_v48 = vld [vmem:[#allocation27_spill] sm:$0xff]  ;;  %v24674_v19 = vld [vmem:[#allocation24_spill] sm:$0xff] }
 0x9c3   : > { %v23014_v37 = vpop.f32.mrb[31].mxu0  ;;  %v24671_v61 = vld [vmem:[#allocation25_spill] sm:$0xff]  ;;  %v24673_v50 = vld [vmem:[#allocation26_spill] sm:$0xff] }
 0x9c4   : > { %5112 = vmatprep.subr.bf16.mxu1 %v5081_v14  ;;  %v4921_v13 = vpop.xlane.xlu1 %4920  ;;  %v21695_v24 = vpop.eup %21694 }
 0x9c5   : > { %21700 = vrcp.f32 %v4921_v13  ;;  %v5027_v4 = vmul.f32 %v21695_v24, %v22817_v47  ;;  %v5026_v9 = vmul.f32 %v21695_v24, %v22815_v52 }
 0x9c7   : > { %v21697_v57 = vpop.eup %21696 }
 0x9c8   : > { %5113 = vmatpush1.bf16.xpose.msra.mxu1 %v5080_v28  ;;  %v5029_v38 = vmul.f32 %v21697_v57, %v22825_v43  ;;  %v5028_v44 = vmul.f32 %v21697_v57, %v22819_v26  ;;  %v4872_v43 = vmul.f32 1.442695, %v4745_v35 }
 0x9c9   : > { %v4924_v58 = vpop.xlane.xlu0 %4923 }
 0x9ca   : > { %v5083_v54 = vpack.c.bf16 %v5029_v38, %v5027_v4  ;;  %21702 = vrcp.f32 %v4924_v58  ;;  %v5082_v30 = vpack.c.bf16 %v5028_v44, %v5026_v9  ;;  %v9927_v4 = vld [vmem:[%s21891_s20] sm:$0xff] }
 0x9cc   : > { %5114 = vmatprep.subr.bf16.mxu1 %v5083_v54  ;;  %v4927_v41 = vpop.xlane.xlu1 %4926  ;;  %v21699_v47 = vpop.eup %21698 }
 0x9cd   : > { %21704 = vrcp.f32 %v4927_v41  ;;  %v5031_v56 = vmul.f32 %v21699_v47, %v22833_v8  ;;  %v9875_v41 = vld [vmem:[%s21886_s12 + $0x20] sm:$0xff] }
 0x9ce   : > { %4232 = vperm.xlu0 %20568, %v4226_v5   ;;  %21706 = vpow2.f32 %v4870_v31 }
 0x9cf   : > { %v21701_v15 = vpop.eup %21700  ;;  %21708 = vpow2.f32 %v4872_v43 }
 0x9d0   : > { %5115 = vmatpush1.bf16.xpose.msra.mxu1 %v5082_v30  ;;  %v5033_v26 = vmul.f32 %v21701_v15, %v22841_v16  ;;  %v5032_v55 = vmul.f32 %v21701_v15, %v22835_v29  ;;  %v24670_v16 = vld [vmem:[#allocation37_spill] sm:$0xff] }
 0x9d1   : > { %v4930_v0 = vpop.xlane.xlu0 %4929  ;;  %v5030_v17 = vmul.f32 %v21699_v47, %v24670_v16 }
 0x9d2   : > { %4247 = vperm.xlu0 %20568, %v4229_v21   ;;  %v5085_v52 = vpack.c.bf16 %v5033_v26, %v5031_v56  ;;  %21710 = vrcp.f32 %v4930_v0  ;;  %v9929_v21 = vld [vmem:[%s21891_s20 + $0x10] sm:$0xff] }
 0x9d3   : > { %v5084_v22 = vpack.c.bf16 %v5032_v55, %v5030_v17  ;;  %v9931_v17 = vld [vmem:[%s21891_s20 + $0x20] sm:$0xff] }
 0x9d4   : > { %5116 = vmatprep.subr.bf16.mxu1 %v5085_v52  ;;  %v4933_v8 = vpop.xlane.xlu1 %4932  ;;  %v21703_v11 = vpop.eup %21702  ;;  %v24675_v52 = vld [vmem:[#allocation29_spill] sm:$0xff] }
 0x9d5   : > { %21712 = vrcp.f32 %v4933_v8  ;;  %v5035_v29 = vmul.f32 %v21703_v11, %v24671_v61  ;;  %v5034_v58 = vmul.f32 %v21703_v11, %v24674_v19  ;;  %v24676_v8 = vld [vmem:[#allocation30_spill] sm:$0xff] }
 0x9d6   : > { %9881 = vperm.xlu0 %20568, %v9871_v53   ;;  %v9933_v61 = vld [vmem:[%s21891_s20 + $0x30] sm:$0xff] }
 0x9d7   : > { %v21705_v60 = vpop.eup %21704 }
 0x9d8   : > { %5117 = vmatpush1.bf16.xpose.msra.mxu1 %v5084_v22  ;;  %v5037_v14 = vmul.f32 %v21705_v60, %v24672_v48  ;;  %v5036_v24 = vmul.f32 %v21705_v60, %v24673_v50  ;;  %v23021_v28 = vpop.eup %21706  ;;  %v24677_v22 = vld [vmem:[#allocation28_spill] sm:$0xff]  ;;  %v24680_v50 = vld [vmem:[#allocation33_spill] sm:$0xff] }
 0x9d9   : > { %v4936_v62 = vpop.xlane.xlu0 %4935  ;;  %v23024_v38 = vpop.eup %21708  ;;  %v24678_v48 = vld [vmem:[#allocation32_spill] sm:$0xff] }
 0x9da   : > { %9891 = vperm.xlu0 %20568, %v9873_v25   ;;  %21714 = vrcp.f32 %v4936_v62  ;;  %v5087_v13 = vpack.c.bf16 %v5037_v14, %v5035_v29  ;;  %v5086_v54 = vpack.c.bf16 %v5036_v24, %v5034_v58  ;;  %v4967_v5 = vadd.f32 %v23024_v38, %v23021_v28  ;;  %v4228_v29 = vld [vmem:[%s21868_s19 + $0x10] sm:$0xff] }
 0x9db   : > { %v4939_v57 = vpop.xlane.xlu1 %4938 }
 0x9dc   : > { %5118 = vmatprep.subr.bf16.mxu1 %v5087_v13  ;;  %21716 = vrcp.f32 %v4939_v57  ;;  %v21711_v35 = vpop.eup %21710  ;;  %v16486_v57 = vld [vmem:[#allocation2] ss:$0 sm:$0xff] }
 0x9dd   : > { %v5039_v9 = vmul.f32 %v21711_v35, %v22865_v12  ;;  %v5038_v26 = vmul.f32 %v21711_v35, %v22863_v23  ;;  %v9872_v35 = vld [vmem:[%s21886_s12 + $0x8] sm:$0xff] }
 0x9de   : > { %9937 = vperm.xlu0 %20568, %v9927_v4   ;;  %v24681_v4 = vld [vmem:[#allocation31_spill] sm:$0xff] }
 0x9df   : > { %v21713_v44 = vpop.eup %21712 }
 0x9e0   : > { %5119 = vmatpush1.bf16.xpose.msra.mxu1 %v5086_v54  ;;  %v5041_v47 = vmul.f32 %v21713_v44, %v22873_v45  ;;  %v5040_v30 = vmul.f32 %v21713_v44, %v22867_v51  ;;  %v9877_v45 = vld [vmem:[%s21886_s12 + $0x30] sm:$0xff]  ;;  %v9874_v54 = vld [vmem:[%s21886_s12 + $0x18] sm:$0xff]  ;;  %v9928_v44 = vld [vmem:[%s21891_s20 + $0x8] sm:$0xff] }
 0x9e1   : > { %4968 = vadd.xlane.f32.xlu1 %v4967_v5  ;;  %v4942_v31 = vpop.xlane.xlu0 %4941  ;;  %v9876_v5 = vld [vmem:[%s21886_s12 + $0x28] sm:$0xff] }
 0x9e2   : > { %9901 = vperm.xlu0 %20568, %v9875_v41   ;;  %21718 = vrcp.f32 %v4942_v31  ;;  %v5089_v43 = vpack.c.bf16 %v5041_v47, %v5039_v9  ;;  %v5088_v12 = vpack.c.bf16 %v5040_v30, %v5038_v26  ;;  %v9930_v41 = vld [vmem:[%s21891_s20 + $0x18] sm:$0xff]  ;;  %v9932_v47 = vld [vmem:[%s21891_s20 + $0x28] sm:$0xff]  ;;  %v21026_v30 = vld [vmem:[%s24682_s10 + $0xc0] sm:$0xff]  }
 0x9e3   : > { %v4945_v15 = vpop.xlane.xlu1 %4944  ;;  %v9878_v9 = vld [vmem:[%s21886_s12 + $0x38] sm:$0xff]  ;;  %18291 = vmatprep.subr.bf16.mxu0 %v21026_v30  ;;  %v21034_v26 = vld [vmem:[%s24682_s10 + $0xd0] sm:$0xff]  }
 0x9e4   : > { %v21715_v56 = vpop.eup %21714  ;;  %5120 = vmatprep.subr.bf16.mxu1 %v5089_v43  ;;  %21720 = vrcp.f32 %v4945_v15  ;;  %v9934_v31 = vld [vmem:[%s21891_s20 + $0x38] sm:$0xff]  ;;  %v10145_v43 = vld [vmem:[%s21911_s22] sm:$0xff] }
 0x9e5   : > { %v5043_v55 = vmul.f32 %v21715_v56, %v24675_v52  ;;  %v5042_v23 = vmul.f32 %v21715_v56, %v24677_v22  ;;  %v21028_v15 = vld [vmem:[%s24682_s10 + $0x80] sm:$0xff]   ;;  %v21032_v56 = vld [vmem:[%s24682_s10 + $0x88] sm:$0xff]  }
 0x9e6   : > { %v21717_v0 = vpop.eup %21716  ;;  %9947 = vperm.xlu0 %20568, %v9929_v21   ;;  %v21030_v21 = vld [vmem:[%s24682_s10 + $0xc8] sm:$0xff]   ;;  %18292 = vmatpush3.bf16.msra.mxu0 %v21028_v15  ;;  %v21042_v52 = vld [vmem:[%s24682_s10 + $0xe0] sm:$0xff]  }
 0x9e7   : > { %v5045_v53 = vmul.f32 %v21717_v0, %v22887_v10  ;;  %v5044_v16 = vmul.f32 %v21717_v0, %v24676_v8  ;;  %v24679_v10 = vld [vmem:[#allocation34_spill] sm:$0xff]  ;;  %18293 = vmatprep.subr.bf16.mxu0 %v21030_v21 }
 0x9e8   : > { %5121 = vmatpush1.bf16.xpose.msra.mxu1 %v5088_v12  ;;  %v21036_v0 = vld [vmem:[%s24682_s10 + $0x90] sm:$0xff]   ;;  %v21038_v12 = vld [vmem:[%s24682_s10 + $0xd8] sm:$0xff]  }
 0x9e9   : > { %v5091_v51 = vpack.c.bf16 %v5045_v53, %v5043_v55  ;;  %v5090_v25 = vpack.c.bf16 %v5044_v16, %v5042_v23  ;;  %v21044_v53 = vld [vmem:[%s24682_s10 + $0xa0] sm:$0xff]   ;;  %v21048_v16 = vld [vmem:[%s24682_s10 + $0xa8] sm:$0xff]  }
 0x9ea   : > { %9911 = vperm.xlu0 %20568, %v9877_v45   ;;  %18294 = vmatpush3.bf16.msra.mxu0 %v21032_v56  ;;  %v21040_v45 = vld [vmem:[%s24682_s10 + $0x98] sm:$0xff]  }
 0x9eb   : > { %5122 = vmatprep.subr.bf16.mxu1 %v5091_v51  ;;  %18295 = vmatprep.subr.bf16.mxu0 %v21034_v26  ;;  %v4951_v55 = vpop.xlane.xlu1 %4950  ;;  %v21046_v51 = vld [vmem:[%s24682_s10 + $0xe8] sm:$0xff]  }
 0x9ec   : > { %v21719_v11 = vpop.eup %21718  ;;  %21722 = vrcp.f32 %v4951_v55 }
 0x9ed   : > { %v5047_v14 = vmul.f32 %v21719_v11, %v24678_v48  ;;  %v5046_v19 = vmul.f32 %v21719_v11, %v24681_v4 }
 0x9ee   : > { %v21721_v60 = vpop.eup %21720  ;;  %9957 = vperm.xlu0 %20568, %v9931_v17   ;;  %18296 = vmatpush3.bf16.msra.mxu0 %v21036_v0 }
 0x9ef   : > { %v5049_v62 = vmul.f32 %v21721_v60, %v24679_v10  ;;  %v5048_v24 = vmul.f32 %v21721_v60, %v24680_v50  ;;  %18297 = vmatprep.subr.bf16.mxu0 %v21038_v12 }
 0x9f0   : > { %5123 = vmatpush1.bf16.xpose.msra.mxu1 %v5090_v25 }
 0x9f1   : > { %v5093_v13 = vpack.c.bf16 %v5049_v62, %v5047_v14  ;;  %v5092_v58 = vpack.c.bf16 %v5048_v24, %v5046_v19  ;;  %v24684_v14 = vld [vmem:[#allocation35_spill] sm:$0xff] }
 0x9f2   : > { %9967 = vperm.xlu0 %20568, %v9933_v61   ;;  %4242 = vperm.xlu1 %20569, %v4228_v29   ;;  %v24683_v61 = vld [vmem:[#allocation36_spill] sm:$0xff] }
 0x9f3   : > { %5124 = vmatprep.subr.bf16.mxu1 %v5093_v13  ;;  %18298 = vmatpush3.bf16.msra.mxu0 %v21040_v45 }
 0x9f4   : > { %18299 = vmatprep.subr.bf16.mxu0 %v21042_v52 }
 0x9f6   : > { %5162 = vperm.xlu1 %20569, %v16486_v57   ;;  %v21723_v22 = vpop.eup %21722 }
 0x9f7   : > { %18300 = vmatpush3.bf16.msra.mxu0 %v21044_v53  ;;  %v5053_v29 = vmul.f32 %v21723_v22, %v24683_v61  ;;  %v5052_v10 = vmul.f32 %v21723_v22, %v24684_v14  ;;  %v21047_v22 = vld [vmem:[%s24682_s10 + $0x68] sm:$0xff]   ;;  %v21052_v61 = vld [vmem:[%s24682_s10 + $0xb0] sm:$0xff]   ;;  %v21055_v14 = vld [vmem:[%s24682_s10 + $0x78] sm:$0xff]  }
 0x9f8   : > { %5125 = vmatpush1.bf16.xpose.msra.mxu1 %v5092_v58  ;;  %18301 = vmatprep.subr.bf16.mxu0 %v21046_v51  ;;  %v21029_v51 = vld [vmem:[%s24682_s10] sm:$0xff]  }
 0x9fa   : > { %9886 = vperm.xlu1 %20569, %v9872_v35  }
 0x9fb   : > { %18302 = vmatpush3.bf16.msra.mxu0 %v21048_v16  ;;  %v21041_v16 = vld [vmem:[%s24682_s10 + $0x18] sm:$0xff]  }
 0x9fe   : > { %9896 = vperm.xlu1 %20569, %v9874_v54  }
 0xa02   : > { %9942 = vperm.xlu1 %20569, %v9928_v44  }
 0xa06   : > { %9906 = vperm.xlu1 %20569, %v9876_v5  }
 0xa0a   : > { %9952 = vperm.xlu1 %20569, %v9930_v41  }
 0xa0e   : > { %9916 = vperm.xlu1 %20569, %v9878_v9  }
 0xa12   : > { %9962 = vperm.xlu1 %20569, %v9932_v47  }
 0xa16   : > { %9972 = vperm.xlu1 %20569, %v9934_v31  }
 0xa1a   : > { %10148 = vperm.xlu1 %20569, %v10145_v43  }
 0xa2d   : > { %v4948_v8 = vpop.xlane.xlu0 %4947 }
 0xa2e   : > { %21724 = vrcp.f32 %v4948_v8  ;;  %v21031_v8 = vld [vmem:[%s24682_s10 + $0x48] sm:$0xff]  }
 0xa2f   : > { %v4957_v17 = vpop.xlane.xlu1 %4956 }
 0xa30   : > { %21726 = vrcp.f32 %v4957_v17  ;;  %v21043_v17 = vld [vmem:[%s24682_s10 + $0x60] sm:$0xff]  }
 0xa35   : > { %v4954_v11 = vpop.xlane.xlu0 %4953 }
 0xa36   : > { %21728 = vrcp.f32 %v4954_v11  ;;  %v21045_v11 = vld [vmem:[%s24682_s10 + $0x20] sm:$0xff]  }
 0xa38   : > { %v21725_v23 = vpop.eup %21724 }
 0xa39   : > { %v4963_v60 = vpop.xlane.xlu1 %4962  ;;  %v5051_v25 = vmul.f32 %v21725_v23, %v22925_v6  ;;  %v5050_v48 = vmul.f32 %v21725_v23, %v22923_v7  ;;  %v21049_v23 = vld [vmem:[%s24682_s10 + $0x28] sm:$0xff]  }
 0xa3a   : > { %21730 = vrcp.f32 %v4963_v60  ;;  %v21727_v24 = vpop.eup %21726  ;;  %v21050_v60 = vld [vmem:[%s24682_s10 + $0xf0] sm:$0xff]  }
 0xa3b   : > { %v5095_v62 = vpack.c.bf16 %v5053_v29, %v5051_v25  ;;  %v5094_v13 = vpack.c.bf16 %v5052_v10, %v5050_v48  ;;  %v5057_v19 = vmul.f32 %v21727_v24, %v22933_v18  ;;  %v5056_v58 = vmul.f32 %v21727_v24, %v22927_v3  ;;  %v21051_v25 = vld [vmem:[%s24682_s10 + $0x70] sm:$0xff]   ;;  %18303 = vmatprep.subr.bf16.mxu0 %v21050_v60  ;;  %v21054_v48 = vld [vmem:[%s24682_s10 + $0xf8] sm:$0xff]   ;;  %v21077_v60 = vld [vmem:[%s24682_s10 + $0x208] sm:$0xff]  }
 0xa3c   : > { %v21053_v29 = vld [vmem:[%s24682_s10 + $0x30] sm:$0xff]   ;;  %18304 = vmatpush3.bf16.msra.mxu0 %v21052_v61  ;;  %v21056_v10 = vld [vmem:[%s24682_s10 + $0xb8] sm:$0xff]  }
 0xa3d   : > { %v4960_v50 = vpop.xlane.xlu0 %4959  ;;  %5126 = vmatprep.subr.bf16.mxu1 %v5095_v62  ;;  %v4238_v18 = vpop.permute.xlu1 %4237  ;;  %18305 = vmatprep.subr.bf16.mxu0 %v21054_v48  ;;  %v21057_v62 = vld [vmem:[%s24682_s10 + $0x38] sm:$0xff]   ;;  %v21079_v61 = vld [vmem:[%s24682_s10 + $0x210] sm:$0xff]  }
 0xa3e   : > { %21732 = vrcp.f32 %v4960_v50  ;;  %5127 = vmatpush1.bf16.xpose.msra.mxu1 %v5094_v13  ;;  %v4305_v3 = vadd.f32 %v22986_v2, %v4238_v18  ;;  %v4307_v30 = vadd.f32 %v22988_v39, %v4238_v18  ;;  %v21058_v13 = vld [vmem:[%s24682_s10 + $0x140] sm:$0xff]   ;;  %v21081_v48 = vld [vmem:[%s24682_s10 + $0x218] sm:$0xff]  }
 0xa40   : > { %v21729_v57 = vpop.eup %21728  ;;  %18306 = vmatpush3.bf16.msra.mxu0 %v21056_v10  ;;  %v21083_v10 = vld [vmem:[%s24682_s10 + $0x220] sm:$0xff]  }
 0xa41   : > { %v5055_v4 = vmul.f32 %v21729_v57, %v22945_v27  ;;  %v5054_v6 = vmul.f32 %v21729_v57, %v22943_v49  ;;  %18331 = vmatprep.subr.bf16.mxu0 %v21058_v13  ;;  %v21085_v13 = vld [vmem:[%s24682_s10 + $0x228] sm:$0xff]  }
 0xa43   : > { %v5097_v7 = vpack.c.bf16 %v5057_v19, %v5055_v4  ;;  %v5096_v35 = vpack.c.bf16 %v5056_v58, %v5054_v6 }
 0xa44   : > { %v21731_v54 = vpop.eup %21730 }
 0xa45   : > { %5128 = vmatprep.subr.bf16.mxu1 %v5097_v7  ;;  %v4966_v5 = vpop.xlane.xlu0 %4965  ;;  %v5061_v9 = vmul.f32 %v21731_v54, %v22953_v33  ;;  %v5060_v27 = vmul.f32 %v21731_v54, %v22951_v20  ;;  %v24685_v54 = vld [vmem:[#allocation16_spill] sm:$0xff] }
 0xa46   : > { %5129 = vmatpush1.bf16.xpose.msra.mxu1 %v5096_v35  ;;  %21734 = vrcp.f32 %v4966_v5  ;;  %v24686_v5 = vld [vmem:[#allocation17_spill] sm:$0xff] }
 0xa48   : > { %v21733_v44 = vpop.eup %21732 }
 0xa49   : > { %v5059_v41 = vmul.f32 %v21733_v44, %v22963_v63  ;;  %v5058_v47 = vmul.f32 %v21733_v44, %v22961_v59 }
 0xa4b   : > { %v5099_v31 = vpack.c.bf16 %v5061_v9, %v5059_v41  ;;  %v5098_v49 = vpack.c.bf16 %v5060_v27, %v5058_v47  ;;  %v24687_v9 = vld [vmem:[#allocation18_spill] sm:$0xff]  ;;  %v24688_v27 = vld [vmem:[#allocation19_spill] sm:$0xff] }
 0xa4d   : > { %v4233_v43 = vpop.permute.xlu0 %4232  ;;  %5130 = vmatprep.subr.bf16.mxu1 %v5099_v31 }
 0xa4e   : > { %v4301_v15 = vadd.f32 %v22981_v40, %v4233_v43  ;;  %v4303_v21 = vadd.f32 %v22983_v42, %v4233_v43  ;;  %5131 = vmatpush1.bf16.xpose.msra.mxu1 %v5098_v49 }
 0xa50   : > { %v5066_v63 = vpack.c.bf16 %v4305_v3, %v4301_v15  ;;  %v5067_v33 = vpack.c.bf16 %v4307_v30, %v4303_v21  ;;  %v21735_v12 = vpop.eup %21734  ;;  %v21059_v3 = vld [vmem:[%s24682_s10 + $0x100] sm:$0xff]   ;;  %v21060_v21 = vld [vmem:[%s24682_s10 + $0x148] sm:$0xff]  }
 0xa51   : > { %v4248_v20 = vpop.permute.xlu0 %4247  ;;  %v5063_v52 = vmul.f32 %v21735_v12, %v22973_v1  ;;  %v21035_v1 = vld [vmem:[%s24682_s10 + $0x50] sm:$0xff]  }
 0xa52   : > { %5134 = vmatprep.mubr.bf16.mxu1 %v5067_v33  ;;  %v4315_v26 = vadd.f32 %v23011_v32, %v4248_v20  ;;  %v4317_v2 = vadd.f32 %v23014_v37, %v4248_v20  ;;  %v5062_v32 = vmul.f32 %v21735_v12, %v22971_v36  ;;  %v21033_v36 = vld [vmem:[%s24682_s10 + $0x8] sm:$0xff]   ;;  %v24691_v12 = vld [vmem:[#allocation22_spill] sm:$0xff] }
 0xa6e   : > { %v4969_v59 = vpop.xlane.xlu1 %4968 }
 0xa6f   : > { %21736 = vrcp.f32 %v4969_v59 }
 0xa72   : > { %v4243_v56 = vpop.permute.xlu1 %4242 }
 0xa73   : > { %v4311_v39 = vadd.f32 %v23006_v46, %v4243_v56  ;;  %v4313_v40 = vadd.f32 %v23008_v34, %v4243_v56  ;;  %v21027_v34 = vld [vmem:[%s24682_s10 + $0x40] sm:$0xff]  }
 0xa75   : > { %v5068_v42 = vpack.c.bf16 %v4315_v26, %v4311_v39  ;;  %v5069_v0 = vpack.c.bf16 %v4317_v2, %v4313_v40  ;;  %v21061_v26 = vld [vmem:[%s24682_s10 + $0x108] sm:$0xff]  }
 0xa76   : > { %v5163_v50 = vpop.permute.xlu1 %5162  ;;  %v24689_v2 = vld [vmem:[#allocation20_spill] sm:$0xff]  ;;  %v24690_v40 = vld [vmem:[#allocation21_spill] sm:$0xff] }
 0xa79   : > { %v21737_v45 = vpop.eup %21736 }
 0xa7a   : > { %v5065_v55 = vmul.f32 %v21737_v45, %v23024_v38  ;;  %v5064_v37 = vmul.f32 %v21737_v45, %v23021_v28  ;;  %v21037_v28 = vld [vmem:[%s24682_s10 + $0x10] sm:$0xff]   ;;  %v21039_v38 = vld [vmem:[%s24682_s10 + $0x58] sm:$0xff]  }
 0xa7c   : > { %v5101_v46 = vpack.c.bf16 %v5065_v55, %v5063_v52  ;;  %v5100_v53 = vpack.c.bf16 %v5064_v37, %v5062_v32  ;;  %v24692_v52 = vld [vmem:[#allocation23_spill] sm:$0xff] }
 0xa7e   : > { %5132 = vmatprep.subr.bf16.mxu1 %v5101_v46  ;;  %v21063_v46 = vld [vmem:[%s24682_s10 + $0x110] sm:$0xff]  }
 0xa7f   : > { %5133 = vmatpush1.bf16.xpose.msra.mxu1 %v5100_v53  ;;  %v21064_v53 = vld [vmem:[%s24682_s10 + $0x158] sm:$0xff]  }
 0xa80   : > { %18263 = vmatprep.subr.bf16.mxu1 %v21027_v34  ;;  %v21065_v34 = vld [vmem:[%s24682_s10 + $0x118] sm:$0xff]  }
 0xa86   : > { %5135 = vmatmul.mubr.bf16.vlgmr.msra.gmra.mrb[120].mxu1 %v5066_v63 }
 0xa87   : > { %5144 = vmatprep.mubr.bf16.mxu1 %v5069_v0  ;;  %18264 = vmatpush3.bf16.msra.mxu1 %v21029_v51  ;;  %v21062_v0 = vld [vmem:[%s24682_s10 + $0x150] sm:$0xff]   ;;  %v21066_v51 = vld [vmem:[%s24682_s10 + $0x160] sm:$0xff]  }
 0xa88   : > { %18265 = vmatprep.subr.bf16.mxu1 %v21031_v8  ;;  %v21067_v8 = vld [vmem:[%s24682_s10 + $0x120] sm:$0xff]  }
 0xa8b   : > { %18266 = vmatpush3.bf16.msra.mxu1 %v21033_v36  ;;  %v21068_v36 = vld [vmem:[%s24682_s10 + $0x168] sm:$0xff]  }
 0xa8c   : > { %18267 = vmatprep.subr.bf16.mxu1 %v21035_v1  ;;  %v21069_v1 = vld [vmem:[%s24682_s10 + $0x128] sm:$0xff]  }
 0xa8e   : > { %5145 = vmatmul.mubr.bf16.gmra.mrb[124].mxu1 %v5068_v42 }
 0xa8f   : > { %18268 = vmatpush3.bf16.msra.mxu1 %v21037_v28  ;;  %v21070_v28 = vld [vmem:[%s24682_s10 + $0x170] sm:$0xff]  }
 0xa90   : > { %18269 = vmatprep.subr.bf16.mxu1 %v21039_v38  ;;  %v21071_v38 = vld [vmem:[%s24682_s10 + $0x130] sm:$0xff]  }
 0xa93   : > { %18270 = vmatpush3.bf16.msra.mxu1 %v21041_v16  ;;  %v21072_v16 = vld [vmem:[%s24682_s10 + $0x178] sm:$0xff]  }
 0xa94   : > { %18271 = vmatprep.subr.bf16.mxu1 %v21043_v17  ;;  %v21073_v17 = vld [vmem:[%s24682_s10 + $0x138] sm:$0xff]  }
 0xa97   : > { %18272 = vmatpush3.bf16.msra.mxu1 %v21045_v11  ;;  %v21074_v11 = vld [vmem:[%s24682_s10 + $0x240] sm:$0xff]  }
 0xa98   : > { %18273 = vmatprep.subr.bf16.mxu1 %v21047_v22  ;;  %v21075_v22 = vld [vmem:[%s24682_s10 + $0x200] sm:$0xff]  }
 0xa9b   : > { %18274 = vmatpush3.bf16.msra.mxu1 %v21049_v23  ;;  %v21076_v23 = vld [vmem:[%s24682_s10 + $0x248] sm:$0xff]  }
 0xa9c   : > { %18275 = vmatprep.subr.bf16.mxu1 %v21051_v25  ;;  %v21078_v25 = vld [vmem:[%s24682_s10 + $0x250] sm:$0xff]  }
 0xa9f   : > { %18276 = vmatpush3.bf16.msra.mxu1 %v21053_v29  ;;  %v21080_v29 = vld [vmem:[%s24682_s10 + $0x258] sm:$0xff]  }
 0xaa0   : > { %18277 = vmatprep.subr.bf16.mxu1 %v21055_v14  ;;  %v21082_v14 = vld [vmem:[%s24682_s10 + $0x260] sm:$0xff]  }
 0xaa3   : > { %18278 = vmatpush3.bf16.msra.mxu1 %v21057_v62  ;;  %v21084_v62 = vld [vmem:[%s24682_s10 + $0x268] sm:$0xff]  }
 0xb59   : > { %v5136_v24 = vpop.f32.mrb[120].mxu1 }
 0xb5a   : > { %v5165_v57 = vmul.f32 %v5163_v50, %v5136_v24  ;;  %v5138_v4 = vpop.f32.mrb[121].mxu1  ;;  %v21087_v24 = vld [vmem:[%s24682_s10 + $0x230] sm:$0xff]  }
 0xb5b   : > { %v5166_v19 = vmul.f32 %v5163_v50, %v5138_v4  ;;  %v5140_v6 = vpop.f32.mrb[122].mxu1  ;;  %v21089_v4 = vld [vmem:[%s24682_s10 + $0x238] sm:$0xff]  }
 0xb5c   : > { %v5167_v58 = vmul.f32 %v5163_v50, %v5140_v6  ;;  %v5142_v7 = vpop.f32.mrb[123].mxu1  ;;  %v5173_v44 = vadd.f32 %v5165_v57, %v24685_v54  ;;  %v21088_v57 = vld [vmem:[%s24682_s10 + $0x278] sm:$0xff]   ;;  %v21091_v6 = vld [vmem:[%s24682_s10 + $0x280] sm:$0xff]   ;;  %v21095_v54 = vld [vmem:[%s24682_s10 + $0x290] sm:$0xff]  }
 0xb5d   : > { %v5168_v35 = vmul.f32 %v5163_v50, %v5142_v7  ;;  %v5174_v47 = vadd.f32 %v5166_v19, %v24687_v9  ;;  %v21090_v19 = vld [vmem:[%s24682_s10 + $0x2c0] sm:$0xff]   ;;  %v21093_v7 = vld [vmem:[%s24682_s10 + $0x288] sm:$0xff]  }
 0xb5e   : > { %v5175_v41 = vadd.f32 %v5167_v58, %v24686_v5  ;;  %v21092_v58 = vld [vmem:[%s24682_s10 + $0x2c8] sm:$0xff]   ;;  %v21097_v5 = vld [vmem:[%s24682_s10 + $0x298] sm:$0xff]   ;;  %v21099_v9 = vld [vmem:[%s24682_s10 + $0x2a0] sm:$0xff]  }
 0xb5f   : > { %v5176_v18 = vadd.f32 %v5168_v35, %v24688_v27  ;;  %v21094_v35 = vld [vmem:[%s24682_s10 + $0x2d0] sm:$0xff]   ;;  %v21101_v27 = vld [vmem:[%s24682_s10 + $0x2a8] sm:$0xff]  }
 0xb60   : > { %v23117_v31 = vpack.c.bf16 %v5175_v41, %v5173_v44  ;;  %v21096_v44 = vld [vmem:[%s24682_s10 + $0x2d8] sm:$0xff]   ;;  %v21098_v41 = vld [vmem:[%s24682_s10 + $0x2e0] sm:$0xff]  }
 0xb61   : > { %v23119_v49 = vpack.c.bf16 %v5176_v18, %v5174_v47  ;;  %v5146_v43 = vpop.f32.mrb[124].mxu1  ;;  %v21100_v47 = vld [vmem:[%s24682_s10 + $0x2e8] sm:$0xff]   ;;  %v21102_v18 = vld [vmem:[%s24682_s10 + $0x2f0] sm:$0xff]  }
 0xb62   : > { %v5169_v30 = vmul.f32 %v5163_v50, %v5146_v43  ;;  %v5148_v15 = vpop.f32.mrb[125].mxu1  ;;  %v21103_v43 = vld [vmem:[%s24682_s10 + $0x2b0] sm:$0xff]  }
 0xb63   : > { %v5170_v63 = vmul.f32 %v5163_v50, %v5148_v15  ;;  %v5150_v33 = vpop.f32.mrb[126].mxu1  ;;  %5345 = vmatprep.mubr.bf16.mxu1 %v23119_v49  ;;  %5533 = vmatprep.mubr.bf16.mxu0 %v23119_v49  ;;  %v21106_v15 = vld [vmem:[%s24682_s10 + $0x340] sm:$0xff]  }
 0xb64   : > { %v5171_v59 = vmul.f32 %v5163_v50, %v5150_v33  ;;  %v5152_v20 = vpop.f32.mrb[127].mxu1  ;;  %5346 = vmatmul.mubr.bf16.vlgmr.msra.gmra.mrb[128].mxu1 %v23117_v31  ;;  %5534 = vmatmul.mubr.bf16.vlgmr.msra.gmra.mrb[32].mxu0 %v23117_v31  ;;  %v5177_v39 = vadd.f32 %v5169_v30, %v24689_v2  ;;  %v21105_v30 = vld [vmem:[%s24682_s10 + $0x2b8] sm:$0xff]   ;;  %v21109_v33 = vld [vmem:[%s24682_s10 + $0x308] sm:$0xff]  }
 0xb65   : > { %v5172_v56 = vmul.f32 %v5163_v50, %v5152_v20  ;;  %18332 = vmatpush3.bf16.msra.mxu0 %v21059_v3  ;;  %v5178_v45 = vadd.f32 %v5170_v63, %v24691_v12  ;;  %v21086_v50 = vld [vmem:[%s24682_s10 + $0x270] sm:$0xff]   ;;  %v21104_v3 = vld [vmem:[%s24682_s10 + $0x2f8] sm:$0xff]   ;;  %v21108_v63 = vld [vmem:[%s24682_s10 + $0x348] sm:$0xff]  }
 0xb66   : > { %v5179_v42 = vadd.f32 %v5171_v59, %v24690_v40  ;;  %18333 = vmatprep.subr.bf16.mxu0 %v21060_v21  ;;  %v21107_v21 = vld [vmem:[%s24682_s10 + $0x300] sm:$0xff]   ;;  %v21110_v59 = vld [vmem:[%s24682_s10 + $0x350] sm:$0xff]   ;;  %v21113_v2 = vld [vmem:[%s24682_s10 + $0x318] sm:$0xff]  }
 0xb67   : > { %v5180_v55 = vadd.f32 %v5172_v56, %v24692_v52  ;;  %v21111_v20 = vld [vmem:[%s24682_s10 + $0x310] sm:$0xff]   ;;  %v21174_v56 = vld [vmem:[%s24693_s11 + $0x20] sm:$0xff]   ;;  %v21120_v52 = vld [vmem:[%s24682_s10 + $0x378] sm:$0xff]  }
 0xb68   : > { %v23133_v32 = vpack.c.bf16 %v5179_v42, %v5177_v39  ;;  %v21114_v39 = vld [vmem:[%s24682_s10 + $0x360] sm:$0xff]   ;;  %v21116_v42 = vld [vmem:[%s24682_s10 + $0x368] sm:$0xff]   ;;  %v21118_v12 = vld [vmem:[%s24682_s10 + $0x370] sm:$0xff]  }
 0xb69   : > { %v23135_v37 = vpack.c.bf16 %v5180_v55, %v5178_v45  ;;  %18334 = vmatpush3.bf16.msra.mxu0 %v21061_v26  ;;  %v21112_v26 = vld [vmem:[%s24682_s10 + $0x358] sm:$0xff]   ;;  %v21115_v40 = vld [vmem:[%s24682_s10 + $0x320] sm:$0xff]   ;;  %v21119_v45 = vld [vmem:[%s24682_s10 + $0x330] sm:$0xff]  }
 0xb6a   : > { %18335 = vmatprep.subr.bf16.mxu0 %v21062_v0  ;;  %v21117_v0 = vld [vmem:[%s24682_s10 + $0x328] sm:$0xff]   ;;  %v21121_v55 = vld [vmem:[%s24682_s10 + $0x338] sm:$0xff]  }
 0xb6b   : > { %5353 = vmatprep.mubr.bf16.mxu1 %v23135_v37  ;;  %5541 = vmatprep.mubr.bf16.mxu0 %v23135_v37 }
 0xb6c   : > { %5354 = vmatmul.mubr.bf16.gmra.mrb[132].mxu1 %v23133_v32  ;;  %5542 = vmatmul.mubr.bf16.gmra.mrb[36].mxu0 %v23133_v32 }
 0xb6d   : > { %18336 = vmatpush3.bf16.msra.mxu0 %v21063_v46  ;;  %5916 = vmatprep.mubr.bf16.mxu0 %v23119_v49  ;;  %v21122_v46 = vld [vmem:[%s24682_s10 + $0x440] sm:$0xff]  }
 0xb6e   : > { %18337 = vmatprep.subr.bf16.mxu0 %v21064_v53  ;;  %19201 = vmatprep.mubr.msk.bf16.mxu1 %vm3961_vm10, %v21174_v56  ;;  %v21123_v53 = vld [vmem:[%s24682_s10 + $0x400] sm:$0xff]  }
 0xb71   : > { %18338 = vmatpush3.bf16.msra.mxu0 %v21065_v34  ;;  %v21124_v34 = vld [vmem:[%s24682_s10 + $0x448] sm:$0xff]  }
 0xb72   : > { %18339 = vmatprep.subr.bf16.mxu0 %v21066_v51  ;;  %v21125_v51 = vld [vmem:[%s24682_s10 + $0x408] sm:$0xff]  }
 0xb75   : > { %18340 = vmatpush3.bf16.msra.mxu0 %v21067_v8  ;;  %v21126_v8 = vld [vmem:[%s24682_s10 + $0x450] sm:$0xff]  }
 0xb76   : > { %18341 = vmatprep.subr.bf16.mxu0 %v21068_v36  ;;  %v21127_v36 = vld [vmem:[%s24682_s10 + $0x410] sm:$0xff]  }
 0xb79   : > { %18342 = vmatpush3.bf16.msra.mxu0 %v21069_v1  ;;  %v21128_v1 = vld [vmem:[%s24682_s10 + $0x458] sm:$0xff]  }
 0xb7a   : > { %18343 = vmatprep.subr.bf16.mxu0 %v21070_v28  ;;  %v21129_v28 = vld [vmem:[%s24682_s10 + $0x418] sm:$0xff]  }
 0xb7d   : > { %18344 = vmatpush3.bf16.msra.mxu0 %v21071_v38  ;;  %v21130_v38 = vld [vmem:[%s24682_s10 + $0x460] sm:$0xff]  }
 0xb7e   : > { %18345 = vmatprep.subr.bf16.mxu0 %v21072_v16  ;;  %v21131_v16 = vld [vmem:[%s24682_s10 + $0x420] sm:$0xff]  }
 0xb81   : > { %18346 = vmatpush3.bf16.msra.mxu0 %v21073_v17  ;;  %v21132_v17 = vld [vmem:[%s24682_s10 + $0x468] sm:$0xff]  }
 0xb82   : > { %18399 = vmatprep.subr.bf16.mxu0 %v21074_v11  ;;  %v21133_v11 = vld [vmem:[%s24682_s10 + $0x428] sm:$0xff]  }
 0xb84   : > { %5917 = vmatmul.mubr.bf16.vlgmr.msra.gmra.mrb[40].mxu0 %v23117_v31 }
 0xb85   : > { %5924 = vmatprep.mubr.bf16.mxu0 %v23135_v37  ;;  %18400 = vmatpush3.bf16.msra.mxu0 %v21075_v22  ;;  %v21134_v22 = vld [vmem:[%s24682_s10 + $0x470] sm:$0xff]  }
 0xb86   : > { %18401 = vmatprep.subr.bf16.mxu0 %v21076_v23  ;;  %v21135_v23 = vld [vmem:[%s24682_s10 + $0x430] sm:$0xff]  }
 0xb89   : > { %18402 = vmatpush3.bf16.msra.mxu0 %v21077_v60  ;;  %v21136_v60 = vld [vmem:[%s24682_s10 + $0x478] sm:$0xff]  }
 0xb8a   : > { %18403 = vmatprep.subr.bf16.mxu0 %v21078_v25  ;;  %v21137_v25 = vld [vmem:[%s24682_s10 + $0x438] sm:$0xff]  }
 0xb8c   : > { %5925 = vmatmul.mubr.bf16.gmra.mrb[44].mxu0 %v23133_v32 }
 0xb8d   : > { %18404 = vmatpush3.bf16.msra.mxu0 %v21079_v61  ;;  %6504 = vmatprep.mubr.bf16.mxu0 %v23119_v49  ;;  %v21138_v61 = vld [vmem:[%s24682_s10 + $0x4c0] sm:$0xff]  }
 0xb8e   : > { %18405 = vmatprep.subr.bf16.mxu0 %v21080_v29  ;;  %v21139_v29 = vld [vmem:[%s24682_s10 + $0x480] sm:$0xff]  }
 0xb91   : > { %18406 = vmatpush3.bf16.msra.mxu0 %v21081_v48  ;;  %v21140_v48 = vld [vmem:[%s24682_s10 + $0x4c8] sm:$0xff]  }
 0xb92   : > { %18407 = vmatprep.subr.bf16.mxu0 %v21082_v14  ;;  %v21141_v14 = vld [vmem:[%s24682_s10 + $0x488] sm:$0xff]  }
 0xb95   : > { %18408 = vmatpush3.bf16.msra.mxu0 %v21083_v10  ;;  %v21142_v10 = vld [vmem:[%s24682_s10 + $0x4d0] sm:$0xff]  }
 0xb96   : > { %18409 = vmatprep.subr.bf16.mxu0 %v21084_v62  ;;  %v21143_v62 = vld [vmem:[%s24682_s10 + $0x490] sm:$0xff]  }
 0xb99   : > { %18410 = vmatpush3.bf16.msra.mxu0 %v21085_v13  ;;  %v21144_v13 = vld [vmem:[%s24682_s10 + $0x4d8] sm:$0xff]  }
 0xb9a   : > { %18411 = vmatprep.subr.bf16.mxu0 %v21086_v50  ;;  %v21145_v50 = vld [vmem:[%s24682_s10 + $0x498] sm:$0xff]  }
 0xb9d   : > { %18412 = vmatpush3.bf16.msra.mxu0 %v21087_v24  ;;  %v21146_v24 = vld [vmem:[%s24682_s10 + $0x4e0] sm:$0xff]  }
 0xb9e   : > { %18413 = vmatprep.subr.bf16.mxu0 %v21088_v57  ;;  %v21147_v57 = vld [vmem:[%s24682_s10 + $0x4a0] sm:$0xff]  }
 0xba1   : > { %18414 = vmatpush3.bf16.msra.mxu0 %v21089_v4  ;;  %v21148_v4 = vld [vmem:[%s24682_s10 + $0x4e8] sm:$0xff]  }
 0xba2   : > { %18433 = vmatprep.subr.bf16.mxu0 %v21090_v19  ;;  %v21149_v19 = vld [vmem:[%s24682_s10 + $0x4a8] sm:$0xff]  }
 0xba4   : > { %6505 = vmatmul.mubr.bf16.vlgmr.msra.gmra.mrb[48].mxu0 %v23117_v31 }
 0xba5   : > { %6512 = vmatprep.mubr.bf16.mxu0 %v23135_v37  ;;  %18434 = vmatpush3.bf16.msra.mxu0 %v21091_v6  ;;  %v21150_v6 = vld [vmem:[%s24682_s10 + $0x4f0] sm:$0xff]  }
 0xba6   : > { %18435 = vmatprep.subr.bf16.mxu0 %v21092_v58  ;;  %v21151_v58 = vld [vmem:[%s24682_s10 + $0x4b0] sm:$0xff]  }
 0xba9   : > { %18436 = vmatpush3.bf16.msra.mxu0 %v21093_v7  ;;  %v21152_v7 = vld [vmem:[%s24682_s10 + $0x4f8] sm:$0xff]  }
 0xbaa   : > { %18437 = vmatprep.subr.bf16.mxu0 %v21094_v35  ;;  %v21153_v35 = vld [vmem:[%s24682_s10 + $0x4b8] sm:$0xff]  }
 0xbac   : > { %6513 = vmatmul.mubr.bf16.gmra.mrb[52].mxu0 %v23133_v32 }
 0xbad   : > { %18438 = vmatpush3.bf16.msra.mxu0 %v21095_v54  ;;  %6798 = vmatprep.mubr.bf16.mxu0 %v23119_v49  ;;  %v21154_v54 = vld [vmem:[%s24682_s10 + $0x540] sm:$0xff]  }
 0xbae   : > { %18439 = vmatprep.subr.bf16.mxu0 %v21096_v44  ;;  %v21155_v44 = vld [vmem:[%s24682_s10 + $0x500] sm:$0xff]  }
 0xbb1   : > { %18440 = vmatpush3.bf16.msra.mxu0 %v21097_v5  ;;  %v21156_v5 = vld [vmem:[%s24682_s10 + $0x548] sm:$0xff]  }
 0xbb2   : > { %18441 = vmatprep.subr.bf16.mxu0 %v21098_v41  ;;  %v21157_v41 = vld [vmem:[%s24682_s10 + $0x508] sm:$0xff]  }
 0xbb5   : > { %18442 = vmatpush3.bf16.msra.mxu0 %v21099_v9  ;;  %v21158_v9 = vld [vmem:[%s24682_s10 + $0x550] sm:$0xff]  }
 0xbb6   : > { %18443 = vmatprep.subr.bf16.mxu0 %v21100_v47  ;;  %v21159_v47 = vld [vmem:[%s24682_s10 + $0x510] sm:$0xff]  }
 0xbb9   : > { %18444 = vmatpush3.bf16.msra.mxu0 %v21101_v27  ;;  %v21160_v27 = vld [vmem:[%s24682_s10 + $0x558] sm:$0xff]  }
 0xbba   : > { %18445 = vmatprep.subr.bf16.mxu0 %v21102_v18  ;;  %v21161_v18 = vld [vmem:[%s24682_s10 + $0x518] sm:$0xff]  }
 0xbbd   : > { %18446 = vmatpush3.bf16.msra.mxu0 %v21103_v43  ;;  %v21162_v43 = vld [vmem:[%s24682_s10 + $0x560] sm:$0xff]  }
 0xbbe   : > { %18447 = vmatprep.subr.bf16.mxu0 %v21104_v3  ;;  %v21163_v3 = vld [vmem:[%s24682_s10 + $0x520] sm:$0xff]  }
 0xbc1   : > { %18448 = vmatpush3.bf16.msra.mxu0 %v21105_v30  ;;  %v21164_v30 = vld [vmem:[%s24682_s10 + $0x568] sm:$0xff]  }
 0xbc2   : > { %18467 = vmatprep.subr.bf16.mxu0 %v21106_v15  ;;  %v21165_v15 = vld [vmem:[%s24682_s10 + $0x528] sm:$0xff]  }
 0xbc4   : > { %6799 = vmatmul.mubr.bf16.vlgmr.msra.gmra.mrb[56].mxu0 %v23117_v31 }
 0xbc5   : > { %6806 = vmatprep.mubr.bf16.mxu0 %v23135_v37  ;;  %18468 = vmatpush3.bf16.msra.mxu0 %v21107_v21  ;;  %v21166_v21 = vld [vmem:[%s24682_s10 + $0x570] sm:$0xff]  }
 0xbc6   : > { %18469 = vmatprep.subr.bf16.mxu0 %v21108_v63 }
 0xbc9   : > { %18470 = vmatpush3.bf16.msra.mxu0 %v21109_v33 }
 0xbca   : > { %18471 = vmatprep.subr.bf16.mxu0 %v21110_v59 }
 0xbcc   : > { %6807 = vmatmul.mubr.bf16.gmra.mrb[60].mxu0 %v23133_v32 }
 0xbcd   : > { %18472 = vmatpush3.bf16.msra.mxu0 %v21111_v20  ;;  %7092 = vmatprep.mubr.bf16.mxu0 %v23119_v49 }
 0xbce   : > { %18473 = vmatprep.subr.bf16.mxu0 %v21112_v26 }
 0xbd1   : > { %18474 = vmatpush3.bf16.msra.mxu0 %v21113_v2 }
 0xbd2   : > { %18475 = vmatprep.subr.bf16.mxu0 %v21114_v39 }
 0xbd5   : > { %18476 = vmatpush3.bf16.msra.mxu0 %v21115_v40  ;;  %v21167_v40 = vld [vmem:[%s24682_s10 + $0x530] sm:$0xff]  }
 0xbd6   : > { %18477 = vmatprep.subr.bf16.mxu0 %v21116_v42 }
 0xbd9   : > { %18478 = vmatpush3.bf16.msra.mxu0 %v21117_v0 }
 0xbda   : > { %18479 = vmatprep.subr.bf16.mxu0 %v21118_v12  ;;  %v21168_v12 = vld [vmem:[%s24682_s10 + $0x578] sm:$0xff]  }
 0xbdd   : > { %18480 = vmatpush3.bf16.msra.mxu0 %v21119_v45 }
 0xbde   : > { %18481 = vmatprep.subr.bf16.mxu0 %v21120_v52 }
 0xbe1   : > { %18482 = vmatpush3.bf16.msra.mxu0 %v21121_v55 }
 0xbe2   : > { %18535 = vmatprep.subr.bf16.mxu0 %v21122_v46 }
 0xbe4   : > { %7093 = vmatmul.mubr.bf16.vlgmr.msra.gmra.mrb[64].mxu0 %v23117_v31 }
 0xbe5   : > { %7100 = vmatprep.mubr.bf16.mxu0 %v23135_v37  ;;  %18536 = vmatpush3.bf16.msra.mxu0 %v21123_v53  ;;  %v21169_v53 = vld [vmem:[%s24682_s10 + $0x538] sm:$0xff]  }
 0xbe6   : > { %18537 = vmatprep.subr.bf16.mxu0 %v21124_v34  ;;  %v21170_v34 = vld [vmem:[%s24682_s10 + $0x640] sm:$0xff]  }
 0xbe9   : > { %18538 = vmatpush3.bf16.msra.mxu0 %v21125_v51 }
 0xbea   : > { %18539 = vmatprep.subr.bf16.mxu0 %v21126_v8 }
 0xbec   : > { %7101 = vmatmul.mubr.bf16.gmra.mrb[68].mxu0 %v23133_v32 }
 0xbed   : > { %18540 = vmatpush3.bf16.msra.mxu0 %v21127_v36  ;;  %7680 = vmatprep.mubr.bf16.mxu0 %v23119_v49 }
 0xbee   : > { %18541 = vmatprep.subr.bf16.mxu0 %v21128_v1 }
 0xbf1   : > { %18542 = vmatpush3.bf16.msra.mxu0 %v21129_v28 }
 0xbf2   : > { %18543 = vmatprep.subr.bf16.mxu0 %v21130_v38 }
 0xbf5   : > { %18544 = vmatpush3.bf16.msra.mxu0 %v21131_v16 }
 0xbf6   : > { %18545 = vmatprep.subr.bf16.mxu0 %v21132_v17 }
 0xbf9   : > { %18546 = vmatpush3.bf16.msra.mxu0 %v21133_v11  ;;  %v21171_v11 = vld [vmem:[%s24682_s10 + $0x600] sm:$0xff]  }
 0xbfa   : > { %18547 = vmatprep.subr.bf16.mxu0 %v21134_v22 }
 0xbfd   : > { %18548 = vmatpush3.bf16.msra.mxu0 %v21135_v23 }
 0xbfe   : > { %18549 = vmatprep.subr.bf16.mxu0 %v21136_v60  ;;  %v21172_v60 = vld [vmem:[%s24682_s10 + $0x648] sm:$0xff]  }
 0xc01   : > { %18550 = vmatpush3.bf16.msra.mxu0 %v21137_v25 }
 0xc02   : > { %18569 = vmatprep.subr.bf16.mxu0 %v21138_v61 }
 0xc04   : > { %7681 = vmatmul.mubr.bf16.vlgmr.msra.gmra.mrb[72].mxu0 %v23117_v31 }
 0xc05   : > { %7688 = vmatprep.mubr.bf16.mxu0 %v23135_v37  ;;  %18570 = vmatpush3.bf16.msra.mxu0 %v21139_v29 }
 0xc06   : > { %18571 = vmatprep.subr.bf16.mxu0 %v21140_v48 }
 0xc09   : > { %18572 = vmatpush3.bf16.msra.mxu0 %v21141_v14  ;;  %v21173_v14 = vld [vmem:[%s24682_s10 + $0x608] sm:$0xff]  }
 0xc0a   : > { %18573 = vmatprep.subr.bf16.mxu0 %v21142_v10  ;;  %v21176_v10 = vld [vmem:[%s24682_s10 + $0x650] sm:$0xff]  }
 0xc0c   : > { %7689 = vmatmul.mubr.bf16.gmra.mrb[76].mxu0 %v23133_v32 }
 0xc0d   : > { %18574 = vmatpush3.bf16.msra.mxu0 %v21143_v62  ;;  %7974 = vmatprep.mubr.bf16.mxu0 %v23119_v49  ;;  %v21175_v62 = vld [vmem:[%s24693_s11 + $0x28] sm:$0xff]  }
 0xc0e   : > { %18575 = vmatprep.subr.bf16.mxu0 %v21144_v13  ;;  %v21177_v13 = vld [vmem:[%s24682_s10 + $0x610] sm:$0xff]  }
 0xc11   : > { %18576 = vmatpush3.bf16.msra.mxu0 %v21145_v50  ;;  %v21178_v50 = vld [vmem:[%s24682_s10 + $0x658] sm:$0xff]  }
 0xc12   : > { %18577 = vmatprep.subr.bf16.mxu0 %v21146_v24  ;;  %v21180_v24 = vld [vmem:[%s24693_s11 + $0x30] sm:$0xff]  }
 0xc15   : > { %18578 = vmatpush3.bf16.msra.mxu0 %v21147_v57  ;;  %v21179_v57 = vld [vmem:[%s24682_s10 + $0x618] sm:$0xff]  }
 0xc16   : > { %18579 = vmatprep.subr.bf16.mxu0 %v21148_v4  ;;  %v21182_v4 = vld [vmem:[%s24682_s10 + $0x660] sm:$0xff]  }
 0xc19   : > { %18580 = vmatpush3.bf16.msra.mxu0 %v21149_v19  ;;  %v21181_v19 = vld [vmem:[%s24693_s11 + $0x38] sm:$0xff]  }
 0xc1a   : > { %18581 = vmatprep.subr.bf16.mxu0 %v21150_v6  ;;  %v21186_v6 = vld [vmem:[%s24693_s11] sm:$0xff]  }
 0xc1d   : > { %18582 = vmatpush3.bf16.msra.mxu0 %v21151_v58  ;;  %v21183_v58 = vld [vmem:[%s24682_s10 + $0x620] sm:$0xff]  }
 0xc1e   : > { %18583 = vmatprep.subr.bf16.mxu0 %v21152_v7  ;;  %v21184_v7 = vld [vmem:[%s24682_s10 + $0x668] sm:$0xff]  }
 0xc21   : > { %18584 = vmatpush3.bf16.msra.mxu0 %v21153_v35  ;;  %v21185_v35 = vld [vmem:[%s24682_s10 + $0x628] sm:$0xff]  }
 0xc22   : > { %18603 = vmatprep.subr.bf16.mxu0 %v21154_v54  ;;  %v21188_v54 = vld [vmem:[%s24682_s10 + $0x670] sm:$0xff]  }
 0xc24   : > { %7975 = vmatmul.mubr.bf16.vlgmr.msra.gmra.mrb[80].mxu0 %v23117_v31 }
 0xc25   : > { %7982 = vmatprep.mubr.bf16.mxu0 %v23135_v37  ;;  %18604 = vmatpush3.bf16.msra.mxu0 %v21155_v44 }
 0xc26   : > { %18605 = vmatprep.subr.bf16.mxu0 %v21156_v5  ;;  %v21187_v5 = vld [vmem:[%s24693_s11 + $0x8] sm:$0xff]  }
 0xc29   : > { %18606 = vmatpush3.bf16.msra.mxu0 %v21157_v41 }
 0xc2a   : > { %18607 = vmatprep.subr.bf16.mxu0 %v21158_v9  ;;  %v21192_v9 = vld [vmem:[%s24693_s11 + $0x10] sm:$0xff]  }
 0xc2c   : > { %7983 = vmatmul.mubr.bf16.gmra.mrb[84].mxu0 %v23133_v32 }
 0xc2d   : > { %18608 = vmatpush3.bf16.msra.mxu0 %v21159_v47  ;;  %8268 = vmatprep.mubr.bf16.mxu0 %v23119_v49 }
 0xc2e   : > { %18609 = vmatprep.subr.bf16.mxu0 %v21160_v27 }
 0xc31   : > { %18610 = vmatpush3.bf16.msra.mxu0 %v21161_v18  ;;  %v21189_v18 = vld [vmem:[%s24682_s10 + $0x630] sm:$0xff]  }
 0xc32   : > { %18611 = vmatprep.subr.bf16.mxu0 %v21162_v43 }
 0xc35   : > { %18612 = vmatpush3.bf16.msra.mxu0 %v21163_v3  ;;  %v21190_v3 = vld [vmem:[%s24682_s10 + $0x678] sm:$0xff]  }
 0xc36   : > { %18613 = vmatprep.subr.bf16.mxu0 %v21164_v30 }
 0xc37   : > { %v18279_v63 = vpop.f32.mrb[128].mxu1  ;;  %v18307_v33 = vpop.f32.mrb[32].mxu0 }
 0xc38   : > { %v18280_v59 = vpop.f32.mrb[129].mxu1  ;;  %v18308_v20 = vpop.f32.mrb[33].mxu0 }
 0xc39   : > { %v18281_v56 = vadd.f32 %v18280_v59, %v18279_v63  ;;  %v18309_v26 = vadd.f32 %v18308_v20, %v18307_v33  ;;  %18614 = vmatpush3.bf16.msra.mxu0 %v21165_v15  ;;  %v18282_v2 = vpop.f32.mrb[130].mxu1  ;;  %v18310_v39 = vpop.f32.mrb[34].mxu0  ;;  %v21194_v63 = vld [vmem:[%s24682_s10 + $0x6c0] sm:$0xff]   ;;  %v21193_v59 = vld [vmem:[%s24693_s11 + $0x18] sm:$0xff]  }
 0xc3a   : > { %v18283_v42 = vpop.f32.mrb[131].mxu1  ;;  %v18311_v0 = vpop.f32.mrb[35].mxu0  ;;  %18615 = vmatprep.subr.bf16.mxu0 %v21166_v21  ;;  %v21191_v21 = vld [vmem:[%s24682_s10 + $0x638] sm:$0xff]  }
 0xc3b   : > { %v18284_v45 = vadd.f32 %v18283_v42, %v18282_v2  ;;  %v18312_v52 = vadd.f32 %v18311_v0, %v18310_v39  ;;  %v21195_v39 = vld [vmem:[%s24682_s10 + $0x680] sm:$0xff]   ;;  %v21196_v42 = vld [vmem:[%s24682_s10 + $0x6c8] sm:$0xff]  }
 0xc3d   : > { %v5370_v55 = vpack.c.bf16 %v18284_v45, %v18281_v56  ;;  %v5559_v46 = vpack.c.bf16 %v18312_v52, %v18309_v26  ;;  %18616 = vmatpush3.bf16.msra.mxu0 %v21167_v40  ;;  %v21198_v56 = vld [vmem:[%s24693_s11 + $0x40] sm:$0xff]   ;;  %v21197_v45 = vld [vmem:[%s24682_s10 + $0x688] sm:$0xff]  }
 0xc3e   : > { %18617 = vmatprep.subr.bf16.mxu0 %v21168_v12  ;;  %v21199_v52 = vld [vmem:[%s24682_s10 + $0x1c0] sm:$0xff]  }
 0xc3f   : > { %v18285_v51 = vpop.f32.mrb[132].mxu1  ;;  %v18313_v8 = vpop.f32.mrb[36].mxu0  ;;  %19197 = vmatprep.subr.bf16.mxu1 %v5559_v46 }
 0xc40   : > { %v18286_v36 = vpop.f32.mrb[133].mxu1  ;;  %v18314_v1 = vpop.f32.mrb[37].mxu0  ;;  %19198 = vmatpush3.bf16.msra.mxu1 %v5559_v46  ;;  %v21200_v46 = vld [vmem:[%s24693_s11 + $0x48] sm:$0xff]  }
 0xc41   : > { %v18287_v28 = vadd.f32 %v18286_v36, %v18285_v51  ;;  %v18315_v38 = vadd.f32 %v18314_v1, %v18313_v8  ;;  %18618 = vmatpush3.bf16.msra.mxu0 %v21169_v53  ;;  %v18288_v16 = vpop.f32.mrb[134].mxu1  ;;  %v18316_v17 = vpop.f32.mrb[38].mxu0  ;;  %v21201_v53 = vld [vmem:[%s24682_s10 + $0x180] sm:$0xff]   ;;  %v21204_v51 = vld [vmem:[%s24682_s10 + $0x1c8] sm:$0xff]   ;;  %v21206_v8 = vld [vmem:[%s24682_s10 + $0x6d8] sm:$0xff]  }
 0xc42   : > { %v18289_v22 = vpop.f32.mrb[135].mxu1  ;;  %v18317_v23 = vpop.f32.mrb[39].mxu0  ;;  %18671 = vmatprep.subr.bf16.mxu0 %v21170_v34  ;;  %v21203_v34 = vld [vmem:[%s24682_s10 + $0x690] sm:$0xff]   ;;  %v21205_v1 = vld [vmem:[%s24682_s10 + $0x188] sm:$0xff]  }
 0xc43   : > { %v18290_v25 = vadd.f32 %v18289_v22, %v18288_v16  ;;  %v18318_v61 = vadd.f32 %v18317_v23, %v18316_v17  ;;  %v21208_v36 = vld [vmem:[%s24693_s11 + $0x50] sm:$0xff]   ;;  %v21212_v16 = vld [vmem:[%s24682_s10 + $0x6e0] sm:$0xff]   ;;  %v21210_v17 = vld [vmem:[%s24693_s11 + $0x58] sm:$0xff]  }
 0xc44   : > { %8269 = vmatmul.mubr.bf16.vlgmr.msra.gmra.mrb[88].mxu0 %v23117_v31  ;;  %v21213_v22 = vld [vmem:[%s24682_s10 + $0x6a0] sm:$0xff]   ;;  %v21214_v23 = vld [vmem:[%s24682_s10 + $0x1d8] sm:$0xff]  }
 0xc45   : > { %v5371_v29 = vpack.c.bf16 %v18290_v25, %v18287_v28  ;;  %v5560_v48 = vpack.c.bf16 %v18318_v61, %v18315_v38  ;;  %8276 = vmatprep.mubr.bf16.mxu0 %v23135_v37  ;;  %18672 = vmatpush3.bf16.msra.mxu0 %v21171_v11  ;;  %v21207_v28 = vld [vmem:[%s24682_s10 + $0x698] sm:$0xff]   ;;  %v21209_v38 = vld [vmem:[%s24682_s10 + $0x1d0] sm:$0xff]   ;;  %v21217_v61 = vld [vmem:[%s24682_s10 + $0x6a8] sm:$0xff]  }
 0xc46   : > { %18673 = vmatprep.subr.bf16.mxu0 %v21172_v60  ;;  %v21211_v11 = vld [vmem:[%s24682_s10 + $0x190] sm:$0xff]   ;;  %v21216_v60 = vld [vmem:[%s24682_s10 + $0x6e8] sm:$0xff]   ;;  %v21215_v25 = vld [vmem:[%s24682_s10 + $0x198] sm:$0xff]  }
 0xc47   : > { %19199 = vmatprep.subr.bf16.mxu1 %v5560_v48 }
 0xc48   : > { %19200 = vmatpush3.bf16.msra.mxu1 %v5560_v48  ;;  %v21220_v48 = vld [vmem:[%s24682_s10 + $0x6f0] sm:$0xff]  }
 0xc49   : > { %18674 = vmatpush3.bf16.msra.mxu0 %v21173_v14  ;;  %19209 = vmatprep.subr.bf16.mxu1 %v5370_v55 }
 0xc4a   : > { %18675 = vmatprep.subr.bf16.mxu0 %v21176_v10 }
 0xc4b   : > { %19202 = vmatmul.mubr.msk.bf16.vlgmr.msra.gmra.mrb[136].mxu1 %vm3961_vm10, %v21175_v62  ;;  %v21219_v62 = vld [vmem:[%s24682_s10 + $0x1a0] sm:$0xff]  }
 0xc4c   : > { %8277 = vmatmul.mubr.bf16.gmra.mrb[92].mxu0 %v23133_v32  ;;  %19210 = vmatpush3.bf16.msra.mxu1 %v5370_v55  ;;  %v21202_v55 = vld [vmem:[%s24682_s10 + $0x6d0] sm:$0xff]  }
 0xc4d   : > { %18676 = vmatpush3.bf16.msra.mxu0 %v21177_v13  ;;  %8856 = vmatprep.mubr.bf16.mxu0 %v23119_v49 }
 0xc4e   : > { %19211 = vmatprep.subr.bf16.mxu1 %v5371_v29  ;;  %18677 = vmatprep.subr.bf16.mxu0 %v21178_v50 }
 0xc4f   : > { %19205 = vmatprep.mubr.msk.bf16.mxu1 %vm3961_vm10, %v21180_v24  ;;  %v21221_v24 = vld [vmem:[%s24682_s10 + $0x6b0] sm:$0xff]  }
 0xc50   : > { %19212 = vmatpush3.bf16.msra.mxu1 %v5371_v29  ;;  %v21218_v29 = vld [vmem:[%s24682_s10 + $0x1e0] sm:$0xff]  }
 0xc51   : > { %18678 = vmatpush3.bf16.msra.mxu0 %v21179_v57  ;;  %v21222_v57 = vld [vmem:[%s24682_s10 + $0x1e8] sm:$0xff]  }
 0xc52   : > { %18679 = vmatprep.subr.bf16.mxu0 %v21182_v4 }
 0xc53   : > { %19206 = vmatmul.mubr.msk.bf16.gmra.mrb[140].mxu1 %vm3961_vm10, %v21181_v19  ;;  %v21224_v19 = vld [vmem:[%s24682_s10 + $0x6f8] sm:$0xff]  }
 0xc54   : > { %19213 = vmatprep.mubr.msk.bf16.mxu1 %vm3961_vm10, %v21186_v6 }
 0xc55   : > { %18680 = vmatpush3.bf16.msra.mxu0 %v21183_v58  ;;  %v21223_v58 = vld [vmem:[%s24682_s10 + $0x1a8] sm:$0xff]  }
 0xc56   : > { %18681 = vmatprep.subr.bf16.mxu0 %v21184_v7 }
 0xc57   : > { %v18347_v44 = vpop.f32.mrb[40].mxu0 }
 0xc58   : > { %v18348_v41 = vpop.f32.mrb[41].mxu0 }
 0xc59   : > { %v18349_v47 = vadd.f32 %v18348_v41, %v18347_v44  ;;  %v18350_v27 = vpop.f32.mrb[42].mxu0  ;;  %18682 = vmatpush3.bf16.msra.mxu0 %v21185_v35  ;;  %v21225_v35 = vld [vmem:[%s24682_s10 + $0x6b8] sm:$0xff]   ;;  %v21228_v44 = vld [vmem:[%s24682_s10 + $0x740] sm:$0xff]  }
 0xc5a   : > { %v18351_v43 = vpop.f32.mrb[43].mxu0  ;;  %18683 = vmatprep.subr.bf16.mxu0 %v21188_v54  ;;  %v21226_v54 = vld [vmem:[%s24682_s10 + $0x1f0] sm:$0xff]  }
 0xc5b   : > { %v18352_v30 = vadd.f32 %v18351_v43, %v18350_v27  ;;  %19214 = vmatmul.mubr.msk.bf16.vlgmr.msra.gmra.mrb[136].mxu1 %vm3961_vm10, %v21187_v5 }
 0xc5c   : > { %19217 = vmatprep.mubr.msk.bf16.mxu1 %vm3961_vm10, %v21192_v9  ;;  %v21227_v9 = vld [vmem:[%s24682_s10 + $0x1b0] sm:$0xff]  }
 0xc5d   : > { %v5942_v15 = vpack.c.bf16 %v18352_v30, %v18349_v47  ;;  %18684 = vmatpush3.bf16.msra.mxu0 %v21189_v18  ;;  %v21229_v18 = vld [vmem:[%s24682_s10 + $0x700] sm:$0xff]   ;;  %v21232_v30 = vld [vmem:[%s24682_s10 + $0x748] sm:$0xff]  }
 0xc5e   : > { %18685 = vmatprep.subr.bf16.mxu0 %v21190_v3  ;;  %v21230_v3 = vld [vmem:[%s24682_s10 + $0x1f8] sm:$0xff]  }
 0xc5f   : > { %v18353_v33 = vpop.f32.mrb[44].mxu0  ;;  %19221 = vmatprep.subr.bf16.mxu1 %v5942_v15 }
 0xc60   : > { %v18354_v20 = vpop.f32.mrb[45].mxu0  ;;  %19222 = vmatpush3.bf16.msra.mxu1 %v5942_v15 }
 0xc61   : > { %v18355_v26 = vadd.f32 %v18354_v20, %v18353_v33  ;;  %v18356_v2 = vpop.f32.mrb[46].mxu0  ;;  %18686 = vmatpush3.bf16.msra.mxu0 %v21191_v21  ;;  %v21231_v21 = vld [vmem:[%s24682_s10 + $0x1b8] sm:$0xff]   ;;  %v21233_v33 = vld [vmem:[%s24682_s10 + $0x708] sm:$0xff]   ;;  %v21235_v20 = vld [vmem:[%s24682_s10 + $0x710] sm:$0xff]  }
 0xc62   : > { %v18357_v40 = vpop.f32.mrb[47].mxu0  ;;  %18705 = vmatprep.subr.bf16.mxu0 %v21194_v63 }
 0xc63   : > { %v18358_v0 = vadd.f32 %v18357_v40, %v18356_v2  ;;  %19218 = vmatmul.mubr.msk.bf16.gmra.mrb[140].mxu1 %vm3961_vm10, %v21193_v59  ;;  %v21234_v59 = vld [vmem:[%s24682_s10 + $0x750] sm:$0xff]   ;;  %v21238_v2 = vld [vmem:[%s24682_s10 + $0x760] sm:$0xff]   ;;  %v21240_v40 = vld [vmem:[%s24682_s10 + $0x768] sm:$0xff]  }
 0xc64   : > { %8857 = vmatmul.mubr.bf16.vlgmr.msra.gmra.mrb[96].mxu0 %v23117_v31  ;;  %19225 = vmatprep.mubr.msk.bf16.mxu1 %vm3961_vm10, %v21198_v56  ;;  %v21236_v56 = vld [vmem:[%s24682_s10 + $0x758] sm:$0xff]  }
 0xc65   : > { %v5943_v12 = vpack.c.bf16 %v18358_v0, %v18355_v26  ;;  %8864 = vmatprep.mubr.bf16.mxu0 %v23135_v37  ;;  %18706 = vmatpush3.bf16.msra.mxu0 %v21195_v39  ;;  %v21237_v26 = vld [vmem:[%s24682_s10 + $0x718] sm:$0xff]   ;;  %v21239_v39 = vld [vmem:[%s24682_s10 + $0x720] sm:$0xff]   ;;  %v21242_v0 = vld [vmem:[%s24682_s10 + $0x770] sm:$0xff]  }
 0xc66   : > { %18707 = vmatprep.subr.bf16.mxu0 %v21196_v42  ;;  %v21241_v42 = vld [vmem:[%s24682_s10 + $0x728] sm:$0xff]  }
 0xc67   : > { %19223 = vmatprep.subr.bf16.mxu1 %v5943_v12 }
 0xc68   : > { %19224 = vmatpush3.bf16.msra.mxu1 %v5943_v12 }
 0xc69   : > { %18708 = vmatpush3.bf16.msra.mxu0 %v21197_v45  ;;  %18365 = vmatprep.subr.bf16.mxu1 %v21199_v52 }
 0xc6a   : > { %18709 = vmatprep.subr.bf16.mxu0 %v21202_v55 }
 0xc6b   : > { %19226 = vmatmul.mubr.msk.bf16.vlgmr.msra.gmra.mrb[136].mxu1 %vm3961_vm10, %v21200_v46  ;;  %v21243_v46 = vld [vmem:[%s24682_s10 + $0x730] sm:$0xff]  }
 0xc6c   : > { %18366 = vmatpush3.bf16.msra.mxu1 %v21201_v53  ;;  %8865 = vmatmul.mubr.bf16.gmra.mrb[100].mxu0 %v23133_v32 }
 0xc6d   : > { %18710 = vmatpush3.bf16.msra.mxu0 %v21203_v34  ;;  %9150 = vmatprep.mubr.bf16.mxu0 %v23119_v49  ;;  %v21244_v34 = vld [vmem:[%s24682_s10 + $0x778] sm:$0xff]  }
 0xc6e   : > { %18367 = vmatprep.subr.bf16.mxu1 %v21204_v51  ;;  %18711 = vmatprep.subr.bf16.mxu0 %v21206_v8 }
 0xc6f   : > { %19229 = vmatprep.mubr.msk.bf16.mxu1 %vm3961_vm10, %v21208_v36  ;;  %v21245_v36 = vld [vmem:[%s24682_s10 + $0x738] sm:$0xff]  }
 0xc70   : > { %18368 = vmatpush3.bf16.msra.mxu1 %v21205_v1 }
 0xc71   : > { %18712 = vmatpush3.bf16.msra.mxu0 %v21207_v28  ;;  %18369 = vmatprep.subr.bf16.mxu1 %v21209_v38 }
 0xc72   : > { %18713 = vmatprep.subr.bf16.mxu0 %v21212_v16 }
 0xc73   : > { %19230 = vmatmul.mubr.msk.bf16.gmra.mrb[140].mxu1 %vm3961_vm10, %v21210_v17 }
 0xc74   : > { %18370 = vmatpush3.bf16.msra.mxu1 %v21211_v11  ;;  %6210 = vmatprep.mubr.bf16.mxu1 %v23119_v49 }
 0xc75   : > { %18714 = vmatpush3.bf16.msra.mxu0 %v21213_v22  ;;  %18371 = vmatprep.subr.bf16.mxu1 %v21214_v23 }
 0xc76   : > { %18715 = vmatprep.subr.bf16.mxu0 %v21216_v60 }
 0xc77   : > { %v18415_v14 = vpop.f32.mrb[48].mxu0 }
 0xc78   : > { %18372 = vmatpush3.bf16.msra.mxu1 %v21215_v25  ;;  %v18416_v10 = vpop.f32.mrb[49].mxu0 }
 0xc79   : > { %v18417_v13 = vadd.f32 %v18416_v10, %v18415_v14  ;;  %v18418_v50 = vpop.f32.mrb[50].mxu0  ;;  %18716 = vmatpush3.bf16.msra.mxu0 %v21217_v61  ;;  %18373 = vmatprep.subr.bf16.mxu1 %v21218_v29 }
 0xc7a   : > { %v18419_v4 = vpop.f32.mrb[51].mxu0  ;;  %18717 = vmatprep.subr.bf16.mxu0 %v21220_v48 }
 0xc7b   : > { %v18420_v6 = vadd.f32 %v18419_v4, %v18418_v50 }
 0xc7c   : > { %18374 = vmatpush3.bf16.msra.mxu1 %v21219_v62 }
 0xc7d   : > { %v23349_v7 = vpack.c.bf16 %v18420_v6, %v18417_v13  ;;  %18718 = vmatpush3.bf16.msra.mxu0 %v21221_v24  ;;  %18375 = vmatprep.subr.bf16.mxu1 %v21222_v57 }
 0xc7e   : > { %18719 = vmatprep.subr.bf16.mxu0 %v21224_v19 }
 0xc7f   : > { %v18421_v5 = vpop.f32.mrb[52].mxu0 }
 0xc80   : > { %18376 = vmatpush3.bf16.msra.mxu1 %v21223_v58  ;;  %v18422_v41 = vpop.f32.mrb[53].mxu0 }
 0xc81   : > { %v18423_v47 = vadd.f32 %v18422_v41, %v18421_v5  ;;  %v18424_v27 = vpop.f32.mrb[54].mxu0  ;;  %18720 = vmatpush3.bf16.msra.mxu0 %v21225_v35  ;;  %18377 = vmatprep.subr.bf16.mxu1 %v21226_v54 }
 0xc82   : > { %v18425_v43 = vpop.f32.mrb[55].mxu0  ;;  %18739 = vmatprep.subr.bf16.mxu0 %v21228_v44 }
 0xc83   : > { %v18426_v15 = vadd.f32 %v18425_v43, %v18424_v27 }
 0xc84   : > { %18378 = vmatpush3.bf16.msra.mxu1 %v21227_v9  ;;  %9151 = vmatmul.mubr.bf16.vlgmr.msra.gmra.mrb[104].mxu0 %v23117_v31 }
 0xc85   : > { %v23360_v63 = vpack.c.bf16 %v18426_v15, %v18423_v47  ;;  %9158 = vmatprep.mubr.bf16.mxu0 %v23135_v37  ;;  %18740 = vmatpush3.bf16.msra.mxu0 %v21229_v18 }
 0xc86   : > { %18379 = vmatprep.subr.bf16.mxu1 %v21230_v3  ;;  %18741 = vmatprep.subr.bf16.mxu0 %v21232_v30  ;;  %v21246_v30 = vld [vmem:[%s24693_s11 + $0x60] sm:$0xff]  }
 0xc88   : > { %18380 = vmatpush3.bf16.msra.mxu1 %v21231_v21 }
 0xc89   : > { %18742 = vmatpush3.bf16.msra.mxu0 %v21233_v33 }
 0xc8a   : > { %18743 = vmatprep.subr.bf16.mxu0 %v21234_v59 }
 0xc8b   : > { %6211 = vmatmul.mubr.bf16.vlgmr.msra.gmra.mrb[144].mxu1 %v23117_v31 }
 0xc8c   : > { %6218 = vmatprep.mubr.bf16.mxu1 %v23135_v37  ;;  %9159 = vmatmul.mubr.bf16.gmra.mrb[108].mxu0 %v23133_v32 }
 0xc8d   : > { %18744 = vmatpush3.bf16.msra.mxu0 %v21235_v20  ;;  %9444 = vmatprep.mubr.bf16.mxu0 %v23119_v49 }
 0xc8e   : > { %18745 = vmatprep.subr.bf16.mxu0 %v21236_v56 }
 0xc91   : > { %18746 = vmatpush3.bf16.msra.mxu0 %v21237_v26 }
 0xc92   : > { %18747 = vmatprep.subr.bf16.mxu0 %v21238_v2 }
 0xc93   : > { %6219 = vmatmul.mubr.bf16.gmra.mrb[148].mxu1 %v23133_v32 }
 0xc94   : > { %19237 = vmatprep.mubr.msk.bf16.mxu1 %vm3961_vm10, %v21246_v30 }
 0xc95   : > { %18748 = vmatpush3.bf16.msra.mxu0 %v21239_v39 }
 0xc96   : > { %18749 = vmatprep.subr.bf16.mxu0 %v21240_v40 }
 0xc97   : > { %v18449_v12 = vpop.f32.mrb[56].mxu0 }
 0xc98   : > { %v18450_v45 = vpop.f32.mrb[57].mxu0 }
 0xc99   : > { %v18451_v52 = vadd.f32 %v18450_v45, %v18449_v12  ;;  %v18452_v55 = vpop.f32.mrb[58].mxu0  ;;  %18750 = vmatpush3.bf16.msra.mxu0 %v21241_v42 }
 0xc9a   : > { %v18453_v53 = vpop.f32.mrb[59].mxu0  ;;  %18751 = vmatprep.subr.bf16.mxu0 %v21242_v0 }
 0xc9b   : > { %v18454_v51 = vadd.f32 %v18453_v53, %v18452_v55 }
 0xc9d   : > { %v23380_v8 = vpack.c.bf16 %v18454_v51, %v18451_v52  ;;  %18752 = vmatpush3.bf16.msra.mxu0 %v21243_v46 }
 0xc9e   : > { %18753 = vmatprep.subr.bf16.mxu0 %v21244_v34 }
 0xc9f   : > { %v18455_v1 = vpop.f32.mrb[60].mxu0 }
 0xca0   : > { %v18456_v28 = vpop.f32.mrb[61].mxu0 }
 0xca1   : > { %v18457_v38 = vadd.f32 %v18456_v28, %v18455_v1  ;;  %v18458_v16 = vpop.f32.mrb[62].mxu0  ;;  %18754 = vmatpush3.bf16.msra.mxu0 %v21245_v36 }
 0xca2   : > { %v18459_v17 = vpop.f32.mrb[63].mxu0 }
 0xca3   : > { %v18460_v11 = vadd.f32 %v18459_v17, %v18458_v16 }
 0xca4   : > { %9445 = vmatmul.mubr.bf16.vlgmr.msra.gmra.mrb[112].mxu0 %v23117_v31 }
 0xca5   : > { %v23384_v22 = vpack.c.bf16 %v18460_v11, %v18457_v38  ;;  %9452 = vmatprep.mubr.bf16.mxu0 %v23135_v37 }
 0xcac   : > { %9453 = vmatmul.mubr.bf16.gmra.mrb[116].mxu0 %v23133_v32 }
 0xcb7   : > { %v18483_v23 = vpop.f32.mrb[64].mxu0 }
 0xcb8   : > { %v18484_v60 = vpop.f32.mrb[65].mxu0 }
 0xcb9   : > { %v18485_v25 = vadd.f32 %v18484_v60, %v18483_v23  ;;  %v18486_v61 = vpop.f32.mrb[66].mxu0 }
 0xcba   : > { %v18487_v29 = vpop.f32.mrb[67].mxu0 }
 0xcbb   : > { %v18488_v48 = vadd.f32 %v18487_v29, %v18486_v61 }
 0xcbd   : > { %v23388_v14 = vpack.c.bf16 %v18488_v48, %v18485_v25 }
 0xcbf   : > { %v18489_v10 = vpop.f32.mrb[68].mxu0 }
 0xcc0   : > { %v18490_v62 = vpop.f32.mrb[69].mxu0 }
 0xcc1   : > { %v18491_v13 = vadd.f32 %v18490_v62, %v18489_v10  ;;  %v18492_v50 = vpop.f32.mrb[70].mxu0 }
 0xcc2   : > { %v18493_v24 = vpop.f32.mrb[71].mxu0 }
 0xcc3   : > { %v18494_v57 = vadd.f32 %v18493_v24, %v18492_v50 }
 0xcc5   : > { %v23390_v4 = vpack.c.bf16 %v18494_v57, %v18491_v13 }
 0xcd7   : > { %v18551_v19 = vpop.f32.mrb[72].mxu0 }
 0xcd8   : > { %v18552_v6 = vpop.f32.mrb[73].mxu0 }
 0xcd9   : > { %v18553_v58 = vadd.f32 %v18552_v6, %v18551_v19  ;;  %v18554_v35 = vpop.f32.mrb[74].mxu0 }
 0xcda   : > { %v18555_v54 = vpop.f32.mrb[75].mxu0 }
 0xcdb   : > { %v18556_v44 = vadd.f32 %v18555_v54, %v18554_v35 }
 0xcdd   : > { %v23392_v5 = vpack.c.bf16 %v18556_v44, %v18553_v58 }
 0xcdf   : > { %v18557_v41 = vpop.f32.mrb[76].mxu0 }
 0xce0   : > { %v18558_v9 = vpop.f32.mrb[77].mxu0 }
 0xce1   : > { %v18559_v47 = vadd.f32 %v18558_v9, %v18557_v41  ;;  %v18560_v27 = vpop.f32.mrb[78].mxu0 }
 0xce2   : > { %v18561_v18 = vpop.f32.mrb[79].mxu0 }
 0xce3   : > { %v18562_v43 = vadd.f32 %v18561_v18, %v18560_v27 }
 0xce5   : > { %v23394_v3 = vpack.c.bf16 %v18562_v43, %v18559_v47 }
 0xcf7   : > { %v18585_v15 = vpop.f32.mrb[80].mxu0 }
 0xcf8   : > { %v18586_v21 = vpop.f32.mrb[81].mxu0 }
 0xcf9   : > { %v18587_v33 = vadd.f32 %v18586_v21, %v18585_v15  ;;  %v18588_v59 = vpop.f32.mrb[82].mxu0 }
 0xcfa   : > { %v18589_v20 = vpop.f32.mrb[83].mxu0 }
 0xcfb   : > { %v18590_v56 = vadd.f32 %v18589_v20, %v18588_v59 }
 0xcfd   : > { %v23398_v26 = vpack.c.bf16 %v18590_v56, %v18587_v33 }
 0xcff   : > { %v18591_v2 = vpop.f32.mrb[84].mxu0 }
 0xd00   : > { %v18592_v39 = vpop.f32.mrb[85].mxu0 }
 0xd01   : > { %v18593_v40 = vadd.f32 %v18592_v39, %v18591_v2  ;;  %v18594_v42 = vpop.f32.mrb[86].mxu0 }
 0xd02   : > { %v18595_v0 = vpop.f32.mrb[87].mxu0 }
 0xd03   : > { %v18596_v12 = vadd.f32 %v18595_v0, %v18594_v42 }
 0xd05   : > { %v23400_v45 = vpack.c.bf16 %v18596_v12, %v18593_v40 }
 0xd17   : > { %v18619_v52 = vpop.f32.mrb[88].mxu0 }
 0xd18   : > { %v18620_v55 = vpop.f32.mrb[89].mxu0 }
 0xd19   : > { %v18621_v46 = vadd.f32 %v18620_v55, %v18619_v52  ;;  %v18622_v53 = vpop.f32.mrb[90].mxu0 }
 0xd1a   : > { %v18623_v34 = vpop.f32.mrb[91].mxu0 }
 0xd1b   : > { %v18624_v51 = vadd.f32 %v18623_v34, %v18622_v53 }
 0xd1d   : > { %v23402_v36 = vpack.c.bf16 %v18624_v51, %v18621_v46 }
 0xd1f   : > { %v18625_v1 = vpop.f32.mrb[92].mxu0 }
 0xd20   : > { %v18626_v28 = vpop.f32.mrb[93].mxu0 }
 0xd21   : > { %v18627_v38 = vadd.f32 %v18626_v28, %v18625_v1  ;;  %v18628_v16 = vpop.f32.mrb[94].mxu0  ;;  %v21247_v1 = vld [vmem:[%s24693_s11 + $0x68] sm:$0xff]   ;;  %v21248_v28 = vld [vmem:[%s24693_s11 + $0x70] sm:$0xff]  }
 0xd22   : > { %v18629_v17 = vpop.f32.mrb[95].mxu0 }
 0xd23   : > { %v18630_v11 = vadd.f32 %v18629_v17, %v18628_v16  ;;  %v21250_v17 = vld [vmem:[%s24693_s11 + $0x80] sm:$0xff]  }
 0xd25   : > { %v23404_v23 = vpack.c.bf16 %v18630_v11, %v18627_v38  ;;  %v21249_v38 = vld [vmem:[%s24693_s11 + $0x78] sm:$0xff]  }
 0xd37   : > { %v18687_v60 = vpop.f32.mrb[96].mxu0 }
 0xd38   : > { %v18688_v25 = vpop.f32.mrb[97].mxu0 }
 0xd39   : > { %v18689_v61 = vadd.f32 %v18688_v25, %v18687_v60  ;;  %v18690_v29 = vpop.f32.mrb[98].mxu0 }
 0xd3a   : > { %v18691_v48 = vpop.f32.mrb[99].mxu0 }
 0xd3b   : > { %v18692_v10 = vadd.f32 %v18691_v48, %v18690_v29  ;;  %v21251_v48 = vld [vmem:[%s24693_s11 + $0x88] sm:$0xff]  }
 0xd3d   : > { %v23406_v62 = vpack.c.bf16 %v18692_v10, %v18689_v61 }
 0xd3f   : > { %v18693_v13 = vpop.f32.mrb[100].mxu0 }
 0xd40   : > { %v18694_v50 = vpop.f32.mrb[101].mxu0 }
 0xd41   : > { %v18695_v24 = vadd.f32 %v18694_v50, %v18693_v13  ;;  %v18696_v57 = vpop.f32.mrb[102].mxu0 }
 0xd42   : > { %v18697_v19 = vpop.f32.mrb[103].mxu0 }
 0xd43   : > { %v18698_v6 = vadd.f32 %v18697_v19, %v18696_v57 }
 0xd45   : > { %v23408_v58 = vpack.c.bf16 %v18698_v6, %v18695_v24 }
 0xd57   : > { %v18721_v35 = vpop.f32.mrb[104].mxu0 }
 0xd58   : > { %v18722_v54 = vpop.f32.mrb[105].mxu0 }
 0xd59   : > { %v18723_v44 = vadd.f32 %v18722_v54, %v18721_v35  ;;  %v18724_v41 = vpop.f32.mrb[106].mxu0  ;;  %v21253_v35 = vld [vmem:[%s24693_s11 + $0x98] sm:$0xff]   ;;  %v21254_v54 = vld [vmem:[%s24693_s11 + $0xa0] sm:$0xff]  }
 0xd5a   : > { %v18725_v9 = vpop.f32.mrb[107].mxu0 }
 0xd5b   : > { %v18726_v47 = vadd.f32 %v18725_v9, %v18724_v41  ;;  %v21257_v41 = vld [vmem:[%s24693_s11 + $0xb8] sm:$0xff]   ;;  %v21258_v9 = vld [vmem:[%s24693_s11 + $0xc0] sm:$0xff]  }
 0xd5d   : > { %v23410_v27 = vpack.c.bf16 %v18726_v47, %v18723_v44  ;;  %v21256_v44 = vld [vmem:[%s24693_s11 + $0xb0] sm:$0xff]   ;;  %v21261_v47 = vld [vmem:[%s24682_s10 + $0x380] sm:$0xff]  }
 0xd5e   : > { %v18381_v18 = vpop.f32.mrb[144].mxu1 }
 0xd5f   : > { %v18382_v43 = vpop.f32.mrb[145].mxu1  ;;  %v18727_v30 = vpop.f32.mrb[108].mxu0 }
 0xd60   : > { %v18383_v15 = vadd.f32 %v18382_v43, %v18381_v18  ;;  %v18384_v21 = vpop.f32.mrb[146].mxu1  ;;  %v18728_v33 = vpop.f32.mrb[109].mxu0  ;;  %v21264_v18 = vld [vmem:[%s24693_s11 + $0xd0] sm:$0xff]   ;;  %v21262_v43 = vld [vmem:[%s24682_s10 + $0x3c8] sm:$0xff]  }
 0xd61   : > { %v18729_v59 = vadd.f32 %v18728_v33, %v18727_v30  ;;  %v18385_v20 = vpop.f32.mrb[147].mxu1  ;;  %v18730_v56 = vpop.f32.mrb[110].mxu0  ;;  %v21263_v30 = vld [vmem:[%s24682_s10 + $0x388] sm:$0xff]   ;;  %v21268_v33 = vld [vmem:[%s24682_s10 + $0x3d8] sm:$0xff]  }
 0xd62   : > { %v18386_v2 = vadd.f32 %v18385_v20, %v18384_v21  ;;  %v18731_v39 = vpop.f32.mrb[111].mxu0  ;;  %v21267_v21 = vld [vmem:[%s24682_s10 + $0x390] sm:$0xff]   ;;  %v21270_v20 = vld [vmem:[%s24682_s10 + $0x3e0] sm:$0xff]  }
 0xd63   : > { %v18732_v40 = vadd.f32 %v18731_v39, %v18730_v56  ;;  %v21271_v56 = vld [vmem:[%s24682_s10 + $0x3a0] sm:$0xff]   ;;  %v21273_v39 = vld [vmem:[%s24682_s10 + $0x3a8] sm:$0xff]  }
 0xd64   : > { %v6236_v42 = vpack.c.bf16 %v18386_v2, %v18383_v15  ;;  %v21266_v15 = vld [vmem:[%s24693_s11 + $0xd8] sm:$0xff]   ;;  %v21272_v2 = vld [vmem:[%s24682_s10 + $0x3e8] sm:$0xff]  }
 0xd65   : > { %v23412_v0 = vpack.c.bf16 %v18732_v40, %v18729_v59  ;;  %v21269_v59 = vld [vmem:[%s24682_s10 + $0x398] sm:$0xff]   ;;  %v21274_v40 = vld [vmem:[%s24682_s10 + $0x3f0] sm:$0xff]  }
 0xd66   : > { %v18387_v12 = vpop.f32.mrb[148].mxu1  ;;  %19233 = vmatprep.subr.bf16.mxu1 %v6236_v42 }
 0xd67   : > { %v18388_v52 = vpop.f32.mrb[149].mxu1  ;;  %19234 = vmatpush3.bf16.msra.mxu1 %v6236_v42  ;;  %v21275_v42 = vld [vmem:[%s24682_s10 + $0x3b0] sm:$0xff]  }
 0xd68   : > { %v18389_v55 = vadd.f32 %v18388_v52, %v18387_v12  ;;  %v18390_v46 = vpop.f32.mrb[150].mxu1  ;;  %v21276_v12 = vld [vmem:[%s24682_s10 + $0x3f8] sm:$0xff]  }
 0xd69   : > { %v18391_v53 = vpop.f32.mrb[151].mxu1  ;;  %v21277_v52 = vld [vmem:[%s24682_s10 + $0x3b8] sm:$0xff]  }
 0xd6a   : > { %v18392_v34 = vadd.f32 %v18391_v53, %v18390_v46 }
 0xd6c   : > { %v6237_v51 = vpack.c.bf16 %v18392_v34, %v18389_v55  ;;  %v21278_v55 = vld [vmem:[%s24693_s11 + $0xe0] sm:$0xff]  }
 0xd6e   : > { %19235 = vmatprep.subr.bf16.mxu1 %v6237_v51 }
 0xd6f   : > { %19236 = vmatpush3.bf16.msra.mxu1 %v6237_v51 }
 0xd70   : > { %19245 = vmatprep.subr.bf16.mxu1 %v23349_v7 }
 0xd72   : > { %19238 = vmatmul.mubr.msk.bf16.vlgmr.msra.gmra.mrb[136].mxu1 %vm3961_vm10, %v21247_v1 }
 0xd73   : > { %19246 = vmatpush3.bf16.msra.mxu1 %v23349_v7  ;;  %19241 = vmatprep.mubr.msk.bf16.mxu1 %vm3961_vm10, %v21248_v28 }
 0xd74   : > { %19247 = vmatprep.subr.bf16.mxu1 %v23360_v63 }
 0xd77   : > { %19248 = vmatpush3.bf16.msra.mxu1 %v23360_v63  ;;  %v18755_v16 = vpop.f32.mrb[112].mxu0  ;;  %v21252_v63 = vld [vmem:[%s24693_s11 + $0x90] sm:$0xff]  }
 0xd78   : > { %19257 = vmatprep.subr.bf16.mxu1 %v23380_v8  ;;  %v18756_v11 = vpop.f32.mrb[113].mxu0 }
 0xd79   : > { %v18757_v60 = vadd.f32 %v18756_v11, %v18755_v16  ;;  %v18758_v25 = vpop.f32.mrb[114].mxu0 }
 0xd7a   : > { %19242 = vmatmul.mubr.msk.bf16.gmra.mrb[140].mxu1 %vm3961_vm10, %v21249_v38  ;;  %v18759_v61 = vpop.f32.mrb[115].mxu0 }
 0xd7b   : > { %v18760_v7 = vadd.f32 %v18759_v61, %v18758_v25  ;;  %19249 = vmatprep.mubr.msk.bf16.mxu1 %vm3961_vm10, %v21250_v17 }
 0xd7d   : > { %v23427_v29 = vpack.c.bf16 %v18760_v7, %v18757_v60 }
 0xd7f   : > { %v18761_v10 = vpop.f32.mrb[116].mxu0 }
 0xd80   : > { %v18762_v13 = vpop.f32.mrb[117].mxu0 }
 0xd81   : > { %v18763_v50 = vadd.f32 %v18762_v13, %v18761_v10  ;;  %v18764_v24 = vpop.f32.mrb[118].mxu0  ;;  %v21280_v10 = vld [vmem:[%s24693_s11 + $0xf0] sm:$0xff]   ;;  %v21282_v13 = vld [vmem:[%s24693_s11 + $0x100] sm:$0xff]  }
 0xd82   : > { %19250 = vmatmul.mubr.msk.bf16.vlgmr.msra.gmra.mrb[136].mxu1 %vm3961_vm10, %v21251_v48  ;;  %v18765_v57 = vpop.f32.mrb[119].mxu0  ;;  %v21279_v48 = vld [vmem:[%s24693_s11 + $0xe8] sm:$0xff]  }
 0xd83   : > { %19258 = vmatpush3.bf16.msra.mxu1 %v23380_v8  ;;  %v18766_v19 = vadd.f32 %v18765_v57, %v18764_v24  ;;  %19253 = vmatprep.mubr.msk.bf16.mxu1 %vm3961_vm10, %v21252_v63  ;;  %v21255_v8 = vld [vmem:[%s24693_s11 + $0xa8] sm:$0xff]   ;;  %v21281_v63 = vld [vmem:[%s24693_s11 + $0xf8] sm:$0xff]   ;;  %v21284_v24 = vld [vmem:[%s24693_s11 + $0x110] sm:$0xff]  }
 0xd84   : > { %19259 = vmatprep.subr.bf16.mxu1 %v23384_v22  ;;  %v21288_v57 = vld [vmem:[%s24693_s11 + $0x130] sm:$0xff]  }
 0xd85   : > { %v23435_v6 = vpack.c.bf16 %v18766_v19, %v18763_v50  ;;  %v21283_v50 = vld [vmem:[%s24693_s11 + $0x108] sm:$0xff]   ;;  %v21289_v19 = vld [vmem:[%s24693_s11 + $0x138] sm:$0xff]  }
 0xd87   : > { %19260 = vmatpush3.bf16.msra.mxu1 %v23384_v22  ;;  %v21259_v22 = vld [vmem:[%s24682_s10 + $0x3c0] sm:$0xff]  }
 0xd88   : > { %19269 = vmatprep.subr.bf16.mxu1 %v23388_v14 }
 0xd8a   : > { %19254 = vmatmul.mubr.msk.bf16.gmra.mrb[140].mxu1 %vm3961_vm10, %v21253_v35  ;;  %v21290_v35 = vld [vmem:[%s24693_s11 + $0x140] sm:$0xff]  }
 0xd8b   : > { %19261 = vmatprep.mubr.msk.bf16.mxu1 %vm3961_vm10, %v21254_v54  ;;  %v21293_v54 = vld [vmem:[%s24682_s10 + $0x580] sm:$0xff]  }
 0xd92   : > { %19262 = vmatmul.mubr.msk.bf16.vlgmr.msra.gmra.mrb[136].mxu1 %vm3961_vm10, %v21255_v8  ;;  %v21296_v8 = vld [vmem:[%s24693_s11 + $0x150] sm:$0xff]  }
 0xd93   : > { %19270 = vmatpush3.bf16.msra.mxu1 %v23388_v14  ;;  %19265 = vmatprep.mubr.msk.bf16.mxu1 %vm3961_vm10, %v21256_v44  ;;  %v21260_v14 = vld [vmem:[%s24693_s11 + $0xc8] sm:$0xff]  }
 0xd94   : > { %19271 = vmatprep.subr.bf16.mxu1 %v23390_v4  ;;  %v21294_v44 = vld [vmem:[%s24682_s10 + $0x5c8] sm:$0xff]  }
 0xd97   : > { %19272 = vmatpush3.bf16.msra.mxu1 %v23390_v4  ;;  %v21265_v4 = vld [vmem:[%s24682_s10 + $0x3d0] sm:$0xff]  }
 0xd98   : > { %18501 = vmatprep.subr.bf16.mxu1 %v21259_v22  ;;  %v21295_v22 = vld [vmem:[%s24682_s10 + $0x588] sm:$0xff]  }
 0xd9a   : > { %19266 = vmatmul.mubr.msk.bf16.gmra.mrb[140].mxu1 %vm3961_vm10, %v21257_v41  ;;  %v21298_v41 = vld [vmem:[%s24693_s11 + $0x158] sm:$0xff]  }
 0xd9b   : > { %19273 = vmatprep.mubr.msk.bf16.mxu1 %vm3961_vm10, %v21258_v9  ;;  %v21299_v9 = vld [vmem:[%s24682_s10 + $0x590] sm:$0xff]  }
 0xda2   : > { %19274 = vmatmul.mubr.msk.bf16.vlgmr.msra.gmra.mrb[136].mxu1 %vm3961_vm10, %v21260_v14  ;;  %v21300_v14 = vld [vmem:[%s24682_s10 + $0x5d8] sm:$0xff]  }
 0xda3   : > { %18502 = vmatpush3.bf16.msra.mxu1 %v21261_v47  ;;  %19277 = vmatprep.mubr.msk.bf16.mxu1 %vm3961_vm10, %v21264_v18  ;;  %v21301_v47 = vld [vmem:[%s24682_s10 + $0x598] sm:$0xff]   ;;  %v21302_v18 = vld [vmem:[%s24682_s10 + $0x5e0] sm:$0xff]  }
 0xda4   : > { %18503 = vmatprep.subr.bf16.mxu1 %v21262_v43  ;;  %v21303_v43 = vld [vmem:[%s24682_s10 + $0x5a0] sm:$0xff]  }
 0xda7   : > { %18504 = vmatpush3.bf16.msra.mxu1 %v21263_v30  ;;  %v21304_v30 = vld [vmem:[%s24682_s10 + $0x5e8] sm:$0xff]  }
 0xda8   : > { %18505 = vmatprep.subr.bf16.mxu1 %v21265_v4  ;;  %v21305_v4 = vld [vmem:[%s24682_s10 + $0x5a8] sm:$0xff]  }
 0xdaa   : > { %19278 = vmatmul.mubr.msk.bf16.gmra.mrb[140].mxu1 %vm3961_vm10, %v21266_v15  ;;  %v21306_v15 = vld [vmem:[%s24682_s10 + $0x5f0] sm:$0xff]  }
 0xdab   : > { %18506 = vmatpush3.bf16.msra.mxu1 %v21267_v21  ;;  %7386 = vmatprep.mubr.bf16.mxu1 %v23119_v49  ;;  %v21307_v21 = vld [vmem:[%s24682_s10 + $0x5b0] sm:$0xff]  }
 0xdac   : > { %18507 = vmatprep.subr.bf16.mxu1 %v21268_v33  ;;  %v21308_v33 = vld [vmem:[%s24682_s10 + $0x5f8] sm:$0xff]  }
 0xdaf   : > { %18508 = vmatpush3.bf16.msra.mxu1 %v21269_v59  ;;  %v21309_v59 = vld [vmem:[%s24682_s10 + $0x5b8] sm:$0xff]  }
 0xdb0   : > { %18509 = vmatprep.subr.bf16.mxu1 %v21270_v20  ;;  %v21310_v20 = vld [vmem:[%s24693_s11 + $0x160] sm:$0xff]  }
 0xdb3   : > { %18510 = vmatpush3.bf16.msra.mxu1 %v21271_v56 }
 0xdb4   : > { %18511 = vmatprep.subr.bf16.mxu1 %v21272_v2 }
 0xdb7   : > { %18512 = vmatpush3.bf16.msra.mxu1 %v21273_v39 }
 0xdb8   : > { %18513 = vmatprep.subr.bf16.mxu1 %v21274_v40 }
 0xdbb   : > { %18514 = vmatpush3.bf16.msra.mxu1 %v21275_v42 }
 0xdbc   : > { %18515 = vmatprep.subr.bf16.mxu1 %v21276_v12 }
 0xdbf   : > { %18516 = vmatpush3.bf16.msra.mxu1 %v21277_v52 }
 0xdc2   : > { %7387 = vmatmul.mubr.bf16.vlgmr.msra.gmra.mrb[152].mxu1 %v23117_v31 }
 0xdc3   : > { %7394 = vmatprep.mubr.bf16.mxu1 %v23135_v37 }
 0xdca   : > { %7395 = vmatmul.mubr.bf16.gmra.mrb[156].mxu1 %v23133_v32 }
 0xdcb   : > { %19285 = vmatprep.mubr.msk.bf16.mxu1 %vm3961_vm10, %v21278_v55 }
 0xe95   : > { %v18517_v46 = vpop.f32.mrb[152].mxu1 }
 0xe96   : > { %v18518_v53 = vpop.f32.mrb[153].mxu1 }
 0xe97   : > { %v18519_v34 = vadd.f32 %v18518_v53, %v18517_v46  ;;  %v18520_v51 = vpop.f32.mrb[154].mxu1 }
 0xe98   : > { %v18521_v1 = vpop.f32.mrb[155].mxu1 }
 0xe99   : > { %v18522_v28 = vadd.f32 %v18521_v1, %v18520_v51 }
 0xe9b   : > { %v7412_v38 = vpack.c.bf16 %v18522_v28, %v18519_v34 }
 0xe9d   : > { %v18523_v16 = vpop.f32.mrb[156].mxu1  ;;  %19281 = vmatprep.subr.bf16.mxu1 %v7412_v38 }
 0xe9e   : > { %v18524_v17 = vpop.f32.mrb[157].mxu1  ;;  %19282 = vmatpush3.bf16.msra.mxu1 %v7412_v38  ;;  %v21311_v38 = vld [vmem:[%s24693_s11 + $0x168] sm:$0xff]  }
 0xe9f   : > { %v18525_v11 = vadd.f32 %v18524_v17, %v18523_v16  ;;  %v18526_v60 = vpop.f32.mrb[158].mxu1  ;;  %v21312_v16 = vld [vmem:[%s24693_s11 + $0x170] sm:$0xff]   ;;  %v21313_v17 = vld [vmem:[%s24693_s11 + $0x178] sm:$0xff]  }
 0xea0   : > { %v18527_v25 = vpop.f32.mrb[159].mxu1 }
 0xea1   : > { %v18528_v61 = vadd.f32 %v18527_v25, %v18526_v60  ;;  %v21315_v60 = vld [vmem:[%s24693_s11 + $0x188] sm:$0xff]   ;;  %v21316_v25 = vld [vmem:[%s24693_s11 + $0x190] sm:$0xff]  }
 0xea3   : > { %v7413_v7 = vpack.c.bf16 %v18528_v61, %v18525_v11  ;;  %v21314_v11 = vld [vmem:[%s24693_s11 + $0x180] sm:$0xff]   ;;  %v21320_v61 = vld [vmem:[%s24693_s11 + $0x1b0] sm:$0xff]  }
 0xea5   : > { %19283 = vmatprep.subr.bf16.mxu1 %v7413_v7 }
 0xea6   : > { %19284 = vmatpush3.bf16.msra.mxu1 %v7413_v7  ;;  %v21321_v7 = vld [vmem:[%s24693_s11 + $0x1b8] sm:$0xff]  }
 0xea7   : > { %19293 = vmatprep.subr.bf16.mxu1 %v23392_v5 }
 0xea9   : > { %19286 = vmatmul.mubr.msk.bf16.vlgmr.msra.gmra.mrb[136].mxu1 %vm3961_vm10, %v21279_v48  ;;  %v21322_v48 = vld [vmem:[%s24693_s11 + $0x1c0] sm:$0xff]  }
 0xeaa   : > { %19294 = vmatpush3.bf16.msra.mxu1 %v23392_v5  ;;  %19289 = vmatprep.mubr.msk.bf16.mxu1 %vm3961_vm10, %v21280_v10  ;;  %v21285_v5 = vld [vmem:[%s24693_s11 + $0x118] sm:$0xff]   ;;  %v21325_v10 = vld [vmem:[%s24682_s10 + $0x780] sm:$0xff]  }
 0xeab   : > { %19295 = vmatprep.subr.bf16.mxu1 %v23394_v3 }
 0xeae   : > { %19296 = vmatpush3.bf16.msra.mxu1 %v23394_v3  ;;  %v21286_v3 = vld [vmem:[%s24693_s11 + $0x120] sm:$0xff]  }
 0xeaf   : > { %19305 = vmatprep.subr.bf16.mxu1 %v23398_v26 }
 0xeb1   : > { %19290 = vmatmul.mubr.msk.bf16.gmra.mrb[140].mxu1 %vm3961_vm10, %v21281_v63  ;;  %v21328_v63 = vld [vmem:[%s24693_s11 + $0x1d0] sm:$0xff]  }
 0xeb2   : > { %19297 = vmatprep.mubr.msk.bf16.mxu1 %vm3961_vm10, %v21282_v13  ;;  %v21326_v13 = vld [vmem:[%s24682_s10 + $0x7c8] sm:$0xff]  }
 0xeb9   : > { %19298 = vmatmul.mubr.msk.bf16.vlgmr.msra.gmra.mrb[136].mxu1 %vm3961_vm10, %v21283_v50  ;;  %v21327_v50 = vld [vmem:[%s24682_s10 + $0x788] sm:$0xff]  }
 0xeba   : > { %19306 = vmatpush3.bf16.msra.mxu1 %v23398_v26  ;;  %19301 = vmatprep.mubr.msk.bf16.mxu1 %vm3961_vm10, %v21284_v24  ;;  %v21287_v26 = vld [vmem:[%s24693_s11 + $0x128] sm:$0xff]   ;;  %v21330_v24 = vld [vmem:[%s24693_s11 + $0x1d8] sm:$0xff]  }
 0xebb   : > { %19307 = vmatprep.subr.bf16.mxu1 %v23400_v45 }
 0xebe   : > { %19308 = vmatpush3.bf16.msra.mxu1 %v23400_v45  ;;  %v21291_v45 = vld [vmem:[%s24682_s10 + $0x5c0] sm:$0xff]  }
 0xebf   : > { %19317 = vmatprep.subr.bf16.mxu1 %v23402_v36 }
 0xec1   : > { %19302 = vmatmul.mubr.msk.bf16.gmra.mrb[140].mxu1 %vm3961_vm10, %v21285_v5  ;;  %v21331_v5 = vld [vmem:[%s24682_s10 + $0x790] sm:$0xff]  }
 0xec2   : > { %19309 = vmatprep.mubr.msk.bf16.mxu1 %vm3961_vm10, %v21286_v3  ;;  %v21332_v3 = vld [vmem:[%s24682_s10 + $0x7d8] sm:$0xff]  }
 0xec9   : > { %19310 = vmatmul.mubr.msk.bf16.vlgmr.msra.gmra.mrb[136].mxu1 %vm3961_vm10, %v21287_v26  ;;  %v21333_v26 = vld [vmem:[%s24682_s10 + $0x798] sm:$0xff]  }
 0xeca   : > { %19318 = vmatpush3.bf16.msra.mxu1 %v23402_v36  ;;  %19313 = vmatprep.mubr.msk.bf16.mxu1 %vm3961_vm10, %v21288_v57  ;;  %v21292_v36 = vld [vmem:[%s24693_s11 + $0x148] sm:$0xff]   ;;  %v21334_v57 = vld [vmem:[%s24682_s10 + $0x7e0] sm:$0xff]  }
 0xecb   : > { %19319 = vmatprep.subr.bf16.mxu1 %v23404_v23 }
 0xece   : > { %19320 = vmatpush3.bf16.msra.mxu1 %v23404_v23  ;;  %v21297_v23 = vld [vmem:[%s24682_s10 + $0x5d0] sm:$0xff]  }
 0xecf   : > { %18637 = vmatprep.subr.bf16.mxu1 %v21291_v45  ;;  %v21335_v45 = vld [vmem:[%s24682_s10 + $0x7a0] sm:$0xff]  }
 0xed1   : > { %19314 = vmatmul.mubr.msk.bf16.gmra.mrb[140].mxu1 %vm3961_vm10, %v21289_v19  ;;  %v21336_v19 = vld [vmem:[%s24682_s10 + $0x7e8] sm:$0xff]  }
 0xed2   : > { %19321 = vmatprep.mubr.msk.bf16.mxu1 %vm3961_vm10, %v21290_v35  ;;  %v21337_v35 = vld [vmem:[%s24682_s10 + $0x7a8] sm:$0xff]  }
 0xed9   : > { %19322 = vmatmul.mubr.msk.bf16.vlgmr.msra.gmra.mrb[136].mxu1 %vm3961_vm10, %v21292_v36  ;;  %v21338_v36 = vld [vmem:[%s24682_s10 + $0x7f0] sm:$0xff]  }
 0xeda   : > { %18638 = vmatpush3.bf16.msra.mxu1 %v21293_v54  ;;  %19325 = vmatprep.mubr.msk.bf16.mxu1 %vm3961_vm10, %v21296_v8  ;;  %v21339_v54 = vld [vmem:[%s24682_s10 + $0x7b0] sm:$0xff]   ;;  %v21340_v8 = vld [vmem:[%s24682_s10 + $0x7f8] sm:$0xff]  }
 0xedb   : > { %18639 = vmatprep.subr.bf16.mxu1 %v21294_v44  ;;  %v21341_v44 = vld [vmem:[%s24682_s10 + $0x7b8] sm:$0xff]  }
 0xede   : > { %18640 = vmatpush3.bf16.msra.mxu1 %v21295_v22 }
 0xedf   : > { %18641 = vmatprep.subr.bf16.mxu1 %v21297_v23 }
 0xee1   : > { %19326 = vmatmul.mubr.msk.bf16.gmra.mrb[140].mxu1 %vm3961_vm10, %v21298_v41 }
 0xee2   : > { %18642 = vmatpush3.bf16.msra.mxu1 %v21299_v9  ;;  %8562 = vmatprep.mubr.bf16.mxu1 %v23119_v49 }
 0xee3   : > { %18643 = vmatprep.subr.bf16.mxu1 %v21300_v14 }
 0xee6   : > { %18644 = vmatpush3.bf16.msra.mxu1 %v21301_v47 }
 0xee7   : > { %18645 = vmatprep.subr.bf16.mxu1 %v21302_v18 }
 0xeea   : > { %18646 = vmatpush3.bf16.msra.mxu1 %v21303_v43 }
 0xeeb   : > { %18647 = vmatprep.subr.bf16.mxu1 %v21304_v30 }
 0xeee   : > { %18648 = vmatpush3.bf16.msra.mxu1 %v21305_v4 }
 0xeef   : > { %18649 = vmatprep.subr.bf16.mxu1 %v21306_v15 }
 0xef2   : > { %18650 = vmatpush3.bf16.msra.mxu1 %v21307_v21  ;;  %v21343_v21 = vld [vmem:[%s24693_s11 + $0x1e8] sm:$0xff]  }
 0xef3   : > { %18651 = vmatprep.subr.bf16.mxu1 %v21308_v33  ;;  %v21344_v33 = vld [vmem:[%s24693_s11 + $0x1f0] sm:$0xff]  }
 0xef6   : > { %18652 = vmatpush3.bf16.msra.mxu1 %v21309_v59  ;;  %v21345_v59 = vld [vmem:[%s24693_s11 + $0x1f8] sm:$0xff]  }
 0xef9   : > { %8563 = vmatmul.mubr.bf16.vlgmr.msra.gmra.mrb[160].mxu1 %v23117_v31 }
 0xefa   : > { %8570 = vmatprep.mubr.bf16.mxu1 %v23135_v37 }
 0xf01   : > { %8571 = vmatmul.mubr.bf16.gmra.mrb[164].mxu1 %v23133_v32 }
 0xf02   : > { %19333 = vmatprep.mubr.msk.bf16.mxu1 %vm3961_vm10, %v21310_v20  ;;  %v21346_v20 = vld [vmem:[%s24694_s6] sm:$0xff]  }
 0xf03   : > { %19389 = vmatprep.subr.bf16.mxu0 %v21346_v20 }
 0xf04   : > { %19390 = vmatpush3.bf16.msra.mxu0 %v21346_v20 }
 0xfcc   : > { %v18653_v56 = vpop.f32.mrb[160].mxu1 }
 0xfcd   : > { %v18654_v2 = vpop.f32.mrb[161].mxu1 }
 0xfce   : > { %v18655_v39 = vadd.f32 %v18654_v2, %v18653_v56  ;;  %v18656_v40 = vpop.f32.mrb[162].mxu1  ;;  %v21347_v56 = vld [vmem:[%s24694_s6 + $0x8] sm:$0xff]   ;;  %v21348_v2 = vld [vmem:[%s24694_s6 + $0x10] sm:$0xff]  }
 0xfcf   : > { %v18657_v42 = vpop.f32.mrb[163].mxu1  ;;  %19391 = vmatprep.subr.bf16.mxu0 %v21347_v56 }
 0xfd0   : > { %v18658_v12 = vadd.f32 %v18657_v42, %v18656_v40  ;;  %19392 = vmatpush3.bf16.msra.mxu0 %v21347_v56  ;;  %v9887_v40 = vpop.permute.xlu1 %9886  ;;  %v9882_v42 = vpop.permute.xlu0 %9881 }
 0xfd1   : > { %19393 = vmatprep.subr.bf16.mxu0 %v21348_v2 }
 0xfd2   : > { %v8588_v52 = vpack.c.bf16 %v18658_v12, %v18655_v39  ;;  %v21349_v39 = vld [vmem:[%s24694_s6 + $0x18] sm:$0xff]  }
 0xfd4   : > { %v18659_v55 = vpop.f32.mrb[164].mxu1  ;;  %19329 = vmatprep.subr.bf16.mxu1 %v8588_v52  ;;  %19394 = vmatpush3.bf16.msra.mxu0 %v21348_v2  ;;  %v9897_v12 = vpop.permute.xlu1 %9896 }
 0xfd5   : > { %v18660_v46 = vpop.f32.mrb[165].mxu1  ;;  %19330 = vmatpush3.bf16.msra.mxu1 %v8588_v52  ;;  %19395 = vmatprep.subr.bf16.mxu0 %v21349_v39  ;;  %v9892_v52 = vpop.permute.xlu0 %9891 }
 0xfd6   : > { %v18661_v53 = vadd.f32 %v18660_v46, %v18659_v55  ;;  %v18662_v34 = vpop.f32.mrb[166].mxu1 }
 0xfd7   : > { %v18663_v51 = vpop.f32.mrb[167].mxu1 }
 0xfd8   : > { %v18664_v1 = vadd.f32 %v18663_v51, %v18662_v34  ;;  %19396 = vmatpush3.bf16.msra.mxu0 %v21349_v39  ;;  %v9943_v55 = vpop.permute.xlu1 %9942  ;;  %v21808_v51 = vmov 0.0  }
 0xfd9   : > { %v9938_v46 = vpop.permute.xlu0 %9937  ;;  %19405 = vmatprep.subr.bf16.mxu0 %v21808_v51 }
 0xfda   : > { %v8589_v28 = vpack.c.bf16 %v18664_v1, %v18661_v53 }
 0xfdc   : > { %19331 = vmatprep.subr.bf16.mxu1 %v8589_v28  ;;  %v9907_v53 = vpop.permute.xlu1 %9906 }
 0xfdd   : > { %19332 = vmatpush3.bf16.msra.mxu1 %v8589_v28  ;;  %v9902_v34 = vpop.permute.xlu0 %9901 }
 0xfde   : > { %19341 = vmatprep.subr.bf16.mxu1 %v23406_v62 }
 0xfe0   : > { %19334 = vmatmul.mubr.msk.bf16.vlgmr.msra.gmra.mrb[136].mxu1 %vm3961_vm10, %v21311_v38  ;;  %v9953_v1 = vpop.permute.xlu1 %9952 }
 0xfe1   : > { %19342 = vmatpush3.bf16.msra.mxu1 %v23406_v62  ;;  %19337 = vmatprep.mubr.msk.bf16.mxu1 %vm3961_vm10, %v21312_v16  ;;  %v21317_v62 = vld [vmem:[%s24693_s11 + $0x198] sm:$0xff]   ;;  %v9948_v28 = vpop.permute.xlu0 %9947 }
 0xfe2   : > { %19343 = vmatprep.subr.bf16.mxu1 %v23408_v58 }
 0xfe4   : > { %v9917_v38 = vpop.permute.xlu1 %9916 }
 0xfe5   : > { %19344 = vmatpush3.bf16.msra.mxu1 %v23408_v58  ;;  %v21318_v58 = vld [vmem:[%s24693_s11 + $0x1a0] sm:$0xff]  }
 0xfe6   : > { %19353 = vmatprep.subr.bf16.mxu1 %v23410_v27 }
 0xfe8   : > { %19338 = vmatmul.mubr.msk.bf16.gmra.mrb[140].mxu1 %vm3961_vm10, %v21313_v17  ;;  %v9912_v17 = vpop.permute.xlu0 %9911 }
 0xfe9   : > { %19345 = vmatprep.mubr.msk.bf16.mxu1 %vm3961_vm10, %v21314_v11 }
 0xff0   : > { %19346 = vmatmul.mubr.msk.bf16.vlgmr.msra.gmra.mrb[136].mxu1 %vm3961_vm10, %v21315_v60 }
 0xff1   : > { %19354 = vmatpush3.bf16.msra.mxu1 %v23410_v27  ;;  %19349 = vmatprep.mubr.msk.bf16.mxu1 %vm3961_vm10, %v21316_v25  ;;  %v21319_v27 = vld [vmem:[%s24693_s11 + $0x1a8] sm:$0xff]  }
 0xff2   : > { %19355 = vmatprep.subr.bf16.mxu1 %v23412_v0 }
 0xff5   : > { %19356 = vmatpush3.bf16.msra.mxu1 %v23412_v0  ;;  %v21323_v0 = vld [vmem:[%s24682_s10 + $0x7c0] sm:$0xff]  }
 0xff6   : > { %19365 = vmatprep.subr.bf16.mxu1 %v23427_v29 }
 0xff8   : > { %19350 = vmatmul.mubr.msk.bf16.gmra.mrb[140].mxu1 %vm3961_vm10, %v21317_v62 }
 0xff9   : > { %19357 = vmatprep.mubr.msk.bf16.mxu1 %vm3961_vm10, %v21318_v58 }
0x1000   : > { %19358 = vmatmul.mubr.msk.bf16.vlgmr.msra.gmra.mrb[136].mxu1 %vm3961_vm10, %v21319_v27 }
0x1001   : > { %19366 = vmatpush3.bf16.msra.mxu1 %v23427_v29  ;;  %19361 = vmatprep.mubr.msk.bf16.mxu1 %vm3961_vm10, %v21320_v61  ;;  %v21324_v29 = vld [vmem:[%s24693_s11 + $0x1c8] sm:$0xff]  }
0x1002   : > { %19367 = vmatprep.subr.bf16.mxu1 %v23435_v6 }
0x1005   : > { %19368 = vmatpush3.bf16.msra.mxu1 %v23435_v6  ;;  %v21329_v6 = vld [vmem:[%s24682_s10 + $0x7d0] sm:$0xff]  }
0x1006   : > { %18773 = vmatprep.subr.bf16.mxu1 %v21323_v0 }
0x1008   : > { %19362 = vmatmul.mubr.msk.bf16.gmra.mrb[140].mxu1 %vm3961_vm10, %v21321_v7 }
0x1009   : > { %19369 = vmatprep.mubr.msk.bf16.mxu1 %vm3961_vm10, %v21322_v48 }
0x1010   : > { %19370 = vmatmul.mubr.msk.bf16.vlgmr.msra.gmra.mrb[136].mxu1 %vm3961_vm10, %v21324_v29  ;;  %v9963_v29 = vpop.permute.xlu1 %9962 }
0x1011   : > { %18774 = vmatpush3.bf16.msra.mxu1 %v21325_v10  ;;  %19373 = vmatprep.mubr.msk.bf16.mxu1 %vm3961_vm10, %v21328_v63 }
0x1012   : > { %18775 = vmatprep.subr.bf16.mxu1 %v21326_v13  ;;  %v9958_v13 = vpop.permute.xlu0 %9957 }
0x1015   : > { %18776 = vmatpush3.bf16.msra.mxu1 %v21327_v50 }
0x1016   : > { %18777 = vmatprep.subr.bf16.mxu1 %v21329_v6 }
0x1018   : > { %19374 = vmatmul.mubr.msk.bf16.gmra.mrb[140].mxu1 %vm3961_vm10, %v21330_v24 }
0x1019   : > { %18778 = vmatpush3.bf16.msra.mxu1 %v21331_v5  ;;  %9738 = vmatprep.mubr.bf16.mxu1 %v23119_v49  ;;  %v21342_v49 = vld [vmem:[%s24693_s11 + $0x1e0] sm:$0xff]  }
0x101a   : > { %18779 = vmatprep.subr.bf16.mxu1 %v21332_v3 }
0x101d   : > { %18780 = vmatpush3.bf16.msra.mxu1 %v21333_v26 }
0x101e   : > { %18781 = vmatprep.subr.bf16.mxu1 %v21334_v57 }
0x1021   : > { %18782 = vmatpush3.bf16.msra.mxu1 %v21335_v45 }
0x1022   : > { %18783 = vmatprep.subr.bf16.mxu1 %v21336_v19 }
0x1025   : > { %18784 = vmatpush3.bf16.msra.mxu1 %v21337_v35 }
0x1026   : > { %18785 = vmatprep.subr.bf16.mxu1 %v21338_v36 }
0x1029   : > { %18786 = vmatpush3.bf16.msra.mxu1 %v21339_v54 }
0x102a   : > { %18787 = vmatprep.subr.bf16.mxu1 %v21340_v8 }
0x102d   : > { %18788 = vmatpush3.bf16.msra.mxu1 %v21341_v44  ;;  %v9973_v44 = vpop.permute.xlu1 %9972 }
0x1030   : > { %9739 = vmatmul.mubr.bf16.vlgmr.msra.gmra.mrb[168].mxu1 %v23117_v31 }
0x1031   : > { %9746 = vmatprep.mubr.bf16.mxu1 %v23135_v37 }
0x1038   : > { %9747 = vmatmul.mubr.bf16.gmra.mrb[172].mxu1 %v23133_v32 }
0x1039   : > { %19381 = vmatprep.mubr.msk.bf16.mxu1 %vm3961_vm10, %v21342_v49 }
0x1103   : > { %v18789_v22 = vpop.f32.mrb[168].mxu1 }
0x1104   : > { %v18790_v23 = vpop.f32.mrb[169].mxu1 }
0x1105   : > { %v18791_v41 = vadd.f32 %v18790_v23, %v18789_v22  ;;  %v18792_v9 = vpop.f32.mrb[170].mxu1 }
0x1106   : > { %v18793_v14 = vpop.f32.mrb[171].mxu1 }
0x1107   : > { %v18794_v47 = vadd.f32 %v18793_v14, %v18792_v9 }
0x1109   : > { %v9764_v18 = vpack.c.bf16 %v18794_v47, %v18791_v41  ;;  %v9968_v41 = vpop.permute.xlu0 %9967 }
0x110b   : > { %v18795_v43 = vpop.f32.mrb[172].mxu1  ;;  %19377 = vmatprep.subr.bf16.mxu1 %v9764_v18 }
0x110c   : > { %v18796_v31 = vpop.f32.mrb[173].mxu1  ;;  %19378 = vmatpush3.bf16.msra.mxu1 %v9764_v18 }
0x110d   : > { %v18797_v32 = vadd.f32 %v18796_v31, %v18795_v43  ;;  %v18798_v37 = vpop.f32.mrb[174].mxu1 }
0x110e   : > { %v18799_v30 = vpop.f32.mrb[175].mxu1 }
0x110f   : > { %v18800_v4 = vadd.f32 %v18799_v30, %v18798_v37 }
0x1111   : > { %v9765_v15 = vpack.c.bf16 %v18800_v4, %v18797_v32 }
0x1113   : > { %19379 = vmatprep.subr.bf16.mxu1 %v9765_v15 }
0x1114   : > { %19380 = vmatpush3.bf16.msra.mxu1 %v9765_v15 }
0x1117   : > { %19382 = vmatmul.mubr.msk.bf16.vlgmr.msra.gmra.mrb[136].mxu1 %vm3961_vm10, %v21343_v21 }
0x1118   : > { %19385 = vmatprep.mubr.msk.bf16.mxu1 %vm3961_vm10, %v21344_v33 }
0x111f   : > { %19386 = vmatmul.mubr.msk.bf16.gmra.mrb[140].mxu1 %vm3961_vm10, %v21345_v59  ;;  %vm15665_vm10 = vcmask 130048  }
0x11ea   : > { %v19383_v16 = vpop.f32.mrb[136].mxu1 }
0x11eb   : > { %v9921_v11 = vmul.f32 %v19383_v16, %v9892_v52  ;;  %v9832_v60 = vpop.f32.mrb[137].mxu1  ;;  %v17471_v52 = vld [vmem:[%s24696_s18] ss:$0 sm:$0xff] }
0x11ec   : > { %v9919_v25 = vmul.f32 %v9882_v42, %v9832_v60  ;;  %v19384_v62 = vpop.f32.mrb[138].mxu1  ;;  %v10144_v42 = vld [vmem:[%s24695_s15] sm:$0xf] }
0x11ed   : > { %v9922_v58 = vmul.f32 %v19384_v62, %v9897_v12  ;;  %v9835_v27 = vpop.f32.mrb[139].mxu1  ;;  %v9977_v7 = vadd.f32 %v9948_v28, %v9921_v11 }
0x11ee   : > { %v9975_v61 = vadd.f32 %v9938_v46, %v9919_v25  ;;  %v9920_v0 = vmul.f32 %v9887_v40, %v9835_v27 }
0x11ef   : > { %v9978_v48 = vadd.f32 %v9953_v1, %v9922_v58  ;;  %v9993_v5 = vmul.f32 0.1, %v9977_v7  ;;  %vm9985_vm2 = vcmp.ge.f32.partialorder %v9977_v7, 0.0 }
0x11f0   : > { %v9991_v10 = vmul.f32 0.1, %v9975_v61  ;;  %v9976_v63 = vadd.f32 %v9943_v55, %v9920_v0  ;;  %vm9983_vm13 = vcmp.ge.f32.partialorder %v9975_v61, 0.0 }
0x11f1   : > { %v9994_v50 = vmul.f32 0.1, %v9978_v48  ;;  %vm9986_vm15 = vcmp.ge.f32.partialorder %v9978_v48, 0.0  ;;  %v23629_v14 = vsel %vm9985_vm2, %v9977_v7, %v9993_v5  ;;  %v21350_v5 = vld [vmem:[%s24697_s27] sm:$0xff]  }
0x11f2   : > { %vm9984_vm14 = vcmp.ge.f32.partialorder %v9976_v63, 0.0  ;;  %v9992_v6 = vmul.f32 0.1, %v9976_v63  ;;  %v19387_v24 = vpop.f32.mrb[140].mxu1  ;;  %v23621_v26 = vsel %vm9983_vm13, %v9975_v61, %v9991_v10 }
0x11f3   : > { %v9848_v3 = vpop.f32.mrb[141].mxu1  ;;  %v9925_v45 = vmul.f32 %v19387_v24, %v9912_v17  ;;  %v23627_v49 = vsel %vm9986_vm15, %v9978_v48, %v9994_v50  ;;  %v10149_v48 = vpop.permute.xlu1 %10148 }
0x11f4   : > { %v23623_v57 = vsel %vm9984_vm14, %v9976_v63, %v9992_v6  ;;  %v9923_v19 = vmul.f32 %v9902_v34, %v9848_v3  ;;  %v19388_v35 = vpop.f32.mrb[142].mxu1  ;;  %v10008_v31 = vpack.c.bf16 %v23627_v49, %v23629_v14  ;;  %v21351_v3 = vld [vmem:[%s24697_s27 + $0x8] sm:$0xff]  }
0x11f5   : > { %v10007_v36 = vpack.c.bf16 %v23623_v57, %v23621_v26  ;;  %v9926_v54 = vmul.f32 %v19388_v35, %v9917_v38  ;;  %v9851_v8 = vpop.f32.mrb[143].mxu1  ;;  %v9981_v47 = vadd.f32 %v9968_v41, %v9925_v45  ;;  %v21352_v45 = vld [vmem:[%s24697_s27 + $0x10] sm:$0xff]  }
0x11f6   : > { %v9979_v22 = vadd.f32 %v9958_v13, %v9923_v19  ;;  %v9924_v23 = vmul.f32 %v9907_v53, %v9851_v8  ;;  %v21353_v19 = vld [vmem:[%s24697_s27 + $0x18] sm:$0xff]  }
0x11f7   : > { %v9982_v9 = vadd.f32 %v9973_v44, %v9926_v54  ;;  %10026 = vxpose.xlu0.c.b16.start [1/4] (short) (narrow) %v10007_v36, 64  ;;  %v9997_v30 = vmul.f32 0.1, %v9981_v47  ;;  %vm9989_vm6 = vcmp.ge.f32.partialorder %v9981_v47, 0.0 }
0x11f8   : > { %v9995_v18 = vmul.f32 0.1, %v9979_v22  ;;  %v9980_v43 = vadd.f32 %v9963_v29, %v9924_v23  ;;  %vm9987_vm3 = vcmp.ge.f32.partialorder %v9979_v22, 0.0 }
0x11f9   : > { %v9998_v32 = vmul.f32 0.1, %v9982_v9  ;;  %vm9990_vm5 = vcmp.ge.f32.partialorder %v9982_v9, 0.0  ;;  %v23641_v59 = vsel %vm9989_vm6, %v9981_v47, %v9997_v30 }
0x11fa   : > { %vm9988_vm4 = vcmp.ge.f32.partialorder %v9980_v43, 0.0  ;;  %v9996_v37 = vmul.f32 0.1, %v9980_v43  ;;  %v23633_v4 = vsel %vm9987_vm3, %v9979_v22, %v9995_v18 }
0x11fb   : > { %10027 = vxpose.xlu0.c.b16.cont [2/4] (short) (narrow) %v10008_v31, 64  ;;  %v23639_v33 = vsel %vm9990_vm5, %v9982_v9, %v9998_v32 }
0x11fc   : > { %v23635_v15 = vsel %vm9988_vm4, %v9980_v43, %v9996_v37  ;;  %v10010_v20 = vpack.c.bf16 %v23639_v33, %v23641_v59 }
0x11fd   : > { %v10009_v21 = vpack.c.bf16 %v23635_v15, %v23633_v4 }
0x11ff   : > { %10028 = vxpose.xlu0.c.b16.cont [3/4] (short) (narrow) %v10009_v21, 64 }
0x1203   : > { %10029 = vxpose.xlu0.c.b16.end [4/4] (short) (narrow) %v10010_v20, 64 }
0x125d   : > { %v10034_v56 = vpop.trf.xlu0 }
0x125e   : > { %19397 = vmatprep.mubr.msk.bf16.mxu0 %vm10066_vm7, %v10034_v56 }
0x1261   : > { %v10035_v2 = vpop.trf.xlu0 }
0x1262   : > { %19398 = vmatmul.mubr.msk.bf16.vlgmr.msra.gmra.mrb[120].mxu0 %vm10066_vm7, %v10035_v2 }
0x1263   : > { %19406 = vmatpush3.bf16.msra.mxu0 %v10007_v36 }
0x1264   : > { %19407 = vmatprep.subr.bf16.mxu0 %v21808_v51 }
0x1265   : > { %v10036_v39 = vpop.trf.xlu0 }
0x1266   : > { %19401 = vmatprep.mubr.msk.bf16.mxu0 %vm10066_vm7, %v10036_v39 }
0x1267   : > { %19408 = vmatpush3.bf16.msra.mxu0 %v10008_v31 }
0x1268   : > { %19409 = vmatprep.subr.bf16.mxu0 %v21808_v51 }
0x1269   : > { %v10037_v40 = vpop.trf.xlu0 }
0x126a   : > { %19402 = vmatmul.mubr.msk.bf16.gmra.mrb[124].mxu0 %vm10066_vm7, %v10037_v40 }
0x126b   : > { %19410 = vmatpush3.bf16.msra.mxu0 %v10009_v21  ;;  %19413 = vmatprep.mubr.msk.bf16.mxu0 %vm21809_vm8, %v21808_v51 }
0x126c   : > { %19411 = vmatprep.subr.bf16.mxu0 %v21808_v51 }
0x126f   : > { %19412 = vmatpush3.bf16.msra.mxu0 %v10010_v20 }
0x1270   : > { %19417 = vmatprep.subr.bf16.mxu0 %v10007_v36 }
0x1272   : > { %19414 = vmatmul.mubr.msk.bf16.vlgmr.msra.gmra.mrb[128].mxu0 %vm10066_vm7, %v10144_v42 }
0x1273   : > { %19418 = vmatpush3.bf16.msra.mxu0 %v10007_v36  ;;  %19425 = vmatprep.mubr.msk.bf16.mxu0 %vm10066_vm7, %v21350_v5 }
0x1274   : > { %19419 = vmatprep.subr.bf16.mxu0 %v10008_v31 }
0x1277   : > { %19420 = vmatpush3.bf16.msra.mxu0 %v10008_v31 }
0x1278   : > { %19421 = vmatprep.subr.bf16.mxu0 %v10009_v21 }
0x127b   : > { %19422 = vmatpush3.bf16.msra.mxu0 %v10009_v21 }
0x127c   : > { %19423 = vmatprep.subr.bf16.mxu0 %v10010_v20 }
0x127f   : > { %19424 = vmatpush3.bf16.msra.mxu0 %v10010_v20 }
0x1282   : > { %19426 = vmatmul.mubr.msk.bf16.vlgmr.msra.gmra.mrb[132].mxu0 %vm10066_vm7, %v21351_v3  ;;  %v10205_v3 = vld [vmem:[%s24698_s23 + $0x18] sm:$0xff] }
0x1283   : > { %19429 = vmatprep.mubr.msk.bf16.mxu0 %vm10066_vm7, %v21352_v45 }
0x128a   : > { %19430 = vmatmul.mubr.msk.bf16.gmra.mrb[136].mxu0 %vm10066_vm7, %v21353_v19  ;;  %v10207_v19 = vld [vmem:[%s24698_s23 + $0x28] sm:$0xff] }
0x1335   : > { %v19399_v12 = vpop.f32.mrb[120].mxu0 }
0x1336   : > { %v10113_v55 = vpop.f32.mrb[121].mxu0  ;;  %v10122_v53 = vadd.f32 %v19399_v12, %v17471_v52 }
0x1337   : > { %v19400_v46 = vpop.f32.mrb[122].mxu0  ;;  %v10114_v51 = vadd.f32 %v17471_v52, %v10113_v55 }
0x1338   : > { %v10125_v34 = vadd.f32 %v19400_v46, %v17471_v52  ;;  %v10116_v1 = vpop.f32.mrb[123].mxu0 }
0x1339   : > { %v10117_v28 = vadd.f32 %v17471_v52, %v10116_v1 }
0x133a   : > { %v10348_v38 = vpack.c.bf16 %v10125_v34, %v10122_v53 }
0x133b   : > { %v10347_v16 = vpack.c.bf16 %v10117_v28, %v10114_v51 }
0x133d   : > { %v19403_v17 = vpop.f32.mrb[124].mxu0  ;;  %19435 = vmatprep.mubr.msk.bf16.mxu1 %vm1404_vm1, %v10347_v16 }
0x133e   : > { %v10129_v11 = vpop.f32.mrb[125].mxu0  ;;  %v10138_v25 = vadd.f32 %v19403_v17, %v17471_v52 }
0x133f   : > { %v19404_v60 = vpop.f32.mrb[126].mxu0  ;;  %v10130_v27 = vadd.f32 %v17471_v52, %v10129_v11 }
0x1340   : > { %v10141_v62 = vadd.f32 %v19404_v60, %v17471_v52  ;;  %v10132_v58 = vpop.f32.mrb[127].mxu0 }
0x1341   : > { %v10133_v61 = vadd.f32 %v17471_v52, %v10132_v58 }
0x1342   : > { %v10350_v0 = vpack.c.bf16 %v10141_v62, %v10138_v25 }
0x1343   : > { %v10349_v7 = vpack.c.bf16 %v10133_v61, %v10130_v27 }
0x1345   : > { %v10188_v29 = vpop.f32.mrb[128].mxu0 }
0x1346   : > { %v10189_v10 = vadd.f32 %v10188_v29, %v10149_v48  ;;  %v19415_v63 = vpop.f32.mrb[129].mxu0 }
0x1347   : > { %v10191_v13 = vpop.f32.mrb[130].mxu0 }
0x1348   : > { %v10351_v50 = vpack.c.bf16 %v10189_v10, %v10189_v10  ;;  %v19416_v6 = vpop.f32.mrb[131].mxu0  ;;  %v10203_v10 = vld [vmem:[%s24698_s23 + $0x8] sm:$0xff] }
0x134a   : > { %v10365_v24 = vsel %vm1411_vm0, %v10351_v50, 0  ;;  %20523 = vmatprep.subr.msk.bf16.mxu1 %vm1411_vm0, %v10351_v50 }
0x134b   : > { %19434 = vmatpush3.bf16.msra.mxu1 %v10365_v24  ;;  %v10202_v24 = vld [vmem:[%s24698_s23] sm:$0xff] }
0x134e   : > { %19436 = vmatmul.mubr.msk.bf16.vlgmr.msra.gmra.mrb[176].mxu1 %vm1404_vm1, %v10348_v38 }
0x134f   : > { %19439 = vmatprep.mubr.msk.bf16.mxu1 %vm1404_vm1, %v10349_v7 }
0x1355   : > { %v23709_v63 = vpop.f32.mrb[132].mxu0 }
0x1356   : > { %19440 = vmatmul.mubr.msk.bf16.gmra.mrb[180].mxu1 %vm1404_vm1, %v10350_v0  ;;  %v23711_v13 = vpop.f32.mrb[133].mxu0 }
0x1357   : > { %v23713_v50 = vpop.f32.mrb[134].mxu0 }
0x1358   : > { %v23715_v6 = vpop.f32.mrb[135].mxu0 }
0x135d   : > { %v23719_v45 = vpop.f32.mrb[136].mxu0 }
0x1421   : > { %v19437_v35 = vpop.f32.mrb[176].mxu1 }
0x1422   : > { %v10401_v36 = vpop.f32.mrb[177].mxu1  ;;  %v10438_v54 = vsel %vm10066_vm7, %v19437_v35, -inf }
0x1423   : > { %10439 = vmax.xlane.f32.xlu0 %v10438_v54  ;;  %v19438_v8 = vpop.f32.mrb[178].mxu1  ;;  %v10432_v44 = vsel %vm10066_vm7, %v10401_v36, -inf }
0x1424   : > { %10433 = vmax.xlane.f32.xlu1 %v10432_v44  ;;  %v10404_v22 = vpop.f32.mrb[179].mxu1  ;;  %v10441_v43 = vsel %vm10066_vm7, %v19438_v8, -inf }
0x1425   : > { %v10435_v23 = vsel %vm10066_vm7, %v10404_v22, -inf }
0x1428   : > { %10436 = vmax.xlane.f32.xlu1 %v10435_v23 }
0x1429   : > { %v19441_v41 = vpop.f32.mrb[180].mxu1 }
0x142a   : > { %v10417_v9 = vpop.f32.mrb[181].mxu1  ;;  %v10450_v47 = vsel %vm10066_vm7, %v19441_v41, -inf }
0x142b   : > { %10451 = vmax.xlane.f32.xlu0 %v10450_v47  ;;  %v23674_v18 = vpop.f32.mrb[182].mxu1  ;;  %v10444_v32 = vsel %vm10066_vm7, %v10417_v9, -inf }
0x142c   : > { %10442 = vmax.xlane.f32.xlu1 %v10441_v43  ;;  %v23677_v31 = vpop.f32.mrb[183].mxu1  ;;  %v10453_v30 = vsel %vm10066_vm7, %v23674_v18, -inf  ;;  %v15363_v43 = vld [vmem:[%s24699_s26 + $0x10] sm:$0xff] }
0x142d   : > { %v10447_v37 = vsel %vm10066_vm7, %v23677_v31, -inf }
0x1430   : > { %10445 = vmax.xlane.f32.xlu1 %v10444_v32  ;;  %v15474_v32 = vld [vmem:[%s24700_s1 + $0x8] sm:$0xff] }
0x1434   : > { %10448 = vmax.xlane.f32.xlu1 %v10447_v37  ;;  %v15475_v37 = vld [vmem:[%s24700_s1 + $0x10] sm:$0xff] }
0x1438   : > { %10454 = vmax.xlane.f32.xlu1 %v10453_v30 }
0x14b0   : > { %v10440_v21 = vpop.xlane.xlu0 %10439 }
0x14b1   : > { %v10458_v20 = vsub.f32 %v19437_v35, %v10440_v21  ;;  %v10434_v56 = vpop.xlane.xlu1 %10433  ;;  %v23722_v35 = vpop.f32.mrb[137].mxu0 }
0x14b2   : > { %v10456_v2 = vsub.f32 %v10401_v36, %v10434_v56  ;;  %v23724_v54 = vpop.f32.mrb[138].mxu0 }
0x14b3   : > { %v10468_v39 = vmul.f32 1.442695, %v10458_v20  ;;  %v15477_v20 = vld [vmem:[%s24700_s1 + $0x20] sm:$0xff] }
0x14b4   : > { %v10464_v40 = vmul.f32 1.442695, %v10456_v2  ;;  %v15478_v2 = vld [vmem:[%s24700_s1 + $0x28] sm:$0xff] }
0x14b5   : > { %v10437_v42 = vpop.xlane.xlu1 %10436 }
0x14b6   : > { %21738 = vpow2.f32 %v10464_v40  ;;  %v10457_v12 = vsub.f32 %v10404_v22, %v10437_v42  ;;  %v10209_v22 = vld [vmem:[%s24698_s23 + $0x38] sm:$0xff]  ;;  %v15481_v42 = vld [vmem:[%s24700_s1 + $0x40] sm:$0xff] }
0x14b7   : > { %21740 = vpow2.f32 %v10468_v39  ;;  %v15479_v39 = vld [vmem:[%s24700_s1 + $0x30] sm:$0xff]  ;;  %v15480_v40 = vld [vmem:[%s24700_s1 + $0x38] sm:$0xff] }
0x14b8   : > { %v10452_v52 = vpop.xlane.xlu0 %10451  ;;  %v10466_v1 = vmul.f32 1.442695, %v10457_v12  ;;  %v10204_v12 = vld [vmem:[%s24698_s23 + $0x10] sm:$0xff] }
0x14b9   : > { %v10462_v55 = vsub.f32 %v19441_v41, %v10452_v52  ;;  %v10443_v46 = vpop.xlane.xlu1 %10442  ;;  %v15482_v52 = vld [vmem:[%s24700_s1 + $0x48] sm:$0xff] }
0x14ba   : > { %v10459_v53 = vsub.f32 %v19438_v8, %v10443_v46  ;;  %v23726_v8 = vpop.f32.mrb[139].mxu0  ;;  %v15483_v46 = vld [vmem:[%s24700_s1 + $0x50] sm:$0xff] }
0x14bb   : > { %v10476_v34 = vmul.f32 1.442695, %v10462_v55  ;;  %v10206_v55 = vld [vmem:[%s24698_s23 + $0x20] sm:$0xff] }
0x14bc   : > { %v10470_v51 = vmul.f32 1.442695, %v10459_v53  ;;  %v10208_v53 = vld [vmem:[%s24698_s23 + $0x30] sm:$0xff] }
0x14bd   : > { %21742 = vpow2.f32 %v10476_v34  ;;  %v10446_v28 = vpop.xlane.xlu1 %10445  ;;  %v15484_v34 = vld [vmem:[%s24700_s1 + $0x58] sm:$0xff] }
0x14be   : > { %21744 = vpow2.f32 %v10470_v51  ;;  %v10460_v38 = vsub.f32 %v10417_v9, %v10446_v28  ;;  %v15361_v9 = vld [vmem:[%s24699_s26] sm:$0xff]  ;;  %v15362_v28 = vld [vmem:[%s24699_s26 + $0x8] sm:$0xff] }
0x14bf   : > { %21746 = vpow2.f32 %v10466_v1  ;;  %v17497_v1 = vld [vmem:[#allocation3] ss:$0 sm:$0xff] }
0x14c0   : > { %v23684_v16 = vpop.eup %21738  ;;  %v10472_v17 = vmul.f32 1.442695, %v10460_v38  ;;  %v15485_v51 = vld [vmem:[%s24700_s1 + $0x60] sm:$0xff]  ;;  %v15486_v38 = vld [vmem:[%s24700_s1 + $0x68] sm:$0xff] }
0x14c1   : > { %v10480_v11 = vsel %vm10066_vm7, %v23684_v16, 0.0  ;;  %v23688_v60 = vpop.eup %21740  ;;  %v10449_v5 = vpop.xlane.xlu1 %10448 }
0x14c2   : > { %21748 = vpow2.f32 %v10472_v17  ;;  %10481 = vadd.xlane.f32.xlu0 %v10480_v11  ;;  %v10486_v25 = vsel %vm10066_vm7, %v23688_v60, 0.0  ;;  %v10461_v23 = vsub.f32 %v23677_v31, %v10449_v5  ;;  %v15476_v31 = vld [vmem:[%s24700_s1 + $0x18] sm:$0xff]  ;;  %v15473_v17 = vld [vmem:[%s24700_s1] sm:$0xff]  ;;  %v15487_v11 = vld [vmem:[%s24700_s1 + $0x70] sm:$0xff] }
0x14c3   : > { %v15371_v5 = vld [vmem:[%s24699_s26 + $0x50] sm:$0xff] }
0x14c4   : > { %v10474_v47 = vmul.f32 1.442695, %v10461_v23 }
0x14c5   : > { %v10455_v36 = vpop.xlane.xlu1 %10454 }
0x14c6   : > { %10487 = vadd.xlane.f32.xlu0 %v10486_v25  ;;  %v10463_v44 = vsub.f32 %v23674_v18, %v10455_v36  ;;  %v15364_v25 = vld [vmem:[%s24699_s26 + $0x18] sm:$0xff]  ;;  %v15373_v36 = vld [vmem:[%s24699_s26 + $0x60] sm:$0xff] }
0x14c7   : > { %v23692_v62 = vpop.eup %21742 }
0x14c8   : > { %v23694_v58 = vpop.eup %21744  ;;  %v10498_v27 = vsel %vm10066_vm7, %v23692_v62, 0.0  ;;  %v10478_v41 = vmul.f32 1.442695, %v10463_v44 }
0x14c9   : > { %v10489_v61 = vsel %vm10066_vm7, %v23694_v58, 0.0  ;;  %v23700_v0 = vpop.eup %21746 }
0x14ca   : > { %10499 = vadd.xlane.f32.xlu0 %v10498_v27  ;;  %10490 = vadd.xlane.f32.xlu1 %v10489_v61  ;;  %v10483_v29 = vsel %vm10066_vm7, %v23700_v0, 0.0  ;;  %21750 = vpow2.f32 %v10478_v41  ;;  %v15365_v27 = vld [vmem:[%s24699_s26 + $0x20] sm:$0xff]  ;;  %v15366_v61 = vld [vmem:[%s24699_s26 + $0x28] sm:$0xff] }
0x14cb   : > { %21752 = vpow2.f32 %v10474_v47 }
0x14cc   : > { %v23702_v7 = vpop.eup %21748 }
0x14cd   : > { %v10492_v48 = vsel %vm10066_vm7, %v23702_v7, 0.0 }
0x14ce   : > { %10493 = vadd.xlane.f32.xlu0 %v10492_v48  ;;  %10484 = vadd.xlane.f32.xlu1 %v10483_v29  ;;  %v15367_v48 = vld [vmem:[%s24699_s26 + $0x30] sm:$0xff]  ;;  %v15368_v29 = vld [vmem:[%s24699_s26 + $0x38] sm:$0xff] }
0x14d4   : > { %v23735_v18 = vpop.eup %21750 }
0x14d5   : > { %v10501_v30 = vsel %vm10066_vm7, %v23735_v18, 0.0  ;;  %v23740_v21 = vpop.eup %21752 }
0x14d6   : > { %v10495_v56 = vsel %vm10066_vm7, %v23740_v21, 0.0 }
0x14df   : > { %10217 = vperm.xlu1 %20569, %v10203_v10   ;;  %v15369_v10 = vld [vmem:[%s24699_s26 + $0x40] sm:$0xff] }
0x14e4   : > { %10212 = vperm.xlu0 %20568, %v10202_v24   ;;  %v15370_v24 = vld [vmem:[%s24699_s26 + $0x48] sm:$0xff] }
0x14e8   : > { %10227 = vperm.xlu0 %20568, %v10205_v3   ;;  %v15372_v3 = vld [vmem:[%s24699_s26 + $0x58] sm:$0xff] }
0x14ec   : > { %10237 = vperm.xlu0 %20568, %v10207_v19  }
0x14f0   : > { %10247 = vperm.xlu0 %20568, %v10209_v22   ;;  %v15374_v22 = vld [vmem:[%s24699_s26 + $0x68] sm:$0xff] }
0x14f4   : > { %15379 = vperm.xlu0 %20568, %v15361_v9   ;;  %v15375_v9 = vld [vmem:[%s24699_s26 + $0x70] sm:$0xff] }
0x14f8   : > { %15389 = vperm.xlu0 %20568, %v15363_v43   ;;  %v15376_v43 = vld [vmem:[%s24699_s26 + $0x78] sm:$0xff] }
0x14fc   : > { %15496 = vperm.xlu0 %20568, %v15474_v32  }
0x1500   : > { %15501 = vperm.xlu0 %20568, %v15475_v37  }
0x1503   : > { %10502 = vadd.xlane.f32.xlu1 %v10501_v30 }
0x1504   : > { %15506 = vperm.xlu0 %20568, %v15476_v31   ;;  %v15488_v31 = vld [vmem:[%s24700_s1 + $0x78] sm:$0xff] }
0x1507   : > { %10496 = vadd.xlane.f32.xlu1 %v10495_v56 }
0x1508   : > { %15511 = vperm.xlu0 %20568, %v15477_v20  }
0x150c   : > { %15516 = vperm.xlu0 %20568, %v15478_v2  }
0x1510   : > { %15521 = vperm.xlu0 %20568, %v15479_v39   ;;  %v21354_v39 = vld [vmem:[%s24701_s24] sm:$0xff]  }
0x1511   : > { %19459 = vmatprep.subr.bf16.mxu1 %v21354_v39 }
0x1512   : > { %19460 = vmatpush3.bf16.msra.mxu1 %v21354_v39 }
0x1514   : > { %15526 = vperm.xlu0 %20568, %v15480_v40   ;;  %v21355_v40 = vld [vmem:[%s24701_s24 + $0x8] sm:$0xff]  }
0x1515   : > { %19461 = vmatprep.subr.bf16.mxu1 %v21355_v40 }
0x1516   : > { %19462 = vmatpush3.bf16.msra.mxu1 %v21355_v40 }
0x1518   : > { %15531 = vperm.xlu0 %20568, %v15481_v42   ;;  %10222 = vperm.xlu1 %20569, %v10204_v12  }
0x151c   : > { %15536 = vperm.xlu0 %20568, %v15482_v52   ;;  %10232 = vperm.xlu1 %20569, %v10206_v55  }
0x1520   : > { %15541 = vperm.xlu0 %20568, %v15483_v46   ;;  %10242 = vperm.xlu1 %20569, %v10208_v53  }
0x1524   : > { %15546 = vperm.xlu0 %20568, %v15484_v34   ;;  %10624 = vperm.xlu1 %20569, %v17497_v1  }
0x1528   : > { %15551 = vperm.xlu0 %20568, %v15485_v51   ;;  %15384 = vperm.xlu1 %20569, %v15362_v28  }
0x152c   : > { %15556 = vperm.xlu0 %20568, %v15486_v38   ;;  %15491 = vperm.xlu1 %20569, %v15473_v17  }
0x1530   : > { %15561 = vperm.xlu0 %20568, %v15487_v11   ;;  %15394 = vperm.xlu1 %20569, %v15364_v25  }
0x1534   : > { %15399 = vperm.xlu1 %20569, %v15365_v27  }
0x1538   : > { %15404 = vperm.xlu1 %20569, %v15366_v61  }
0x153c   : > { %15409 = vperm.xlu1 %20569, %v15367_v48  }
0x1540   : > { %15414 = vperm.xlu1 %20569, %v15368_v29  }
0x1544   : > { %15419 = vperm.xlu1 %20569, %v15369_v10  }
0x1548   : > { %15424 = vperm.xlu1 %20569, %v15370_v24  }
0x154c   : > { %15429 = vperm.xlu1 %20569, %v15371_v5  }
0x154f   : > { %v10482_v19 = vpop.xlane.xlu0 %10481 }
0x1550   : > { %15434 = vperm.xlu1 %20569, %v15372_v3   ;;  %21754 = vrcp.f32 %v10482_v19 }
0x1553   : > { %v10488_v44 = vpop.xlane.xlu0 %10487 }
0x1554   : > { %15439 = vperm.xlu1 %20569, %v15373_v36  }
0x1557   : > { %v10491_v23 = vpop.xlane.xlu1 %10490  ;;  %v10500_v41 = vpop.xlane.xlu0 %10499 }
0x1558   : > { %15444 = vperm.xlu1 %20569, %v15374_v22   ;;  %21756 = vrcp.f32 %v10491_v23 }
0x1559   : > { %21758 = vrcp.f32 %v10488_v44 }
0x155a   : > { %v21755_v20 = vpop.eup %21754 }
0x155b   : > { %v10485_v47 = vpop.xlane.xlu1 %10484  ;;  %v10494_v32 = vpop.xlane.xlu0 %10493  ;;  %v10512_v46 = vmul.f32 %v21755_v20, %v23684_v16 }
0x155c   : > { %15449 = vperm.xlu1 %20569, %v15375_v9   ;;  %21760 = vrcp.f32 %v10485_v47 }
0x155d   : > { %21762 = vrcp.f32 %v10494_v32 }
0x155f   : > { %v10218_v37 = vpop.permute.xlu1 %10217 }
0x1560   : > { %15454 = vperm.xlu1 %20569, %v15376_v43   ;;  %v10320_v56 = vadd.f32 %v23715_v6, %v10218_v37 }
0x1562   : > { %v21757_v42 = vpop.eup %21756 }
0x1563   : > { %v10213_v30 = vpop.permute.xlu0 %10212  ;;  %v21759_v12 = vpop.eup %21758  ;;  %v10515_v34 = vmul.f32 %v21757_v42, %v23694_v58 }
0x1564   : > { %v10317_v2 = vadd.f32 %v23711_v13, %v10213_v30  ;;  %15566 = vperm.xlu1 %20569, %v15488_v31   ;;  %v10514_v13 = vmul.f32 %v21759_v12, %v23688_v60 }
0x1566   : > { %v10520_v52 = vpack.c.bf16 %v10320_v56, %v10317_v2  ;;  %v21761_v55 = vpop.eup %21760  ;;  %v10525_v51 = vpack.c.bf16 %v10515_v34, %v10514_v13  ;;  %v21359_v34 = vld [vmem:[%s24701_s24 + $0x28] sm:$0xff]  }
0x1567   : > { %v10513_v53 = vmul.f32 %v21761_v55, %v23700_v0  ;;  %v10228_v0 = vpop.permute.xlu0 %10227  ;;  %v21763_v27 = vpop.eup %21762 }
0x1568   : > { %19451 = vmatprep.mubr.msk.bf16.mxu0 %vm10066_vm7, %v10520_v52  ;;  %v10544_v28 = vsel %vm10066_vm7, %v10525_v51, 0  ;;  %v10328_v17 = vadd.f32 %v23713_v50, %v10228_v0  ;;  %v10516_v44 = vmul.f32 %v21763_v27, %v23702_v7  ;;  %v21370_v27 = vld [vmem:[%s24701_s24 + $0x80] sm:$0xff]  }
0x1569   : > { %v10524_v6 = vpack.c.bf16 %v10513_v53, %v10512_v46 }
0x156b   : > { %20524 = vmatprep.subr.msk.bf16.mxu0 %vm10066_vm7, %v10524_v6  ;;  %v10541_v1 = vsel %vm10066_vm7, %v10524_v6, 0  ;;  %v10238_v60 = vpop.permute.xlu0 %10237 }
0x156c   : > { %19444 = vmatpush3.bf16.xpose.msra.mxu0 %v10541_v1  ;;  %v10336_v29 = vadd.f32 %v23726_v8, %v10238_v60  ;;  %v21361_v60 = vld [vmem:[%s24701_s24 + $0x38] sm:$0xff]  }
0x156d   : > { %20525 = vmatprep.subr.msk.bf16.mxu0 %vm10066_vm7, %v10525_v51  ;;  %v21360_v51 = vld [vmem:[%s24701_s24 + $0x30] sm:$0xff]  }
0x156f   : > { %v10248_v5 = vpop.permute.xlu0 %10247 }
0x1574   : > { %19446 = vmatpush3.bf16.xpose.msra.mxu0 %v10544_v28 }
0x1590   : > { %v10503_v16 = vpop.xlane.xlu1 %10502 }
0x1591   : > { %21764 = vrcp.f32 %v10503_v16 }
0x1592   : > { %21766 = vrcp.f32 %v10500_v41 }
0x1594   : > { %v10497_v58 = vpop.xlane.xlu1 %10496 }
0x1595   : > { %21768 = vrcp.f32 %v10497_v58 }
0x1598   : > { %v10223_v38 = vpop.permute.xlu1 %10222 }
0x1599   : > { %v10325_v11 = vadd.f32 %v23709_v63, %v10223_v38  ;;  %v10344_v63 = vadd.f32 %v23724_v54, %v10248_v5  ;;  %v21358_v54 = vld [vmem:[%s24701_s24 + $0x20] sm:$0xff]   ;;  %v21376_v5 = vld [vmem:[%s24701_s24 + $0xb0] sm:$0xff]  }
0x159a   : > { %v21366_v38 = vld [vmem:[%s24701_s24 + $0x60] sm:$0xff]  }
0x159b   : > { %v10521_v25 = vpack.c.bf16 %v10328_v17, %v10325_v11  ;;  %v21765_v48 = vpop.eup %21764  ;;  %v21367_v17 = vld [vmem:[%s24701_s24 + $0x68] sm:$0xff]   ;;  %v21368_v11 = vld [vmem:[%s24701_s24 + $0x70] sm:$0xff]  }
0x159c   : > { %v10233_v61 = vpop.permute.xlu1 %10232  ;;  %v21767_v24 = vpop.eup %21766  ;;  %v10519_v50 = vmul.f32 %v21765_v48, %v23735_v18  ;;  %v21372_v48 = vld [vmem:[%s24701_s24 + $0x90] sm:$0xff]  }
0x159d   : > { %v10333_v10 = vadd.f32 %v23722_v35, %v10233_v61  ;;  %v10518_v35 = vmul.f32 %v21767_v24, %v23692_v62  ;;  %v21356_v62 = vld [vmem:[%s24701_s24 + $0x10] sm:$0xff]   ;;  %v21371_v61 = vld [vmem:[%s24701_s24 + $0x88] sm:$0xff]  }
0x159e   : > { %19463 = vmatprep.subr.bf16.mxu1 %v21356_v62  ;;  %v21375_v24 = vld [vmem:[%s24701_s24 + $0xa8] sm:$0xff]  }
0x159f   : > { %v21769_v3 = vpop.eup %21768  ;;  %v10522_v19 = vpack.c.bf16 %v10336_v29, %v10333_v10  ;;  %v10527_v7 = vpack.c.bf16 %v10519_v50, %v10518_v35  ;;  %19464 = vmatpush3.bf16.msra.mxu1 %v21356_v62  ;;  %v21373_v29 = vld [vmem:[%s24701_s24 + $0x98] sm:$0xff]   ;;  %v21374_v10 = vld [vmem:[%s24701_s24 + $0xa0] sm:$0xff]  }
0x15a0   : > { %v10243_v36 = vpop.permute.xlu1 %10242  ;;  %v10517_v22 = vmul.f32 %v21769_v3, %v23740_v21  ;;  %v21377_v3 = vld [vmem:[%s24701_s24 + $0xb8] sm:$0xff]   ;;  %v21382_v50 = vld [vmem:[%s24701_s24 + $0xe0] sm:$0xff]  }
0x15a1   : > { %v10341_v23 = vadd.f32 %v23719_v45, %v10243_v36  ;;  %v10550_v18 = vsel %vm10066_vm7, %v10527_v7, 0  ;;  %v21357_v45 = vld [vmem:[%s24701_s24 + $0x18] sm:$0xff]   ;;  %v21379_v36 = vld [vmem:[%s24701_s24 + $0xc8] sm:$0xff]   ;;  %v21386_v35 = vld [vmem:[%s24701_s24 + $0x100] sm:$0xff]  }
0x15a2   : > { %v10526_v41 = vpack.c.bf16 %v10517_v22, %v10516_v44  ;;  %19465 = vmatprep.subr.bf16.mxu1 %v21357_v45  ;;  %v21380_v44 = vld [vmem:[%s24701_s24 + $0xd0] sm:$0xff]   ;;  %v21381_v22 = vld [vmem:[%s24701_s24 + $0xd8] sm:$0xff]   ;;  %v21390_v62 = vld [vmem:[%s24701_s24 + $0x120] sm:$0xff]  }
0x15a3   : > { %v10523_v8 = vpack.c.bf16 %v10344_v63, %v10341_v23  ;;  %19466 = vmatpush3.bf16.msra.mxu1 %v21357_v45  ;;  %v21383_v63 = vld [vmem:[%s24701_s24 + $0xe8] sm:$0xff]   ;;  %v21384_v23 = vld [vmem:[%s24701_s24 + $0xf0] sm:$0xff]  }
0x15a4   : > { %20526 = vmatprep.subr.msk.bf16.mxu0 %vm10066_vm7, %v10526_v41  ;;  %v10547_v9 = vsel %vm10066_vm7, %v10526_v41, 0  ;;  %19475 = vmatprep.subr.bf16.mxu1 %v21358_v54  ;;  %v10625_v21 = vpop.permute.xlu1 %10624  ;;  %v21385_v41 = vld [vmem:[%s24701_s24 + $0xf8] sm:$0xff]   ;;  %v21391_v45 = vld [vmem:[%s24701_s24 + $0x128] sm:$0xff]  }
0x15a5   : > { %19448 = vmatpush3.bf16.xpose.msra.mxu0 %v10547_v9  ;;  %v21388_v9 = vld [vmem:[%s24701_s24 + $0x110] sm:$0xff]  }
0x15a6   : > { %20527 = vmatprep.subr.msk.bf16.mxu0 %vm10066_vm7, %v10527_v7  ;;  %v21389_v7 = vld [vmem:[%s24701_s24 + $0x118] sm:$0xff]  }
0x15ad   : > { %19450 = vmatpush3.bf16.xpose.msra.mxu0 %v10550_v18  ;;  %v21418_v18 = vld [vmem:[%s24702_s2 + $0x40] sm:$0xff]  }
0x15b4   : > { %19452 = vmatmul.mubr.msk.bf16.vlgmr.msra.gmra.mrb[140].mxu0 %vm10066_vm7, %v10521_v25  ;;  %v21369_v25 = vld [vmem:[%s24701_s24 + $0x78] sm:$0xff]  }
0x15b5   : > { %19455 = vmatprep.mubr.msk.bf16.mxu0 %vm10066_vm7, %v10522_v19  ;;  %v21378_v19 = vld [vmem:[%s24701_s24 + $0xc0] sm:$0xff]  }
0x15bc   : > { %19456 = vmatmul.mubr.msk.bf16.gmra.mrb[144].mxu0 %vm10066_vm7, %v10523_v8  ;;  %v21387_v8 = vld [vmem:[%s24701_s24 + $0x108] sm:$0xff]  }
0x15bd   : > { %19499 = vmatprep.mubr.msk.bf16.mxu0 %vm10066_vm7, %v21418_v18 }
0x1687   : > { %v19453_v47 = vpop.f32.mrb[140].mxu0 }
0x1688   : > { %v10629_v43 = vmul.f32 %v19453_v47, %v10625_v21  ;;  %v10586_v32 = vpop.f32.mrb[141].mxu0  ;;  %v21394_v47 = vld [vmem:[%s24701_s24 + $0x140] sm:$0xff]  }
0x1689   : > { %v10627_v37 = vmul.f32 %v10625_v21, %v10586_v32  ;;  %v19454_v31 = vpop.f32.mrb[142].mxu0  ;;  %v21396_v32 = vld [vmem:[%s24701_s24 + $0x150] sm:$0xff]  }
0x168a   : > { %v10630_v30 = vmul.f32 %v19454_v31, %v10625_v21  ;;  %v10589_v20 = vpop.f32.mrb[143].mxu0  ;;  %v10637_v2 = vadd.f32 %v10629_v43, %v23629_v14  ;;  %v21395_v43 = vld [vmem:[%s24701_s24 + $0x148] sm:$0xff]   ;;  %v21398_v31 = vld [vmem:[%s24701_s24 + $0x160] sm:$0xff]  }
0x168b   : > { %v10628_v56 = vmul.f32 %v10625_v21, %v10589_v20  ;;  %v10635_v40 = vadd.f32 %v10627_v37, %v23621_v26  ;;  %v21397_v37 = vld [vmem:[%s24701_s24 + $0x158] sm:$0xff]   ;;  %v21400_v20 = vld [vmem:[%s24701_s24 + $0x170] sm:$0xff]  }
0x168c   : > { %v10638_v39 = vadd.f32 %v10630_v30, %v23627_v49  ;;  %v21399_v30 = vld [vmem:[%s24701_s24 + $0x168] sm:$0xff]  }
0x168d   : > { %v10636_v42 = vadd.f32 %v10628_v56, %v23623_v57  ;;  %v21401_v56 = vld [vmem:[%s24701_s24 + $0x178] sm:$0xff]  }
0x168e   : > { %v23811_v12 = vpack.c.bf16 %v10638_v39, %v10637_v2  ;;  %v21402_v2 = vld [vmem:[%s24701_s24 + $0x180] sm:$0xff]   ;;  %v21403_v39 = vld [vmem:[%s24701_s24 + $0x188] sm:$0xff]  }
0x168f   : > { %v23813_v52 = vpack.c.bf16 %v10636_v42, %v10635_v40  ;;  %v19457_v55 = vpop.f32.mrb[144].mxu0  ;;  %v21404_v40 = vld [vmem:[%s24701_s24 + $0x190] sm:$0xff]   ;;  %v21405_v42 = vld [vmem:[%s24701_s24 + $0x198] sm:$0xff]  }
0x1690   : > { %v10633_v46 = vmul.f32 %v19457_v55, %v10625_v21  ;;  %v10602_v53 = vpop.f32.mrb[145].mxu0  ;;  %v21406_v55 = vld [vmem:[%s24701_s24 + $0x1a0] sm:$0xff]  }
0x1691   : > { %v10631_v6 = vmul.f32 %v10625_v21, %v10602_v53  ;;  %v19458_v13 = vpop.f32.mrb[146].mxu0  ;;  %19467 = vmatprep.mubr.msk.bf16.mxu1 %vm10066_vm7, %v23813_v52  ;;  %v21408_v53 = vld [vmem:[%s24701_s24 + $0x1b0] sm:$0xff]  }
0x1692   : > { %v10634_v49 = vmul.f32 %v19458_v13, %v10625_v21  ;;  %v10605_v14 = vpop.f32.mrb[147].mxu0  ;;  %19468 = vmatmul.mubr.msk.bf16.vlgmr.msra.gmra.mrb[184].mxu1 %vm10066_vm7, %v23811_v12  ;;  %v10641_v57 = vadd.f32 %v10633_v46, %v23641_v59  ;;  %v21365_v59 = vld [vmem:[%s24701_s24 + $0x58] sm:$0xff]   ;;  %v21407_v46 = vld [vmem:[%s24701_s24 + $0x1a8] sm:$0xff]  }
0x1693   : > { %v10632_v26 = vmul.f32 %v10625_v21, %v10605_v14  ;;  %19476 = vmatpush3.bf16.msra.mxu1 %v21358_v54  ;;  %v10639_v28 = vadd.f32 %v10631_v6, %v23633_v4  ;;  %v21362_v4 = vld [vmem:[%s24701_s24 + $0x40] sm:$0xff]   ;;  %v21392_v54 = vld [vmem:[%s24701_s24 + $0x130] sm:$0xff]   ;;  %v21393_v21 = vld [vmem:[%s24701_s24 + $0x138] sm:$0xff]  }
0x1694   : > { %v10642_v1 = vadd.f32 %v10634_v49, %v23639_v33  ;;  %19477 = vmatprep.subr.bf16.mxu1 %v21359_v34  ;;  %v21364_v33 = vld [vmem:[%s24701_s24 + $0x50] sm:$0xff]   ;;  %v21410_v6 = vld [vmem:[%s24701_s24 + $0x1c0] sm:$0xff]   ;;  %v21411_v13 = vld [vmem:[%s24701_s24 + $0x1c8] sm:$0xff]  }
0x1695   : > { %v10640_v16 = vadd.f32 %v10632_v26, %v23635_v15  ;;  %v21363_v15 = vld [vmem:[%s24701_s24 + $0x48] sm:$0xff]   ;;  %v21412_v49 = vld [vmem:[%s24701_s24 + $0x1d0] sm:$0xff]  }
0x1696   : > { %v23825_v0 = vpack.c.bf16 %v10642_v1, %v10641_v57 }
0x1697   : > { %v23827_v58 = vpack.c.bf16 %v10640_v16, %v10639_v28  ;;  %19478 = vmatpush3.bf16.msra.mxu1 %v21359_v34  ;;  %v21409_v34 = vld [vmem:[%s24701_s24 + $0x1b8] sm:$0xff]  }
0x1698   : > { %19479 = vmatprep.subr.bf16.mxu1 %v21360_v51  ;;  %v21413_v28 = vld [vmem:[%s24701_s24 + $0x1d8] sm:$0xff]  }
0x1699   : > { %19471 = vmatprep.mubr.msk.bf16.mxu1 %vm10066_vm7, %v23827_v58 }
0x169a   : > { %19472 = vmatmul.mubr.msk.bf16.gmra.mrb[188].mxu1 %vm10066_vm7, %v23825_v0 }
0x169b   : > { %19480 = vmatpush3.bf16.msra.mxu1 %v21360_v51  ;;  %19483 = vmatprep.mubr.msk.bf16.mxu1 %vm10066_vm7, %v23813_v52 }
0x169c   : > { %19481 = vmatprep.subr.bf16.mxu1 %v21361_v60 }
0x169f   : > { %19482 = vmatpush3.bf16.msra.mxu1 %v21361_v60  ;;  %v21414_v60 = vld [vmem:[%s24701_s24 + $0x1e0] sm:$0xff]  }
0x16a0   : > { %19539 = vmatprep.subr.bf16.mxu1 %v21362_v4 }
0x16a2   : > { %19484 = vmatmul.mubr.msk.bf16.vlgmr.msra.gmra.mrb[192].mxu1 %vm10066_vm7, %v23811_v12 }
0x16a3   : > { %19487 = vmatprep.mubr.msk.bf16.mxu1 %vm10066_vm7, %v23827_v58  ;;  %19540 = vmatpush3.bf16.msra.mxu1 %v21362_v4 }
0x16a4   : > { %19541 = vmatprep.subr.bf16.mxu1 %v21363_v15 }
0x16a7   : > { %19542 = vmatpush3.bf16.msra.mxu1 %v21363_v15 }
0x16a8   : > { %19543 = vmatprep.subr.bf16.mxu1 %v21364_v33 }
0x16aa   : > { %19488 = vmatmul.mubr.msk.bf16.gmra.mrb[196].mxu1 %vm10066_vm7, %v23825_v0 }
0x16ab   : > { %19544 = vmatpush3.bf16.msra.mxu1 %v21364_v33  ;;  %19547 = vmatprep.mubr.msk.bf16.mxu1 %vm10066_vm7, %v23813_v52 }
0x16ac   : > { %19545 = vmatprep.subr.bf16.mxu1 %v21365_v59 }
0x16af   : > { %19546 = vmatpush3.bf16.msra.mxu1 %v21365_v59 }
0x16b0   : > { %19579 = vmatprep.subr.bf16.mxu1 %v21366_v38 }
0x16b2   : > { %19548 = vmatmul.mubr.msk.bf16.vlgmr.msra.gmra.mrb[200].mxu1 %vm10066_vm7, %v23811_v12 }
0x16b3   : > { %19551 = vmatprep.mubr.msk.bf16.mxu1 %vm10066_vm7, %v23827_v58  ;;  %19580 = vmatpush3.bf16.msra.mxu1 %v21366_v38 }
0x16b4   : > { %19581 = vmatprep.subr.bf16.mxu1 %v21367_v17 }
0x16b7   : > { %19582 = vmatpush3.bf16.msra.mxu1 %v21367_v17  ;;  %v21415_v17 = vld [vmem:[%s24701_s24 + $0x1e8] sm:$0xff]  }
0x16b8   : > { %19583 = vmatprep.subr.bf16.mxu1 %v21368_v11 }
0x16ba   : > { %19552 = vmatmul.mubr.msk.bf16.gmra.mrb[204].mxu1 %vm10066_vm7, %v23825_v0 }
0x16bb   : > { %19584 = vmatpush3.bf16.msra.mxu1 %v21368_v11  ;;  %19587 = vmatprep.mubr.msk.bf16.mxu1 %vm10066_vm7, %v23813_v52 }
0x16bc   : > { %19585 = vmatprep.subr.bf16.mxu1 %v21369_v25 }
0x16bf   : > { %19586 = vmatpush3.bf16.msra.mxu1 %v21369_v25  ;;  %v21416_v25 = vld [vmem:[%s24701_s24 + $0x1f0] sm:$0xff]  }
0x16c0   : > { %19619 = vmatprep.subr.bf16.mxu1 %v21370_v27 }
0x16c2   : > { %19588 = vmatmul.mubr.msk.bf16.vlgmr.msra.gmra.mrb[208].mxu1 %vm10066_vm7, %v23811_v12 }
0x16c3   : > { %19591 = vmatprep.mubr.msk.bf16.mxu1 %vm10066_vm7, %v23827_v58  ;;  %19620 = vmatpush3.bf16.msra.mxu1 %v21370_v27 }
0x16c4   : > { %19621 = vmatprep.subr.bf16.mxu1 %v21371_v61 }
0x16c7   : > { %19622 = vmatpush3.bf16.msra.mxu1 %v21371_v61 }
0x16c8   : > { %19623 = vmatprep.subr.bf16.mxu1 %v21372_v48 }
0x16ca   : > { %19592 = vmatmul.mubr.msk.bf16.gmra.mrb[212].mxu1 %vm10066_vm7, %v23825_v0 }
0x16cb   : > { %19624 = vmatpush3.bf16.msra.mxu1 %v21372_v48  ;;  %19627 = vmatprep.mubr.msk.bf16.mxu1 %vm10066_vm7, %v23813_v52 }
0x16cc   : > { %19625 = vmatprep.subr.bf16.mxu1 %v21373_v29 }
0x16cf   : > { %19626 = vmatpush3.bf16.msra.mxu1 %v21373_v29 }
0x16d0   : > { %19659 = vmatprep.subr.bf16.mxu1 %v21374_v10 }
0x16d2   : > { %19628 = vmatmul.mubr.msk.bf16.vlgmr.msra.gmra.mrb[216].mxu1 %vm10066_vm7, %v23811_v12 }
0x16d3   : > { %19631 = vmatprep.mubr.msk.bf16.mxu1 %vm10066_vm7, %v23827_v58  ;;  %19660 = vmatpush3.bf16.msra.mxu1 %v21374_v10 }
0x16d4   : > { %19661 = vmatprep.subr.bf16.mxu1 %v21375_v24 }
0x16d7   : > { %19662 = vmatpush3.bf16.msra.mxu1 %v21375_v24 }
0x16d8   : > { %19663 = vmatprep.subr.bf16.mxu1 %v21376_v5 }
0x16da   : > { %19632 = vmatmul.mubr.msk.bf16.gmra.mrb[220].mxu1 %vm10066_vm7, %v23825_v0 }
0x16db   : > { %19664 = vmatpush3.bf16.msra.mxu1 %v21376_v5  ;;  %19667 = vmatprep.mubr.msk.bf16.mxu1 %vm10066_vm7, %v23813_v52  ;;  %v21417_v5 = vld [vmem:[%s24701_s24 + $0x1f8] sm:$0xff]  }
0x16dc   : > { %19665 = vmatprep.subr.bf16.mxu1 %v21377_v3 }
0x16df   : > { %19666 = vmatpush3.bf16.msra.mxu1 %v21377_v3 }
0x16e0   : > { %19699 = vmatprep.subr.bf16.mxu1 %v21378_v19 }
0x16e2   : > { %19668 = vmatmul.mubr.msk.bf16.vlgmr.msra.gmra.mrb[224].mxu1 %vm10066_vm7, %v23811_v12 }
0x16e3   : > { %19671 = vmatprep.mubr.msk.bf16.mxu1 %vm10066_vm7, %v23827_v58  ;;  %19700 = vmatpush3.bf16.msra.mxu1 %v21378_v19 }
0x16e4   : > { %19701 = vmatprep.subr.bf16.mxu1 %v21379_v36 }
0x16e7   : > { %19702 = vmatpush3.bf16.msra.mxu1 %v21379_v36 }
0x16e8   : > { %19703 = vmatprep.subr.bf16.mxu1 %v21380_v44 }
0x16ea   : > { %19672 = vmatmul.mubr.msk.bf16.gmra.mrb[228].mxu1 %vm10066_vm7, %v23825_v0 }
0x16eb   : > { %19704 = vmatpush3.bf16.msra.mxu1 %v21380_v44  ;;  %19707 = vmatprep.mubr.msk.bf16.mxu1 %vm10066_vm7, %v23813_v52 }
0x16ec   : > { %19705 = vmatprep.subr.bf16.mxu1 %v21381_v22 }
0x16ef   : > { %19706 = vmatpush3.bf16.msra.mxu1 %v21381_v22 }
0x16f0   : > { %19739 = vmatprep.subr.bf16.mxu1 %v21382_v50 }
0x16f2   : > { %19708 = vmatmul.mubr.msk.bf16.vlgmr.msra.gmra.mrb[232].mxu1 %vm10066_vm7, %v23811_v12 }
0x16f3   : > { %19711 = vmatprep.mubr.msk.bf16.mxu1 %vm10066_vm7, %v23827_v58  ;;  %19740 = vmatpush3.bf16.msra.mxu1 %v21382_v50 }
0x16f4   : > { %19741 = vmatprep.subr.bf16.mxu1 %v21383_v63 }
0x16f7   : > { %19742 = vmatpush3.bf16.msra.mxu1 %v21383_v63 }
0x16f8   : > { %19743 = vmatprep.subr.bf16.mxu1 %v21384_v23 }
0x16fa   : > { %19712 = vmatmul.mubr.msk.bf16.gmra.mrb[236].mxu1 %vm10066_vm7, %v23825_v0 }
0x16fb   : > { %19744 = vmatpush3.bf16.msra.mxu1 %v21384_v23  ;;  %19747 = vmatprep.mubr.msk.bf16.mxu1 %vm10066_vm7, %v23813_v52 }
0x16fc   : > { %19745 = vmatprep.subr.bf16.mxu1 %v21385_v41 }
0x16ff   : > { %19746 = vmatpush3.bf16.msra.mxu1 %v21385_v41  ;;  %v21419_v41 = vld [vmem:[%s24702_s2 + $0x48] sm:$0xff]  }
0x1700   : > { %19779 = vmatprep.subr.bf16.mxu1 %v21386_v35 }
0x1702   : > { %19748 = vmatmul.mubr.msk.bf16.vlgmr.msra.gmra.mrb[240].mxu1 %vm10066_vm7, %v23811_v12 }
0x1703   : > { %19751 = vmatprep.mubr.msk.bf16.mxu1 %vm10066_vm7, %v23827_v58  ;;  %19780 = vmatpush3.bf16.msra.mxu1 %v21386_v35 }
0x1704   : > { %19781 = vmatprep.subr.bf16.mxu1 %v21387_v8 }
0x1707   : > { %19782 = vmatpush3.bf16.msra.mxu1 %v21387_v8 }
0x1708   : > { %19783 = vmatprep.subr.bf16.mxu1 %v21388_v9 }
0x170a   : > { %19752 = vmatmul.mubr.msk.bf16.gmra.mrb[244].mxu1 %vm10066_vm7, %v23825_v0 }
0x170b   : > { %19784 = vmatpush3.bf16.msra.mxu1 %v21388_v9  ;;  %19787 = vmatprep.mubr.msk.bf16.mxu1 %vm10066_vm7, %v23813_v52  ;;  %v21420_v9 = vld [vmem:[%s24702_s2 + $0x50] sm:$0xff]  }
0x170c   : > { %19785 = vmatprep.subr.bf16.mxu1 %v21389_v7 }
0x170f   : > { %19786 = vmatpush3.bf16.msra.mxu1 %v21389_v7 }
0x1710   : > { %19819 = vmatprep.subr.bf16.mxu1 %v21390_v62 }
0x1712   : > { %19788 = vmatmul.mubr.msk.bf16.vlgmr.msra.gmra.mrb[248].mxu1 %vm10066_vm7, %v23811_v12 }
0x1713   : > { %19791 = vmatprep.mubr.msk.bf16.mxu1 %vm10066_vm7, %v23827_v58  ;;  %19820 = vmatpush3.bf16.msra.mxu1 %v21390_v62  ;;  %v21421_v62 = vld [vmem:[%s24702_s2 + $0x58] sm:$0xff]  }
0x1714   : > { %19821 = vmatprep.subr.bf16.mxu1 %v21391_v45 }
0x1717   : > { %19822 = vmatpush3.bf16.msra.mxu1 %v21391_v45 }
0x1718   : > { %19823 = vmatprep.subr.bf16.mxu1 %v21392_v54 }
0x171a   : > { %19792 = vmatmul.mubr.msk.bf16.gmra.mrb[252].mxu1 %vm10066_vm7, %v23825_v0 }
0x171b   : > { %19824 = vmatpush3.bf16.msra.mxu1 %v21392_v54  ;;  %19827 = vmatprep.mubr.msk.bf16.mxu1 %vm10066_vm7, %v23813_v52 }
0x171c   : > { %19825 = vmatprep.subr.bf16.mxu1 %v21393_v21 }
0x171f   : > { %19826 = vmatpush3.bf16.msra.mxu1 %v21393_v21  ;;  %v21422_v21 = vld [vmem:[%s24702_s2 + $0x60] sm:$0xff]  }
0x1720   : > { %19859 = vmatprep.subr.bf16.mxu1 %v21394_v47 }
0x1722   : > { %19828 = vmatmul.mubr.msk.bf16.vlgmr.msra.gmra.mrb[0].mxu1 %vm10066_vm7, %v23811_v12 }
0x1723   : > { %19831 = vmatprep.mubr.msk.bf16.mxu1 %vm10066_vm7, %v23827_v58  ;;  %19860 = vmatpush3.bf16.msra.mxu1 %v21394_v47 }
0x1724   : > { %19861 = vmatprep.subr.bf16.mxu1 %v21395_v43 }
0x1727   : > { %19862 = vmatpush3.bf16.msra.mxu1 %v21395_v43 }
0x1728   : > { %19863 = vmatprep.subr.bf16.mxu1 %v21396_v32 }
0x172a   : > { %19832 = vmatmul.mubr.msk.bf16.gmra.mrb[4].mxu1 %vm10066_vm7, %v23825_v0 }
0x172b   : > { %19864 = vmatpush3.bf16.msra.mxu1 %v21396_v32  ;;  %19867 = vmatprep.mubr.msk.bf16.mxu1 %vm10066_vm7, %v23813_v52 }
0x172c   : > { %19865 = vmatprep.subr.bf16.mxu1 %v21397_v37 }
0x172f   : > { %19866 = vmatpush3.bf16.msra.mxu1 %v21397_v37  ;;  %v21423_v37 = vld [vmem:[%s24702_s2 + $0x68] sm:$0xff]  }
0x1730   : > { %19899 = vmatprep.subr.bf16.mxu1 %v21398_v31 }
0x1732   : > { %19868 = vmatmul.mubr.msk.bf16.vlgmr.msra.gmra.mrb[8].mxu1 %vm10066_vm7, %v23811_v12 }
0x1733   : > { %19871 = vmatprep.mubr.msk.bf16.mxu1 %vm10066_vm7, %v23827_v58  ;;  %19900 = vmatpush3.bf16.msra.mxu1 %v21398_v31 }
0x1734   : > { %19901 = vmatprep.subr.bf16.mxu1 %v21399_v30 }
0x1737   : > { %19902 = vmatpush3.bf16.msra.mxu1 %v21399_v30 }
0x1738   : > { %19903 = vmatprep.subr.bf16.mxu1 %v21400_v20 }
0x173a   : > { %19872 = vmatmul.mubr.msk.bf16.gmra.mrb[12].mxu1 %vm10066_vm7, %v23825_v0 }
0x173b   : > { %19904 = vmatpush3.bf16.msra.mxu1 %v21400_v20  ;;  %19907 = vmatprep.mubr.msk.bf16.mxu1 %vm10066_vm7, %v23813_v52  ;;  %v21424_v20 = vld [vmem:[%s24702_s2 + $0x70] sm:$0xff]  }
0x173c   : > { %19905 = vmatprep.subr.bf16.mxu1 %v21401_v56 }
0x173f   : > { %19906 = vmatpush3.bf16.msra.mxu1 %v21401_v56 }
0x1740   : > { %19939 = vmatprep.subr.bf16.mxu1 %v21402_v2 }
0x1742   : > { %19908 = vmatmul.mubr.msk.bf16.vlgmr.msra.gmra.mrb[16].mxu1 %vm10066_vm7, %v23811_v12 }
0x1743   : > { %19911 = vmatprep.mubr.msk.bf16.mxu1 %vm10066_vm7, %v23827_v58  ;;  %19940 = vmatpush3.bf16.msra.mxu1 %v21402_v2 }
0x1744   : > { %19941 = vmatprep.subr.bf16.mxu1 %v21403_v39 }
0x1747   : > { %19942 = vmatpush3.bf16.msra.mxu1 %v21403_v39 }
0x1748   : > { %19943 = vmatprep.subr.bf16.mxu1 %v21404_v40 }
0x174a   : > { %19912 = vmatmul.mubr.msk.bf16.gmra.mrb[20].mxu1 %vm10066_vm7, %v23825_v0 }
0x174b   : > { %19944 = vmatpush3.bf16.msra.mxu1 %v21404_v40  ;;  %19947 = vmatprep.mubr.msk.bf16.mxu1 %vm10066_vm7, %v23813_v52 }
0x174c   : > { %19945 = vmatprep.subr.bf16.mxu1 %v21405_v42 }
0x174f   : > { %19946 = vmatpush3.bf16.msra.mxu1 %v21405_v42  ;;  %v21425_v42 = vld [vmem:[%s24702_s2 + $0x78] sm:$0xff]  }
0x1750   : > { %19979 = vmatprep.subr.bf16.mxu1 %v21406_v55 }
0x1752   : > { %19948 = vmatmul.mubr.msk.bf16.vlgmr.msra.gmra.mrb[24].mxu1 %vm10066_vm7, %v23811_v12 }
0x1753   : > { %19951 = vmatprep.mubr.msk.bf16.mxu1 %vm10066_vm7, %v23827_v58  ;;  %19980 = vmatpush3.bf16.msra.mxu1 %v21406_v55 }
0x1754   : > { %19981 = vmatprep.subr.bf16.mxu1 %v21407_v46 }
0x1757   : > { %19982 = vmatpush3.bf16.msra.mxu1 %v21407_v46 }
0x1758   : > { %19983 = vmatprep.subr.bf16.mxu1 %v21408_v53 }
0x175a   : > { %19952 = vmatmul.mubr.msk.bf16.gmra.mrb[28].mxu1 %vm10066_vm7, %v23825_v0 }
0x175b   : > { %19984 = vmatpush3.bf16.msra.mxu1 %v21408_v53  ;;  %19987 = vmatprep.mubr.msk.bf16.mxu1 %vm10066_vm7, %v23813_v52  ;;  %v21426_v53 = vld [vmem:[%s24702_s2] sm:$0xff]  }
0x175c   : > { %19985 = vmatprep.subr.bf16.mxu1 %v21409_v34 }
0x175f   : > { %19986 = vmatpush3.bf16.msra.mxu1 %v21409_v34 }
0x1760   : > { %20019 = vmatprep.subr.bf16.mxu1 %v21410_v6 }
0x1762   : > { %19988 = vmatmul.mubr.msk.bf16.vlgmr.msra.gmra.mrb[32].mxu1 %vm10066_vm7, %v23811_v12 }
0x1763   : > { %19991 = vmatprep.mubr.msk.bf16.mxu1 %vm10066_vm7, %v23827_v58  ;;  %20020 = vmatpush3.bf16.msra.mxu1 %v21410_v6 }
0x1764   : > { %20021 = vmatprep.subr.bf16.mxu1 %v21411_v13 }
0x1765   : > { %v19469_v14 = vpop.f32.mrb[184].mxu1 }
0x1766   : > { %v10725_v26 = vpop.f32.mrb[185].mxu1 }
0x1767   : > { %v19470_v57 = vpop.f32.mrb[186].mxu1  ;;  %20022 = vmatpush3.bf16.msra.mxu1 %v21411_v13 }
0x1768   : > { %v23989_v1 = vpack.c.bf16 %v19470_v57, %v19469_v14  ;;  %v10728_v51 = vpop.f32.mrb[187].mxu1  ;;  %20023 = vmatprep.subr.bf16.mxu1 %v21412_v49  ;;  %v21427_v14 = vld [vmem:[%s24702_s2 + $0x8] sm:$0xff]  }
0x1769   : > { %v10772_v16 = vpack.c.bf16 %v10728_v51, %v10725_v26 }
0x176a   : > { %19992 = vmatmul.mubr.msk.bf16.gmra.mrb[36].mxu1 %vm10066_vm7, %v23825_v0 }
0x176b   : > { %20024 = vmatpush3.bf16.msra.mxu1 %v21412_v49  ;;  %20027 = vmatprep.mubr.msk.bf16.mxu1 %vm10066_vm7, %v23813_v52 }
0x176c   : > { %20025 = vmatprep.subr.bf16.mxu1 %v21413_v28 }
0x176d   : > { %v19473_v4 = vpop.f32.mrb[188].mxu1 }
0x176e   : > { %v10741_v15 = vpop.f32.mrb[189].mxu1 }
0x176f   : > { %v19474_v33 = vpop.f32.mrb[190].mxu1  ;;  %20026 = vmatpush3.bf16.msra.mxu1 %v21413_v28 }
0x1770   : > { %v23997_v59 = vpack.c.bf16 %v19474_v33, %v19473_v4  ;;  %v10744_v38 = vpop.f32.mrb[191].mxu1  ;;  %20059 = vmatprep.subr.bf16.mxu1 %v21414_v60  ;;  %v21429_v4 = vld [vmem:[%s24702_s2 + $0x18] sm:$0xff]  }
0x1771   : > { %v10774_v11 = vpack.c.bf16 %v10744_v38, %v10741_v15 }
0x1772   : > { %20028 = vmatmul.mubr.msk.bf16.vlgmr.msra.gmra.mrb[40].mxu1 %vm10066_vm7, %v23811_v12 }
0x1773   : > { %20031 = vmatprep.mubr.msk.bf16.mxu1 %vm10066_vm7, %v23827_v58  ;;  %20060 = vmatpush3.bf16.msra.mxu1 %v21414_v60 }
0x1774   : > { %20061 = vmatprep.subr.bf16.mxu1 %v21415_v17 }
0x1775   : > { %v19485_v27 = vpop.f32.mrb[192].mxu1 }
0x1776   : > { %v10843_v61 = vpop.f32.mrb[193].mxu1 }
0x1777   : > { %v19486_v48 = vpop.f32.mrb[194].mxu1  ;;  %20062 = vmatpush3.bf16.msra.mxu1 %v21415_v17 }
0x1778   : > { %v10892_v29 = vpack.c.bf16 %v19486_v48, %v19485_v27  ;;  %v10846_v10 = vpop.f32.mrb[195].mxu1  ;;  %20063 = vmatprep.subr.bf16.mxu1 %v21416_v25  ;;  %v21431_v27 = vld [vmem:[%s24702_s2 + $0x28] sm:$0xff]  }
0x1779   : > { %v10891_v24 = vpack.c.bf16 %v10846_v10, %v10843_v61 }
0x177a   : > { %20032 = vmatmul.mubr.msk.bf16.gmra.mrb[44].mxu1 %vm10066_vm7, %v23825_v0 }
0x177b   : > { %19491 = vmatprep.subr.bf16.mxu0 %v10891_v24  ;;  %20064 = vmatpush3.bf16.msra.mxu1 %v21416_v25 }
0x177c   : > { %20067 = vmatprep.mubr.msk.bf16.mxu1 %vm10066_vm7, %v23813_v52  ;;  %19492 = vmatpush3.bf16.msra.mxu0 %v10891_v24 }
0x177d   : > { %v19489_v3 = vpop.f32.mrb[196].mxu1  ;;  %19493 = vmatprep.subr.bf16.mxu0 %v10892_v29  ;;  %20065 = vmatprep.subr.bf16.mxu1 %v21417_v5 }
0x177e   : > { %v10859_v19 = vpop.f32.mrb[197].mxu1 }
0x177f   : > { %v19490_v36 = vpop.f32.mrb[198].mxu1  ;;  %20066 = vmatpush3.bf16.msra.mxu1 %v21417_v5 }
0x1780   : > { %v10894_v44 = vpack.c.bf16 %v19490_v36, %v19489_v3  ;;  %v10862_v22 = vpop.f32.mrb[199].mxu1  ;;  %19494 = vmatpush3.bf16.msra.mxu0 %v10892_v29  ;;  %v21432_v29 = vld [vmem:[%s24702_s2 + $0x30] sm:$0xff]  }
0x1781   : > { %v10893_v50 = vpack.c.bf16 %v10862_v22, %v10859_v19  ;;  %v21433_v19 = vld [vmem:[%s24702_s2 + $0x38] sm:$0xff]   ;;  %v21434_v22 = vld [vmem:[%s24702_s2 + $0x80] sm:$0xff]  }
0x1782   : > { %20068 = vmatmul.mubr.msk.bf16.vlgmr.msra.gmra.mrb[48].mxu1 %vm10066_vm7, %v23811_v12 }
0x1783   : > { %19495 = vmatprep.subr.bf16.mxu0 %v10893_v50  ;;  %20071 = vmatprep.mubr.msk.bf16.mxu1 %vm10066_vm7, %v23827_v58 }
0x1784   : > { %19496 = vmatpush3.bf16.msra.mxu0 %v10893_v50 }
0x1785   : > { %19497 = vmatprep.subr.bf16.mxu0 %v10894_v44  ;;  %v19549_v52 = vpop.f32.mrb[200].mxu1 }
0x1786   : > { %v11284_v63 = vpop.f32.mrb[201].mxu1 }
0x1787   : > { %v19550_v23 = vpop.f32.mrb[202].mxu1 }
0x1788   : > { %v11333_v35 = vpack.c.bf16 %v19550_v23, %v19549_v52  ;;  %19498 = vmatpush3.bf16.msra.mxu0 %v10894_v44  ;;  %v11287_v8 = vpop.f32.mrb[203].mxu1 }
0x1789   : > { %v11332_v7 = vpack.c.bf16 %v11287_v8, %v11284_v63  ;;  %19515 = vmatprep.subr.bf16.mxu0 %v10772_v16 }
0x178a   : > { %20072 = vmatmul.mubr.msk.bf16.gmra.mrb[52].mxu1 %vm10066_vm7, %v23825_v0 }
0x178b   : > { %19500 = vmatmul.mubr.msk.bf16.vlgmr.msra.gmra.mrb[148].mxu0 %vm10066_vm7, %v21419_v41  ;;  %v21435_v41 = vld [vmem:[%s24702_s2 + $0x88] sm:$0xff]  }
0x178c   : > { %19516 = vmatpush3.bf16.msra.mxu0 %v10772_v16  ;;  %19503 = vmatprep.mubr.msk.bf16.mxu0 %vm10066_vm7, %v21420_v9  ;;  %v21436_v9 = vld [vmem:[%s24702_s2 + $0x90] sm:$0xff]  }
0x178d   : > { %19517 = vmatprep.subr.bf16.mxu0 %v23989_v1  ;;  %v19553_v12 = vpop.f32.mrb[204].mxu1 }
0x178e   : > { %v11300_v58 = vpop.f32.mrb[205].mxu1 }
0x178f   : > { %v19554_v18 = vpop.f32.mrb[206].mxu1 }
0x1790   : > { %v11335_v45 = vpack.c.bf16 %v19554_v18, %v19553_v12  ;;  %19518 = vmatpush3.bf16.msra.mxu0 %v23989_v1  ;;  %v11303_v54 = vpop.f32.mrb[207].mxu1  ;;  %v21428_v1 = vld [vmem:[%s24702_s2 + $0x10] sm:$0xff]  }
0x1791   : > { %v11334_v47 = vpack.c.bf16 %v11303_v54, %v11300_v58  ;;  %19519 = vmatprep.subr.bf16.mxu0 %v10774_v11 }
0x1793   : > { %19504 = vmatmul.mubr.msk.bf16.gmra.mrb[152].mxu0 %vm10066_vm7, %v21421_v62  ;;  %v21437_v62 = vld [vmem:[%s24702_s2 + $0x98] sm:$0xff]  }
0x1794   : > { %19520 = vmatpush3.bf16.msra.mxu0 %v10774_v11  ;;  %19507 = vmatprep.mubr.msk.bf16.mxu0 %vm10066_vm7, %v21422_v21  ;;  %v21438_v21 = vld [vmem:[%s24702_s2 + $0xa0] sm:$0xff]  }
0x1795   : > { %19521 = vmatprep.subr.bf16.mxu0 %v23997_v59  ;;  %v19589_v0 = vpop.f32.mrb[208].mxu1 }
0x1796   : > { %v11580_v43 = vpop.f32.mrb[209].mxu1 }
0x1797   : > { %v19590_v32 = vpop.f32.mrb[210].mxu1 }
0x1798   : > { %v24028_v31 = vpack.c.bf16 %v19590_v32, %v19589_v0  ;;  %19522 = vmatpush3.bf16.msra.mxu0 %v23997_v59  ;;  %v11583_v30 = vpop.f32.mrb[211].mxu1  ;;  %v21430_v59 = vld [vmem:[%s24702_s2 + $0x20] sm:$0xff]  }
0x1799   : > { %v24032_v56 = vpack.c.bf16 %v11583_v30, %v11580_v43  ;;  %19555 = vmatprep.subr.bf16.mxu0 %v11332_v7 }
0x179b   : > { %19508 = vmatmul.mubr.msk.bf16.gmra.mrb[156].mxu0 %vm10066_vm7, %v21423_v37  ;;  %v21439_v37 = vld [vmem:[%s24702_s2 + $0xa8] sm:$0xff]  }
0x179c   : > { %19511 = vmatprep.mubr.msk.bf16.mxu0 %vm10066_vm7, %v21424_v20  ;;  %v21440_v20 = vld [vmem:[%s24702_s2 + $0xb0] sm:$0xff]  }
0x179d   : > { %v19593_v2 = vpop.f32.mrb[212].mxu1 }
0x179e   : > { %v11596_v39 = vpop.f32.mrb[213].mxu1 }
0x179f   : > { %v19594_v40 = vpop.f32.mrb[214].mxu1 }
0x17a0   : > { %v24037_v55 = vpack.c.bf16 %v19594_v40, %v19593_v2  ;;  %v11599_v46 = vpop.f32.mrb[215].mxu1 }
0x17a1   : > { %v24040_v34 = vpack.c.bf16 %v11599_v46, %v11596_v39 }
0x17a3   : > { %19512 = vmatmul.mubr.msk.bf16.gmra.mrb[160].mxu0 %vm10066_vm7, %v21425_v42  ;;  %v21441_v42 = vld [vmem:[%s24702_s2 + $0xb8] sm:$0xff]  }
0x17a4   : > { %19523 = vmatprep.mubr.msk.bf16.mxu0 %vm10066_vm7, %v21426_v53  ;;  %v21442_v53 = vld [vmem:[%s24702_s2 + $0xc0] sm:$0xff]  }
0x17a5   : > { %v19629_v6 = vpop.f32.mrb[216].mxu1 }
0x17a6   : > { %v11876_v13 = vpop.f32.mrb[217].mxu1 }
0x17a7   : > { %v19630_v49 = vpop.f32.mrb[218].mxu1 }
0x17a8   : > { %v24045_v26 = vpack.c.bf16 %v19630_v49, %v19629_v6  ;;  %v11879_v57 = vpop.f32.mrb[219].mxu1 }
0x17a9   : > { %v24048_v51 = vpack.c.bf16 %v11879_v57, %v11876_v13 }
0x17ab   : > { %19524 = vmatmul.mubr.msk.bf16.vlgmr.msra.gmra.mrb[148].mxu0 %vm10066_vm7, %v21427_v14  ;;  %v21443_v14 = vld [vmem:[%s24702_s2 + $0xc8] sm:$0xff]  }
0x17ac   : > { %19556 = vmatpush3.bf16.msra.mxu0 %v11332_v7  ;;  %19527 = vmatprep.mubr.msk.bf16.mxu0 %vm10066_vm7, %v21428_v1 }
0x17ad   : > { %19557 = vmatprep.subr.bf16.mxu0 %v11333_v35  ;;  %v19633_v28 = vpop.f32.mrb[220].mxu1 }
0x17ae   : > { %v11892_v16 = vpop.f32.mrb[221].mxu1 }
0x17af   : > { %v19634_v60 = vpop.f32.mrb[222].mxu1 }
0x17b0   : > { %19558 = vmatpush3.bf16.msra.mxu0 %v11333_v35  ;;  %v24053_v15 = vpack.c.bf16 %v19634_v60, %v19633_v28  ;;  %v11895_v33 = vpop.f32.mrb[223].mxu1  ;;  %v21444_v28 = vld [vmem:[%s24702_s2 + $0xd0] sm:$0xff]  }
0x17b1   : > { %19559 = vmatprep.subr.bf16.mxu0 %v11334_v47  ;;  %v24056_v38 = vpack.c.bf16 %v11895_v33, %v11892_v16 }
0x17b3   : > { %19528 = vmatmul.mubr.msk.bf16.gmra.mrb[152].mxu0 %vm10066_vm7, %v21429_v4 }
0x17b4   : > { %19560 = vmatpush3.bf16.msra.mxu0 %v11334_v47  ;;  %19531 = vmatprep.mubr.msk.bf16.mxu0 %vm10066_vm7, %v21430_v59  ;;  %v21445_v59 = vld [vmem:[%s24702_s2 + $0xd8] sm:$0xff]  }
0x17b5   : > { %19561 = vmatprep.subr.bf16.mxu0 %v11335_v45  ;;  %v19669_v17 = vpop.f32.mrb[224].mxu1 }
0x17b6   : > { %v12172_v11 = vpop.f32.mrb[225].mxu1 }
0x17b7   : > { %v19670_v25 = vpop.f32.mrb[226].mxu1 }
0x17b8   : > { %19562 = vmatpush3.bf16.msra.mxu0 %v11335_v45  ;;  %v24061_v61 = vpack.c.bf16 %v19670_v25, %v19669_v17  ;;  %v12175_v48 = vpop.f32.mrb[227].mxu1  ;;  %v21446_v25 = vld [vmem:[%s24702_s2 + $0xe0] sm:$0xff]  }
0x17b9   : > { %19595 = vmatprep.subr.bf16.mxu0 %v24032_v56  ;;  %v24065_v10 = vpack.c.bf16 %v12175_v48, %v12172_v11 }
0x17bb   : > { %19532 = vmatmul.mubr.msk.bf16.gmra.mrb[156].mxu0 %vm10066_vm7, %v21431_v27 }
0x17bc   : > { %19535 = vmatprep.mubr.msk.bf16.mxu0 %vm10066_vm7, %v21432_v29  ;;  %v21447_v29 = vld [vmem:[%s24702_s2 + $0xe8] sm:$0xff]  }
0x17bd   : > { %v19673_v24 = vpop.f32.mrb[228].mxu1 }
0x17be   : > { %v12188_v5 = vpop.f32.mrb[229].mxu1 }
0x17bf   : > { %v19674_v3 = vpop.f32.mrb[230].mxu1 }
0x17c0   : > { %v24070_v36 = vpack.c.bf16 %v19674_v3, %v19673_v24  ;;  %v12191_v44 = vpop.f32.mrb[231].mxu1  ;;  %v21448_v3 = vld [vmem:[%s24702_s2 + $0xf0] sm:$0xff]  }
0x17c1   : > { %v24073_v50 = vpack.c.bf16 %v12191_v44, %v12188_v5 }
0x17c3   : > { %19536 = vmatmul.mubr.msk.bf16.gmra.mrb[160].mxu0 %vm10066_vm7, %v21433_v19 }
0x17c4   : > { %19563 = vmatprep.mubr.msk.bf16.mxu0 %vm10066_vm7, %v21434_v22 }
0x17c5   : > { %v19709_v52 = vpop.f32.mrb[232].mxu1 }
0x17c6   : > { %v12468_v63 = vpop.f32.mrb[233].mxu1 }
0x17c7   : > { %v19710_v23 = vpop.f32.mrb[234].mxu1 }
0x17c8   : > { %v24078_v35 = vpack.c.bf16 %v19710_v23, %v19709_v52  ;;  %v12471_v8 = vpop.f32.mrb[235].mxu1  ;;  %v21449_v52 = vld [vmem:[%s24702_s2 + $0xf8] sm:$0xff]   ;;  %v21450_v23 = vld [vmem:[%s24702_s2 + $0x100] sm:$0xff]  }
0x17c9   : > { %v24081_v7 = vpack.c.bf16 %v12471_v8, %v12468_v63 }
0x17cb   : > { %19564 = vmatmul.mubr.msk.bf16.vlgmr.msra.gmra.mrb[148].mxu0 %vm10066_vm7, %v21435_v41 }
0x17cc   : > { %19596 = vmatpush3.bf16.msra.mxu0 %v24032_v56  ;;  %19567 = vmatprep.mubr.msk.bf16.mxu0 %vm10066_vm7, %v21436_v9 }
0x17cd   : > { %19597 = vmatprep.subr.bf16.mxu0 %v24028_v31  ;;  %v19713_v12 = vpop.f32.mrb[236].mxu1 }
0x17ce   : > { %v12484_v58 = vpop.f32.mrb[237].mxu1 }
0x17cf   : > { %v19714_v18 = vpop.f32.mrb[238].mxu1 }
0x17d0   : > { %19598 = vmatpush3.bf16.msra.mxu0 %v24028_v31  ;;  %v24089_v45 = vpack.c.bf16 %v19714_v18, %v19713_v12  ;;  %v12487_v54 = vpop.f32.mrb[239].mxu1 }
0x17d1   : > { %19599 = vmatprep.subr.bf16.mxu0 %v24040_v34  ;;  %v24093_v47 = vpack.c.bf16 %v12487_v54, %v12484_v58  ;;  %v21451_v58 = vld [vmem:[%s24702_s2 + $0x108] sm:$0xff]   ;;  %v21452_v54 = vld [vmem:[%s24702_s2 + $0x110] sm:$0xff]  }
0x17d3   : > { %19568 = vmatmul.mubr.msk.bf16.gmra.mrb[152].mxu0 %vm10066_vm7, %v21437_v62 }
0x17d4   : > { %19600 = vmatpush3.bf16.msra.mxu0 %v24040_v34  ;;  %19571 = vmatprep.mubr.msk.bf16.mxu0 %vm10066_vm7, %v21438_v21 }
0x17d5   : > { %19601 = vmatprep.subr.bf16.mxu0 %v24037_v55  ;;  %v19749_v0 = vpop.f32.mrb[240].mxu1 }
0x17d6   : > { %v12764_v43 = vpop.f32.mrb[241].mxu1 }
0x17d7   : > { %v19750_v32 = vpop.f32.mrb[242].mxu1 }
0x17d8   : > { %19602 = vmatpush3.bf16.msra.mxu0 %v24037_v55  ;;  %v24101_v31 = vpack.c.bf16 %v19750_v32, %v19749_v0  ;;  %v12767_v30 = vpop.f32.mrb[243].mxu1 }
0x17d9   : > { %19635 = vmatprep.subr.bf16.mxu0 %v24048_v51  ;;  %v24105_v56 = vpack.c.bf16 %v12767_v30, %v12764_v43 }
0x17db   : > { %19572 = vmatmul.mubr.msk.bf16.gmra.mrb[156].mxu0 %vm10066_vm7, %v21439_v37  ;;  %v21453_v37 = vld [vmem:[%s24702_s2 + $0x118] sm:$0xff]  }
0x17dc   : > { %19575 = vmatprep.mubr.msk.bf16.mxu0 %vm10066_vm7, %v21440_v20 }
0x17dd   : > { %v19753_v2 = vpop.f32.mrb[244].mxu1 }
0x17de   : > { %v12780_v39 = vpop.f32.mrb[245].mxu1 }
0x17df   : > { %v19754_v40 = vpop.f32.mrb[246].mxu1 }
0x17e0   : > { %v24110_v46 = vpack.c.bf16 %v19754_v40, %v19753_v2  ;;  %v12783_v55 = vpop.f32.mrb[247].mxu1  ;;  %v21454_v2 = vld [vmem:[%s24702_s2 + $0x120] sm:$0xff]  }
0x17e1   : > { %v24113_v34 = vpack.c.bf16 %v12783_v55, %v12780_v39 }
0x17e3   : > { %19576 = vmatmul.mubr.msk.bf16.gmra.mrb[160].mxu0 %vm10066_vm7, %v21441_v42  ;;  %v21455_v42 = vld [vmem:[%s24702_s2 + $0x128] sm:$0xff]  }
0x17e4   : > { %19603 = vmatprep.mubr.msk.bf16.mxu0 %vm10066_vm7, %v21442_v53 }
0x17e5   : > { %v19789_v6 = vpop.f32.mrb[248].mxu1 }
0x17e6   : > { %v13060_v13 = vpop.f32.mrb[249].mxu1 }
0x17e7   : > { %v19790_v49 = vpop.f32.mrb[250].mxu1 }
0x17e8   : > { %v24118_v57 = vpack.c.bf16 %v19790_v49, %v19789_v6  ;;  %v13063_v1 = vpop.f32.mrb[251].mxu1  ;;  %v21456_v6 = vld [vmem:[%s24702_s2 + $0x130] sm:$0xff]  }
0x17e9   : > { %v24121_v16 = vpack.c.bf16 %v13063_v1, %v13060_v13  ;;  %v21457_v1 = vld [vmem:[%s24702_s2 + $0x138] sm:$0xff]  }
0x17eb   : > { %19604 = vmatmul.mubr.msk.bf16.vlgmr.msra.gmra.mrb[148].mxu0 %vm10066_vm7, %v21443_v14 }
0x17ec   : > { %19636 = vmatpush3.bf16.msra.mxu0 %v24048_v51  ;;  %19607 = vmatprep.mubr.msk.bf16.mxu0 %vm10066_vm7, %v21444_v28 }
0x17ed   : > { %19637 = vmatprep.subr.bf16.mxu0 %v24045_v26  ;;  %v19793_v60 = vpop.f32.mrb[252].mxu1 }
0x17ee   : > { %v13076_v4 = vpop.f32.mrb[253].mxu1 }
0x17ef   : > { %v19794_v33 = vpop.f32.mrb[254].mxu1 }
0x17f0   : > { %19638 = vmatpush3.bf16.msra.mxu0 %v24045_v26  ;;  %v24129_v17 = vpack.c.bf16 %v19794_v33, %v19793_v60  ;;  %v13079_v11 = vpop.f32.mrb[255].mxu1  ;;  %v21458_v60 = vld [vmem:[%s24702_s2 + $0x140] sm:$0xff]  }
0x17f1   : > { %19639 = vmatprep.subr.bf16.mxu0 %v24056_v38  ;;  %v24133_v27 = vpack.c.bf16 %v13079_v11, %v13076_v4 }
0x17f3   : > { %19608 = vmatmul.mubr.msk.bf16.gmra.mrb[152].mxu0 %vm10066_vm7, %v21445_v59 }
0x17f4   : > { %19640 = vmatpush3.bf16.msra.mxu0 %v24056_v38  ;;  %19611 = vmatprep.mubr.msk.bf16.mxu0 %vm10066_vm7, %v21446_v25  ;;  %v21459_v25 = vld [vmem:[%s24702_s2 + $0x148] sm:$0xff]  }
0x17f5   : > { %19641 = vmatprep.subr.bf16.mxu0 %v24053_v15  ;;  %v19829_v51 = vpop.f32.mrb[0].mxu1 }
0x17f6   : > { %v13356_v26 = vpop.f32.mrb[1].mxu1 }
0x17f7   : > { %v19830_v48 = vpop.f32.mrb[2].mxu1 }
0x17f8   : > { %19642 = vmatpush3.bf16.msra.mxu0 %v24053_v15  ;;  %v24141_v24 = vpack.c.bf16 %v19830_v48, %v19829_v51  ;;  %v13359_v5 = vpop.f32.mrb[3].mxu1  ;;  %v21460_v48 = vld [vmem:[%s24702_s2 + $0x150] sm:$0xff]  }
0x17f9   : > { %19675 = vmatprep.subr.bf16.mxu0 %v24065_v10  ;;  %v24145_v19 = vpack.c.bf16 %v13359_v5, %v13356_v26 }
0x17fb   : > { %19612 = vmatmul.mubr.msk.bf16.gmra.mrb[156].mxu0 %vm10066_vm7, %v21447_v29 }
0x17fc   : > { %19615 = vmatprep.mubr.msk.bf16.mxu0 %vm10066_vm7, %v21448_v3 }
0x17fd   : > { %v19833_v38 = vpop.f32.mrb[4].mxu1 }
0x17fe   : > { %v13372_v44 = vpop.f32.mrb[5].mxu1 }
0x17ff   : > { %v19834_v22 = vpop.f32.mrb[6].mxu1 }
0x1800   : > { %v24150_v63 = vpack.c.bf16 %v19834_v22, %v19833_v38  ;;  %v13375_v15 = vpop.f32.mrb[7].mxu1 }
0x1801   : > { %v24153_v41 = vpack.c.bf16 %v13375_v15, %v13372_v44  ;;  %v21461_v44 = vld [vmem:[%s24702_s2 + $0x158] sm:$0xff]   ;;  %v21462_v15 = vld [vmem:[%s24702_s2 + $0x160] sm:$0xff]  }
0x1803   : > { %19616 = vmatmul.mubr.msk.bf16.gmra.mrb[160].mxu0 %vm10066_vm7, %v21449_v52 }
0x1804   : > { %19643 = vmatprep.mubr.msk.bf16.mxu0 %vm10066_vm7, %v21450_v23 }
0x1805   : > { %v19869_v8 = vpop.f32.mrb[8].mxu1 }
0x1806   : > { %v13652_v9 = vpop.f32.mrb[9].mxu1 }
0x1807   : > { %v19870_v12 = vpop.f32.mrb[10].mxu1 }
0x1808   : > { %v24158_v18 = vpack.c.bf16 %v19870_v12, %v19869_v8  ;;  %v13655_v62 = vpop.f32.mrb[11].mxu1 }
0x1809   : > { %v24161_v21 = vpack.c.bf16 %v13655_v62, %v13652_v9  ;;  %v21463_v9 = vld [vmem:[%s24702_s2 + $0x168] sm:$0xff]   ;;  %v21464_v62 = vld [vmem:[%s24702_s2 + $0x170] sm:$0xff]  }
0x180b   : > { %19644 = vmatmul.mubr.msk.bf16.vlgmr.msra.gmra.mrb[148].mxu0 %vm10066_vm7, %v21451_v58 }
0x180c   : > { %19676 = vmatpush3.bf16.msra.mxu0 %v24065_v10  ;;  %19647 = vmatprep.mubr.msk.bf16.mxu0 %vm10066_vm7, %v21452_v54 }
0x180d   : > { %19677 = vmatprep.subr.bf16.mxu0 %v24061_v61  ;;  %v19873_v0 = vpop.f32.mrb[12].mxu1 }
0x180e   : > { %v13668_v43 = vpop.f32.mrb[13].mxu1 }
0x180f   : > { %v19874_v32 = vpop.f32.mrb[14].mxu1 }
0x1810   : > { %19678 = vmatpush3.bf16.msra.mxu0 %v24061_v61  ;;  %v24169_v30 = vpack.c.bf16 %v19874_v32, %v19873_v0  ;;  %v13671_v20 = vpop.f32.mrb[15].mxu1  ;;  %v21465_v32 = vld [vmem:[%s24702_s2 + $0x178] sm:$0xff]  }
0x1811   : > { %19679 = vmatprep.subr.bf16.mxu0 %v24073_v50  ;;  %v24173_v39 = vpack.c.bf16 %v13671_v20, %v13668_v43  ;;  %v21466_v20 = vld [vmem:[%s24702_s2 + $0x180] sm:$0xff]  }
0x1813   : > { %19648 = vmatmul.mubr.msk.bf16.gmra.mrb[152].mxu0 %vm10066_vm7, %v21453_v37 }
0x1814   : > { %19680 = vmatpush3.bf16.msra.mxu0 %v24073_v50  ;;  %19651 = vmatprep.mubr.msk.bf16.mxu0 %vm10066_vm7, %v21454_v2 }
0x1815   : > { %19681 = vmatprep.subr.bf16.mxu0 %v24070_v36  ;;  %v19909_v10 = vpop.f32.mrb[16].mxu1 }
0x1816   : > { %v13948_v61 = vpop.f32.mrb[17].mxu1 }
0x1817   : > { %v19910_v40 = vpop.f32.mrb[18].mxu1 }
0x1818   : > { %19682 = vmatpush3.bf16.msra.mxu0 %v24070_v36  ;;  %v24181_v55 = vpack.c.bf16 %v19910_v40, %v19909_v10  ;;  %v13951_v53 = vpop.f32.mrb[19].mxu1 }
0x1819   : > { %19715 = vmatprep.subr.bf16.mxu0 %v24081_v7  ;;  %v24185_v13 = vpack.c.bf16 %v13951_v53, %v13948_v61 }
0x181b   : > { %19652 = vmatmul.mubr.msk.bf16.gmra.mrb[156].mxu0 %vm10066_vm7, %v21455_v42  ;;  %v21467_v42 = vld [vmem:[%s24702_s2 + $0x188] sm:$0xff]  }
0x181c   : > { %19655 = vmatprep.mubr.msk.bf16.mxu0 %vm10066_vm7, %v21456_v6 }
0x181d   : > { %v19913_v50 = vpop.f32.mrb[20].mxu1 }
0x181e   : > { %v13964_v49 = vpop.f32.mrb[21].mxu1 }
0x181f   : > { %v19914_v14 = vpop.f32.mrb[22].mxu1 }
0x1820   : > { %v24190_v28 = vpack.c.bf16 %v19914_v14, %v19913_v50  ;;  %v13967_v36 = vpop.f32.mrb[23].mxu1  ;;  %v21468_v50 = vld [vmem:[%s24702_s2 + $0x190] sm:$0xff]  }
0x1821   : > { %v24193_v4 = vpack.c.bf16 %v13967_v36, %v13964_v49 }
0x1823   : > { %19656 = vmatmul.mubr.msk.bf16.gmra.mrb[160].mxu0 %vm10066_vm7, %v21457_v1 }
0x1824   : > { %19683 = vmatprep.mubr.msk.bf16.mxu0 %vm10066_vm7, %v21458_v60  ;;  %v21469_v60 = vld [vmem:[%s24702_s2 + $0x198] sm:$0xff]  }
0x1825   : > { %v19949_v33 = vpop.f32.mrb[24].mxu1 }
0x1826   : > { %v14244_v59 = vpop.f32.mrb[25].mxu1 }
0x1827   : > { %v19950_v11 = vpop.f32.mrb[26].mxu1 }
0x1828   : > { %v24198_v51 = vpack.c.bf16 %v19950_v11, %v19949_v33  ;;  %v14247_v26 = vpop.f32.mrb[27].mxu1  ;;  %v21470_v11 = vld [vmem:[%s24702_s2 + $0x1a0] sm:$0xff]  }
0x1829   : > { %v24201_v29 = vpack.c.bf16 %v14247_v26, %v14244_v59 }
0x182b   : > { %19684 = vmatmul.mubr.msk.bf16.vlgmr.msra.gmra.mrb[148].mxu0 %vm10066_vm7, %v21459_v25 }
0x182c   : > { %19716 = vmatpush3.bf16.msra.mxu0 %v24081_v7  ;;  %19687 = vmatprep.mubr.msk.bf16.mxu0 %vm10066_vm7, %v21460_v48  ;;  %v21471_v48 = vld [vmem:[%s24702_s2 + $0x1a8] sm:$0xff]  }
0x182d   : > { %19717 = vmatprep.subr.bf16.mxu0 %v24078_v35  ;;  %v19953_v5 = vpop.f32.mrb[28].mxu1 }
0x182e   : > { %v14260_v3 = vpop.f32.mrb[29].mxu1 }
0x182f   : > { %v19954_v38 = vpop.f32.mrb[30].mxu1 }
0x1830   : > { %19718 = vmatpush3.bf16.msra.mxu0 %v24078_v35  ;;  %v24209_v22 = vpack.c.bf16 %v19954_v38, %v19953_v5  ;;  %v14263_v52 = vpop.f32.mrb[31].mxu1  ;;  %v21472_v38 = vld [vmem:[%s24702_s2 + $0x1b0] sm:$0xff]  }
0x1831   : > { %19719 = vmatprep.subr.bf16.mxu0 %v24093_v47  ;;  %v24213_v23 = vpack.c.bf16 %v14263_v52, %v14260_v3 }
0x1833   : > { %19688 = vmatmul.mubr.msk.bf16.gmra.mrb[152].mxu0 %vm10066_vm7, %v21461_v44 }
0x1834   : > { %19720 = vmatpush3.bf16.msra.mxu0 %v24093_v47  ;;  %19691 = vmatprep.mubr.msk.bf16.mxu0 %vm10066_vm7, %v21462_v15 }
0x1835   : > { %19721 = vmatprep.subr.bf16.mxu0 %v24089_v45  ;;  %v19989_v7 = vpop.f32.mrb[32].mxu1 }
0x1836   : > { %v14540_v35 = vpop.f32.mrb[33].mxu1 }
0x1837   : > { %v19990_v8 = vpop.f32.mrb[34].mxu1 }
0x1838   : > { %19722 = vmatpush3.bf16.msra.mxu0 %v24089_v45  ;;  %v24221_v12 = vpack.c.bf16 %v19990_v8, %v19989_v7  ;;  %v14543_v58 = vpop.f32.mrb[35].mxu1  ;;  %v21474_v8 = vld [vmem:[%s24702_s2 + $0x1c0] sm:$0xff]  }
0x1839   : > { %19755 = vmatprep.subr.bf16.mxu0 %v24105_v56  ;;  %v24225_v54 = vpack.c.bf16 %v14543_v58, %v14540_v35  ;;  %v21475_v58 = vld [vmem:[%s24702_s2 + $0x1c8] sm:$0xff]  }
0x183b   : > { %19692 = vmatmul.mubr.msk.bf16.gmra.mrb[156].mxu0 %vm10066_vm7, %v21463_v9 }
0x183c   : > { %19695 = vmatprep.mubr.msk.bf16.mxu0 %vm10066_vm7, %v21464_v62  ;;  %v21476_v62 = vld [vmem:[%s24702_s2 + $0x1d0] sm:$0xff]  }
0x183d   : > { %v19993_v47 = vpop.f32.mrb[36].mxu1 }
0x183e   : > { %v14556_v0 = vpop.f32.mrb[37].mxu1 }
0x183f   : > { %v19994_v43 = vpop.f32.mrb[38].mxu1 }
0x1840   : > { %v24230_v37 = vpack.c.bf16 %v19994_v43, %v19993_v47  ;;  %v14559_v45 = vpop.f32.mrb[39].mxu1  ;;  %v21477_v47 = vld [vmem:[%s24702_s2 + $0x1d8] sm:$0xff]   ;;  %v21480_v43 = vld [vmem:[%s24702_s2 + $0x1f0] sm:$0xff]  }
0x1841   : > { %v24233_v2 = vpack.c.bf16 %v14559_v45, %v14556_v0  ;;  %v21478_v0 = vld [vmem:[%s24702_s2 + $0x1e0] sm:$0xff]   ;;  %v21484_v45 = vld [vmem:[%s24702_s2 + $0x210] sm:$0xff]  }
0x1843   : > { %19696 = vmatmul.mubr.msk.bf16.gmra.mrb[160].mxu0 %vm10066_vm7, %v21465_v32  ;;  %v21482_v32 = vld [vmem:[%s24702_s2 + $0x200] sm:$0xff]  }
0x1844   : > { %19723 = vmatprep.mubr.msk.bf16.mxu0 %vm10066_vm7, %v21466_v20  ;;  %v21486_v20 = vld [vmem:[%s24702_s2 + $0x220] sm:$0xff]  }
0x1845   : > { %v20029_v10 = vpop.f32.mrb[40].mxu1 }
0x1846   : > { %v14836_v61 = vpop.f32.mrb[41].mxu1 }
0x1847   : > { %v20030_v40 = vpop.f32.mrb[42].mxu1 }
0x1848   : > { %v24238_v53 = vpack.c.bf16 %v20030_v40, %v20029_v10  ;;  %v14839_v6 = vpop.f32.mrb[43].mxu1  ;;  %v21488_v10 = vld [vmem:[%s24702_s2 + $0x230] sm:$0xff]  }
0x1849   : > { %v24241_v49 = vpack.c.bf16 %v14839_v6, %v14836_v61  ;;  %v21490_v61 = vld [vmem:[%s24702_s2 + $0x240] sm:$0xff]   ;;  %v21492_v40 = vld [vmem:[%s24702_s2 + $0x250] sm:$0xff]  }
0x184a   : > { %v21496_v6 = vld [vmem:[%s24702_s2 + $0x270] sm:$0xff]  }
0x184b   : > { %19724 = vmatmul.mubr.msk.bf16.vlgmr.msra.gmra.mrb[148].mxu0 %vm10066_vm7, %v21467_v42  ;;  %v21494_v42 = vld [vmem:[%s24702_s2 + $0x260] sm:$0xff]  }
0x184c   : > { %19756 = vmatpush3.bf16.msra.mxu0 %v24105_v56  ;;  %19727 = vmatprep.mubr.msk.bf16.mxu0 %vm10066_vm7, %v21468_v50  ;;  %v21498_v50 = vld [vmem:[%s24702_s2 + $0x280] sm:$0xff]  }
0x184d   : > { %19757 = vmatprep.subr.bf16.mxu0 %v24101_v31  ;;  %v20033_v14 = vpop.f32.mrb[44].mxu1 }
0x184e   : > { %v14852_v1 = vpop.f32.mrb[45].mxu1 }
0x184f   : > { %v20034_v36 = vpop.f32.mrb[46].mxu1 }
0x1850   : > { %19758 = vmatpush3.bf16.msra.mxu0 %v24101_v31  ;;  %v24249_v33 = vpack.c.bf16 %v20034_v36, %v20033_v14  ;;  %v14855_v59 = vpop.f32.mrb[47].mxu1  ;;  %v21500_v14 = vld [vmem:[%s24702_s2 + $0x290] sm:$0xff]  }
0x1851   : > { %19759 = vmatprep.subr.bf16.mxu0 %v24113_v34  ;;  %v24253_v25 = vpack.c.bf16 %v14855_v59, %v14852_v1  ;;  %v21502_v1 = vld [vmem:[%s24702_s2 + $0x2a0] sm:$0xff]   ;;  %v21504_v36 = vld [vmem:[%s24702_s2 + $0x2b0] sm:$0xff]  }
0x1852   : > { %v21508_v59 = vld [vmem:[%s24702_s2 + $0x2d0] sm:$0xff]  }
0x1853   : > { %19728 = vmatmul.mubr.msk.bf16.gmra.mrb[152].mxu0 %vm10066_vm7, %v21469_v60  ;;  %v21506_v60 = vld [vmem:[%s24702_s2 + $0x2c0] sm:$0xff]  }
0x1854   : > { %19760 = vmatpush3.bf16.msra.mxu0 %v24113_v34  ;;  %19731 = vmatprep.mubr.msk.bf16.mxu0 %vm10066_vm7, %v21470_v11  ;;  %v21510_v11 = vld [vmem:[%s24702_s2 + $0x2e0] sm:$0xff]  }
0x1855   : > { %19761 = vmatprep.subr.bf16.mxu0 %v24110_v46  ;;  %v20069_v56 = vpop.f32.mrb[48].mxu1 }
0x1856   : > { %v15132_v31 = vpop.f32.mrb[49].mxu1 }
0x1857   : > { %v20070_v26 = vpop.f32.mrb[50].mxu1 }
0x1858   : > { %19762 = vmatpush3.bf16.msra.mxu0 %v24110_v46  ;;  %v24261_v5 = vpack.c.bf16 %v20070_v26, %v20069_v56  ;;  %v15135_v3 = vpop.f32.mrb[51].mxu1  ;;  %v21473_v46 = vld [vmem:[%s24702_s2 + $0x1b8] sm:$0xff]   ;;  %v21512_v56 = vld [vmem:[%s24702_s2 + $0x2f0] sm:$0xff]  }
0x1859   : > { %19795 = vmatprep.subr.bf16.mxu0 %v24121_v16  ;;  %v24265_v34 = vpack.c.bf16 %v15135_v3, %v15132_v31  ;;  %v21514_v31 = vld [vmem:[%s24702_s2 + $0x300] sm:$0xff]   ;;  %v21516_v26 = vld [vmem:[%s24702_s2 + $0x310] sm:$0xff]  }
0x185a   : > { %v21520_v3 = vld [vmem:[%s24702_s2 + $0x330] sm:$0xff]  }
0x185b   : > { %19732 = vmatmul.mubr.msk.bf16.gmra.mrb[156].mxu0 %vm10066_vm7, %v21471_v48  ;;  %v21518_v48 = vld [vmem:[%s24702_s2 + $0x320] sm:$0xff]  }
0x185c   : > { %19735 = vmatprep.mubr.msk.bf16.mxu0 %vm10066_vm7, %v21472_v38  ;;  %v21522_v38 = vld [vmem:[%s24702_s2 + $0x340] sm:$0xff]  }
0x185d   : > { %v20073_v44 = vpop.f32.mrb[52].mxu1 }
0x185e   : > { %v15148_v52 = vpop.f32.mrb[53].mxu1 }
0x185f   : > { %v20074_v15 = vpop.f32.mrb[54].mxu1 }
0x1860   : > { %v24270_v7 = vpack.c.bf16 %v20074_v15, %v20073_v44  ;;  %v15151_v35 = vpop.f32.mrb[55].mxu1  ;;  %v21524_v44 = vld [vmem:[%s24702_s2 + $0x350] sm:$0xff]  }
0x1861   : > { %v24273_v9 = vpack.c.bf16 %v15151_v35, %v15148_v52  ;;  %v21526_v52 = vld [vmem:[%s24702_s2 + $0x360] sm:$0xff]   ;;  %v21528_v15 = vld [vmem:[%s24702_s2 + $0x370] sm:$0xff]  }
0x1862   : > { %v21532_v35 = vld [vmem:[%s24702_s2 + $0x390] sm:$0xff]  }
0x1863   : > { %19736 = vmatmul.mubr.msk.bf16.gmra.mrb[160].mxu0 %vm10066_vm7, %v21473_v46  ;;  %v21530_v46 = vld [vmem:[%s24702_s2 + $0x380] sm:$0xff]  }
0x1864   : > { %19763 = vmatprep.mubr.msk.bf16.mxu0 %vm10066_vm7, %v21474_v8  ;;  %v21534_v8 = vld [vmem:[%s24702_s2 + $0x3a0] sm:$0xff]  }
0x186b   : > { %19764 = vmatmul.mubr.msk.bf16.vlgmr.msra.gmra.mrb[148].mxu0 %vm10066_vm7, %v21475_v58  ;;  %v21537_v58 = vld [vmem:[%s24702_s2 + $0x3b8] sm:$0xff]  }
0x186c   : > { %19796 = vmatpush3.bf16.msra.mxu0 %v24121_v16  ;;  %19767 = vmatprep.mubr.msk.bf16.mxu0 %vm10066_vm7, %v21476_v62  ;;  %v21479_v16 = vld [vmem:[%s24702_s2 + $0x1e8] sm:$0xff]   ;;  %v21538_v62 = vld [vmem:[%s24702_s2 + $0x3c0] sm:$0xff]  }
0x186d   : > { %19797 = vmatprep.subr.bf16.mxu0 %v24118_v57 }
0x1870   : > { %19798 = vmatpush3.bf16.msra.mxu0 %v24118_v57  ;;  %v21481_v57 = vld [vmem:[%s24702_s2 + $0x1f8] sm:$0xff]  }
0x1871   : > { %19799 = vmatprep.subr.bf16.mxu0 %v24133_v27 }
0x1873   : > { %19768 = vmatmul.mubr.msk.bf16.gmra.mrb[152].mxu0 %vm10066_vm7, %v21477_v47  ;;  %v21540_v47 = vld [vmem:[%s24702_s2 + $0x3d0] sm:$0xff]  }
0x1874   : > { %19800 = vmatpush3.bf16.msra.mxu0 %v24133_v27  ;;  %19771 = vmatprep.mubr.msk.bf16.mxu0 %vm10066_vm7, %v21478_v0  ;;  %v21483_v27 = vld [vmem:[%s24702_s2 + $0x208] sm:$0xff]   ;;  %v21542_v0 = vld [vmem:[%s24702_s2 + $0x3e0] sm:$0xff]  }
0x1875   : > { %19801 = vmatprep.subr.bf16.mxu0 %v24129_v17 }
0x1878   : > { %19802 = vmatpush3.bf16.msra.mxu0 %v24129_v17  ;;  %v21485_v17 = vld [vmem:[%s24702_s2 + $0x218] sm:$0xff]  }
0x1879   : > { %19835 = vmatprep.subr.bf16.mxu0 %v24145_v19 }
0x187b   : > { %19772 = vmatmul.mubr.msk.bf16.gmra.mrb[156].mxu0 %vm10066_vm7, %v21479_v16  ;;  %v21543_v16 = vld [vmem:[%s24702_s2 + $0x3e8] sm:$0xff]  }
0x187c   : > { %19775 = vmatprep.mubr.msk.bf16.mxu0 %vm10066_vm7, %v21480_v43  ;;  %v21544_v43 = vld [vmem:[%s24702_s2 + $0x3f0] sm:$0xff]  }
0x1883   : > { %19776 = vmatmul.mubr.msk.bf16.gmra.mrb[160].mxu0 %vm10066_vm7, %v21481_v57  ;;  %v21545_v57 = vld [vmem:[%s24702_s2 + $0x3f8] sm:$0xff]  }
0x1884   : > { %19803 = vmatprep.mubr.msk.bf16.mxu0 %vm10066_vm7, %v21482_v32  ;;  %v15380_v32 = vpop.permute.xlu0 %15379 }
0x188b   : > { %19804 = vmatmul.mubr.msk.bf16.vlgmr.msra.gmra.mrb[148].mxu0 %vm10066_vm7, %v21483_v27  ;;  %v15385_v27 = vpop.permute.xlu1 %15384 }
0x188c   : > { %19836 = vmatpush3.bf16.msra.mxu0 %v24145_v19  ;;  %19807 = vmatprep.mubr.msk.bf16.mxu0 %vm10066_vm7, %v21484_v45  ;;  %v21487_v19 = vld [vmem:[%s24702_s2 + $0x228] sm:$0xff]   ;;  %v15390_v45 = vpop.permute.xlu0 %15389 }
0x188d   : > { %19837 = vmatprep.subr.bf16.mxu0 %v24141_v24 }
0x1890   : > { %19838 = vmatpush3.bf16.msra.mxu0 %v24141_v24  ;;  %v21489_v24 = vld [vmem:[%s24702_s2 + $0x238] sm:$0xff]  }
0x1891   : > { %19839 = vmatprep.subr.bf16.mxu0 %v24153_v41 }
0x1893   : > { %19808 = vmatmul.mubr.msk.bf16.gmra.mrb[152].mxu0 %vm10066_vm7, %v21485_v17  ;;  %v15492_v17 = vpop.permute.xlu1 %15491 }
0x1894   : > { %19840 = vmatpush3.bf16.msra.mxu0 %v24153_v41  ;;  %19811 = vmatprep.mubr.msk.bf16.mxu0 %vm10066_vm7, %v21486_v20  ;;  %v21491_v41 = vld [vmem:[%s24702_s2 + $0x248] sm:$0xff]   ;;  %v15497_v20 = vpop.permute.xlu0 %15496 }
0x1895   : > { %19841 = vmatprep.subr.bf16.mxu0 %v24150_v63 }
0x1898   : > { %19842 = vmatpush3.bf16.msra.mxu0 %v24150_v63  ;;  %v21493_v63 = vld [vmem:[%s24702_s2 + $0x258] sm:$0xff]  }
0x1899   : > { %19875 = vmatprep.subr.bf16.mxu0 %v24161_v21 }
0x189b   : > { %19812 = vmatmul.mubr.msk.bf16.gmra.mrb[156].mxu0 %vm10066_vm7, %v21487_v19  ;;  %v15395_v19 = vpop.permute.xlu1 %15394 }
0x189c   : > { %19815 = vmatprep.mubr.msk.bf16.mxu0 %vm10066_vm7, %v21488_v10  ;;  %v15502_v10 = vpop.permute.xlu0 %15501 }
0x18a3   : > { %19816 = vmatmul.mubr.msk.bf16.gmra.mrb[160].mxu0 %vm10066_vm7, %v21489_v24  ;;  %v15400_v24 = vpop.permute.xlu1 %15399 }
0x18a4   : > { %19843 = vmatprep.mubr.msk.bf16.mxu0 %vm10066_vm7, %v21490_v61  ;;  %v15507_v61 = vpop.permute.xlu0 %15506 }
0x18ab   : > { %19844 = vmatmul.mubr.msk.bf16.vlgmr.msra.gmra.mrb[148].mxu0 %vm10066_vm7, %v21491_v41  ;;  %v15405_v41 = vpop.permute.xlu1 %15404 }
0x18ac   : > { %19876 = vmatpush3.bf16.msra.mxu0 %v24161_v21  ;;  %19847 = vmatprep.mubr.msk.bf16.mxu0 %vm10066_vm7, %v21492_v40  ;;  %v21495_v21 = vld [vmem:[%s24702_s2 + $0x268] sm:$0xff]   ;;  %v15512_v40 = vpop.permute.xlu0 %15511 }
0x18ad   : > { %19877 = vmatprep.subr.bf16.mxu0 %v24158_v18 }
0x18b0   : > { %19878 = vmatpush3.bf16.msra.mxu0 %v24158_v18  ;;  %v21497_v18 = vld [vmem:[%s24702_s2 + $0x278] sm:$0xff]  }
0x18b1   : > { %19879 = vmatprep.subr.bf16.mxu0 %v24173_v39 }
0x18b3   : > { %19848 = vmatmul.mubr.msk.bf16.gmra.mrb[152].mxu0 %vm10066_vm7, %v21493_v63  ;;  %v15410_v63 = vpop.permute.xlu1 %15409 }
0x18b4   : > { %19880 = vmatpush3.bf16.msra.mxu0 %v24173_v39  ;;  %19851 = vmatprep.mubr.msk.bf16.mxu0 %vm10066_vm7, %v21494_v42  ;;  %v21499_v39 = vld [vmem:[%s24702_s2 + $0x288] sm:$0xff]   ;;  %v24482_v42 = vpop.permute.xlu0 %15516 }
0x18b5   : > { %19881 = vmatprep.subr.bf16.mxu0 %v24169_v30 }
0x18b8   : > { %19882 = vmatpush3.bf16.msra.mxu0 %v24169_v30  ;;  %v21501_v30 = vld [vmem:[%s24702_s2 + $0x298] sm:$0xff]  }
0x18b9   : > { %19915 = vmatprep.subr.bf16.mxu0 %v24185_v13 }
0x18bb   : > { %19852 = vmatmul.mubr.msk.bf16.gmra.mrb[156].mxu0 %vm10066_vm7, %v21495_v21  ;;  %v15415_v21 = vpop.permute.xlu1 %15414 }
0x18bc   : > { %19855 = vmatprep.mubr.msk.bf16.mxu0 %vm10066_vm7, %v21496_v6  ;;  %v15522_v6 = vpop.permute.xlu0 %15521 }
0x18c3   : > { %19856 = vmatmul.mubr.msk.bf16.gmra.mrb[160].mxu0 %vm10066_vm7, %v21497_v18  ;;  %v24484_v18 = vpop.permute.xlu1 %15419 }
0x18c4   : > { %19883 = vmatprep.mubr.msk.bf16.mxu0 %vm10066_vm7, %v21498_v50  ;;  %v15527_v50 = vpop.permute.xlu0 %15526 }
0x18cb   : > { %19884 = vmatmul.mubr.msk.bf16.vlgmr.msra.gmra.mrb[148].mxu0 %vm10066_vm7, %v21499_v39  ;;  %v24486_v39 = vpop.permute.xlu1 %15424 }
0x18cc   : > { %19916 = vmatpush3.bf16.msra.mxu0 %v24185_v13  ;;  %19887 = vmatprep.mubr.msk.bf16.mxu0 %vm10066_vm7, %v21500_v14  ;;  %v21503_v13 = vld [vmem:[%s24702_s2 + $0x2a8] sm:$0xff]   ;;  %v24488_v14 = vpop.permute.xlu0 %15531 }
0x18cd   : > { %19917 = vmatprep.subr.bf16.mxu0 %v24181_v55 }
0x18d0   : > { %19918 = vmatpush3.bf16.msra.mxu0 %v24181_v55  ;;  %v21505_v55 = vld [vmem:[%s24702_s2 + $0x2b8] sm:$0xff]  }
0x18d1   : > { %19919 = vmatprep.subr.bf16.mxu0 %v24193_v4 }
0x18d3   : > { %19888 = vmatmul.mubr.msk.bf16.gmra.mrb[152].mxu0 %vm10066_vm7, %v21501_v30  ;;  %v24490_v30 = vpop.permute.xlu1 %15429 }
0x18d4   : > { %19920 = vmatpush3.bf16.msra.mxu0 %v24193_v4  ;;  %19891 = vmatprep.mubr.msk.bf16.mxu0 %vm10066_vm7, %v21502_v1  ;;  %v21507_v4 = vld [vmem:[%s24702_s2 + $0x2c8] sm:$0xff]   ;;  %v24492_v1 = vpop.permute.xlu0 %15536 }
0x18d5   : > { %19921 = vmatprep.subr.bf16.mxu0 %v24190_v28 }
0x18d8   : > { %19922 = vmatpush3.bf16.msra.mxu0 %v24190_v28  ;;  %v21509_v28 = vld [vmem:[%s24702_s2 + $0x2d8] sm:$0xff]  }
0x18d9   : > { %19955 = vmatprep.subr.bf16.mxu0 %v24201_v29 }
0x18db   : > { %19892 = vmatmul.mubr.msk.bf16.gmra.mrb[156].mxu0 %vm10066_vm7, %v21503_v13  ;;  %v24494_v13 = vpop.permute.xlu1 %15434 }
0x18dc   : > { %19895 = vmatprep.mubr.msk.bf16.mxu0 %vm10066_vm7, %v21504_v36 }
0x18e3   : > { %19896 = vmatmul.mubr.msk.bf16.gmra.mrb[160].mxu0 %vm10066_vm7, %v21505_v55 }
0x18e4   : > { %19923 = vmatprep.mubr.msk.bf16.mxu0 %vm10066_vm7, %v21506_v60 }
0x18eb   : > { %19924 = vmatmul.mubr.msk.bf16.vlgmr.msra.gmra.mrb[148].mxu0 %vm10066_vm7, %v21507_v4  ;;  %v24496_v4 = vpop.permute.xlu0 %15541 }
0x18ec   : > { %19956 = vmatpush3.bf16.msra.mxu0 %v24201_v29  ;;  %19927 = vmatprep.mubr.msk.bf16.mxu0 %vm10066_vm7, %v21508_v59  ;;  %v21511_v29 = vld [vmem:[%s24702_s2 + $0x2e8] sm:$0xff]  }
0x18ed   : > { %19957 = vmatprep.subr.bf16.mxu0 %v24198_v51 }
0x18f0   : > { %19958 = vmatpush3.bf16.msra.mxu0 %v24198_v51  ;;  %v21513_v51 = vld [vmem:[%s24702_s2 + $0x2f8] sm:$0xff]  }
0x18f1   : > { %19959 = vmatprep.subr.bf16.mxu0 %v24213_v23 }
0x18f3   : > { %19928 = vmatmul.mubr.msk.bf16.gmra.mrb[152].mxu0 %vm10066_vm7, %v21509_v28 }
0x18f4   : > { %19960 = vmatpush3.bf16.msra.mxu0 %v24213_v23  ;;  %19931 = vmatprep.mubr.msk.bf16.mxu0 %vm10066_vm7, %v21510_v11  ;;  %v21515_v23 = vld [vmem:[%s24702_s2 + $0x308] sm:$0xff]  }
0x18f5   : > { %19961 = vmatprep.subr.bf16.mxu0 %v24209_v22 }
0x18f8   : > { %19962 = vmatpush3.bf16.msra.mxu0 %v24209_v22  ;;  %v21517_v22 = vld [vmem:[%s24702_s2 + $0x318] sm:$0xff]  }
0x18f9   : > { %19995 = vmatprep.subr.bf16.mxu0 %v24225_v54 }
0x18fb   : > { %19932 = vmatmul.mubr.msk.bf16.gmra.mrb[156].mxu0 %vm10066_vm7, %v21511_v29 }
0x18fc   : > { %19935 = vmatprep.mubr.msk.bf16.mxu0 %vm10066_vm7, %v21512_v56 }
0x1903   : > { %19936 = vmatmul.mubr.msk.bf16.gmra.mrb[160].mxu0 %vm10066_vm7, %v21513_v51  ;;  %v24498_v51 = vpop.permute.xlu1 %15439 }
0x1904   : > { %19963 = vmatprep.mubr.msk.bf16.mxu0 %vm10066_vm7, %v21514_v31 }
0x190b   : > { %19964 = vmatmul.mubr.msk.bf16.vlgmr.msra.gmra.mrb[148].mxu0 %vm10066_vm7, %v21515_v23 }
0x190c   : > { %19996 = vmatpush3.bf16.msra.mxu0 %v24225_v54  ;;  %19967 = vmatprep.mubr.msk.bf16.mxu0 %vm10066_vm7, %v21516_v26  ;;  %v21519_v54 = vld [vmem:[%s24702_s2 + $0x328] sm:$0xff]  }
0x190d   : > { %19997 = vmatprep.subr.bf16.mxu0 %v24221_v12 }
0x1910   : > { %19998 = vmatpush3.bf16.msra.mxu0 %v24221_v12  ;;  %v21521_v12 = vld [vmem:[%s24702_s2 + $0x338] sm:$0xff]  }
0x1911   : > { %19999 = vmatprep.subr.bf16.mxu0 %v24233_v2 }
0x1913   : > { %19968 = vmatmul.mubr.msk.bf16.gmra.mrb[152].mxu0 %vm10066_vm7, %v21517_v22 }
0x1914   : > { %20000 = vmatpush3.bf16.msra.mxu0 %v24233_v2  ;;  %19971 = vmatprep.mubr.msk.bf16.mxu0 %vm10066_vm7, %v21518_v48  ;;  %v21523_v2 = vld [vmem:[%s24702_s2 + $0x348] sm:$0xff]  }
0x1915   : > { %20001 = vmatprep.subr.bf16.mxu0 %v24230_v37 }
0x1918   : > { %20002 = vmatpush3.bf16.msra.mxu0 %v24230_v37  ;;  %v21525_v37 = vld [vmem:[%s24702_s2 + $0x358] sm:$0xff]  }
0x1919   : > { %20035 = vmatprep.subr.bf16.mxu0 %v24241_v49 }
0x191b   : > { %19972 = vmatmul.mubr.msk.bf16.gmra.mrb[156].mxu0 %vm10066_vm7, %v21519_v54 }
0x191c   : > { %19975 = vmatprep.mubr.msk.bf16.mxu0 %vm10066_vm7, %v21520_v3  ;;  %v15633_v3 = vld [vmem:[%s21946_s16] sm:$0xff] }
0x1923   : > { %19976 = vmatmul.mubr.msk.bf16.gmra.mrb[160].mxu0 %vm10066_vm7, %v21521_v12 }
0x1924   : > { %20003 = vmatprep.mubr.msk.bf16.mxu0 %vm10066_vm7, %v21522_v38 }
0x192b   : > { %20004 = vmatmul.mubr.msk.bf16.vlgmr.msra.gmra.mrb[148].mxu0 %vm10066_vm7, %v21523_v2  ;;  %v15635_v2 = vld [vmem:[%s21946_s16 + $0x10] sm:$0xff] }
0x192c   : > { %20036 = vmatpush3.bf16.msra.mxu0 %v24241_v49  ;;  %20007 = vmatprep.mubr.msk.bf16.mxu0 %vm10066_vm7, %v21524_v44  ;;  %v21527_v49 = vld [vmem:[%s24702_s2 + $0x368] sm:$0xff]   ;;  %v24502_v44 = vpop.permute.xlu0 %15546 }
0x192d   : > { %20037 = vmatprep.subr.bf16.mxu0 %v24238_v53 }
0x1930   : > { %20038 = vmatpush3.bf16.msra.mxu0 %v24238_v53  ;;  %v21529_v53 = vld [vmem:[%s24702_s2 + $0x378] sm:$0xff]  }
0x1931   : > { %20039 = vmatprep.subr.bf16.mxu0 %v24253_v25 }
0x1933   : > { %20008 = vmatmul.mubr.msk.bf16.gmra.mrb[152].mxu0 %vm10066_vm7, %v21525_v37 }
0x1934   : > { %20040 = vmatpush3.bf16.msra.mxu0 %v24253_v25  ;;  %20011 = vmatprep.mubr.msk.bf16.mxu0 %vm10066_vm7, %v21526_v52  ;;  %v21531_v25 = vld [vmem:[%s24702_s2 + $0x388] sm:$0xff]  }
0x1935   : > { %20041 = vmatprep.subr.bf16.mxu0 %v24249_v33 }
0x1938   : > { %20042 = vmatpush3.bf16.msra.mxu0 %v24249_v33  ;;  %v21533_v33 = vld [vmem:[%s24702_s2 + $0x398] sm:$0xff]  }
0x1939   : > { %20075 = vmatprep.subr.bf16.mxu0 %v24265_v34 }
0x193b   : > { %20012 = vmatmul.mubr.msk.bf16.gmra.mrb[156].mxu0 %vm10066_vm7, %v21527_v49 }
0x193c   : > { %20015 = vmatprep.mubr.msk.bf16.mxu0 %vm10066_vm7, %v21528_v15  ;;  %v15634_v15 = vld [vmem:[%s21946_s16 + $0x8] sm:$0xff] }
0x1943   : > { %20016 = vmatmul.mubr.msk.bf16.gmra.mrb[160].mxu0 %vm10066_vm7, %v21529_v53 }
0x1944   : > { %20043 = vmatprep.mubr.msk.bf16.mxu0 %vm10066_vm7, %v21530_v46 }
0x194b   : > { %20044 = vmatmul.mubr.msk.bf16.vlgmr.msra.gmra.mrb[148].mxu0 %vm10066_vm7, %v21531_v25 }
0x194c   : > { %20076 = vmatpush3.bf16.msra.mxu0 %v24265_v34  ;;  %20047 = vmatprep.mubr.msk.bf16.mxu0 %vm10066_vm7, %v21532_v35  ;;  %v21535_v34 = vld [vmem:[%s24702_s2 + $0x3a8] sm:$0xff]  }
0x194d   : > { %20077 = vmatprep.subr.bf16.mxu0 %v24261_v5 }
0x1950   : > { %20078 = vmatpush3.bf16.msra.mxu0 %v24261_v5  ;;  %v21536_v5 = vld [vmem:[%s24702_s2 + $0x3b0] sm:$0xff]  }
0x1951   : > { %20079 = vmatprep.subr.bf16.mxu0 %v24273_v9 }
0x1953   : > { %20048 = vmatmul.mubr.msk.bf16.gmra.mrb[152].mxu0 %vm10066_vm7, %v21533_v33  ;;  %v15636_v33 = vld [vmem:[%s21946_s16 + $0x18] sm:$0xff] }
0x1954   : > { %20080 = vmatpush3.bf16.msra.mxu0 %v24273_v9  ;;  %20051 = vmatprep.mubr.msk.bf16.mxu0 %vm10066_vm7, %v21534_v8  ;;  %v21539_v9 = vld [vmem:[%s24702_s2 + $0x3c8] sm:$0xff]   ;;  %v24506_v8 = vpop.permute.xlu1 %15444 }
0x1955   : > { %20081 = vmatprep.subr.bf16.mxu0 %v24270_v7 }
0x1958   : > { %20082 = vmatpush3.bf16.msra.mxu0 %v24270_v7  ;;  %v21541_v7 = vld [vmem:[%s24702_s2 + $0x3d8] sm:$0xff]  }
0x195b   : > { %20052 = vmatmul.mubr.msk.bf16.gmra.mrb[156].mxu0 %vm10066_vm7, %v21535_v34 }
0x195c   : > { %20055 = vmatprep.mubr.msk.bf16.mxu0 %vm10066_vm7, %v21536_v5 }
0x1963   : > { %20056 = vmatmul.mubr.msk.bf16.gmra.mrb[160].mxu0 %vm10066_vm7, %v21537_v58 }
0x1964   : > { %20083 = vmatprep.mubr.msk.bf16.mxu0 %vm10066_vm7, %v21538_v62 }
0x196b   : > { %20084 = vmatmul.mubr.msk.bf16.vlgmr.msra.gmra.mrb[148].mxu0 %vm10066_vm7, %v21539_v9 }
0x196c   : > { %20087 = vmatprep.mubr.msk.bf16.mxu0 %vm10066_vm7, %v21540_v47 }
0x1973   : > { %20088 = vmatmul.mubr.msk.bf16.gmra.mrb[152].mxu0 %vm10066_vm7, %v21541_v7 }
0x1974   : > { %20091 = vmatprep.mubr.msk.bf16.mxu0 %vm10066_vm7, %v21542_v0 }
0x197b   : > { %20092 = vmatmul.mubr.msk.bf16.gmra.mrb[156].mxu0 %vm10066_vm7, %v21543_v16 }
0x197c   : > { %20095 = vmatprep.mubr.msk.bf16.mxu0 %vm10066_vm7, %v21544_v43 }
0x1983   : > { %20096 = vmatmul.mubr.msk.bf16.gmra.mrb[160].mxu0 %vm10066_vm7, %v21545_v57 }
0x1a3e   : > { %v20085_v36 = vpop.f32.mrb[148].mxu0 }
0x1a3f   : > { %v15459_v55 = vmul.f32 %v20085_v36, %v15390_v45  ;;  %v15282_v60 = vpop.f32.mrb[149].mxu0 }
0x1a40   : > { %v15457_v59 = vmul.f32 %v15380_v32, %v15282_v60  ;;  %v20086_v28 = vpop.f32.mrb[150].mxu0 }
0x1a41   : > { %v15571_v11 = vadd.f32 %v15502_v10, %v15459_v55  ;;  %v15460_v29 = vmul.f32 %v20086_v28, %v15395_v19  ;;  %v15285_v56 = vpop.f32.mrb[151].mxu0  ;;  %v15638_v55 = vld [vmem:[%s21946_s16 + $0x28] sm:$0xff] }
0x1a42   : > { %v15569_v31 = vadd.f32 %v15492_v17, %v15457_v59  ;;  %v15458_v23 = vmul.f32 %v15385_v27, %v15285_v56 }
0x1a43   : > { %v15603_v26 = vmul.f32 0.1, %v15571_v11  ;;  %v15572_v22 = vadd.f32 %v15507_v61, %v15460_v29  ;;  %vm15587_vm0 = vcmp.ge.f32.partialorder %v15571_v11, 0.0 }
0x1a44   : > { %v15601_v48 = vmul.f32 0.1, %v15569_v31  ;;  %v15570_v54 = vadd.f32 %v15497_v20, %v15458_v23  ;;  %vm15585_vm1 = vcmp.ge.f32.partialorder %v15569_v31, 0.0  ;;  %v24510_v20 = vpop.permute.xlu0 %15551 }
0x1a45   : > { %v15604_v12 = vmul.f32 0.1, %v15572_v22  ;;  %v15619_v38 = vsel %vm15587_vm0, %v15571_v11, %v15603_v26  ;;  %vm15588_vm9 = vcmp.ge.f32.partialorder %v15572_v22, 0.0 }
0x1a46   : > { %v15602_v37 = vmul.f32 0.1, %v15570_v54  ;;  %v20089_v52 = vpop.f32.mrb[152].mxu0  ;;  %v15617_v49 = vsel %vm15585_vm1, %v15569_v31, %v15601_v48  ;;  %vm15586_vm11 = vcmp.ge.f32.partialorder %v15570_v54, 0.0  ;;  %v15651_v62 = vmul.f32 %v15635_v2, %v15619_v38 }
0x1a47   : > { %v15463_v53 = vmul.f32 %v20089_v52, %v15410_v63  ;;  %v15298_v46 = vpop.f32.mrb[153].mxu0  ;;  %v15649_v25 = vmul.f32 %v15633_v3, %v15617_v49  ;;  %v15620_v35 = vsel %vm15588_vm9, %v15572_v22, %v15604_v12  ;;  %v15639_v63 = vld [vmem:[%s21946_s16 + $0x30] sm:$0xff]  ;;  %v15640_v3 = vld [vmem:[%s21946_s16 + $0x38] sm:$0xff]  ;;  %vm15737_vm1 = vcmask 0  }
0x1a48   : > { %v15461_v34 = vmul.f32 %v15400_v24, %v15298_v46  ;;  %v20090_v5 = vpop.f32.mrb[154].mxu0  ;;  %v15618_v58 = vsel %vm15586_vm11, %v15570_v54, %v15602_v37  ;;  %v15652_v32 = vmul.f32 %v15636_v33, %v15620_v35  ;;  %v15637_v24 = vld [vmem:[%s21946_s16 + $0x20] sm:$0xff]  ;;  %v15557_v12 = vpop.permute.xlu0 %15556  ;;  %v15642_v46 = vld [vmem:[%s21946_s16 + $0x48] sm:$0xff] }
0x1a49   : > { %v15575_v9 = vadd.f32 %v15522_v6, %v15463_v53  ;;  %v15464_v47 = vmul.f32 %v20090_v5, %v15415_v21  ;;  %v15301_v7 = vpop.f32.mrb[155].mxu0  ;;  %v15666_v0 = vsel %vm15665_vm10, %v15649_v25, 0.0  ;;  %v15650_v16 = vmul.f32 %v15634_v15, %v15618_v58  ;;  %v15450_v21 = vpop.permute.xlu1 %15449  ;;  %v15641_v15 = vld [vmem:[%s21946_s16 + $0x40] sm:$0xff]  ;;  %v15643_v25 = vld [vmem:[%s21946_s16 + $0x50] sm:$0xff] }
0x1a4a   : > { %v15573_v43 = vadd.f32 %v15512_v40, %v15461_v34  ;;  %v15462_v57 = vmul.f32 %v15405_v41, %v15301_v7  ;;  %15667 = vadd.xlane.f32.xlu0 %v15666_v0  ;;  %v15672_v41 = vsel %vm15665_vm10, %v15651_v62, 0.0  ;;  %v15675_v59 = vsel %vm15665_vm10, %v15652_v32, 0.0 }
0x1a4b   : > { %v15607_v27 = vmul.f32 0.1, %v15575_v9  ;;  %v15576_v45 = vadd.f32 %v15527_v50, %v15464_v47  ;;  %v15669_v17 = vsel %vm15665_vm10, %v15650_v16, 0.0  ;;  %vm15591_vm12 = vcmp.ge.f32.partialorder %v15575_v9, 0.0 }
0x1a4c   : > { %v15605_v19 = vmul.f32 0.1, %v15573_v43  ;;  %v15574_v10 = vadd.f32 %v24482_v42, %v15462_v57  ;;  %15670 = vadd.xlane.f32.xlu1 %v15669_v17  ;;  %vm15589_vm13 = vcmp.ge.f32.partialorder %v15573_v43, 0.0  ;;  %v15562_v62 = vpop.permute.xlu0 %15561 }
0x1a4d   : > { %v15608_v61 = vmul.f32 0.1, %v15576_v45  ;;  %v15623_v40 = vsel %vm15591_vm12, %v15575_v9, %v15607_v27  ;;  %vm15592_vm14 = vcmp.ge.f32.partialorder %v15576_v45, 0.0 }
0x1a4e   : > { %v15606_v6 = vmul.f32 0.1, %v15574_v10  ;;  %v20093_v50 = vpop.f32.mrb[156].mxu0  ;;  %15673 = vadd.xlane.f32.xlu0 %v15672_v41  ;;  %v15621_v36 = vsel %vm15589_vm13, %v15573_v43, %v15605_v19  ;;  %vm15590_vm15 = vcmp.ge.f32.partialorder %v15574_v10, 0.0  ;;  %v15655_v31 = vmul.f32 %v15639_v63, %v15623_v40 }
0x1a4f   : > { %v15467_v60 = vmul.f32 %v20093_v50, %v24490_v30  ;;  %v15314_v42 = vpop.f32.mrb[157].mxu0  ;;  %v15653_v28 = vmul.f32 %v15637_v24, %v15621_v36  ;;  %v15624_v23 = vsel %vm15592_vm14, %v15576_v45, %v15608_v61  ;;  %v15644_v24 = vld [vmem:[%s21946_s16 + $0x58] sm:$0xff] }
0x1a50   : > { %v15465_v11 = vmul.f32 %v24484_v18, %v15314_v42  ;;  %v20094_v29 = vpop.f32.mrb[158].mxu0  ;;  %v15622_v56 = vsel %vm15590_vm15, %v15574_v10, %v15606_v6  ;;  %v15656_v49 = vmul.f32 %v15640_v3, %v15624_v23 }
0x1a51   : > { %v15579_v26 = vadd.f32 %v24496_v4, %v15467_v60  ;;  %v15468_v22 = vmul.f32 %v20094_v29, %v24494_v13  ;;  %v15317_v48 = vpop.f32.mrb[159].mxu0  ;;  %v15678_v54 = vsel %vm15665_vm10, %v15653_v28, 0.0  ;;  %v15654_v30 = vmul.f32 %v15638_v55, %v15622_v56  ;;  %v15455_v13 = vpop.permute.xlu1 %15454  ;;  %v15646_v60 = vld [vmem:[%s21946_s16 + $0x68] sm:$0xff] }
0x1a52   : > { %v15577_v38 = vadd.f32 %v24488_v14, %v15465_v11  ;;  %v15466_v18 = vmul.f32 %v24486_v39, %v15317_v48  ;;  %15676 = vadd.xlane.f32.xlu0 %v15675_v59  ;;  %15679 = vadd.xlane.f32.xlu1 %v15678_v54  ;;  %v15684_v14 = vsel %vm15665_vm10, %v15655_v31, 0.0  ;;  %v15687_v7 = vsel %vm15665_vm10, %v15656_v49, 0.0  ;;  %v15647_v59 = vld [vmem:[%s21946_s16 + $0x70] sm:$0xff] }
0x1a53   : > { %v15611_v2 = vmul.f32 0.1, %v15579_v26  ;;  %v15580_v4 = vadd.f32 %v24502_v44, %v15468_v22  ;;  %vm15595_vm2 = vcmp.ge.f32.partialorder %v15579_v26, 0.0  ;;  %v15681_v53 = vsel %vm15665_vm10, %v15654_v30, 0.0  ;;  %v15648_v22 = vld [vmem:[%s21946_s16 + $0x78] sm:$0xff] }
0x1a54   : > { %v15609_v37 = vmul.f32 0.1, %v15577_v38  ;;  %v15578_v52 = vadd.f32 %v24492_v1, %v15466_v18  ;;  %vm15593_vm3 = vcmp.ge.f32.partialorder %v15577_v38, 0.0 }
0x1a55   : > { %v15627_v39 = vsel %vm15595_vm2, %v15579_v26, %v15611_v2  ;;  %v15612_v35 = vmul.f32 0.1, %v15580_v4  ;;  %vm15596_vm5 = vcmp.ge.f32.partialorder %v15580_v4, 0.0  ;;  %v15567_v17 = vpop.permute.xlu1 %15566 }
0x1a56   : > { %v15610_v33 = vmul.f32 0.1, %v15578_v52  ;;  %v20097_v34 = vpop.f32.mrb[160].mxu0  ;;  %15682 = vadd.xlane.f32.xlu0 %v15681_v53  ;;  %15685 = vadd.xlane.f32.xlu1 %v15684_v14  ;;  %v15625_v44 = vsel %vm15593_vm3, %v15577_v38, %v15609_v37  ;;  %vm15594_vm4 = vcmp.ge.f32.partialorder %v15578_v52, 0.0  ;;  %v15659_v16 = vmul.f32 %v15643_v25, %v15627_v39 }
0x1a57   : > { %v15471_v5 = vmul.f32 %v20097_v34, %v15450_v21  ;;  %v15330_v58 = vpop.f32.mrb[161].mxu0  ;;  %v15657_v1 = vmul.f32 %v15641_v15, %v15625_v44  ;;  %v15645_v21 = vld [vmem:[%s21946_s16 + $0x60] sm:$0xff] }
0x1a58   : > { %v15469_v9 = vmul.f32 %v24498_v51, %v15330_v58  ;;  %v20098_v47 = vpop.f32.mrb[162].mxu0  ;;  %v15626_v0 = vsel %vm15594_vm4, %v15578_v52, %v15610_v33  ;;  %v15628_v51 = vsel %vm15596_vm5, %v15580_v4, %v15612_v35 }
0x1a59   : > { %v15583_v43 = vadd.f32 %v15562_v62, %v15471_v5  ;;  %v15472_v57 = vmul.f32 %v20098_v47, %v15455_v13  ;;  %v15333_v32 = vpop.f32.mrb[163].mxu0  ;;  %v15690_v27 = vsel %vm15665_vm10, %v15657_v1, 0.0  ;;  %v15658_v45 = vmul.f32 %v15642_v46, %v15626_v0 }
0x1a5a   : > { %v15581_v19 = vadd.f32 %v24510_v20, %v15469_v9  ;;  %v15470_v10 = vmul.f32 %v24506_v8, %v15333_v32  ;;  %15688 = vadd.xlane.f32.xlu0 %v15687_v7  ;;  %15691 = vadd.xlane.f32.xlu1 %v15690_v27  ;;  %v15696_v20 = vsel %vm15665_vm10, %v15659_v16, 0.0  ;;  %v15660_v8 = vmul.f32 %v15644_v24, %v15628_v51  ;;  %v15735_v51 = vld [vmem:[#allocation4] sm:$0x1] }
0x1a5b   : > { %v15615_v61 = vmul.f32 0.1, %v15583_v43  ;;  %v15584_v41 = vadd.f32 %v15567_v17, %v15472_v57  ;;  %vm15599_vm6 = vcmp.ge.f32.partialorder %v15583_v43, 0.0  ;;  %v15693_v50 = vsel %vm15665_vm10, %v15658_v45, 0.0 }
0x1a5c   : > { %v15613_v40 = vmul.f32 0.1, %v15581_v19  ;;  %v15582_v63 = vadd.f32 %v15557_v12, %v15470_v10  ;;  %vm15597_vm7 = vcmp.ge.f32.partialorder %v15581_v19, 0.0  ;;  %v15699_v29 = vsel %vm15665_vm10, %v15660_v8, 0.0 }
0x1a5d   : > { %v15616_v6 = vmul.f32 0.1, %v15584_v41  ;;  %v15631_v42 = vsel %vm15599_vm6, %v15583_v43, %v15615_v61  ;;  %vm15600_vm0 = vcmp.ge.f32.partialorder %v15584_v41, 0.0 }
0x1a5e   : > { %v15614_v36 = vmul.f32 0.1, %v15582_v63  ;;  %15694 = vadd.xlane.f32.xlu0 %v15693_v50  ;;  %15697 = vadd.xlane.f32.xlu1 %v15696_v20  ;;  %v15629_v55 = vsel %vm15597_vm7, %v15581_v19, %v15613_v40  ;;  %vm15598_vm8 = vcmp.ge.f32.partialorder %v15582_v63, 0.0  ;;  %v15663_v23 = vmul.f32 %v15647_v59, %v15631_v42 }
0x1a5f   : > { %v15661_v28 = vmul.f32 %v15645_v21, %v15629_v55  ;;  %v15632_v26 = vsel %vm15600_vm0, %v15584_v41, %v15616_v6 }
0x1a60   : > { %v15630_v11 = vsel %vm15598_vm8, %v15582_v63, %v15614_v36  ;;  %v15708_v54 = vsel %vm15665_vm10, %v15663_v23, 0.0  ;;  %v15664_v30 = vmul.f32 %v15648_v22, %v15632_v26 }
0x1a61   : > { %v15702_v56 = vsel %vm15665_vm10, %v15661_v28, 0.0  ;;  %v15662_v31 = vmul.f32 %v15646_v60, %v15630_v11 }
0x1a62   : > { %15700 = vadd.xlane.f32.xlu0 %v15699_v29  ;;  %15703 = vadd.xlane.f32.xlu1 %v15702_v56  ;;  %v15711_v3 = vsel %vm15665_vm10, %v15664_v30, 0.0 }
0x1a63   : > { %v15705_v48 = vsel %vm15665_vm10, %v15662_v31, 0.0 }
0x1a66   : > { %15706 = vadd.xlane.f32.xlu0 %v15705_v48  ;;  %15709 = vadd.xlane.f32.xlu1 %v15708_v54 }
0x1a6a   : > { %15712 = vadd.xlane.f32.xlu0 %v15711_v3 }
0x1ad7   : > { %v15668_v12 = vpop.xlane.xlu0 %15667 }
0x1ad9   : > { %v15671_v38 = vpop.xlane.xlu1 %15670 }
0x1ada   : > { %v15714_v18 = vadd.f32 %v15671_v38, %v15668_v12 }
0x1adb   : > { %v15674_v2 = vpop.xlane.xlu0 %15673 }
0x1adc   : > { %v15715_v4 = vadd.f32 %v15714_v18, %v15674_v2 }
0x1adf   : > { %v15677_v13 = vpop.xlane.xlu0 %15676  ;;  %v15680_v37 = vpop.xlane.xlu1 %15679 }
0x1ae0   : > { %v15716_v52 = vadd.f32 %v15715_v4, %v15677_v13 }
0x1ae2   : > { %v15717_v49 = vadd.f32 %v15716_v52, %v15680_v37 }
0x1ae3   : > { %v15683_v15 = vpop.xlane.xlu0 %15682  ;;  %v15686_v53 = vpop.xlane.xlu1 %15685 }
0x1ae4   : > { %v15718_v14 = vadd.f32 %v15717_v49, %v15683_v15 }
0x1ae6   : > { %v15719_v46 = vadd.f32 %v15718_v14, %v15686_v53 }
0x1ae7   : > { %v15689_v39 = vpop.xlane.xlu0 %15688  ;;  %v15692_v25 = vpop.xlane.xlu1 %15691 }
0x1ae8   : > { %v15720_v35 = vadd.f32 %v15719_v46, %v15689_v39 }
0x1aea   : > { %v15721_v33 = vadd.f32 %v15720_v35, %v15692_v25 }
0x1aeb   : > { %v15695_v34 = vpop.xlane.xlu0 %15694  ;;  %v15698_v44 = vpop.xlane.xlu1 %15697 }
0x1aec   : > { %v15722_v5 = vadd.f32 %v15721_v33, %v15695_v34 }
0x1aee   : > { %v15723_v58 = vadd.f32 %v15722_v5, %v15698_v44 }
0x1aef   : > { %v15701_v1 = vpop.xlane.xlu0 %15700  ;;  %v15704_v62 = vpop.xlane.xlu1 %15703 }
0x1af0   : > { %v15724_v9 = vadd.f32 %v15723_v58, %v15701_v1 }
0x1af2   : > { %v15725_v47 = vadd.f32 %v15724_v9, %v15704_v62 }
0x1af3   : > { %v15707_v7 = vpop.xlane.xlu0 %15706  ;;  %v15710_v16 = vpop.xlane.xlu1 %15709 }
0x1af4   : > { %v15726_v0 = vadd.f32 %v15725_v47, %v15707_v7 }
0x1af6   : > { %v15727_v43 = vadd.f32 %v15726_v0, %v15710_v16 }
0x1af7   : > { %v15713_v57 = vpop.xlane.xlu0 %15712 }
0x1af8   : > { %v15728_v32 = vadd.f32 %v15727_v43, %v15713_v57 }
0x1afa   : > { %v15729_v27 = vrot.slane %v15728_v32, 4 }
0x1afc   : > { %v15730_v45 = vadd.f32 %v15729_v27, %v15728_v32 }
0x1afe   : > { %v15731_v17 = vrot.slane %v15730_v45, 2 }
0x1b00   : > { %v15732_v19 = vadd.f32 %v15731_v17, %v15730_v45 }
0x1b02   : > { %v15733_v10 = vrot.slane %v15732_v19, 1 }
0x1b04   : > { %v15734_v24 = vadd.f32 %v15733_v10, %v15732_v19 }
0x1b06   : > { %v15736_v61 = vadd.f32 %v15735_v51, %v15734_v24 }
0x1b08   : > { %15738 = vst.msk [vmem:[%s904_s0] sm:$0x1] %vm15737_vm1, %v15736_v61 }
0x1b09 PF: > { %s75_s4 = sadd.s32 1, %s21776_s4  }
0x1b0a   : > { %p72_p4 = scmp.ge.s32.totalorder %s75_s4, 4  }
0x1b0c   :  { %74 = sbr.rel (!%p72_p4) target bundleno = 51 (0x33), region = 271 }

</bundles_post_ra>
